<compile_context>
chip_gen: v5e
topology: v5e:2x2
jax: 0.10.0
libtpu: 0.0.40
codegen_flags: <defaults>
</compile_context>

<pallas_src>
import numpy as np

import jax
import jax.numpy as jnp
from jax.experimental import pallas as pl
from jax.experimental.pallas import tpu as pltpu

BN_EPS = 1e-5


# ---------------------------------------------------------------------------
# Fused CropResBlock kernel
# ---------------------------------------------------------------------------
def _crop_res_block_kernel(x_ref, wt1_ref, b1_ref, wt2_ref, b2_ref, o_ref):
    """One full CropResBlock for a single batch element.

    x_ref  : (1, H, W*C)            row-flattened NHWC activation (lane-dense)
    wt1_ref: (3, W*C, (W-2)*C)      banded (Toeplitz-over-W) conv1 weights, BN1 folded
    b1_ref : (1, (W-2)*C)           folded BN1 bias tiled per output column
    wt2_ref: (3, (W-2)*C, (W-4)*C)  conv2 weights, BN2 folded
    b2_ref : (1, (W-4)*C)
    o_ref  : (1, H-4, (W-4)*C)
    """
    H, WC = x_ref.shape[1], x_ref.shape[2]
    n1 = wt1_ref.shape[2]
    n2 = wt2_ref.shape[2]
    x = x_ref[0]                                     # (H, W*C)

    def conv3x3(inp, wt_ref, b_ref, n_rows):
        # Valid 3x3 conv as 3 dense matmuls of row-shifted slabs against the
        # banded weight (the kw and channel taps live inside the K axis), so
        # there are no per-tap slice/reshape relayouts.  The accumulator is
        # initialized with the folded BN bias (hoisted out of the loop).
        acc = jnp.broadcast_to(b_ref[...], (n_rows, b_ref.shape[1])).astype(jnp.float32)
        for kh in range(3):
            acc = acc + jnp.dot(inp[kh:kh + n_rows, :], wt_ref[kh],
                                preferred_element_type=jnp.float32)
        return acc

    # conv1 + bn1 (folded) + relu -- intermediate stays in VMEM/vregs.
    h = jnp.maximum(conv3x3(x, wt1_ref, b1_ref, H - 2), 0.0)
    # conv2 + bn2 (folded)
    y = conv3x3(h, wt2_ref, b2_ref, H - 4)
    # ZeroPad2d(-2) identity == center crop: rows [2, H-2), lanes [2C, (W-2)*C).
    ident = x[2:H - 2, (WC - n1):(WC - n1) + n2]
    o_ref[0] = jnp.maximum(y + ident, 0.0).astype(o_ref.dtype)


def crop_res_block(x_flat, block_params):
    """x_flat: (B, H, W*C) row-flattened NHWC; returns (B, H-4, (W-4)*C)."""
    wt1, b1, wt2, b2 = block_params
    B, H, WC = x_flat.shape
    k1, n1 = wt1.shape[1], wt1.shape[2]
    n2 = wt2.shape[2]
    assert k1 == WC, (k1, WC)
    Ho = H - 4
    return pl.pallas_call(
        _crop_res_block_kernel,
        out_shape=jax.ShapeDtypeStruct((B, Ho, n2), x_flat.dtype),
        grid_spec=pltpu.PrefetchScalarGridSpec(
            num_scalar_prefetch=0,
            grid=(B,),
            in_specs=[
                pl.BlockSpec((1, H, WC), lambda b: (b, 0, 0)),
                pl.BlockSpec((3, k1, n1), lambda b: (0, 0, 0)),
                pl.BlockSpec((1, n1), lambda b: (0, 0)),
                pl.BlockSpec((3, n1, n2), lambda b: (0, 0, 0)),
                pl.BlockSpec((1, n2), lambda b: (0, 0)),
            ],
            out_specs=pl.BlockSpec((1, Ho, n2), lambda b: (b, 0, 0)),
        ),
        compiler_params=pltpu.CompilerParams(
            dimension_semantics=("parallel",)),  # B=2 parallel steps -> both v7x TCs
    )(x_flat, wt1, b1, wt2, b2)


# ---------------------------------------------------------------------------
# Fused global-average-pool + fc head kernel
# ---------------------------------------------------------------------------
def _pool_fc_kernel(x_ref, w_ref, b_ref, o_ref):
    # x_ref: (B, H, W, C), w_ref: (1, C), b_ref: (1, 1), o_ref: (B, 1)
    x = x_ref[...].astype(jnp.float32)
    pooled = jnp.mean(x, axis=(1, 2))                               # (B, C)
    o_ref[...] = (jnp.sum(pooled * w_ref[...], axis=-1, keepdims=True)
                  + b_ref[...]).astype(o_ref.dtype)


def pool_fc(x_nhwc, fc_w, fc_b):
    B, H, W, C = x_nhwc.shape
    out = pl.pallas_call(
        _pool_fc_kernel,
        out_shape=jax.ShapeDtypeStruct((B, 1), jnp.float32),
        grid_spec=pltpu.PrefetchScalarGridSpec(
            num_scalar_prefetch=0,
            grid=(1,),
            in_specs=[
                pl.BlockSpec((B, H, W, C), lambda i: (0, 0, 0, 0)),
                pl.BlockSpec((1, C), lambda i: (0, 0)),
                pl.BlockSpec((1, 1), lambda i: (0, 0)),
            ],
            out_specs=pl.BlockSpec((B, 1), lambda i: (0, 0)),
        ),
    )(x_nhwc, fc_w, fc_b.reshape(1, 1))
    return out[:, 0]


# ---------------------------------------------------------------------------
# Host-side parameter preparation (BN folding + banded weight construction)
# ---------------------------------------------------------------------------
def _toeplitz_weights(w_folded, w_in):
    """(3,3,Cin,Cout) folded conv weight -> (3, w_in*Cin, (w_in-2)*Cout) banded
    matrices so that a valid 3x3 conv over a row-flattened (H, w_in*Cin) slab is
    3 dense matmuls (one per kh row shift)."""
    w_np = np.asarray(w_folded, dtype=np.float32)
    _, _, cin, cout = w_np.shape
    w_out = w_in - 2
    t = np.zeros((3, w_in * cin, w_out * cout), np.float32)
    for kh in range(3):
        for w in range(w_out):
            for kw in range(3):
                t[kh,
                  (w + kw) * cin:(w + kw + 1) * cin,
                  w * cout:(w + 1) * cout] = w_np[kh, kw]
    return jnp.asarray(t)


def prepare_pallas_params(raw_params, in_width):
    """Fold inference-mode BatchNorm into the convs and build banded weights."""
    def fold(w, bn):
        g, be, m, v = bn
        scale = g / jnp.sqrt(v + BN_EPS)
        return w * scale[None, None, None, :], be - m * scale

    def block_params(raw_block, w_in):
        w1, bn1, w2, bn2 = raw_block
        w1f, b1f = fold(w1, bn1)
        w2f, b2f = fold(w2, bn2)
        w_mid, w_out = w_in - 2, w_in - 4
        c1, c2 = w1f.shape[3], w2f.shape[3]
        wt1 = _toeplitz_weights(w1f, w_in)
        wt2 = _toeplitz_weights(w2f, w_mid)
        b1row = jnp.tile(b1f, w_mid).reshape(1, w_mid * c1)
        b2row = jnp.tile(b2f, w_out).reshape(1, w_out * c2)
        return (wt1, b1row, wt2, b2row)

    out = {"matrix_blocks": [], "common_blocks": []}
    width = in_width
    for rb in raw_params["matrix_blocks"]:
        out["matrix_blocks"].append(block_params(rb, width))
        width -= 4
    for rb in raw_params["common_blocks"]:
        out["common_blocks"].append(block_params(rb, width))
        width -= 4
    out["fc_w"] = raw_params["fc_w"]          # (1, C_comb)
    out["fc_b"] = raw_params["fc_b"]          # (1,)
    return out


# ---------------------------------------------------------------------------
# Model forward (NHWC end-to-end; single boundary transpose)
# ---------------------------------------------------------------------------
def scalar2matrix_nhwc(xs, out_height, out_width):
    # TODO(synk): `scalar2matrix` is not defined in the provided source; assumed
    # semantics: broadcast each scalar to a constant (out_height x out_width) plane.
    B, S = xs.shape
    return jnp.broadcast_to(xs[:, None, None, :], (B, out_height, out_width, S))


@jax.jit
def crop_resnet_pool_forward(matrix_inputs, scalar_inputs, params):
    """matrix_inputs: NCHW (like the PyTorch module); scalar_inputs: (B, S)."""
    B, Cm, H, W = matrix_inputs.shape
    # Single boundary layout change: NCHW -> row-flattened NHWC (B, H, W*C).
    x = jnp.transpose(matrix_inputs, (0, 2, 3, 1)).reshape(B, H, W * Cm)

    for bp in params["matrix_blocks"]:
        x = crop_res_block(x, bp)

    Hm = x.shape[1]
    Wm = x.shape[2] // Cm
    xm = x.reshape(B, Hm, Wm, Cm)                       # free row-major view
    xs = scalar2matrix_nhwc(scalar_inputs, Hm, Wm)
    xc = jnp.concatenate([xm, xs], axis=-1)             # channel concat (NHWC)
    Cc = xc.shape[-1]
    x = xc.reshape(B, Hm, Wm * Cc)

    for bp in params["common_blocks"]:
        x = crop_res_block(x, bp)

    Hf = x.shape[1]
    Wf = x.shape[2] // Cc
    return pool_fc(x.reshape(B, Hf, Wf, Cc), params["fc_w"], params["fc_b"])


# ---------------------------------------------------------------------------
# Parameter init (kaiming-style convs, non-trivial BN stats to exercise folding)
# ---------------------------------------------------------------------------
def init_params(key, n_matrix, n_scalar):
    n_combin = n_matrix + n_scalar

    def init_block(k, cin, cout):
        ks = jax.random.split(k, 10)
        std = (2.0 / (9 * cout)) ** 0.5           # kaiming_normal_, fan_out, relu
        w1 = std * jax.random.normal(ks[0], (3, 3, cin, cout), jnp.float32)
        w2 = std * jax.random.normal(ks[1], (3, 3, cout, cout), jnp.float32)

        def bn(k0, k1, k2, k3):
            gamma = jax.random.uniform(k0, (cout,), jnp.float32, 0.5, 1.5)
            beta = 0.1 * jax.random.normal(k1, (cout,), jnp.float32)
            mean = 0.1 * jax.random.normal(k2, (cout,), jnp.float32)
            var = jax.random.uniform(k3, (cout,), jnp.float32, 0.5, 1.5)
            return (gamma, beta, mean, var)

        return (w1, bn(ks[2], ks[3], ks[4], ks[5]),
                w2, bn(ks[6], ks[7], ks[8], ks[9]))

    keys = jax.random.split(key, 10)
    raw = {
        "matrix_blocks": [init_block(keys[i], n_matrix, n_matrix) for i in range(4)],
        "common_blocks": [init_block(keys[4 + i], n_combin, n_combin) for i in range(4)],
    }
    bound = 1.0 / (n_combin ** 0.5)
    raw["fc_w"] = jax.random.uniform(keys[8], (1, n_combin), jnp.float32, -bound, bound)
    raw["fc_b"] = jax.random.uniform(keys[9], (1,), jnp.float32, -bound, bound)
    return raw


# ---------------------------------------------------------------------------
# Pure-JAX reference (lax conv, NCHW like PyTorch) for correctness checking
# ---------------------------------------------------------------------------
def _reference(matrix_inputs, scalar_inputs, raw_params):
    def bn(x, p):
        g, be, m, v = p
        scale = g / jnp.sqrt(v + BN_EPS)
        return ((x - m[None, :, None, None]) * scale[None, :, None, None]
                + be[None, :, None, None])

    def conv(x, w):   # w: (3,3,Cin,Cout) -> OIHW
        w_oihw = jnp.transpose(w, (3, 2, 0, 1))
        return jax.lax.conv_general_dilated(
            x, w_oihw, window_strides=(1, 1), padding="VALID",
            dimension_numbers=("NCHW", "OIHW", "NCHW"),
            precision=jax.lax.Precision.HIGHEST)

    def block(x, p):
        w1, bn1, w2, bn2 = p
        h = jnp.maximum(bn(conv(x, w1), bn1), 0.0)
        y = bn(conv(h, w2), bn2)
        return jnp.maximum(y + x[:, :, 2:-2, 2:-2], 0.0)

    x = matrix_inputs
    for p in raw_params["matrix_blocks"]:
        x = block(x, p)
    B, S = scalar_inputs.shape
    Hm, Wm = x.shape[2], x.shape[3]
    xs = jnp.broadcast_to(scalar_inputs[:, :, None, None], (B, S, Hm, Wm))
    x = jnp.concatenate([x, xs], axis=1)
    for p in raw_params["common_blocks"]:
        x = block(x, p)
    pooled = jnp.mean(x, axis=(2, 3))                                  # (B, C)
    return jnp.sum(pooled * raw_params["fc_w"], axis=-1) + raw_params["fc_b"][0]


if __name__ == "__main__":
    key = jax.random.PRNGKey(0)
    kx, ks, kp = jax.random.split(key, 3)

    B, n_matrix, n_scalar = 2, 4, 4
    H = W = 40    # 8 CropResBlocks, each shrinks spatial by 4 -> final 8x8 before pooling
    matrix_inputs = jax.random.normal(kx, (B, n_matrix, H, W), jnp.float32)
    scalar_inputs = jax.random.normal(ks, (B, n_scalar), jnp.float32)

    raw_params = init_params(kp, n_matrix, n_scalar)
    pallas_params = prepare_pallas_params(raw_params, W)

    out = crop_resnet_pool_forward(matrix_inputs, scalar_inputs, pallas_params)
    out = jax.block_until_ready(out)

    ref = _reference(matrix_inputs, scalar_inputs, raw_params)
    assert out.shape == (B,), out.shape
    assert jnp.allclose(out, ref, atol=5e-3, rtol=5e-3), (out, ref)

    print("KERNEL_OK")
</pallas_src>

<mosaic_0001>
module attributes {stable_mosaic.version = 11 : i64} {
  func.func @_crop_res_block_kernel(%arg0: i32, %arg1: memref<1x36x144xf32, #tpu.memory_space<vmem>>, %arg2: memref<3x144x136xf32, #tpu.memory_space<vmem>>, %arg3: memref<1x136xf32, #tpu.memory_space<vmem>>, %arg4: memref<3x136x128xf32, #tpu.memory_space<vmem>>, %arg5: memref<1x128xf32, #tpu.memory_space<vmem>>, %arg6: memref<1x32x128xf32, #tpu.memory_space<vmem>>) attributes {dimension_semantics = [#tpu.dimension_semantics<parallel>], iteration_bounds = array<i64: 2>, scalar_prefetch = 0 : i64, scratch_operands = 0 : i64, tpu.core_type = #tpu.core_type<tc>, window_params = [{transform_indices = @transform_0, window_bounds = array<i64: 1, 36, 144>}, {pipeline_mode = #tpu.pipeline_mode<synchronous>, transform_indices = @transform_1, window_bounds = array<i64: 3, 144, 136>}, {pipeline_mode = #tpu.pipeline_mode<synchronous>, transform_indices = @transform_2, window_bounds = array<i64: 1, 136>}, {pipeline_mode = #tpu.pipeline_mode<synchronous>, transform_indices = @transform_3, window_bounds = array<i64: 3, 136, 128>}, {pipeline_mode = #tpu.pipeline_mode<synchronous>, transform_indices = @transform_4, window_bounds = array<i64: 1, 128>}, {transform_indices = @transform_5, window_bounds = array<i64: 1, 32, 128>}]} {
    %c0 = arith.constant 0 : index
    %c0_0 = arith.constant 0 : index
    %c0_1 = arith.constant 0 : index
    %0 = vector.load %arg1[%c0, %c0_0, %c0_1] : memref<1x36x144xf32, #tpu.memory_space<vmem>>, vector<1x36x144xf32>
    %1 = vector.shape_cast %0 : vector<1x36x144xf32> to vector<36x144xf32>
    %c0_2 = arith.constant 0 : index
    %c0_3 = arith.constant 0 : index
    %2 = vector.load %arg3[%c0_2, %c0_3] : memref<1x136xf32, #tpu.memory_space<vmem>>, vector<1x136xf32>
    %3 = vector.shape_cast %2 : vector<1x136xf32> to vector<1x136xf32>
    %4 = vector.broadcast %3 : vector<1x136xf32> to vector<34x136xf32>
    %5 = vector.extract_strided_slice %1 {offsets = [0, 0], sizes = [34, 144], strides = [1, 1]} : vector<36x144xf32> to vector<34x144xf32>
    %c0_4 = arith.constant 0 : index
    %c0_5 = arith.constant 0 : index
    %c0_6 = arith.constant 0 : index
    %6 = vector.load %arg2[%c0_4, %c0_5, %c0_6] : memref<3x144x136xf32, #tpu.memory_space<vmem>>, vector<1x144x136xf32>
    %7 = vector.shape_cast %6 : vector<1x144x136xf32> to vector<144x136xf32>
    %cst = arith.constant dense<0.000000e+00> : vector<34x136xf32>
    %8 = tpu.matmul %5, %7, %cst {dimension_numbers = #tpu.dot_dimension_numbers<[1], [0], [0], [1], [0, 0, 1, 1], [], []>} : vector<34x144xf32>, vector<144x136xf32>, vector<34x136xf32> -> vector<34x136xf32>
    %9 = arith.addf %4, %8 : vector<34x136xf32>
    %10 = vector.extract_strided_slice %1 {offsets = [1, 0], sizes = [34, 144], strides = [1, 1]} : vector<36x144xf32> to vector<34x144xf32>
    %c1 = arith.constant 1 : index
    %c0_7 = arith.constant 0 : index
    %c0_8 = arith.constant 0 : index
    %11 = vector.load %arg2[%c1, %c0_7, %c0_8] : memref<3x144x136xf32, #tpu.memory_space<vmem>>, vector<1x144x136xf32>
    %12 = vector.shape_cast %11 : vector<1x144x136xf32> to vector<144x136xf32>
    %cst_9 = arith.constant dense<0.000000e+00> : vector<34x136xf32>
    %13 = tpu.matmul %10, %12, %cst_9 {dimension_numbers = #tpu.dot_dimension_numbers<[1], [0], [0], [1], [0, 0, 1, 1], [], []>} : vector<34x144xf32>, vector<144x136xf32>, vector<34x136xf32> -> vector<34x136xf32>
    %14 = arith.addf %9, %13 : vector<34x136xf32>
    %15 = vector.extract_strided_slice %1 {offsets = [2, 0], sizes = [34, 144], strides = [1, 1]} : vector<36x144xf32> to vector<34x144xf32>
    %c2 = arith.constant 2 : index
    %c0_10 = arith.constant 0 : index
    %c0_11 = arith.constant 0 : index
    %16 = vector.load %arg2[%c2, %c0_10, %c0_11] : memref<3x144x136xf32, #tpu.memory_space<vmem>>, vector<1x144x136xf32>
    %17 = vector.shape_cast %16 : vector<1x144x136xf32> to vector<144x136xf32>
    %cst_12 = arith.constant dense<0.000000e+00> : vector<34x136xf32>
    %18 = tpu.matmul %15, %17, %cst_12 {dimension_numbers = #tpu.dot_dimension_numbers<[1], [0], [0], [1], [0, 0, 1, 1], [], []>} : vector<34x144xf32>, vector<144x136xf32>, vector<34x136xf32> -> vector<34x136xf32>
    %19 = arith.addf %14, %18 : vector<34x136xf32>
    %cst_13 = arith.constant 0.000000e+00 : f32
    %20 = vector.broadcast %cst_13 : f32 to vector<34x136xf32>
    %21 = arith.maximumf %19, %20 : vector<34x136xf32>
    %c0_14 = arith.constant 0 : index
    %c0_15 = arith.constant 0 : index
    %22 = vector.load %arg5[%c0_14, %c0_15] : memref<1x128xf32, #tpu.memory_space<vmem>>, vector<1x128xf32>
    %23 = vector.shape_cast %22 : vector<1x128xf32> to vector<1x128xf32>
    %24 = vector.broadcast %23 : vector<1x128xf32> to vector<32x128xf32>
    %25 = vector.extract_strided_slice %21 {offsets = [0, 0], sizes = [32, 136], strides = [1, 1]} : vector<34x136xf32> to vector<32x136xf32>
    %c0_16 = arith.constant 0 : index
    %c0_17 = arith.constant 0 : index
    %c0_18 = arith.constant 0 : index
    %26 = vector.load %arg4[%c0_16, %c0_17, %c0_18] : memref<3x136x128xf32, #tpu.memory_space<vmem>>, vector<1x136x128xf32>
    %27 = vector.shape_cast %26 : vector<1x136x128xf32> to vector<136x128xf32>
    %cst_19 = arith.constant dense<0.000000e+00> : vector<32x128xf32>
    %28 = tpu.matmul %25, %27, %cst_19 {dimension_numbers = #tpu.dot_dimension_numbers<[1], [0], [0], [1], [0, 0, 1, 1], [], []>} : vector<32x136xf32>, vector<136x128xf32>, vector<32x128xf32> -> vector<32x128xf32>
    %29 = arith.addf %24, %28 : vector<32x128xf32>
    %30 = vector.extract_strided_slice %21 {offsets = [1, 0], sizes = [32, 136], strides = [1, 1]} : vector<34x136xf32> to vector<32x136xf32>
    %c1_20 = arith.constant 1 : index
    %c0_21 = arith.constant 0 : index
    %c0_22 = arith.constant 0 : index
    %31 = vector.load %arg4[%c1_20, %c0_21, %c0_22] : memref<3x136x128xf32, #tpu.memory_space<vmem>>, vector<1x136x128xf32>
    %32 = vector.shape_cast %31 : vector<1x136x128xf32> to vector<136x128xf32>
    %cst_23 = arith.constant dense<0.000000e+00> : vector<32x128xf32>
    %33 = tpu.matmul %30, %32, %cst_23 {dimension_numbers = #tpu.dot_dimension_numbers<[1], [0], [0], [1], [0, 0, 1, 1], [], []>} : vector<32x136xf32>, vector<136x128xf32>, vector<32x128xf32> -> vector<32x128xf32>
    %34 = arith.addf %29, %33 : vector<32x128xf32>
    %35 = vector.extract_strided_slice %21 {offsets = [2, 0], sizes = [32, 136], strides = [1, 1]} : vector<34x136xf32> to vector<32x136xf32>
    %c2_24 = arith.constant 2 : index
    %c0_25 = arith.constant 0 : index
    %c0_26 = arith.constant 0 : index
    %36 = vector.load %arg4[%c2_24, %c0_25, %c0_26] : memref<3x136x128xf32, #tpu.memory_space<vmem>>, vector<1x136x128xf32>
    %37 = vector.shape_cast %36 : vector<1x136x128xf32> to vector<136x128xf32>
    %cst_27 = arith.constant dense<0.000000e+00> : vector<32x128xf32>
    %38 = tpu.matmul %35, %37, %cst_27 {dimension_numbers = #tpu.dot_dimension_numbers<[1], [0], [0], [1], [0, 0, 1, 1], [], []>} : vector<32x136xf32>, vector<136x128xf32>, vector<32x128xf32> -> vector<32x128xf32>
    %39 = arith.addf %34, %38 : vector<32x128xf32>
    %40 = vector.extract_strided_slice %1 {offsets = [2, 8], sizes = [32, 128], strides = [1, 1]} : vector<36x144xf32> to vector<32x128xf32>
    %41 = arith.addf %39, %40 : vector<32x128xf32>
    %cst_28 = arith.constant 0.000000e+00 : f32
    %42 = vector.broadcast %cst_28 : f32 to vector<32x128xf32>
    %43 = arith.maximumf %41, %42 : vector<32x128xf32>
    %c0_29 = arith.constant 0 : index
    %c0_30 = arith.constant 0 : index
    %c0_31 = arith.constant 0 : index
    %44 = vector.load %arg6[%c0_29, %c0_30, %c0_31] : memref<1x32x128xf32, #tpu.memory_space<vmem>>, vector<1x32x128xf32>
    %45 = vector.shape_cast %44 : vector<1x32x128xf32> to vector<32x128xf32>
    %46 = vector.shape_cast %43 : vector<32x128xf32> to vector<1x32x128xf32>
    tpu.vector_store %arg6[%c0_29, %c0_30, %c0_31], %46 {strides = array<i32>} : memref<1x32x128xf32, #tpu.memory_space<vmem>>, vector<1x32x128xf32>,
    return
  }
  func.func @transform_0(%arg0: i32) -> (i32, i32, i32) {
    %c0_i32 = arith.constant 0 : i32
    %c0_i32_0 = arith.constant 0 : i32
    %c0_i32_1 = arith.constant 0 : i32
    return %arg0, %c0_i32, %c0_i32_0 : i32, i32, i32
  }
  func.func @transform_1(%arg0: i32) -> (i32, i32, i32) {
    %c0_i32 = arith.constant 0 : i32
    %c0_i32_0 = arith.constant 0 : i32
    %c0_i32_1 = arith.constant 0 : i32
    %c0_i32_2 = arith.constant 0 : i32
    return %c0_i32, %c0_i32_0, %c0_i32_1 : i32, i32, i32
  }
  func.func @transform_2(%arg0: i32) -> (i32, i32) {
    %c0_i32 = arith.constant 0 : i32
    %c0_i32_0 = arith.constant 0 : i32
    %c0_i32_1 = arith.constant 0 : i32
    return %c0_i32, %c0_i32_0 : i32, i32
  }
  func.func @transform_3(%arg0: i32) -> (i32, i32, i32) {
    %c0_i32 = arith.constant 0 : i32
    %c0_i32_0 = arith.constant 0 : i32
    %c0_i32_1 = arith.constant 0 : i32
    %c0_i32_2 = arith.constant 0 : i32
    return %c0_i32, %c0_i32_0, %c0_i32_1 : i32, i32, i32
  }
  func.func @transform_4(%arg0: i32) -> (i32, i32) {
    %c0_i32 = arith.constant 0 : i32
    %c0_i32_0 = arith.constant 0 : i32
    %c0_i32_1 = arith.constant 0 : i32
    return %c0_i32, %c0_i32_0 : i32, i32
  }
  func.func @transform_5(%arg0: i32) -> (i32, i32, i32) {
    %c0_i32 = arith.constant 0 : i32
    %c0_i32_0 = arith.constant 0 : i32
    %c0_i32_1 = arith.constant 0 : i32
    return %arg0, %c0_i32, %c0_i32_0 : i32, i32, i32
  }
}

module attributes {stable_mosaic.version = 11 : i64} {
  func.func @_crop_res_block_kernel(%arg0: i32, %arg1: memref<1x40x160xf32, #tpu.memory_space<vmem>>, %arg2: memref<3x160x152xf32, #tpu.memory_space<vmem>>, %arg3: memref<1x152xf32, #tpu.memory_space<vmem>>, %arg4: memref<3x152x144xf32, #tpu.memory_space<vmem>>, %arg5: memref<1x144xf32, #tpu.memory_space<vmem>>, %arg6: memref<1x36x144xf32, #tpu.memory_space<vmem>>) attributes {dimension_semantics = [#tpu.dimension_semantics<parallel>], iteration_bounds = array<i64: 2>, scalar_prefetch = 0 : i64, scratch_operands = 0 : i64, tpu.core_type = #tpu.core_type<tc>, window_params = [{transform_indices = @transform_0, window_bounds = array<i64: 1, 40, 160>}, {pipeline_mode = #tpu.pipeline_mode<synchronous>, transform_indices = @transform_1, window_bounds = array<i64: 3, 160, 152>}, {pipeline_mode = #tpu.pipeline_mode<synchronous>, transform_indices = @transform_2, window_bounds = array<i64: 1, 152>}, {pipeline_mode = #tpu.pipeline_mode<synchronous>, transform_indices = @transform_3, window_bounds = array<i64: 3, 152, 144>}, {pipeline_mode = #tpu.pipeline_mode<synchronous>, transform_indices = @transform_4, window_bounds = array<i64: 1, 144>}, {transform_indices = @transform_5, window_bounds = array<i64: 1, 36, 144>}]} {
    %c0 = arith.constant 0 : index
    %c0_0 = arith.constant 0 : index
    %c0_1 = arith.constant 0 : index
    %0 = vector.load %arg1[%c0, %c0_0, %c0_1] : memref<1x40x160xf32, #tpu.memory_space<vmem>>, vector<1x40x160xf32>
    %1 = vector.shape_cast %0 : vector<1x40x160xf32> to vector<40x160xf32>
    %c0_2 = arith.constant 0 : index
    %c0_3 = arith.constant 0 : index
    %2 = vector.load %arg3[%c0_2, %c0_3] : memref<1x152xf32, #tpu.memory_space<vmem>>, vector<1x152xf32>
    %3 = vector.shape_cast %2 : vector<1x152xf32> to vector<1x152xf32>
    %4 = vector.broadcast %3 : vector<1x152xf32> to vector<38x152xf32>
    %5 = vector.extract_strided_slice %1 {offsets = [0, 0], sizes = [38, 160], strides = [1, 1]} : vector<40x160xf32> to vector<38x160xf32>
    %c0_4 = arith.constant 0 : index
    %c0_5 = arith.constant 0 : index
    %c0_6 = arith.constant 0 : index
    %6 = vector.load %arg2[%c0_4, %c0_5, %c0_6] : memref<3x160x152xf32, #tpu.memory_space<vmem>>, vector<1x160x152xf32>
    %7 = vector.shape_cast %6 : vector<1x160x152xf32> to vector<160x152xf32>
    %cst = arith.constant dense<0.000000e+00> : vector<38x152xf32>
    %8 = tpu.matmul %5, %7, %cst {dimension_numbers = #tpu.dot_dimension_numbers<[1], [0], [0], [1], [0, 0, 1, 1], [], []>} : vector<38x160xf32>, vector<160x152xf32>, vector<38x152xf32> -> vector<38x152xf32>
    %9 = arith.addf %4, %8 : vector<38x152xf32>
    %10 = vector.extract_strided_slice %1 {offsets = [1, 0], sizes = [38, 160], strides = [1, 1]} : vector<40x160xf32> to vector<38x160xf32>
    %c1 = arith.constant 1 : index
    %c0_7 = arith.constant 0 : index
    %c0_8 = arith.constant 0 : index
    %11 = vector.load %arg2[%c1, %c0_7, %c0_8] : memref<3x160x152xf32, #tpu.memory_space<vmem>>, vector<1x160x152xf32>
    %12 = vector.shape_cast %11 : vector<1x160x152xf32> to vector<160x152xf32>
    %cst_9 = arith.constant dense<0.000000e+00> : vector<38x152xf32>
    %13 = tpu.matmul %10, %12, %cst_9 {dimension_numbers = #tpu.dot_dimension_numbers<[1], [0], [0], [1], [0, 0, 1, 1], [], []>} : vector<38x160xf32>, vector<160x152xf32>, vector<38x152xf32> -> vector<38x152xf32>
    %14 = arith.addf %9, %13 : vector<38x152xf32>
    %15 = vector.extract_strided_slice %1 {offsets = [2, 0], sizes = [38, 160], strides = [1, 1]} : vector<40x160xf32> to vector<38x160xf32>
    %c2 = arith.constant 2 : index
    %c0_10 = arith.constant 0 : index
    %c0_11 = arith.constant 0 : index
    %16 = vector.load %arg2[%c2, %c0_10, %c0_11] : memref<3x160x152xf32, #tpu.memory_space<vmem>>, vector<1x160x152xf32>
    %17 = vector.shape_cast %16 : vector<1x160x152xf32> to vector<160x152xf32>
    %cst_12 = arith.constant dense<0.000000e+00> : vector<38x152xf32>
    %18 = tpu.matmul %15, %17, %cst_12 {dimension_numbers = #tpu.dot_dimension_numbers<[1], [0], [0], [1], [0, 0, 1, 1], [], []>} : vector<38x160xf32>, vector<160x152xf32>, vector<38x152xf32> -> vector<38x152xf32>
    %19 = arith.addf %14, %18 : vector<38x152xf32>
    %cst_13 = arith.constant 0.000000e+00 : f32
    %20 = vector.broadcast %cst_13 : f32 to vector<38x152xf32>
    %21 = arith.maximumf %19, %20 : vector<38x152xf32>
    %c0_14 = arith.constant 0 : index
    %c0_15 = arith.constant 0 : index
    %22 = vector.load %arg5[%c0_14, %c0_15] : memref<1x144xf32, #tpu.memory_space<vmem>>, vector<1x144xf32>
    %23 = vector.shape_cast %22 : vector<1x144xf32> to vector<1x144xf32>
    %24 = vector.broadcast %23 : vector<1x144xf32> to vector<36x144xf32>
    %25 = vector.extract_strided_slice %21 {offsets = [0, 0], sizes = [36, 152], strides = [1, 1]} : vector<38x152xf32> to vector<36x152xf32>
    %c0_16 = arith.constant 0 : index
    %c0_17 = arith.constant 0 : index
    %c0_18 = arith.constant 0 : index
    %26 = vector.load %arg4[%c0_16, %c0_17, %c0_18] : memref<3x152x144xf32, #tpu.memory_space<vmem>>, vector<1x152x144xf32>
    %27 = vector.shape_cast %26 : vector<1x152x144xf32> to vector<152x144xf32>
    %cst_19 = arith.constant dense<0.000000e+00> : vector<36x144xf32>
    %28 = tpu.matmul %25, %27, %cst_19 {dimension_numbers = #tpu.dot_dimension_numbers<[1], [0], [0], [1], [0, 0, 1, 1], [], []>} : vector<36x152xf32>, vector<152x144xf32>, vector<36x144xf32> -> vector<36x144xf32>
    %29 = arith.addf %24, %28 : vector<36x144xf32>
    %30 = vector.extract_strided_slice %21 {offsets = [1, 0], sizes = [36, 152], strides = [1, 1]} : vector<38x152xf32> to vector<36x152xf32>
    %c1_20 = arith.constant 1 : index
    %c0_21 = arith.constant 0 : index
    %c0_22 = arith.constant 0 : index
    %31 = vector.load %arg4[%c1_20, %c0_21, %c0_22] : memref<3x152x144xf32, #tpu.memory_space<vmem>>, vector<1x152x144xf32>
    %32 = vector.shape_cast %31 : vector<1x152x144xf32> to vector<152x144xf32>
    %cst_23 = arith.constant dense<0.000000e+00> : vector<36x144xf32>
    %33 = tpu.matmul %30, %32, %cst_23 {dimension_numbers = #tpu.dot_dimension_numbers<[1], [0], [0], [1], [0, 0, 1, 1], [], []>} : vector<36x152xf32>, vector<152x144xf32>, vector<36x144xf32> -> vector<36x144xf32>
    %34 = arith.addf %29, %33 : vector<36x144xf32>
    %35 = vector.extract_strided_slice %21 {offsets = [2, 0], sizes = [36, 152], strides = [1, 1]} : vector<38x152xf32> to vector<36x152xf32>
    %c2_24 = arith.constant 2 : index
    %c0_25 = arith.constant 0 : index
    %c0_26 = arith.constant 0 : index
    %36 = vector.load %arg4[%c2_24, %c0_25, %c0_26] : memref<3x152x144xf32, #tpu.memory_space<vmem>>, vector<1x152x144xf32>
    %37 = vector.shape_cast %36 : vector<1x152x144xf32> to vector<152x144xf32>
    %cst_27 = arith.constant dense<0.000000e+00> : vector<36x144xf32>
    %38 = tpu.matmul %35, %37, %cst_27 {dimension_numbers = #tpu.dot_dimension_numbers<[1], [0], [0], [1], [0, 0, 1, 1], [], []>} : vector<36x152xf32>, vector<152x144xf32>, vector<36x144xf32> -> vector<36x144xf32>
    %39 = arith.addf %34, %38 : vector<36x144xf32>
    %40 = vector.extract_strided_slice %1 {offsets = [2, 8], sizes = [36, 144], strides = [1, 1]} : vector<40x160xf32> to vector<36x144xf32>
    %41 = arith.addf %39, %40 : vector<36x144xf32>
    %cst_28 = arith.constant 0.000000e+00 : f32
    %42 = vector.broadcast %cst_28 : f32 to vector<36x144xf32>
    %43 = arith.maximumf %41, %42 : vector<36x144xf32>
    %c0_29 = arith.constant 0 : index
    %c0_30 = arith.constant 0 : index
    %c0_31 = arith.constant 0 : index
    %44 = vector.load %arg6[%c0_29, %c0_30, %c0_31] : memref<1x36x144xf32, #tpu.memory_space<vmem>>, vector<1x36x144xf32>
    %45 = vector.shape_cast %44 : vector<1x36x144xf32> to vector<36x144xf32>
    %46 = vector.shape_cast %43 : vector<36x144xf32> to vector<1x36x144xf32>
    tpu.vector_store %arg6[%c0_29, %c0_30, %c0_31], %46 {strides = array<i32>} : memref<1x36x144xf32, #tpu.memory_space<vmem>>, vector<1x36x144xf32>,
    return
  }
  func.func @transform_0(%arg0: i32) -> (i32, i32, i32) {
    %c0_i32 = arith.constant 0 : i32
    %c0_i32_0 = arith.constant 0 : i32
    %c0_i32_1 = arith.constant 0 : i32
    return %arg0, %c0_i32, %c0_i32_0 : i32, i32, i32
  }
  func.func @transform_1(%arg0: i32) -> (i32, i32, i32) {
    %c0_i32 = arith.constant 0 : i32
    %c0_i32_0 = arith.constant 0 : i32
    %c0_i32_1 = arith.constant 0 : i32
    %c0_i32_2 = arith.constant 0 : i32
    return %c0_i32, %c0_i32_0, %c0_i32_1 : i32, i32, i32
  }
  func.func @transform_2(%arg0: i32) -> (i32, i32) {
    %c0_i32 = arith.constant 0 : i32
    %c0_i32_0 = arith.constant 0 : i32
    %c0_i32_1 = arith.constant 0 : i32
    return %c0_i32, %c0_i32_0 : i32, i32
  }
  func.func @transform_3(%arg0: i32) -> (i32, i32, i32) {
    %c0_i32 = arith.constant 0 : i32
    %c0_i32_0 = arith.constant 0 : i32
    %c0_i32_1 = arith.constant 0 : i32
    %c0_i32_2 = arith.constant 0 : i32
    return %c0_i32, %c0_i32_0, %c0_i32_1 : i32, i32, i32
  }
  func.func @transform_4(%arg0: i32) -> (i32, i32) {
    %c0_i32 = arith.constant 0 : i32
    %c0_i32_0 = arith.constant 0 : i32
    %c0_i32_1 = arith.constant 0 : i32
    return %c0_i32, %c0_i32_0 : i32, i32
  }
  func.func @transform_5(%arg0: i32) -> (i32, i32, i32) {
    %c0_i32 = arith.constant 0 : i32
    %c0_i32_0 = arith.constant 0 : i32
    %c0_i32_1 = arith.constant 0 : i32
    return %arg0, %c0_i32, %c0_i32_0 : i32, i32, i32
  }
}

module attributes {stable_mosaic.version = 11 : i64} {
  func.func @_crop_res_block_kernel(%arg0: i32, %arg1: memref<1x32x128xf32, #tpu.memory_space<vmem>>, %arg2: memref<3x128x120xf32, #tpu.memory_space<vmem>>, %arg3: memref<1x120xf32, #tpu.memory_space<vmem>>, %arg4: memref<3x120x112xf32, #tpu.memory_space<vmem>>, %arg5: memref<1x112xf32, #tpu.memory_space<vmem>>, %arg6: memref<1x28x112xf32, #tpu.memory_space<vmem>>) attributes {dimension_semantics = [#tpu.dimension_semantics<parallel>], iteration_bounds = array<i64: 2>, scalar_prefetch = 0 : i64, scratch_operands = 0 : i64, tpu.core_type = #tpu.core_type<tc>, window_params = [{transform_indices = @transform_0, window_bounds = array<i64: 1, 32, 128>}, {pipeline_mode = #tpu.pipeline_mode<synchronous>, transform_indices = @transform_1, window_bounds = array<i64: 3, 128, 120>}, {pipeline_mode = #tpu.pipeline_mode<synchronous>, transform_indices = @transform_2, window_bounds = array<i64: 1, 120>}, {pipeline_mode = #tpu.pipeline_mode<synchronous>, transform_indices = @transform_3, window_bounds = array<i64: 3, 120, 112>}, {pipeline_mode = #tpu.pipeline_mode<synchronous>, transform_indices = @transform_4, window_bounds = array<i64: 1, 112>}, {transform_indices = @transform_5, window_bounds = array<i64: 1, 28, 112>}]} {
    %c0 = arith.constant 0 : index
    %c0_0 = arith.constant 0 : index
    %c0_1 = arith.constant 0 : index
    %0 = vector.load %arg1[%c0, %c0_0, %c0_1] : memref<1x32x128xf32, #tpu.memory_space<vmem>>, vector<1x32x128xf32>
    %1 = vector.shape_cast %0 : vector<1x32x128xf32> to vector<32x128xf32>
    %c0_2 = arith.constant 0 : index
    %c0_3 = arith.constant 0 : index
    %2 = vector.load %arg3[%c0_2, %c0_3] : memref<1x120xf32, #tpu.memory_space<vmem>>, vector<1x120xf32>
    %3 = vector.shape_cast %2 : vector<1x120xf32> to vector<1x120xf32>
    %4 = vector.broadcast %3 : vector<1x120xf32> to vector<30x120xf32>
    %5 = vector.extract_strided_slice %1 {offsets = [0, 0], sizes = [30, 128], strides = [1, 1]} : vector<32x128xf32> to vector<30x128xf32>
    %c0_4 = arith.constant 0 : index
    %c0_5 = arith.constant 0 : index
    %c0_6 = arith.constant 0 : index
    %6 = vector.load %arg2[%c0_4, %c0_5, %c0_6] : memref<3x128x120xf32, #tpu.memory_space<vmem>>, vector<1x128x120xf32>
    %7 = vector.shape_cast %6 : vector<1x128x120xf32> to vector<128x120xf32>
    %cst = arith.constant dense<0.000000e+00> : vector<30x120xf32>
    %8 = tpu.matmul %5, %7, %cst {dimension_numbers = #tpu.dot_dimension_numbers<[1], [0], [0], [1], [0, 0, 1, 1], [], []>} : vector<30x128xf32>, vector<128x120xf32>, vector<30x120xf32> -> vector<30x120xf32>
    %9 = arith.addf %4, %8 : vector<30x120xf32>
    %10 = vector.extract_strided_slice %1 {offsets = [1, 0], sizes = [30, 128], strides = [1, 1]} : vector<32x128xf32> to vector<30x128xf32>
    %c1 = arith.constant 1 : index
    %c0_7 = arith.constant 0 : index
    %c0_8 = arith.constant 0 : index
    %11 = vector.load %arg2[%c1, %c0_7, %c0_8] : memref<3x128x120xf32, #tpu.memory_space<vmem>>, vector<1x128x120xf32>
    %12 = vector.shape_cast %11 : vector<1x128x120xf32> to vector<128x120xf32>
    %cst_9 = arith.constant dense<0.000000e+00> : vector<30x120xf32>
    %13 = tpu.matmul %10, %12, %cst_9 {dimension_numbers = #tpu.dot_dimension_numbers<[1], [0], [0], [1], [0, 0, 1, 1], [], []>} : vector<30x128xf32>, vector<128x120xf32>, vector<30x120xf32> -> vector<30x120xf32>
    %14 = arith.addf %9, %13 : vector<30x120xf32>
    %15 = vector.extract_strided_slice %1 {offsets = [2, 0], sizes = [30, 128], strides = [1, 1]} : vector<32x128xf32> to vector<30x128xf32>
    %c2 = arith.constant 2 : index
    %c0_10 = arith.constant 0 : index
    %c0_11 = arith.constant 0 : index
    %16 = vector.load %arg2[%c2, %c0_10, %c0_11] : memref<3x128x120xf32, #tpu.memory_space<vmem>>, vector<1x128x120xf32>
    %17 = vector.shape_cast %16 : vector<1x128x120xf32> to vector<128x120xf32>
    %cst_12 = arith.constant dense<0.000000e+00> : vector<30x120xf32>
    %18 = tpu.matmul %15, %17, %cst_12 {dimension_numbers = #tpu.dot_dimension_numbers<[1], [0], [0], [1], [0, 0, 1, 1], [], []>} : vector<30x128xf32>, vector<128x120xf32>, vector<30x120xf32> -> vector<30x120xf32>
    %19 = arith.addf %14, %18 : vector<30x120xf32>
    %cst_13 = arith.constant 0.000000e+00 : f32
    %20 = vector.broadcast %cst_13 : f32 to vector<30x120xf32>
    %21 = arith.maximumf %19, %20 : vector<30x120xf32>
    %c0_14 = arith.constant 0 : index
    %c0_15 = arith.constant 0 : index
    %22 = vector.load %arg5[%c0_14, %c0_15] : memref<1x112xf32, #tpu.memory_space<vmem>>, vector<1x112xf32>
    %23 = vector.shape_cast %22 : vector<1x112xf32> to vector<1x112xf32>
    %24 = vector.broadcast %23 : vector<1x112xf32> to vector<28x112xf32>
    %25 = vector.extract_strided_slice %21 {offsets = [0, 0], sizes = [28, 120], strides = [1, 1]} : vector<30x120xf32> to vector<28x120xf32>
    %c0_16 = arith.constant 0 : index
    %c0_17 = arith.constant 0 : index
    %c0_18 = arith.constant 0 : index
    %26 = vector.load %arg4[%c0_16, %c0_17, %c0_18] : memref<3x120x112xf32, #tpu.memory_space<vmem>>, vector<1x120x112xf32>
    %27 = vector.shape_cast %26 : vector<1x120x112xf32> to vector<120x112xf32>
    %cst_19 = arith.constant dense<0.000000e+00> : vector<28x112xf32>
    %28 = tpu.matmul %25, %27, %cst_19 {dimension_numbers = #tpu.dot_dimension_numbers<[1], [0], [0], [1], [0, 0, 1, 1], [], []>} : vector<28x120xf32>, vector<120x112xf32>, vector<28x112xf32> -> vector<28x112xf32>
    %29 = arith.addf %24, %28 : vector<28x112xf32>
    %30 = vector.extract_strided_slice %21 {offsets = [1, 0], sizes = [28, 120], strides = [1, 1]} : vector<30x120xf32> to vector<28x120xf32>
    %c1_20 = arith.constant 1 : index
    %c0_21 = arith.constant 0 : index
    %c0_22 = arith.constant 0 : index
    %31 = vector.load %arg4[%c1_20, %c0_21, %c0_22] : memref<3x120x112xf32, #tpu.memory_space<vmem>>, vector<1x120x112xf32>
    %32 = vector.shape_cast %31 : vector<1x120x112xf32> to vector<120x112xf32>
    %cst_23 = arith.constant dense<0.000000e+00> : vector<28x112xf32>
    %33 = tpu.matmul %30, %32, %cst_23 {dimension_numbers = #tpu.dot_dimension_numbers<[1], [0], [0], [1], [0, 0, 1, 1], [], []>} : vector<28x120xf32>, vector<120x112xf32>, vector<28x112xf32> -> vector<28x112xf32>
    %34 = arith.addf %29, %33 : vector<28x112xf32>
    %35 = vector.extract_strided_slice %21 {offsets = [2, 0], sizes = [28, 120], strides = [1, 1]} : vector<30x120xf32> to vector<28x120xf32>
    %c2_24 = arith.constant 2 : index
    %c0_25 = arith.constant 0 : index
    %c0_26 = arith.constant 0 : index
    %36 = vector.load %arg4[%c2_24, %c0_25, %c0_26] : memref<3x120x112xf32, #tpu.memory_space<vmem>>, vector<1x120x112xf32>
    %37 = vector.shape_cast %36 : vector<1x120x112xf32> to vector<120x112xf32>
    %cst_27 = arith.constant dense<0.000000e+00> : vector<28x112xf32>
    %38 = tpu.matmul %35, %37, %cst_27 {dimension_numbers = #tpu.dot_dimension_numbers<[1], [0], [0], [1], [0, 0, 1, 1], [], []>} : vector<28x120xf32>, vector<120x112xf32>, vector<28x112xf32> -> vector<28x112xf32>
    %39 = arith.addf %34, %38 : vector<28x112xf32>
    %40 = vector.extract_strided_slice %1 {offsets = [2, 8], sizes = [28, 112], strides = [1, 1]} : vector<32x128xf32> to vector<28x112xf32>
    %41 = arith.addf %39, %40 : vector<28x112xf32>
    %cst_28 = arith.constant 0.000000e+00 : f32
    %42 = vector.broadcast %cst_28 : f32 to vector<28x112xf32>
    %43 = arith.maximumf %41, %42 : vector<28x112xf32>
    %c0_29 = arith.constant 0 : index
    %c0_30 = arith.constant 0 : index
    %c0_31 = arith.constant 0 : index
    %44 = vector.load %arg6[%c0_29, %c0_30, %c0_31] : memref<1x28x112xf32, #tpu.memory_space<vmem>>, vector<1x28x112xf32>
    %45 = vector.shape_cast %44 : vector<1x28x112xf32> to vector<28x112xf32>
    %46 = vector.shape_cast %43 : vector<28x112xf32> to vector<1x28x112xf32>
    tpu.vector_store %arg6[%c0_29, %c0_30, %c0_31], %46 {strides = array<i32>} : memref<1x28x112xf32, #tpu.memory_space<vmem>>, vector<1x28x112xf32>,
    return
  }
  func.func @transform_0(%arg0: i32) -> (i32, i32, i32) {
    %c0_i32 = arith.constant 0 : i32
    %c0_i32_0 = arith.constant 0 : i32
    %c0_i32_1 = arith.constant 0 : i32
    return %arg0, %c0_i32, %c0_i32_0 : i32, i32, i32
  }
  func.func @transform_1(%arg0: i32) -> (i32, i32, i32) {
    %c0_i32 = arith.constant 0 : i32
    %c0_i32_0 = arith.constant 0 : i32
    %c0_i32_1 = arith.constant 0 : i32
    %c0_i32_2 = arith.constant 0 : i32
    return %c0_i32, %c0_i32_0, %c0_i32_1 : i32, i32, i32
  }
  func.func @transform_2(%arg0: i32) -> (i32, i32) {
    %c0_i32 = arith.constant 0 : i32
    %c0_i32_0 = arith.constant 0 : i32
    %c0_i32_1 = arith.constant 0 : i32
    return %c0_i32, %c0_i32_0 : i32, i32
  }
  func.func @transform_3(%arg0: i32) -> (i32, i32, i32) {
    %c0_i32 = arith.constant 0 : i32
    %c0_i32_0 = arith.constant 0 : i32
    %c0_i32_1 = arith.constant 0 : i32
    %c0_i32_2 = arith.constant 0 : i32
    return %c0_i32, %c0_i32_0, %c0_i32_1 : i32, i32, i32
  }
  func.func @transform_4(%arg0: i32) -> (i32, i32) {
    %c0_i32 = arith.constant 0 : i32
    %c0_i32_0 = arith.constant 0 : i32
    %c0_i32_1 = arith.constant 0 : i32
    return %c0_i32, %c0_i32_0 : i32, i32
  }
  func.func @transform_5(%arg0: i32) -> (i32, i32, i32) {
    %c0_i32 = arith.constant 0 : i32
    %c0_i32_0 = arith.constant 0 : i32
    %c0_i32_1 = arith.constant 0 : i32
    return %arg0, %c0_i32, %c0_i32_0 : i32, i32, i32
  }
}

module attributes {stable_mosaic.version = 11 : i64} {
  func.func @_crop_res_block_kernel(%arg0: i32, %arg1: memref<1x28x112xf32, #tpu.memory_space<vmem>>, %arg2: memref<3x112x104xf32, #tpu.memory_space<vmem>>, %arg3: memref<1x104xf32, #tpu.memory_space<vmem>>, %arg4: memref<3x104x96xf32, #tpu.memory_space<vmem>>, %arg5: memref<1x96xf32, #tpu.memory_space<vmem>>, %arg6: memref<1x24x96xf32, #tpu.memory_space<vmem>>) attributes {dimension_semantics = [#tpu.dimension_semantics<parallel>], iteration_bounds = array<i64: 2>, scalar_prefetch = 0 : i64, scratch_operands = 0 : i64, tpu.core_type = #tpu.core_type<tc>, window_params = [{transform_indices = @transform_0, window_bounds = array<i64: 1, 28, 112>}, {pipeline_mode = #tpu.pipeline_mode<synchronous>, transform_indices = @transform_1, window_bounds = array<i64: 3, 112, 104>}, {pipeline_mode = #tpu.pipeline_mode<synchronous>, transform_indices = @transform_2, window_bounds = array<i64: 1, 104>}, {pipeline_mode = #tpu.pipeline_mode<synchronous>, transform_indices = @transform_3, window_bounds = array<i64: 3, 104, 96>}, {pipeline_mode = #tpu.pipeline_mode<synchronous>, transform_indices = @transform_4, window_bounds = array<i64: 1, 96>}, {transform_indices = @transform_5, window_bounds = array<i64: 1, 24, 96>}]} {
    %c0 = arith.constant 0 : index
    %c0_0 = arith.constant 0 : index
    %c0_1 = arith.constant 0 : index
    %0 = vector.load %arg1[%c0, %c0_0, %c0_1] : memref<1x28x112xf32, #tpu.memory_space<vmem>>, vector<1x28x112xf32>
    %1 = vector.shape_cast %0 : vector<1x28x112xf32> to vector<28x112xf32>
    %c0_2 = arith.constant 0 : index
    %c0_3 = arith.constant 0 : index
    %2 = vector.load %arg3[%c0_2, %c0_3] : memref<1x104xf32, #tpu.memory_space<vmem>>, vector<1x104xf32>
    %3 = vector.shape_cast %2 : vector<1x104xf32> to vector<1x104xf32>
    %4 = vector.broadcast %3 : vector<1x104xf32> to vector<26x104xf32>
    %5 = vector.extract_strided_slice %1 {offsets = [0, 0], sizes = [26, 112], strides = [1, 1]} : vector<28x112xf32> to vector<26x112xf32>
    %c0_4 = arith.constant 0 : index
    %c0_5 = arith.constant 0 : index
    %c0_6 = arith.constant 0 : index
    %6 = vector.load %arg2[%c0_4, %c0_5, %c0_6] : memref<3x112x104xf32, #tpu.memory_space<vmem>>, vector<1x112x104xf32>
    %7 = vector.shape_cast %6 : vector<1x112x104xf32> to vector<112x104xf32>
    %cst = arith.constant dense<0.000000e+00> : vector<26x104xf32>
    %8 = tpu.matmul %5, %7, %cst {dimension_numbers = #tpu.dot_dimension_numbers<[1], [0], [0], [1], [0, 0, 1, 1], [], []>} : vector<26x112xf32>, vector<112x104xf32>, vector<26x104xf32> -> vector<26x104xf32>
    %9 = arith.addf %4, %8 : vector<26x104xf32>
    %10 = vector.extract_strided_slice %1 {offsets = [1, 0], sizes = [26, 112], strides = [1, 1]} : vector<28x112xf32> to vector<26x112xf32>
    %c1 = arith.constant 1 : index
    %c0_7 = arith.constant 0 : index
    %c0_8 = arith.constant 0 : index
    %11 = vector.load %arg2[%c1, %c0_7, %c0_8] : memref<3x112x104xf32, #tpu.memory_space<vmem>>, vector<1x112x104xf32>
    %12 = vector.shape_cast %11 : vector<1x112x104xf32> to vector<112x104xf32>
    %cst_9 = arith.constant dense<0.000000e+00> : vector<26x104xf32>
    %13 = tpu.matmul %10, %12, %cst_9 {dimension_numbers = #tpu.dot_dimension_numbers<[1], [0], [0], [1], [0, 0, 1, 1], [], []>} : vector<26x112xf32>, vector<112x104xf32>, vector<26x104xf32> -> vector<26x104xf32>
    %14 = arith.addf %9, %13 : vector<26x104xf32>
    %15 = vector.extract_strided_slice %1 {offsets = [2, 0], sizes = [26, 112], strides = [1, 1]} : vector<28x112xf32> to vector<26x112xf32>
    %c2 = arith.constant 2 : index
    %c0_10 = arith.constant 0 : index
    %c0_11 = arith.constant 0 : index
    %16 = vector.load %arg2[%c2, %c0_10, %c0_11] : memref<3x112x104xf32, #tpu.memory_space<vmem>>, vector<1x112x104xf32>
    %17 = vector.shape_cast %16 : vector<1x112x104xf32> to vector<112x104xf32>
    %cst_12 = arith.constant dense<0.000000e+00> : vector<26x104xf32>
    %18 = tpu.matmul %15, %17, %cst_12 {dimension_numbers = #tpu.dot_dimension_numbers<[1], [0], [0], [1], [0, 0, 1, 1], [], []>} : vector<26x112xf32>, vector<112x104xf32>, vector<26x104xf32> -> vector<26x104xf32>
    %19 = arith.addf %14, %18 : vector<26x104xf32>
    %cst_13 = arith.constant 0.000000e+00 : f32
    %20 = vector.broadcast %cst_13 : f32 to vector<26x104xf32>
    %21 = arith.maximumf %19, %20 : vector<26x104xf32>
    %c0_14 = arith.constant 0 : index
    %c0_15 = arith.constant 0 : index
    %22 = vector.load %arg5[%c0_14, %c0_15] : memref<1x96xf32, #tpu.memory_space<vmem>>, vector<1x96xf32>
    %23 = vector.shape_cast %22 : vector<1x96xf32> to vector<1x96xf32>
    %24 = vector.broadcast %23 : vector<1x96xf32> to vector<24x96xf32>
    %25 = vector.extract_strided_slice %21 {offsets = [0, 0], sizes = [24, 104], strides = [1, 1]} : vector<26x104xf32> to vector<24x104xf32>
    %c0_16 = arith.constant 0 : index
    %c0_17 = arith.constant 0 : index
    %c0_18 = arith.constant 0 : index
    %26 = vector.load %arg4[%c0_16, %c0_17, %c0_18] : memref<3x104x96xf32, #tpu.memory_space<vmem>>, vector<1x104x96xf32>
    %27 = vector.shape_cast %26 : vector<1x104x96xf32> to vector<104x96xf32>
    %cst_19 = arith.constant dense<0.000000e+00> : vector<24x96xf32>
    %28 = tpu.matmul %25, %27, %cst_19 {dimension_numbers = #tpu.dot_dimension_numbers<[1], [0], [0], [1], [0, 0, 1, 1], [], []>} : vector<24x104xf32>, vector<104x96xf32>, vector<24x96xf32> -> vector<24x96xf32>
    %29 = arith.addf %24, %28 : vector<24x96xf32>
    %30 = vector.extract_strided_slice %21 {offsets = [1, 0], sizes = [24, 104], strides = [1, 1]} : vector<26x104xf32> to vector<24x104xf32>
    %c1_20 = arith.constant 1 : index
    %c0_21 = arith.constant 0 : index
    %c0_22 = arith.constant 0 : index
    %31 = vector.load %arg4[%c1_20, %c0_21, %c0_22] : memref<3x104x96xf32, #tpu.memory_space<vmem>>, vector<1x104x96xf32>
    %32 = vector.shape_cast %31 : vector<1x104x96xf32> to vector<104x96xf32>
    %cst_23 = arith.constant dense<0.000000e+00> : vector<24x96xf32>
    %33 = tpu.matmul %30, %32, %cst_23 {dimension_numbers = #tpu.dot_dimension_numbers<[1], [0], [0], [1], [0, 0, 1, 1], [], []>} : vector<24x104xf32>, vector<104x96xf32>, vector<24x96xf32> -> vector<24x96xf32>
    %34 = arith.addf %29, %33 : vector<24x96xf32>
    %35 = vector.extract_strided_slice %21 {offsets = [2, 0], sizes = [24, 104], strides = [1, 1]} : vector<26x104xf32> to vector<24x104xf32>
    %c2_24 = arith.constant 2 : index
    %c0_25 = arith.constant 0 : index
    %c0_26 = arith.constant 0 : index
    %36 = vector.load %arg4[%c2_24, %c0_25, %c0_26] : memref<3x104x96xf32, #tpu.memory_space<vmem>>, vector<1x104x96xf32>
    %37 = vector.shape_cast %36 : vector<1x104x96xf32> to vector<104x96xf32>
    %cst_27 = arith.constant dense<0.000000e+00> : vector<24x96xf32>
    %38 = tpu.matmul %35, %37, %cst_27 {dimension_numbers = #tpu.dot_dimension_numbers<[1], [0], [0], [1], [0, 0, 1, 1], [], []>} : vector<24x104xf32>, vector<104x96xf32>, vector<24x96xf32> -> vector<24x96xf32>
    %39 = arith.addf %34, %38 : vector<24x96xf32>
    %40 = vector.extract_strided_slice %1 {offsets = [2, 8], sizes = [24, 96], strides = [1, 1]} : vector<28x112xf32> to vector<24x96xf32>
    %41 = arith.addf %39, %40 : vector<24x96xf32>
    %cst_28 = arith.constant 0.000000e+00 : f32
    %42 = vector.broadcast %cst_28 : f32 to vector<24x96xf32>
    %43 = arith.maximumf %41, %42 : vector<24x96xf32>
    %c0_29 = arith.constant 0 : index
    %c0_30 = arith.constant 0 : index
    %c0_31 = arith.constant 0 : index
    %44 = vector.load %arg6[%c0_29, %c0_30, %c0_31] : memref<1x24x96xf32, #tpu.memory_space<vmem>>, vector<1x24x96xf32>
    %45 = vector.shape_cast %44 : vector<1x24x96xf32> to vector<24x96xf32>
    %46 = vector.shape_cast %43 : vector<24x96xf32> to vector<1x24x96xf32>
    tpu.vector_store %arg6[%c0_29, %c0_30, %c0_31], %46 {strides = array<i32>} : memref<1x24x96xf32, #tpu.memory_space<vmem>>, vector<1x24x96xf32>,
    return
  }
  func.func @transform_0(%arg0: i32) -> (i32, i32, i32) {
    %c0_i32 = arith.constant 0 : i32
    %c0_i32_0 = arith.constant 0 : i32
    %c0_i32_1 = arith.constant 0 : i32
    return %arg0, %c0_i32, %c0_i32_0 : i32, i32, i32
  }
  func.func @transform_1(%arg0: i32) -> (i32, i32, i32) {
    %c0_i32 = arith.constant 0 : i32
    %c0_i32_0 = arith.constant 0 : i32
    %c0_i32_1 = arith.constant 0 : i32
    %c0_i32_2 = arith.constant 0 : i32
    return %c0_i32, %c0_i32_0, %c0_i32_1 : i32, i32, i32
  }
  func.func @transform_2(%arg0: i32) -> (i32, i32) {
    %c0_i32 = arith.constant 0 : i32
    %c0_i32_0 = arith.constant 0 : i32
    %c0_i32_1 = arith.constant 0 : i32
    return %c0_i32, %c0_i32_0 : i32, i32
  }
  func.func @transform_3(%arg0: i32) -> (i32, i32, i32) {
    %c0_i32 = arith.constant 0 : i32
    %c0_i32_0 = arith.constant 0 : i32
    %c0_i32_1 = arith.constant 0 : i32
    %c0_i32_2 = arith.constant 0 : i32
    return %c0_i32, %c0_i32_0, %c0_i32_1 : i32, i32, i32
  }
  func.func @transform_4(%arg0: i32) -> (i32, i32) {
    %c0_i32 = arith.constant 0 : i32
    %c0_i32_0 = arith.constant 0 : i32
    %c0_i32_1 = arith.constant 0 : i32
    return %c0_i32, %c0_i32_0 : i32, i32
  }
  func.func @transform_5(%arg0: i32) -> (i32, i32, i32) {
    %c0_i32 = arith.constant 0 : i32
    %c0_i32_0 = arith.constant 0 : i32
    %c0_i32_1 = arith.constant 0 : i32
    return %arg0, %c0_i32, %c0_i32_0 : i32, i32, i32
  }
}

module attributes {stable_mosaic.version = 11 : i64} {
  func.func @_crop_res_block_kernel(%arg0: i32, %arg1: memref<1x24x192xf32, #tpu.memory_space<vmem>>, %arg2: memref<3x192x176xf32, #tpu.memory_space<vmem>>, %arg3: memref<1x176xf32, #tpu.memory_space<vmem>>, %arg4: memref<3x176x160xf32, #tpu.memory_space<vmem>>, %arg5: memref<1x160xf32, #tpu.memory_space<vmem>>, %arg6: memref<1x20x160xf32, #tpu.memory_space<vmem>>) attributes {dimension_semantics = [#tpu.dimension_semantics<parallel>], iteration_bounds = array<i64: 2>, scalar_prefetch = 0 : i64, scratch_operands = 0 : i64, tpu.core_type = #tpu.core_type<tc>, window_params = [{transform_indices = @transform_0, window_bounds = array<i64: 1, 24, 192>}, {pipeline_mode = #tpu.pipeline_mode<synchronous>, transform_indices = @transform_1, window_bounds = array<i64: 3, 192, 176>}, {pipeline_mode = #tpu.pipeline_mode<synchronous>, transform_indices = @transform_2, window_bounds = array<i64: 1, 176>}, {pipeline_mode = #tpu.pipeline_mode<synchronous>, transform_indices = @transform_3, window_bounds = array<i64: 3, 176, 160>}, {pipeline_mode = #tpu.pipeline_mode<synchronous>, transform_indices = @transform_4, window_bounds = array<i64: 1, 160>}, {transform_indices = @transform_5, window_bounds = array<i64: 1, 20, 160>}]} {
    %c0 = arith.constant 0 : index
    %c0_0 = arith.constant 0 : index
    %c0_1 = arith.constant 0 : index
    %0 = vector.load %arg1[%c0, %c0_0, %c0_1] : memref<1x24x192xf32, #tpu.memory_space<vmem>>, vector<1x24x192xf32>
    %1 = vector.shape_cast %0 : vector<1x24x192xf32> to vector<24x192xf32>
    %c0_2 = arith.constant 0 : index
    %c0_3 = arith.constant 0 : index
    %2 = vector.load %arg3[%c0_2, %c0_3] : memref<1x176xf32, #tpu.memory_space<vmem>>, vector<1x176xf32>
    %3 = vector.shape_cast %2 : vector<1x176xf32> to vector<1x176xf32>
    %4 = vector.broadcast %3 : vector<1x176xf32> to vector<22x176xf32>
    %5 = vector.extract_strided_slice %1 {offsets = [0, 0], sizes = [22, 192], strides = [1, 1]} : vector<24x192xf32> to vector<22x192xf32>
    %c0_4 = arith.constant 0 : index
    %c0_5 = arith.constant 0 : index
    %c0_6 = arith.constant 0 : index
    %6 = vector.load %arg2[%c0_4, %c0_5, %c0_6] : memref<3x192x176xf32, #tpu.memory_space<vmem>>, vector<1x192x176xf32>
    %7 = vector.shape_cast %6 : vector<1x192x176xf32> to vector<192x176xf32>
    %cst = arith.constant dense<0.000000e+00> : vector<22x176xf32>
    %8 = tpu.matmul %5, %7, %cst {dimension_numbers = #tpu.dot_dimension_numbers<[1], [0], [0], [1], [0, 0, 1, 1], [], []>} : vector<22x192xf32>, vector<192x176xf32>, vector<22x176xf32> -> vector<22x176xf32>
    %9 = arith.addf %4, %8 : vector<22x176xf32>
    %10 = vector.extract_strided_slice %1 {offsets = [1, 0], sizes = [22, 192], strides = [1, 1]} : vector<24x192xf32> to vector<22x192xf32>
    %c1 = arith.constant 1 : index
    %c0_7 = arith.constant 0 : index
    %c0_8 = arith.constant 0 : index
    %11 = vector.load %arg2[%c1, %c0_7, %c0_8] : memref<3x192x176xf32, #tpu.memory_space<vmem>>, vector<1x192x176xf32>
    %12 = vector.shape_cast %11 : vector<1x192x176xf32> to vector<192x176xf32>
    %cst_9 = arith.constant dense<0.000000e+00> : vector<22x176xf32>
    %13 = tpu.matmul %10, %12, %cst_9 {dimension_numbers = #tpu.dot_dimension_numbers<[1], [0], [0], [1], [0, 0, 1, 1], [], []>} : vector<22x192xf32>, vector<192x176xf32>, vector<22x176xf32> -> vector<22x176xf32>
    %14 = arith.addf %9, %13 : vector<22x176xf32>
    %15 = vector.extract_strided_slice %1 {offsets = [2, 0], sizes = [22, 192], strides = [1, 1]} : vector<24x192xf32> to vector<22x192xf32>
    %c2 = arith.constant 2 : index
    %c0_10 = arith.constant 0 : index
    %c0_11 = arith.constant 0 : index
    %16 = vector.load %arg2[%c2, %c0_10, %c0_11] : memref<3x192x176xf32, #tpu.memory_space<vmem>>, vector<1x192x176xf32>
    %17 = vector.shape_cast %16 : vector<1x192x176xf32> to vector<192x176xf32>
    %cst_12 = arith.constant dense<0.000000e+00> : vector<22x176xf32>
    %18 = tpu.matmul %15, %17, %cst_12 {dimension_numbers = #tpu.dot_dimension_numbers<[1], [0], [0], [1], [0, 0, 1, 1], [], []>} : vector<22x192xf32>, vector<192x176xf32>, vector<22x176xf32> -> vector<22x176xf32>
    %19 = arith.addf %14, %18 : vector<22x176xf32>
    %cst_13 = arith.constant 0.000000e+00 : f32
    %20 = vector.broadcast %cst_13 : f32 to vector<22x176xf32>
    %21 = arith.maximumf %19, %20 : vector<22x176xf32>
    %c0_14 = arith.constant 0 : index
    %c0_15 = arith.constant 0 : index
    %22 = vector.load %arg5[%c0_14, %c0_15] : memref<1x160xf32, #tpu.memory_space<vmem>>, vector<1x160xf32>
    %23 = vector.shape_cast %22 : vector<1x160xf32> to vector<1x160xf32>
    %24 = vector.broadcast %23 : vector<1x160xf32> to vector<20x160xf32>
    %25 = vector.extract_strided_slice %21 {offsets = [0, 0], sizes = [20, 176], strides = [1, 1]} : vector<22x176xf32> to vector<20x176xf32>
    %c0_16 = arith.constant 0 : index
    %c0_17 = arith.constant 0 : index
    %c0_18 = arith.constant 0 : index
    %26 = vector.load %arg4[%c0_16, %c0_17, %c0_18] : memref<3x176x160xf32, #tpu.memory_space<vmem>>, vector<1x176x160xf32>
    %27 = vector.shape_cast %26 : vector<1x176x160xf32> to vector<176x160xf32>
    %cst_19 = arith.constant dense<0.000000e+00> : vector<20x160xf32>
    %28 = tpu.matmul %25, %27, %cst_19 {dimension_numbers = #tpu.dot_dimension_numbers<[1], [0], [0], [1], [0, 0, 1, 1], [], []>} : vector<20x176xf32>, vector<176x160xf32>, vector<20x160xf32> -> vector<20x160xf32>
    %29 = arith.addf %24, %28 : vector<20x160xf32>
    %30 = vector.extract_strided_slice %21 {offsets = [1, 0], sizes = [20, 176], strides = [1, 1]} : vector<22x176xf32> to vector<20x176xf32>
    %c1_20 = arith.constant 1 : index
    %c0_21 = arith.constant 0 : index
    %c0_22 = arith.constant 0 : index
    %31 = vector.load %arg4[%c1_20, %c0_21, %c0_22] : memref<3x176x160xf32, #tpu.memory_space<vmem>>, vector<1x176x160xf32>
    %32 = vector.shape_cast %31 : vector<1x176x160xf32> to vector<176x160xf32>
    %cst_23 = arith.constant dense<0.000000e+00> : vector<20x160xf32>
    %33 = tpu.matmul %30, %32, %cst_23 {dimension_numbers = #tpu.dot_dimension_numbers<[1], [0], [0], [1], [0, 0, 1, 1], [], []>} : vector<20x176xf32>, vector<176x160xf32>, vector<20x160xf32> -> vector<20x160xf32>
    %34 = arith.addf %29, %33 : vector<20x160xf32>
    %35 = vector.extract_strided_slice %21 {offsets = [2, 0], sizes = [20, 176], strides = [1, 1]} : vector<22x176xf32> to vector<20x176xf32>
    %c2_24 = arith.constant 2 : index
    %c0_25 = arith.constant 0 : index
    %c0_26 = arith.constant 0 : index
    %36 = vector.load %arg4[%c2_24, %c0_25, %c0_26] : memref<3x176x160xf32, #tpu.memory_space<vmem>>, vector<1x176x160xf32>
    %37 = vector.shape_cast %36 : vector<1x176x160xf32> to vector<176x160xf32>
    %cst_27 = arith.constant dense<0.000000e+00> : vector<20x160xf32>
    %38 = tpu.matmul %35, %37, %cst_27 {dimension_numbers = #tpu.dot_dimension_numbers<[1], [0], [0], [1], [0, 0, 1, 1], [], []>} : vector<20x176xf32>, vector<176x160xf32>, vector<20x160xf32> -> vector<20x160xf32>
    %39 = arith.addf %34, %38 : vector<20x160xf32>
    %40 = vector.extract_strided_slice %1 {offsets = [2, 16], sizes = [20, 160], strides = [1, 1]} : vector<24x192xf32> to vector<20x160xf32>
    %41 = arith.addf %39, %40 : vector<20x160xf32>
    %cst_28 = arith.constant 0.000000e+00 : f32
    %42 = vector.broadcast %cst_28 : f32 to vector<20x160xf32>
    %43 = arith.maximumf %41, %42 : vector<20x160xf32>
    %c0_29 = arith.constant 0 : index
    %c0_30 = arith.constant 0 : index
    %c0_31 = arith.constant 0 : index
    %44 = vector.load %arg6[%c0_29, %c0_30, %c0_31] : memref<1x20x160xf32, #tpu.memory_space<vmem>>, vector<1x20x160xf32>
    %45 = vector.shape_cast %44 : vector<1x20x160xf32> to vector<20x160xf32>
    %46 = vector.shape_cast %43 : vector<20x160xf32> to vector<1x20x160xf32>
    tpu.vector_store %arg6[%c0_29, %c0_30, %c0_31], %46 {strides = array<i32>} : memref<1x20x160xf32, #tpu.memory_space<vmem>>, vector<1x20x160xf32>,
    return
  }
  func.func @transform_0(%arg0: i32) -> (i32, i32, i32) {
    %c0_i32 = arith.constant 0 : i32
    %c0_i32_0 = arith.constant 0 : i32
    %c0_i32_1 = arith.constant 0 : i32
    return %arg0, %c0_i32, %c0_i32_0 : i32, i32, i32
  }
  func.func @transform_1(%arg0: i32) -> (i32, i32, i32) {
    %c0_i32 = arith.constant 0 : i32
    %c0_i32_0 = arith.constant 0 : i32
    %c0_i32_1 = arith.constant 0 : i32
    %c0_i32_2 = arith.constant 0 : i32
    return %c0_i32, %c0_i32_0, %c0_i32_1 : i32, i32, i32
  }
  func.func @transform_2(%arg0: i32) -> (i32, i32) {
    %c0_i32 = arith.constant 0 : i32
    %c0_i32_0 = arith.constant 0 : i32
    %c0_i32_1 = arith.constant 0 : i32
    return %c0_i32, %c0_i32_0 : i32, i32
  }
  func.func @transform_3(%arg0: i32) -> (i32, i32, i32) {
    %c0_i32 = arith.constant 0 : i32
    %c0_i32_0 = arith.constant 0 : i32
    %c0_i32_1 = arith.constant 0 : i32
    %c0_i32_2 = arith.constant 0 : i32
    return %c0_i32, %c0_i32_0, %c0_i32_1 : i32, i32, i32
  }
  func.func @transform_4(%arg0: i32) -> (i32, i32) {
    %c0_i32 = arith.constant 0 : i32
    %c0_i32_0 = arith.constant 0 : i32
    %c0_i32_1 = arith.constant 0 : i32
    return %c0_i32, %c0_i32_0 : i32, i32
  }
  func.func @transform_5(%arg0: i32) -> (i32, i32, i32) {
    %c0_i32 = arith.constant 0 : i32
    %c0_i32_0 = arith.constant 0 : i32
    %c0_i32_1 = arith.constant 0 : i32
    return %arg0, %c0_i32, %c0_i32_0 : i32, i32, i32
  }
}

module attributes {stable_mosaic.version = 11 : i64} {
  func.func @_crop_res_block_kernel(%arg0: i32, %arg1: memref<1x20x160xf32, #tpu.memory_space<vmem>>, %arg2: memref<3x160x144xf32, #tpu.memory_space<vmem>>, %arg3: memref<1x144xf32, #tpu.memory_space<vmem>>, %arg4: memref<3x144x128xf32, #tpu.memory_space<vmem>>, %arg5: memref<1x128xf32, #tpu.memory_space<vmem>>, %arg6: memref<1x16x128xf32, #tpu.memory_space<vmem>>) attributes {dimension_semantics = [#tpu.dimension_semantics<parallel>], iteration_bounds = array<i64: 2>, scalar_prefetch = 0 : i64, scratch_operands = 0 : i64, tpu.core_type = #tpu.core_type<tc>, window_params = [{transform_indices = @transform_0, window_bounds = array<i64: 1, 20, 160>}, {pipeline_mode = #tpu.pipeline_mode<synchronous>, transform_indices = @transform_1, window_bounds = array<i64: 3, 160, 144>}, {pipeline_mode = #tpu.pipeline_mode<synchronous>, transform_indices = @transform_2, window_bounds = array<i64: 1, 144>}, {pipeline_mode = #tpu.pipeline_mode<synchronous>, transform_indices = @transform_3, window_bounds = array<i64: 3, 144, 128>}, {pipeline_mode = #tpu.pipeline_mode<synchronous>, transform_indices = @transform_4, window_bounds = array<i64: 1, 128>}, {transform_indices = @transform_5, window_bounds = array<i64: 1, 16, 128>}]} {
    %c0 = arith.constant 0 : index
    %c0_0 = arith.constant 0 : index
    %c0_1 = arith.constant 0 : index
    %0 = vector.load %arg1[%c0, %c0_0, %c0_1] : memref<1x20x160xf32, #tpu.memory_space<vmem>>, vector<1x20x160xf32>
    %1 = vector.shape_cast %0 : vector<1x20x160xf32> to vector<20x160xf32>
    %c0_2 = arith.constant 0 : index
    %c0_3 = arith.constant 0 : index
    %2 = vector.load %arg3[%c0_2, %c0_3] : memref<1x144xf32, #tpu.memory_space<vmem>>, vector<1x144xf32>
    %3 = vector.shape_cast %2 : vector<1x144xf32> to vector<1x144xf32>
    %4 = vector.broadcast %3 : vector<1x144xf32> to vector<18x144xf32>
    %5 = vector.extract_strided_slice %1 {offsets = [0, 0], sizes = [18, 160], strides = [1, 1]} : vector<20x160xf32> to vector<18x160xf32>
    %c0_4 = arith.constant 0 : index
    %c0_5 = arith.constant 0 : index
    %c0_6 = arith.constant 0 : index
    %6 = vector.load %arg2[%c0_4, %c0_5, %c0_6] : memref<3x160x144xf32, #tpu.memory_space<vmem>>, vector<1x160x144xf32>
    %7 = vector.shape_cast %6 : vector<1x160x144xf32> to vector<160x144xf32>
    %cst = arith.constant dense<0.000000e+00> : vector<18x144xf32>
    %8 = tpu.matmul %5, %7, %cst {dimension_numbers = #tpu.dot_dimension_numbers<[1], [0], [0], [1], [0, 0, 1, 1], [], []>} : vector<18x160xf32>, vector<160x144xf32>, vector<18x144xf32> -> vector<18x144xf32>
    %9 = arith.addf %4, %8 : vector<18x144xf32>
    %10 = vector.extract_strided_slice %1 {offsets = [1, 0], sizes = [18, 160], strides = [1, 1]} : vector<20x160xf32> to vector<18x160xf32>
    %c1 = arith.constant 1 : index
    %c0_7 = arith.constant 0 : index
    %c0_8 = arith.constant 0 : index
    %11 = vector.load %arg2[%c1, %c0_7, %c0_8] : memref<3x160x144xf32, #tpu.memory_space<vmem>>, vector<1x160x144xf32>
    %12 = vector.shape_cast %11 : vector<1x160x144xf32> to vector<160x144xf32>
    %cst_9 = arith.constant dense<0.000000e+00> : vector<18x144xf32>
    %13 = tpu.matmul %10, %12, %cst_9 {dimension_numbers = #tpu.dot_dimension_numbers<[1], [0], [0], [1], [0, 0, 1, 1], [], []>} : vector<18x160xf32>, vector<160x144xf32>, vector<18x144xf32> -> vector<18x144xf32>
    %14 = arith.addf %9, %13 : vector<18x144xf32>
    %15 = vector.extract_strided_slice %1 {offsets = [2, 0], sizes = [18, 160], strides = [1, 1]} : vector<20x160xf32> to vector<18x160xf32>
    %c2 = arith.constant 2 : index
    %c0_10 = arith.constant 0 : index
    %c0_11 = arith.constant 0 : index
    %16 = vector.load %arg2[%c2, %c0_10, %c0_11] : memref<3x160x144xf32, #tpu.memory_space<vmem>>, vector<1x160x144xf32>
    %17 = vector.shape_cast %16 : vector<1x160x144xf32> to vector<160x144xf32>
    %cst_12 = arith.constant dense<0.000000e+00> : vector<18x144xf32>
    %18 = tpu.matmul %15, %17, %cst_12 {dimension_numbers = #tpu.dot_dimension_numbers<[1], [0], [0], [1], [0, 0, 1, 1], [], []>} : vector<18x160xf32>, vector<160x144xf32>, vector<18x144xf32> -> vector<18x144xf32>
    %19 = arith.addf %14, %18 : vector<18x144xf32>
    %cst_13 = arith.constant 0.000000e+00 : f32
    %20 = vector.broadcast %cst_13 : f32 to vector<18x144xf32>
    %21 = arith.maximumf %19, %20 : vector<18x144xf32>
    %c0_14 = arith.constant 0 : index
    %c0_15 = arith.constant 0 : index
    %22 = vector.load %arg5[%c0_14, %c0_15] : memref<1x128xf32, #tpu.memory_space<vmem>>, vector<1x128xf32>
    %23 = vector.shape_cast %22 : vector<1x128xf32> to vector<1x128xf32>
    %24 = vector.broadcast %23 : vector<1x128xf32> to vector<16x128xf32>
    %25 = vector.extract_strided_slice %21 {offsets = [0, 0], sizes = [16, 144], strides = [1, 1]} : vector<18x144xf32> to vector<16x144xf32>
    %c0_16 = arith.constant 0 : index
    %c0_17 = arith.constant 0 : index
    %c0_18 = arith.constant 0 : index
    %26 = vector.load %arg4[%c0_16, %c0_17, %c0_18] : memref<3x144x128xf32, #tpu.memory_space<vmem>>, vector<1x144x128xf32>
    %27 = vector.shape_cast %26 : vector<1x144x128xf32> to vector<144x128xf32>
    %cst_19 = arith.constant dense<0.000000e+00> : vector<16x128xf32>
    %28 = tpu.matmul %25, %27, %cst_19 {dimension_numbers = #tpu.dot_dimension_numbers<[1], [0], [0], [1], [0, 0, 1, 1], [], []>} : vector<16x144xf32>, vector<144x128xf32>, vector<16x128xf32> -> vector<16x128xf32>
    %29 = arith.addf %24, %28 : vector<16x128xf32>
    %30 = vector.extract_strided_slice %21 {offsets = [1, 0], sizes = [16, 144], strides = [1, 1]} : vector<18x144xf32> to vector<16x144xf32>
    %c1_20 = arith.constant 1 : index
    %c0_21 = arith.constant 0 : index
    %c0_22 = arith.constant 0 : index
    %31 = vector.load %arg4[%c1_20, %c0_21, %c0_22] : memref<3x144x128xf32, #tpu.memory_space<vmem>>, vector<1x144x128xf32>
    %32 = vector.shape_cast %31 : vector<1x144x128xf32> to vector<144x128xf32>
    %cst_23 = arith.constant dense<0.000000e+00> : vector<16x128xf32>
    %33 = tpu.matmul %30, %32, %cst_23 {dimension_numbers = #tpu.dot_dimension_numbers<[1], [0], [0], [1], [0, 0, 1, 1], [], []>} : vector<16x144xf32>, vector<144x128xf32>, vector<16x128xf32> -> vector<16x128xf32>
    %34 = arith.addf %29, %33 : vector<16x128xf32>
    %35 = vector.extract_strided_slice %21 {offsets = [2, 0], sizes = [16, 144], strides = [1, 1]} : vector<18x144xf32> to vector<16x144xf32>
    %c2_24 = arith.constant 2 : index
    %c0_25 = arith.constant 0 : index
    %c0_26 = arith.constant 0 : index
    %36 = vector.load %arg4[%c2_24, %c0_25, %c0_26] : memref<3x144x128xf32, #tpu.memory_space<vmem>>, vector<1x144x128xf32>
    %37 = vector.shape_cast %36 : vector<1x144x128xf32> to vector<144x128xf32>
    %cst_27 = arith.constant dense<0.000000e+00> : vector<16x128xf32>
    %38 = tpu.matmul %35, %37, %cst_27 {dimension_numbers = #tpu.dot_dimension_numbers<[1], [0], [0], [1], [0, 0, 1, 1], [], []>} : vector<16x144xf32>, vector<144x128xf32>, vector<16x128xf32> -> vector<16x128xf32>
    %39 = arith.addf %34, %38 : vector<16x128xf32>
    %40 = vector.extract_strided_slice %1 {offsets = [2, 16], sizes = [16, 128], strides = [1, 1]} : vector<20x160xf32> to vector<16x128xf32>
    %41 = arith.addf %39, %40 : vector<16x128xf32>
    %cst_28 = arith.constant 0.000000e+00 : f32
    %42 = vector.broadcast %cst_28 : f32 to vector<16x128xf32>
    %43 = arith.maximumf %41, %42 : vector<16x128xf32>
    %c0_29 = arith.constant 0 : index
    %c0_30 = arith.constant 0 : index
    %c0_31 = arith.constant 0 : index
    %44 = vector.load %arg6[%c0_29, %c0_30, %c0_31] : memref<1x16x128xf32, #tpu.memory_space<vmem>>, vector<1x16x128xf32>
    %45 = vector.shape_cast %44 : vector<1x16x128xf32> to vector<16x128xf32>
    %46 = vector.shape_cast %43 : vector<16x128xf32> to vector<1x16x128xf32>
    tpu.vector_store %arg6[%c0_29, %c0_30, %c0_31], %46 {strides = array<i32>} : memref<1x16x128xf32, #tpu.memory_space<vmem>>, vector<1x16x128xf32>,
    return
  }
  func.func @transform_0(%arg0: i32) -> (i32, i32, i32) {
    %c0_i32 = arith.constant 0 : i32
    %c0_i32_0 = arith.constant 0 : i32
    %c0_i32_1 = arith.constant 0 : i32
    return %arg0, %c0_i32, %c0_i32_0 : i32, i32, i32
  }
  func.func @transform_1(%arg0: i32) -> (i32, i32, i32) {
    %c0_i32 = arith.constant 0 : i32
    %c0_i32_0 = arith.constant 0 : i32
    %c0_i32_1 = arith.constant 0 : i32
    %c0_i32_2 = arith.constant 0 : i32
    return %c0_i32, %c0_i32_0, %c0_i32_1 : i32, i32, i32
  }
  func.func @transform_2(%arg0: i32) -> (i32, i32) {
    %c0_i32 = arith.constant 0 : i32
    %c0_i32_0 = arith.constant 0 : i32
    %c0_i32_1 = arith.constant 0 : i32
    return %c0_i32, %c0_i32_0 : i32, i32
  }
  func.func @transform_3(%arg0: i32) -> (i32, i32, i32) {
    %c0_i32 = arith.constant 0 : i32
    %c0_i32_0 = arith.constant 0 : i32
    %c0_i32_1 = arith.constant 0 : i32
    %c0_i32_2 = arith.constant 0 : i32
    return %c0_i32, %c0_i32_0, %c0_i32_1 : i32, i32, i32
  }
  func.func @transform_4(%arg0: i32) -> (i32, i32) {
    %c0_i32 = arith.constant 0 : i32
    %c0_i32_0 = arith.constant 0 : i32
    %c0_i32_1 = arith.constant 0 : i32
    return %c0_i32, %c0_i32_0 : i32, i32
  }
  func.func @transform_5(%arg0: i32) -> (i32, i32, i32) {
    %c0_i32 = arith.constant 0 : i32
    %c0_i32_0 = arith.constant 0 : i32
    %c0_i32_1 = arith.constant 0 : i32
    return %arg0, %c0_i32, %c0_i32_0 : i32, i32, i32
  }
}

module attributes {stable_mosaic.version = 11 : i64} {
  func.func @_crop_res_block_kernel(%arg0: i32, %arg1: memref<1x16x128xf32, #tpu.memory_space<vmem>>, %arg2: memref<3x128x112xf32, #tpu.memory_space<vmem>>, %arg3: memref<1x112xf32, #tpu.memory_space<vmem>>, %arg4: memref<3x112x96xf32, #tpu.memory_space<vmem>>, %arg5: memref<1x96xf32, #tpu.memory_space<vmem>>, %arg6: memref<1x12x96xf32, #tpu.memory_space<vmem>>) attributes {dimension_semantics = [#tpu.dimension_semantics<parallel>], iteration_bounds = array<i64: 2>, scalar_prefetch = 0 : i64, scratch_operands = 0 : i64, tpu.core_type = #tpu.core_type<tc>, window_params = [{transform_indices = @transform_0, window_bounds = array<i64: 1, 16, 128>}, {pipeline_mode = #tpu.pipeline_mode<synchronous>, transform_indices = @transform_1, window_bounds = array<i64: 3, 128, 112>}, {pipeline_mode = #tpu.pipeline_mode<synchronous>, transform_indices = @transform_2, window_bounds = array<i64: 1, 112>}, {pipeline_mode = #tpu.pipeline_mode<synchronous>, transform_indices = @transform_3, window_bounds = array<i64: 3, 112, 96>}, {pipeline_mode = #tpu.pipeline_mode<synchronous>, transform_indices = @transform_4, window_bounds = array<i64: 1, 96>}, {transform_indices = @transform_5, window_bounds = array<i64: 1, 12, 96>}]} {
    %c0 = arith.constant 0 : index
    %c0_0 = arith.constant 0 : index
    %c0_1 = arith.constant 0 : index
    %0 = vector.load %arg1[%c0, %c0_0, %c0_1] : memref<1x16x128xf32, #tpu.memory_space<vmem>>, vector<1x16x128xf32>
    %1 = vector.shape_cast %0 : vector<1x16x128xf32> to vector<16x128xf32>
    %c0_2 = arith.constant 0 : index
    %c0_3 = arith.constant 0 : index
    %2 = vector.load %arg3[%c0_2, %c0_3] : memref<1x112xf32, #tpu.memory_space<vmem>>, vector<1x112xf32>
    %3 = vector.shape_cast %2 : vector<1x112xf32> to vector<1x112xf32>
    %4 = vector.broadcast %3 : vector<1x112xf32> to vector<14x112xf32>
    %5 = vector.extract_strided_slice %1 {offsets = [0, 0], sizes = [14, 128], strides = [1, 1]} : vector<16x128xf32> to vector<14x128xf32>
    %c0_4 = arith.constant 0 : index
    %c0_5 = arith.constant 0 : index
    %c0_6 = arith.constant 0 : index
    %6 = vector.load %arg2[%c0_4, %c0_5, %c0_6] : memref<3x128x112xf32, #tpu.memory_space<vmem>>, vector<1x128x112xf32>
    %7 = vector.shape_cast %6 : vector<1x128x112xf32> to vector<128x112xf32>
    %cst = arith.constant dense<0.000000e+00> : vector<14x112xf32>
    %8 = tpu.matmul %5, %7, %cst {dimension_numbers = #tpu.dot_dimension_numbers<[1], [0], [0], [1], [0, 0, 1, 1], [], []>} : vector<14x128xf32>, vector<128x112xf32>, vector<14x112xf32> -> vector<14x112xf32>
    %9 = arith.addf %4, %8 : vector<14x112xf32>
    %10 = vector.extract_strided_slice %1 {offsets = [1, 0], sizes = [14, 128], strides = [1, 1]} : vector<16x128xf32> to vector<14x128xf32>
    %c1 = arith.constant 1 : index
    %c0_7 = arith.constant 0 : index
    %c0_8 = arith.constant 0 : index
    %11 = vector.load %arg2[%c1, %c0_7, %c0_8] : memref<3x128x112xf32, #tpu.memory_space<vmem>>, vector<1x128x112xf32>
    %12 = vector.shape_cast %11 : vector<1x128x112xf32> to vector<128x112xf32>
    %cst_9 = arith.constant dense<0.000000e+00> : vector<14x112xf32>
    %13 = tpu.matmul %10, %12, %cst_9 {dimension_numbers = #tpu.dot_dimension_numbers<[1], [0], [0], [1], [0, 0, 1, 1], [], []>} : vector<14x128xf32>, vector<128x112xf32>, vector<14x112xf32> -> vector<14x112xf32>
    %14 = arith.addf %9, %13 : vector<14x112xf32>
    %15 = vector.extract_strided_slice %1 {offsets = [2, 0], sizes = [14, 128], strides = [1, 1]} : vector<16x128xf32> to vector<14x128xf32>
    %c2 = arith.constant 2 : index
    %c0_10 = arith.constant 0 : index
    %c0_11 = arith.constant 0 : index
    %16 = vector.load %arg2[%c2, %c0_10, %c0_11] : memref<3x128x112xf32, #tpu.memory_space<vmem>>, vector<1x128x112xf32>
    %17 = vector.shape_cast %16 : vector<1x128x112xf32> to vector<128x112xf32>
    %cst_12 = arith.constant dense<0.000000e+00> : vector<14x112xf32>
    %18 = tpu.matmul %15, %17, %cst_12 {dimension_numbers = #tpu.dot_dimension_numbers<[1], [0], [0], [1], [0, 0, 1, 1], [], []>} : vector<14x128xf32>, vector<128x112xf32>, vector<14x112xf32> -> vector<14x112xf32>
    %19 = arith.addf %14, %18 : vector<14x112xf32>
    %cst_13 = arith.constant 0.000000e+00 : f32
    %20 = vector.broadcast %cst_13 : f32 to vector<14x112xf32>
    %21 = arith.maximumf %19, %20 : vector<14x112xf32>
    %c0_14 = arith.constant 0 : index
    %c0_15 = arith.constant 0 : index
    %22 = vector.load %arg5[%c0_14, %c0_15] : memref<1x96xf32, #tpu.memory_space<vmem>>, vector<1x96xf32>
    %23 = vector.shape_cast %22 : vector<1x96xf32> to vector<1x96xf32>
    %24 = vector.broadcast %23 : vector<1x96xf32> to vector<12x96xf32>
    %25 = vector.extract_strided_slice %21 {offsets = [0, 0], sizes = [12, 112], strides = [1, 1]} : vector<14x112xf32> to vector<12x112xf32>
    %c0_16 = arith.constant 0 : index
    %c0_17 = arith.constant 0 : index
    %c0_18 = arith.constant 0 : index
    %26 = vector.load %arg4[%c0_16, %c0_17, %c0_18] : memref<3x112x96xf32, #tpu.memory_space<vmem>>, vector<1x112x96xf32>
    %27 = vector.shape_cast %26 : vector<1x112x96xf32> to vector<112x96xf32>
    %cst_19 = arith.constant dense<0.000000e+00> : vector<12x96xf32>
    %28 = tpu.matmul %25, %27, %cst_19 {dimension_numbers = #tpu.dot_dimension_numbers<[1], [0], [0], [1], [0, 0, 1, 1], [], []>} : vector<12x112xf32>, vector<112x96xf32>, vector<12x96xf32> -> vector<12x96xf32>
    %29 = arith.addf %24, %28 : vector<12x96xf32>
    %30 = vector.extract_strided_slice %21 {offsets = [1, 0], sizes = [12, 112], strides = [1, 1]} : vector<14x112xf32> to vector<12x112xf32>
    %c1_20 = arith.constant 1 : index
    %c0_21 = arith.constant 0 : index
    %c0_22 = arith.constant 0 : index
    %31 = vector.load %arg4[%c1_20, %c0_21, %c0_22] : memref<3x112x96xf32, #tpu.memory_space<vmem>>, vector<1x112x96xf32>
    %32 = vector.shape_cast %31 : vector<1x112x96xf32> to vector<112x96xf32>
    %cst_23 = arith.constant dense<0.000000e+00> : vector<12x96xf32>
    %33 = tpu.matmul %30, %32, %cst_23 {dimension_numbers = #tpu.dot_dimension_numbers<[1], [0], [0], [1], [0, 0, 1, 1], [], []>} : vector<12x112xf32>, vector<112x96xf32>, vector<12x96xf32> -> vector<12x96xf32>
    %34 = arith.addf %29, %33 : vector<12x96xf32>
    %35 = vector.extract_strided_slice %21 {offsets = [2, 0], sizes = [12, 112], strides = [1, 1]} : vector<14x112xf32> to vector<12x112xf32>
    %c2_24 = arith.constant 2 : index
    %c0_25 = arith.constant 0 : index
    %c0_26 = arith.constant 0 : index
    %36 = vector.load %arg4[%c2_24, %c0_25, %c0_26] : memref<3x112x96xf32, #tpu.memory_space<vmem>>, vector<1x112x96xf32>
    %37 = vector.shape_cast %36 : vector<1x112x96xf32> to vector<112x96xf32>
    %cst_27 = arith.constant dense<0.000000e+00> : vector<12x96xf32>
    %38 = tpu.matmul %35, %37, %cst_27 {dimension_numbers = #tpu.dot_dimension_numbers<[1], [0], [0], [1], [0, 0, 1, 1], [], []>} : vector<12x112xf32>, vector<112x96xf32>, vector<12x96xf32> -> vector<12x96xf32>
    %39 = arith.addf %34, %38 : vector<12x96xf32>
    %40 = vector.extract_strided_slice %1 {offsets = [2, 16], sizes = [12, 96], strides = [1, 1]} : vector<16x128xf32> to vector<12x96xf32>
    %41 = arith.addf %39, %40 : vector<12x96xf32>
    %cst_28 = arith.constant 0.000000e+00 : f32
    %42 = vector.broadcast %cst_28 : f32 to vector<12x96xf32>
    %43 = arith.maximumf %41, %42 : vector<12x96xf32>
    %c0_29 = arith.constant 0 : index
    %c0_30 = arith.constant 0 : index
    %c0_31 = arith.constant 0 : index
    %44 = vector.load %arg6[%c0_29, %c0_30, %c0_31] : memref<1x12x96xf32, #tpu.memory_space<vmem>>, vector<1x12x96xf32>
    %45 = vector.shape_cast %44 : vector<1x12x96xf32> to vector<12x96xf32>
    %46 = vector.shape_cast %43 : vector<12x96xf32> to vector<1x12x96xf32>
    tpu.vector_store %arg6[%c0_29, %c0_30, %c0_31], %46 {strides = array<i32>} : memref<1x12x96xf32, #tpu.memory_space<vmem>>, vector<1x12x96xf32>,
    return
  }
  func.func @transform_0(%arg0: i32) -> (i32, i32, i32) {
    %c0_i32 = arith.constant 0 : i32
    %c0_i32_0 = arith.constant 0 : i32
    %c0_i32_1 = arith.constant 0 : i32
    return %arg0, %c0_i32, %c0_i32_0 : i32, i32, i32
  }
  func.func @transform_1(%arg0: i32) -> (i32, i32, i32) {
    %c0_i32 = arith.constant 0 : i32
    %c0_i32_0 = arith.constant 0 : i32
    %c0_i32_1 = arith.constant 0 : i32
    %c0_i32_2 = arith.constant 0 : i32
    return %c0_i32, %c0_i32_0, %c0_i32_1 : i32, i32, i32
  }
  func.func @transform_2(%arg0: i32) -> (i32, i32) {
    %c0_i32 = arith.constant 0 : i32
    %c0_i32_0 = arith.constant 0 : i32
    %c0_i32_1 = arith.constant 0 : i32
    return %c0_i32, %c0_i32_0 : i32, i32
  }
  func.func @transform_3(%arg0: i32) -> (i32, i32, i32) {
    %c0_i32 = arith.constant 0 : i32
    %c0_i32_0 = arith.constant 0 : i32
    %c0_i32_1 = arith.constant 0 : i32
    %c0_i32_2 = arith.constant 0 : i32
    return %c0_i32, %c0_i32_0, %c0_i32_1 : i32, i32, i32
  }
  func.func @transform_4(%arg0: i32) -> (i32, i32) {
    %c0_i32 = arith.constant 0 : i32
    %c0_i32_0 = arith.constant 0 : i32
    %c0_i32_1 = arith.constant 0 : i32
    return %c0_i32, %c0_i32_0 : i32, i32
  }
  func.func @transform_5(%arg0: i32) -> (i32, i32, i32) {
    %c0_i32 = arith.constant 0 : i32
    %c0_i32_0 = arith.constant 0 : i32
    %c0_i32_1 = arith.constant 0 : i32
    return %arg0, %c0_i32, %c0_i32_0 : i32, i32, i32
  }
}

module attributes {stable_mosaic.version = 11 : i64} {
  func.func @_crop_res_block_kernel(%arg0: i32, %arg1: memref<1x12x96xf32, #tpu.memory_space<vmem>>, %arg2: memref<3x96x80xf32, #tpu.memory_space<vmem>>, %arg3: memref<1x80xf32, #tpu.memory_space<vmem>>, %arg4: memref<3x80x64xf32, #tpu.memory_space<vmem>>, %arg5: memref<1x64xf32, #tpu.memory_space<vmem>>, %arg6: memref<1x8x64xf32, #tpu.memory_space<vmem>>) attributes {dimension_semantics = [#tpu.dimension_semantics<parallel>], iteration_bounds = array<i64: 2>, scalar_prefetch = 0 : i64, scratch_operands = 0 : i64, tpu.core_type = #tpu.core_type<tc>, window_params = [{transform_indices = @transform_0, window_bounds = array<i64: 1, 12, 96>}, {pipeline_mode = #tpu.pipeline_mode<synchronous>, transform_indices = @transform_1, window_bounds = array<i64: 3, 96, 80>}, {pipeline_mode = #tpu.pipeline_mode<synchronous>, transform_indices = @transform_2, window_bounds = array<i64: 1, 80>}, {pipeline_mode = #tpu.pipeline_mode<synchronous>, transform_indices = @transform_3, window_bounds = array<i64: 3, 80, 64>}, {pipeline_mode = #tpu.pipeline_mode<synchronous>, transform_indices = @transform_4, window_bounds = array<i64: 1, 64>}, {transform_indices = @transform_5, window_bounds = array<i64: 1, 8, 64>}]} {
    %c0 = arith.constant 0 : index
    %c0_0 = arith.constant 0 : index
    %c0_1 = arith.constant 0 : index
    %0 = vector.load %arg1[%c0, %c0_0, %c0_1] : memref<1x12x96xf32, #tpu.memory_space<vmem>>, vector<1x12x96xf32>
    %1 = vector.shape_cast %0 : vector<1x12x96xf32> to vector<12x96xf32>
    %c0_2 = arith.constant 0 : index
    %c0_3 = arith.constant 0 : index
    %2 = vector.load %arg3[%c0_2, %c0_3] : memref<1x80xf32, #tpu.memory_space<vmem>>, vector<1x80xf32>
    %3 = vector.shape_cast %2 : vector<1x80xf32> to vector<1x80xf32>
    %4 = vector.broadcast %3 : vector<1x80xf32> to vector<10x80xf32>
    %5 = vector.extract_strided_slice %1 {offsets = [0, 0], sizes = [10, 96], strides = [1, 1]} : vector<12x96xf32> to vector<10x96xf32>
    %c0_4 = arith.constant 0 : index
    %c0_5 = arith.constant 0 : index
    %c0_6 = arith.constant 0 : index
    %6 = vector.load %arg2[%c0_4, %c0_5, %c0_6] : memref<3x96x80xf32, #tpu.memory_space<vmem>>, vector<1x96x80xf32>
    %7 = vector.shape_cast %6 : vector<1x96x80xf32> to vector<96x80xf32>
    %cst = arith.constant dense<0.000000e+00> : vector<10x80xf32>
    %8 = tpu.matmul %5, %7, %cst {dimension_numbers = #tpu.dot_dimension_numbers<[1], [0], [0], [1], [0, 0, 1, 1], [], []>} : vector<10x96xf32>, vector<96x80xf32>, vector<10x80xf32> -> vector<10x80xf32>
    %9 = arith.addf %4, %8 : vector<10x80xf32>
    %10 = vector.extract_strided_slice %1 {offsets = [1, 0], sizes = [10, 96], strides = [1, 1]} : vector<12x96xf32> to vector<10x96xf32>
    %c1 = arith.constant 1 : index
    %c0_7 = arith.constant 0 : index
    %c0_8 = arith.constant 0 : index
    %11 = vector.load %arg2[%c1, %c0_7, %c0_8] : memref<3x96x80xf32, #tpu.memory_space<vmem>>, vector<1x96x80xf32>
    %12 = vector.shape_cast %11 : vector<1x96x80xf32> to vector<96x80xf32>
    %cst_9 = arith.constant dense<0.000000e+00> : vector<10x80xf32>
    %13 = tpu.matmul %10, %12, %cst_9 {dimension_numbers = #tpu.dot_dimension_numbers<[1], [0], [0], [1], [0, 0, 1, 1], [], []>} : vector<10x96xf32>, vector<96x80xf32>, vector<10x80xf32> -> vector<10x80xf32>
    %14 = arith.addf %9, %13 : vector<10x80xf32>
    %15 = vector.extract_strided_slice %1 {offsets = [2, 0], sizes = [10, 96], strides = [1, 1]} : vector<12x96xf32> to vector<10x96xf32>
    %c2 = arith.constant 2 : index
    %c0_10 = arith.constant 0 : index
    %c0_11 = arith.constant 0 : index
    %16 = vector.load %arg2[%c2, %c0_10, %c0_11] : memref<3x96x80xf32, #tpu.memory_space<vmem>>, vector<1x96x80xf32>
    %17 = vector.shape_cast %16 : vector<1x96x80xf32> to vector<96x80xf32>
    %cst_12 = arith.constant dense<0.000000e+00> : vector<10x80xf32>
    %18 = tpu.matmul %15, %17, %cst_12 {dimension_numbers = #tpu.dot_dimension_numbers<[1], [0], [0], [1], [0, 0, 1, 1], [], []>} : vector<10x96xf32>, vector<96x80xf32>, vector<10x80xf32> -> vector<10x80xf32>
    %19 = arith.addf %14, %18 : vector<10x80xf32>
    %cst_13 = arith.constant 0.000000e+00 : f32
    %20 = vector.broadcast %cst_13 : f32 to vector<10x80xf32>
    %21 = arith.maximumf %19, %20 : vector<10x80xf32>
    %c0_14 = arith.constant 0 : index
    %c0_15 = arith.constant 0 : index
    %22 = vector.load %arg5[%c0_14, %c0_15] : memref<1x64xf32, #tpu.memory_space<vmem>>, vector<1x64xf32>
    %23 = vector.shape_cast %22 : vector<1x64xf32> to vector<1x64xf32>
    %24 = vector.broadcast %23 : vector<1x64xf32> to vector<8x64xf32>
    %25 = vector.extract_strided_slice %21 {offsets = [0, 0], sizes = [8, 80], strides = [1, 1]} : vector<10x80xf32> to vector<8x80xf32>
    %c0_16 = arith.constant 0 : index
    %c0_17 = arith.constant 0 : index
    %c0_18 = arith.constant 0 : index
    %26 = vector.load %arg4[%c0_16, %c0_17, %c0_18] : memref<3x80x64xf32, #tpu.memory_space<vmem>>, vector<1x80x64xf32>
    %27 = vector.shape_cast %26 : vector<1x80x64xf32> to vector<80x64xf32>
    %cst_19 = arith.constant dense<0.000000e+00> : vector<8x64xf32>
    %28 = tpu.matmul %25, %27, %cst_19 {dimension_numbers = #tpu.dot_dimension_numbers<[1], [0], [0], [1], [0, 0, 1, 1], [], []>} : vector<8x80xf32>, vector<80x64xf32>, vector<8x64xf32> -> vector<8x64xf32>
    %29 = arith.addf %24, %28 : vector<8x64xf32>
    %30 = vector.extract_strided_slice %21 {offsets = [1, 0], sizes = [8, 80], strides = [1, 1]} : vector<10x80xf32> to vector<8x80xf32>
    %c1_20 = arith.constant 1 : index
    %c0_21 = arith.constant 0 : index
    %c0_22 = arith.constant 0 : index
    %31 = vector.load %arg4[%c1_20, %c0_21, %c0_22] : memref<3x80x64xf32, #tpu.memory_space<vmem>>, vector<1x80x64xf32>
    %32 = vector.shape_cast %31 : vector<1x80x64xf32> to vector<80x64xf32>
    %cst_23 = arith.constant dense<0.000000e+00> : vector<8x64xf32>
    %33 = tpu.matmul %30, %32, %cst_23 {dimension_numbers = #tpu.dot_dimension_numbers<[1], [0], [0], [1], [0, 0, 1, 1], [], []>} : vector<8x80xf32>, vector<80x64xf32>, vector<8x64xf32> -> vector<8x64xf32>
    %34 = arith.addf %29, %33 : vector<8x64xf32>
    %35 = vector.extract_strided_slice %21 {offsets = [2, 0], sizes = [8, 80], strides = [1, 1]} : vector<10x80xf32> to vector<8x80xf32>
    %c2_24 = arith.constant 2 : index
    %c0_25 = arith.constant 0 : index
    %c0_26 = arith.constant 0 : index
    %36 = vector.load %arg4[%c2_24, %c0_25, %c0_26] : memref<3x80x64xf32, #tpu.memory_space<vmem>>, vector<1x80x64xf32>
    %37 = vector.shape_cast %36 : vector<1x80x64xf32> to vector<80x64xf32>
    %cst_27 = arith.constant dense<0.000000e+00> : vector<8x64xf32>
    %38 = tpu.matmul %35, %37, %cst_27 {dimension_numbers = #tpu.dot_dimension_numbers<[1], [0], [0], [1], [0, 0, 1, 1], [], []>} : vector<8x80xf32>, vector<80x64xf32>, vector<8x64xf32> -> vector<8x64xf32>
    %39 = arith.addf %34, %38 : vector<8x64xf32>
    %40 = vector.extract_strided_slice %1 {offsets = [2, 16], sizes = [8, 64], strides = [1, 1]} : vector<12x96xf32> to vector<8x64xf32>
    %41 = arith.addf %39, %40 : vector<8x64xf32>
    %cst_28 = arith.constant 0.000000e+00 : f32
    %42 = vector.broadcast %cst_28 : f32 to vector<8x64xf32>
    %43 = arith.maximumf %41, %42 : vector<8x64xf32>
    %c0_29 = arith.constant 0 : index
    %c0_30 = arith.constant 0 : index
    %c0_31 = arith.constant 0 : index
    %44 = vector.load %arg6[%c0_29, %c0_30, %c0_31] : memref<1x8x64xf32, #tpu.memory_space<vmem>>, vector<1x8x64xf32>
    %45 = vector.shape_cast %44 : vector<1x8x64xf32> to vector<8x64xf32>
    %46 = vector.shape_cast %43 : vector<8x64xf32> to vector<1x8x64xf32>
    tpu.vector_store %arg6[%c0_29, %c0_30, %c0_31], %46 {strides = array<i32>} : memref<1x8x64xf32, #tpu.memory_space<vmem>>, vector<1x8x64xf32>,
    return
  }
  func.func @transform_0(%arg0: i32) -> (i32, i32, i32) {
    %c0_i32 = arith.constant 0 : i32
    %c0_i32_0 = arith.constant 0 : i32
    %c0_i32_1 = arith.constant 0 : i32
    return %arg0, %c0_i32, %c0_i32_0 : i32, i32, i32
  }
  func.func @transform_1(%arg0: i32) -> (i32, i32, i32) {
    %c0_i32 = arith.constant 0 : i32
    %c0_i32_0 = arith.constant 0 : i32
    %c0_i32_1 = arith.constant 0 : i32
    %c0_i32_2 = arith.constant 0 : i32
    return %c0_i32, %c0_i32_0, %c0_i32_1 : i32, i32, i32
  }
  func.func @transform_2(%arg0: i32) -> (i32, i32) {
    %c0_i32 = arith.constant 0 : i32
    %c0_i32_0 = arith.constant 0 : i32
    %c0_i32_1 = arith.constant 0 : i32
    return %c0_i32, %c0_i32_0 : i32, i32
  }
  func.func @transform_3(%arg0: i32) -> (i32, i32, i32) {
    %c0_i32 = arith.constant 0 : i32
    %c0_i32_0 = arith.constant 0 : i32
    %c0_i32_1 = arith.constant 0 : i32
    %c0_i32_2 = arith.constant 0 : i32
    return %c0_i32, %c0_i32_0, %c0_i32_1 : i32, i32, i32
  }
  func.func @transform_4(%arg0: i32) -> (i32, i32) {
    %c0_i32 = arith.constant 0 : i32
    %c0_i32_0 = arith.constant 0 : i32
    %c0_i32_1 = arith.constant 0 : i32
    return %c0_i32, %c0_i32_0 : i32, i32
  }
  func.func @transform_5(%arg0: i32) -> (i32, i32, i32) {
    %c0_i32 = arith.constant 0 : i32
    %c0_i32_0 = arith.constant 0 : i32
    %c0_i32_1 = arith.constant 0 : i32
    return %arg0, %c0_i32, %c0_i32_0 : i32, i32, i32
  }
}

module attributes {stable_mosaic.version = 11 : i64} {
  func.func @_pool_fc_kernel(%arg0: i32, %arg1: memref<2x8x8x8xf32, #tpu.memory_space<vmem>>, %arg2: memref<1x8xf32, #tpu.memory_space<vmem>>, %arg3: memref<1x1xf32, #tpu.memory_space<vmem>>, %arg4: memref<2x1xf32, #tpu.memory_space<vmem>>) attributes {dimension_semantics = [#tpu.dimension_semantics<arbitrary>], iteration_bounds = array<i64: 1>, scalar_prefetch = 0 : i64, scratch_operands = 0 : i64, tpu.core_type = #tpu.core_type<tc>, window_params = [{pipeline_mode = #tpu.pipeline_mode<synchronous>, transform_indices = @transform_0, window_bounds = array<i64: 2, 8, 8, 8>}, {pipeline_mode = #tpu.pipeline_mode<synchronous>, transform_indices = @transform_1, window_bounds = array<i64: 1, 8>}, {pipeline_mode = #tpu.pipeline_mode<synchronous>, transform_indices = @transform_2, window_bounds = array<i64: 1, 1>}, {pipeline_mode = #tpu.pipeline_mode<synchronous>, transform_indices = @transform_3, window_bounds = array<i64: 2, 1>}]} {
    %c0 = arith.constant 0 : index
    %c0_0 = arith.constant 0 : index
    %c0_1 = arith.constant 0 : index
    %c0_2 = arith.constant 0 : index
    %0 = vector.load %arg1[%c0, %c0_0, %c0_1, %c0_2] : memref<2x8x8x8xf32, #tpu.memory_space<vmem>>, vector<2x8x8x8xf32>
    %cst = arith.constant dense<0.000000e+00> : vector<2x8xf32>
    %1 = vector.multi_reduction <add>, %0, %cst [1, 2] : vector<2x8x8x8xf32> to vector<2x8xf32>
    %cst_3 = arith.constant 6.400000e+01 : f32
    %2 = vector.broadcast %cst_3 : f32 to vector<2x8xf32>
    %3 = arith.divf %1, %2 : vector<2x8xf32>
    %c0_4 = arith.constant 0 : index
    %c0_5 = arith.constant 0 : index
    %4 = vector.load %arg2[%c0_4, %c0_5] : memref<1x8xf32, #tpu.memory_space<vmem>>, vector<1x8xf32>
    %5 = vector.broadcast %4 : vector<1x8xf32> to vector<2x8xf32>
    %6 = arith.mulf %3, %5 : vector<2x8xf32>
    %cst_6 = arith.constant dense<0.000000e+00> : vector<2xf32>
    %7 = vector.multi_reduction <add>, %6, %cst_6 [1] : vector<2x8xf32> to vector<2xf32>
    %8 = vector.shape_cast %7 : vector<2xf32> to vector<2x1xf32>
    %c0_7 = arith.constant 0 : index
    %c0_8 = arith.constant 0 : index
    %9 = vector.load %arg3[%c0_7, %c0_8] : memref<1x1xf32, #tpu.memory_space<vmem>>, vector<1x1xf32>
    %10 = vector.broadcast %9 : vector<1x1xf32> to vector<2x1xf32>
    %11 = arith.addf %8, %10 : vector<2x1xf32>
    %c0_9 = arith.constant 0 : index
    %c0_10 = arith.constant 0 : index
    %12 = vector.load %arg4[%c0_9, %c0_10] : memref<2x1xf32, #tpu.memory_space<vmem>>, vector<2x1xf32>
    tpu.vector_store %arg4[%c0_9, %c0_10], %11 {strides = array<i32>} : memref<2x1xf32, #tpu.memory_space<vmem>>, vector<2x1xf32>,
    return
  }
  func.func @transform_0(%arg0: i32) -> (i32, i32, i32, i32) {
    %c0_i32 = arith.constant 0 : i32
    %c0_i32_0 = arith.constant 0 : i32
    %c0_i32_1 = arith.constant 0 : i32
    %c0_i32_2 = arith.constant 0 : i32
    %c0_i32_3 = arith.constant 0 : i32
    return %c0_i32, %c0_i32_0, %c0_i32_1, %c0_i32_2 : i32, i32, i32, i32
  }
  func.func @transform_1(%arg0: i32) -> (i32, i32) {
    %c0_i32 = arith.constant 0 : i32
    %c0_i32_0 = arith.constant 0 : i32
    %c0_i32_1 = arith.constant 0 : i32
    return %c0_i32, %c0_i32_0 : i32, i32
  }
  func.func @transform_2(%arg0: i32) -> (i32, i32) {
    %c0_i32 = arith.constant 0 : i32
    %c0_i32_0 = arith.constant 0 : i32
    %c0_i32_1 = arith.constant 0 : i32
    return %c0_i32, %c0_i32_0 : i32, i32
  }
  func.func @transform_3(%arg0: i32) -> (i32, i32) {
    %c0_i32 = arith.constant 0 : i32
    %c0_i32_0 = arith.constant 0 : i32
    %c0_i32_1 = arith.constant 0 : i32
    return %c0_i32, %c0_i32_0 : i32, i32
  }
}

</mosaic_0001>

<bundles_post_ra>
// kernel: crop_resnet_pool_forward.10
= control target key start
LH: loop header
LB: loop body
LE: loop exit
PB: predicated region body
PF: predicated region fallthrough
CT: control target
= control target key end

     0   :  { %s1487_s18 = smov 0   ;;  %s2344_s0 = inlined_call_operand.vmem [shape: f32[2,36,144], index: 0, kind: input, shape index: {}]   ;;  %s2345_s1 = inlined_call_operand.vmem [shape: f32[3,144,136], index: 1, kind: input, shape index: {}]   ;;  %s2346_s2 = inlined_call_operand.vmem [shape: f32[1,136], index: 2, kind: input, shape index: {}]   ;;  %s2347_s3 = inlined_call_operand.vmem [shape: f32[3,136,128], index: 3, kind: input, shape index: {}]   ;;  %s2348_s4 = inlined_call_operand.vmem [shape: f32[1,128], index: 4, kind: input, shape index: {}]   ;;  %s2349_s5 = inlined_call_operand.vmem [shape: f32[2,32,128], index: 5, kind: output, shape index: {}]  }
   0x1 LB: > { %s1278_s19 = sadd.s32 4294967295, %s1454_s18   ;;  %p1282_p0 = scmp.ge.s32.totalorder %s1454_s18, 1  ;;  %s1454_s18 = sphi %s1487_s18, %s15_s18  }
   0x2   : > { %p187_p1 = scmp.lt.s32.totalorder %s1454_s18, 3 }
   0x4   : > { %p188_p2 = pnand %p1282_p0, %p187_p1 }
   0x5   : > { %p215_p3 = scmp.lt.s32.totalorder (!%p188_p2), %s1278_s19, 1 }
   0x6   : > { %191 = sbr.rel (%p188_p2) target bundleno = 458 (0x1ca), region = 40 }
   0xb   : > { %v272_v0 = vld [vmem:[%s2345_s1 + $0xf8] sm:$0xff]  ;;  %v270_v1 = vld [vmem:[%s2345_s1 + $0xe8] sm:$0xff]  ;;  %v271_v3 = vld [vmem:[%s2345_s1 + $0xf0] sm:$0xff]  ;;  %s2351_s19 = smov (!%p215_p3, %s1278_s19), 1  ;;  %vm277_vm0 = vcmask 130048   ;;  %vm473_vm1 = vcmask 1046528  }
   0xc   : > { %357 = vmatpush.msra.mxu2 %v272_v0  ;;  %v276_v2 = vld [vmem:[%s2345_s1 + $0x118] sm:$0xff]  ;;  %293 = vmatpush.msra.mxu0 %v271_v3  ;;  %v274_v5 = vld [vmem:[%s2345_s1 + $0x108] sm:$0xff]  ;;  %v269_v6 = vld [vmem:[%s2345_s1 + $0xe0] sm:$0xff]  ;;  %s1437_s15 = smul.u32 80, %s2351_s19  ;;  %vm682_vm2 = vcmask 1045504   ;;  %vm885_vm3 = vcmask 64512  }
   0xd   : > { %v268_v4 = vld [vmem:[%s2345_s1 + $0xd8] sm:$0xff]  ;;  %403 = vmatpush.msra.mxu3 %v276_v2  ;;  %v267_v7 = vld [vmem:[%s2345_s1 + $0xd0] sm:$0xff]  ;;  %v266_v9 = vld [vmem:[%s2345_s1 + $0xc8] sm:$0xff]  ;;  %vm1202_vm4 = vcmask 982016   ;;  %s1436_s7 = sshll.u32 %s2351_s19, 5 }
   0xe   : > { %358 = vmatpush.msra.mxu2 %v270_v1  ;;  %v275_v8 = vld [vmem:[%s2345_s1 + $0x110] sm:$0xff]  ;;  %294 = vmatpush.msra.mxu0 %v269_v6  ;;  %v273_v10 = vld [vmem:[%s2345_s1 + $0x100] sm:$0xff]  ;;  %s1537_s24 = scalar_lea.vmem %s2344_s0, %s1437_s15  ;;  %v264_v12 = vld [vmem:[%s2345_s1 + $0xb8] sm:$0xff]  ;;  %s1456_s15 = smov 120  }
   0xf   : > { %404 = vmatpush.msra.mxu3 %v274_v5  ;;  %339 = vmatpush.msra.mxu1 %v275_v8  ;;  %v265_v11 = vld [vmem:[%s2345_s1 + $0xc0] sm:$0xff]  ;;  %v1543_v13 = vld [vmem:[%s1537_s24 + $0x8] sm:$0xff]  ;;  %v263_v14 = vld [vmem:[%s2345_s1 + $0xb0] sm:$0xff]  ;;  %s2332_s9 = scalar_lea.vmem %s2349_s5, %s1436_s7 }
  0x10   : > { %359 = vmatpush.msra.mxu2 %v268_v4  ;;  %295 = vmatpush.msra.mxu0 %v267_v7  ;;  %v262_v15 = vld [vmem:[%s2345_s1 + $0xa8] sm:$0xff]  ;;  %v261_v16 = vld [vmem:[%s2345_s1 + $0xa0] sm:$0xff]  ;;  %v1326_v17 = vld [vmem:[%s2345_s1 + $0x210] sm:$0xff]  ;;  %v477_v2 = vrot.slane %v1543_v13, 1 }
  0x11   : > { %340 = vmatpush.msra.mxu1 %v273_v10  ;;  %1291 = vmatmul.msk.f32.vlgmr.msra.gmra.mxu3 %vm277_vm0, %v1543_v13  ;;  %v260_v18 = vld [vmem:[%s2345_s1 + $0x98] sm:$0xff]  ;;  %v1324_v19 = vld [vmem:[%s2345_s1 + $0x200] sm:$0xff]  ;;  %v259_v20 = vld [vmem:[%s2345_s1 + $0x90] sm:$0xff] }
  0x12   : > { %360 = vmatpush.msra.mxu2 %v266_v9  ;;  %296 = vmatpush.msra.mxu0 %v265_v11  ;;  %v1322_v21 = vld [vmem:[%s2345_s1 + $0x1f0] sm:$0xff]  ;;  %v258_v22 = vld [vmem:[%s2345_s1 + $0x88] sm:$0xff]  ;;  %v1577_v23 = vld [vmem:[%s1537_s24 + $0x18] sm:$0xff] }
  0x13   : > { %1286 = vmatmul.msk.f32.vlgmr.msra.gmra.mxu1 %vm277_vm0, %v1543_v13  ;;  %v257_v24 = vld [vmem:[%s2345_s1 + $0x80] sm:$0xff]  ;;  %v256_v25 = vld [vmem:[%s2345_s1 + $0x78] sm:$0xff]  ;;  %v255_v26 = vld [vmem:[%s2345_s1 + $0x70] sm:$0xff]  ;;  %v478_v3 = vrot.slane %v1577_v23, 1 }
  0x14   : > { %361 = vmatpush.msra.mxu2 %v264_v12  ;;  %297 = vmatpush.msra.mxu0 %v263_v14  ;;  %v1320_v27 = vld [vmem:[%s2345_s1 + $0x1e0] sm:$0xff]  ;;  %v254_v28 = vld [vmem:[%s2345_s1 + $0x68] sm:$0xff]  ;;  %v1318_v30 = vld [vmem:[%s2345_s1 + $0x1d0] sm:$0xff] }
  0x15   : > { %507 = vmatpush.msrb.mxu1 %v1326_v17  ;;  %v253_v29 = vld [vmem:[%s2345_s1 + $0x60] sm:$0xff]  ;;  %v1330_v31 = vld [vmem:[%s2345_s1 + $0x230] sm:$0xff]  ;;  %v252_v32 = vld [vmem:[%s2345_s1 + $0x58] sm:$0xff]  ;;  %v1751_v14 = vsel %vm473_vm1, %v477_v2, %v478_v3 }
  0x16   : > { %362 = vmatpush.msra.mxu2 %v262_v15  ;;  %298 = vmatpush.msra.mxu0 %v261_v16  ;;  %v251_v33 = vld [vmem:[%s2345_s1 + $0x50] sm:$0xff]  ;;  %v1316_v34 = vld [vmem:[%s2345_s1 + $0x1c0] sm:$0xff]  ;;  %v250_v35 = vld [vmem:[%s2345_s1 + $0x48] sm:$0xff] }
  0x17   : > { %508 = vmatpush.msrb.mxu1 %v1324_v19  ;;  %553 = vmatpush.msrb.mxu3 %v1330_v31  ;;  %v1620_v36 = vld [vmem:[%s1537_s24 + $0x28] sm:$0xff]  ;;  %v249_v37 = vld [vmem:[%s2345_s1 + $0x40] sm:$0xff]  ;;  %v248_v39 = vld [vmem:[%s2345_s1 + $0x38] sm:$0xff] }
  0x18   : > { %363 = vmatpush.msra.mxu2 %v260_v18  ;;  %299 = vmatpush.msra.mxu0 %v259_v20  ;;  %v1328_v38 = vld [vmem:[%s2345_s1 + $0x220] sm:$0xff]  ;;  %v247_v40 = vld [vmem:[%s2345_s1 + $0x30] sm:$0xff]  ;;  %v246_v42 = vld [vmem:[%s2345_s1 + $0x28] sm:$0xff]  ;;  %v482_v20 = vrot.slane %v1620_v36, 1 }
  0x19   : > { %509 = vmatpush.msrb.mxu1 %v1322_v21  ;;  %1292 = vmatmul.msk.f32.gmra.mxu3 %vm277_vm0, %v1577_v23  ;;  %v1314_v41 = vld [vmem:[%s2345_s1 + $0x1b0] sm:$0xff]  ;;  %v245_v43 = vld [vmem:[%s2345_s1 + $0x20] sm:$0xff]  ;;  %v244_v45 = vld [vmem:[%s2345_s1 + $0x18] sm:$0xff] }
  0x1a   : > { %364 = vmatpush.msra.mxu2 %v258_v22  ;;  %300 = vmatpush.msra.mxu0 %v257_v24  ;;  %v1312_v44 = vld [vmem:[%s2345_s1 + $0x1a0] sm:$0xff]  ;;  %v243_v46 = vld [vmem:[%s2345_s1 + $0x10] sm:$0xff]  ;;  %v242_v48 = vld [vmem:[%s2345_s1 + $0x8] sm:$0xff]  ;;  %v1796_v31 = vsel %vm473_vm1, %v478_v3, %v482_v20 }
  0x1b   : > { %1287 = vmatmul.msk.f32.gmra.mxu1 %vm277_vm0, %v1577_v23  ;;  %554 = vmatpush.msrb.mxu3 %v1328_v38  ;;  %v1310_v47 = vld [vmem:[%s2345_s1 + $0x190] sm:$0xff]  ;;  %v1663_v49 = vld [vmem:[%s1537_s24] sm:$0xff]  ;;  %v1666_v50 = vld [vmem:[%s1537_s24 + $0x38] sm:$0xff] }
  0x1c   : > { %365 = vmatpush.msra.mxu2 %v256_v25  ;;  %301 = vmatpush.msra.mxu0 %v255_v26  ;;  %v1331_v51 = vld [vmem:[%s2345_s1 + $0x238] sm:$0xff]  ;;  %v241_v52 = vld [vmem:[%s2345_s1] sm:$0xff]  ;;  %v1329_v55 = vld [vmem:[%s2345_s1 + $0x228] sm:$0xff]  ;;  %v474_v8 = vrot.slane %v1663_v49, 1  ;;  %v686_v25 = vrot.slane %v1543_v13, 2  ;;  %v687_v26 = vrot.slane %v1577_v23, 2 }
  0x1d   : > { %510 = vmatpush.msrb.mxu1 %v1320_v27  ;;  %v1327_v53 = vld [vmem:[%s2345_s1 + $0x218] sm:$0xff]  ;;  %v1308_v54 = vld [vmem:[%s2345_s1 + $0x180] sm:$0xff]  ;;  %v1325_v56 = vld [vmem:[%s2345_s1 + $0x208] sm:$0xff] }
  0x1e   : > { %366 = vmatpush.msra.mxu2 %v254_v28  ;;  %302 = vmatpush.msra.mxu0 %v253_v29  ;;  %v1306_v57 = vld [vmem:[%s2345_s1 + $0x170] sm:$0xff]  ;;  %v1323_v58 = vld [vmem:[%s2345_s1 + $0x1f8] sm:$0xff]  ;;  %v1304_v59 = vld [vmem:[%s2345_s1 + $0x160] sm:$0xff] }
  0x1f   : > { %511 = vmatpush.msrb.mxu1 %v1318_v30  ;;  %v1702_v60 = vld [vmem:[%s1537_s24 + $0x10] sm:$0xff]  ;;  %v1705_v61 = vld [vmem:[%s1537_s24 + $0x48] sm:$0xf]  ;;  %v1319_v0 = vld [vmem:[%s2345_s1 + $0x1d8] sm:$0xff] }
  0x20   : > { %367 = vmatpush.msra.mxu2 %v252_v32  ;;  %303 = vmatpush.msra.mxu0 %v251_v33  ;;  %v1321_v62 = vld [vmem:[%s2345_s1 + $0x1e8] sm:$0xff]  ;;  %v1302_v63 = vld [vmem:[%s2345_s1 + $0x150] sm:$0xff]  ;;  %v1300_v1 = vld [vmem:[%s2345_s1 + $0x140] sm:$0xff]  ;;  %v475_v9 = vrot.slane %v1702_v60, 1  ;;  %v1808_v33 = vsel %vm682_vm2, %v686_v25, %v687_v26 }
  0x21   : > { %512 = vmatpush.msrb.mxu1 %v1316_v34  ;;  %1293 = vmatmul.msk.f32.gmra.mxu3 %vm277_vm0, %v1620_v36  ;;  %v1377_v4 = vld [vmem:[%s2345_s1 + $0x358] sm:$0xff]  ;;  %v1298_v5 = vld [vmem:[%s2345_s1 + $0x130] sm:$0xff]  ;;  %v1317_v6 = vld [vmem:[%s2345_s1 + $0x1c8] sm:$0xff] }
  0x22   : > { %368 = vmatpush.msra.mxu2 %v250_v35  ;;  %304 = vmatpush.msra.mxu0 %v249_v37  ;;  %v1376_v7 = vld [vmem:[%s2345_s1 + $0x350] sm:$0xff]  ;;  %v1296_v10 = vld [vmem:[%s2345_s1 + $0x120] sm:$0xff]  ;;  %v1315_v11 = vld [vmem:[%s2345_s1 + $0x1b8] sm:$0xff]  ;;  %v1760_v17 = vsel %vm473_vm1, %v474_v8, %v475_v9  ;;  %v486_v37 = vrot.slane %v1666_v50, 1 }
  0x23   : > { %1288 = vmatmul.msk.f32.gmra.mxu1 %vm277_vm0, %v1620_v36  ;;  %762 = vmatpush.msra.mxu3 %v1376_v7  ;;  %v1748_v12 = vld [vmem:[%s1537_s24 + $0x20] sm:$0xff]  ;;  %v1313_v15 = vld [vmem:[%s2345_s1 + $0x1a8] sm:$0xff]  ;;  %v1372_v16 = vld [vmem:[%s2345_s1 + $0x330] sm:$0xff]  ;;  %v1917_v7 = vrot.slane %v1705_v61, 2 }
  0x24   : > { %369 = vmatpush.msra.mxu2 %v248_v39  ;;  %305 = vmatpush.msra.mxu0 %v247_v40  ;;  %v1311_v18 = vld [vmem:[%s2345_s1 + $0x198] sm:$0xff]  ;;  %v1370_v19 = vld [vmem:[%s2345_s1 + $0x320] sm:$0xff]  ;;  %v1309_v21 = vld [vmem:[%s2345_s1 + $0x188] sm:$0xff]  ;;  %v480_v27 = vrot.slane %v1748_v12, 1 }
  0x25   : > { %513 = vmatpush.msrb.mxu1 %v1314_v41  ;;  %v1368_v22 = vld [vmem:[%s2345_s1 + $0x310] sm:$0xff]  ;;  %v1374_v24 = vld [vmem:[%s2345_s1 + $0x340] sm:$0xff]  ;;  %v1307_v28 = vld [vmem:[%s2345_s1 + $0x178] sm:$0xff] }
  0x26   : > { %370 = vmatpush.msra.mxu2 %v246_v42  ;;  %306 = vmatpush.msra.mxu0 %v245_v43  ;;  %v1366_v29 = vld [vmem:[%s2345_s1 + $0x300] sm:$0xff]  ;;  %v1793_v30 = vld [vmem:[%s1537_s24 + $0x30] sm:$0xff]  ;;  %v1305_v13 = vld [vmem:[%s2345_s1 + $0x168] sm:$0xff]  ;;  %v1805_v32 = vsel %vm473_vm1, %v475_v9, %v480_v27 }
  0x27   : > { %514 = vmatpush.msrb.mxu1 %v1312_v44  ;;  %763 = vmatpush.msra.mxu3 %v1374_v24  ;;  %v1364_v23 = vld [vmem:[%s2345_s1 + $0x2f0] sm:$0xff]  ;;  %v1303_v34 = vld [vmem:[%s2345_s1 + $0x158] sm:$0xff]  ;;  %v1362_v35 = vld [vmem:[%s2345_s1 + $0x2e0] sm:$0xff]  ;;  %v484_v41 = vrot.slane %v1793_v30, 1 }
  0x28   : > { %371 = vmatpush.msra.mxu2 %v244_v45  ;;  %307 = vmatpush.msra.mxu0 %v243_v46  ;;  %v1375_v38 = vld [vmem:[%s2345_s1 + $0x348] sm:$0xff]  ;;  %v1360_v40 = vld [vmem:[%s2345_s1 + $0x2d0] sm:$0xff]  ;;  %v1299_v42 = vld [vmem:[%s2345_s1 + $0x138] sm:$0xff]  ;;  %v1842_v45 = vsel %vm473_vm1, %v482_v20, %v486_v37  ;;  %v691_v46 = vrot.slane %v1620_v36, 2  ;;  %v689_v20 = vrot.slane %v1748_v12, 2 }
  0x29   : > { %515 = vmatpush.msrb.mxu1 %v1310_v47  ;;  %1294 = vmatmul.msk.f32.gmra.mxu3 %vm277_vm0, %v1666_v50  ;;  %v1301_v39 = vld [vmem:[%s2345_s1 + $0x148] sm:$0xff]  ;;  %v1358_v43 = vld [vmem:[%s2345_s1 + $0x2c0] sm:$0xff]  ;;  %v1373_v36 = vld [vmem:[%s2345_s1 + $0x338] sm:$0xff] }
  0x2a   : > { %372 = vmatpush.msra.mxu2 %v242_v48  ;;  %308 = vmatpush.msra.mxu0 %v241_v52  ;;  %v1839_v44 = vld [vmem:[%s1537_s24 + $0x40] sm:$0xf]  ;;  %v1297_v47 = vld [vmem:[%s2345_s1 + $0x128] sm:$0xff]  ;;  %v1356_v48 = vld [vmem:[%s2345_s1 + $0x2b0] sm:$0xff]  ;;  %v1855_v52 = vsel %vm682_vm2, %v687_v26, %v691_v46 }
  0x2b   : > { %373 = vmatmul.f32.vlgmr.msra.gmra.mxu2 %v1663_v49  ;;  %309 = vmatmul.f32.vlgmr.msra.gmra.mxu0 %v1663_v49  ;;  %v1342_v8 = vld [vmem:[%s2345_s1 + $0x240] sm:$0xff]  ;;  %v1361_v9 = vld [vmem:[%s2345_s1 + $0x2d8] sm:$0xff]  ;;  %v697_v26 = vrot.slane %v1839_v44, 2 }
  0x2c   : > { %617 = vmatpush.msrb.mxu2 %v1331_v51  ;;  %1289 = vmatmul.msk.f32.gmra.mxu1 %vm277_vm0, %v1666_v50  ;;  %v1852_v51 = vsel %vm473_vm1, %v480_v27, %v484_v41 }
  0x2d   : > { %571 = vmatpush.msrb.mxu0 %v1327_v53  ;;  %516 = vmatpush.msrb.mxu1 %v1308_v54  ;;  %v1354_v53 = vld [vmem:[%s2345_s1 + $0x2a0] sm:$0xff]  ;;  %v1867_v54 = vrot.slane %v1705_v61, 1 }
  0x2e   : > { %618 = vmatpush.msrb.mxu2 %v1329_v55  ;;  %v1371_v55 = vld [vmem:[%s2345_s1 + $0x328] sm:$0xff] }
  0x2f   : > { %572 = vmatpush.msrb.mxu0 %v1325_v56  ;;  %517 = vmatpush.msrb.mxu1 %v1306_v57  ;;  %v1352_v56 = vld [vmem:[%s2345_s1 + $0x290] sm:$0xff]  ;;  %v1878_v57 = vrot.slane %v1839_v44, 1 }
  0x30   : > { %826 = vmatpush.msra.mxu2 %v1377_v4  ;;  %v1346_v4 = vld [vmem:[%s2345_s1 + $0x260] sm:$0xff] }
  0x31   : > { %573 = vmatpush.msrb.mxu0 %v1323_v58  ;;  %518 = vmatpush.msrb.mxu1 %v1304_v59  ;;  %v1369_v58 = vld [vmem:[%s2345_s1 + $0x318] sm:$0xff]  ;;  %v1350_v59 = vld [vmem:[%s2345_s1 + $0x280] sm:$0xff]  ;;  %v489_v2 = vsel %vm473_vm1, %v484_v41, %v1878_v57  ;;  %v881_v41 = vld [vmem:[%s2347_s3 + $0x68] sm:$0xff] }
  0x32   : > { %1295 = vmatmul.msk.f32.gmra.mxu3 %vm277_vm0, %v1705_v61  ;;  %827 = vmatpush.msra.mxu2 %v1375_v38 }
  0x33   : > { %376 = vmatmul.f32.gmra.mxu2 %v1702_v60  ;;  %574 = vmatpush.msrb.mxu0 %v1321_v62  ;;  %v491_v62 = vsel %vm473_vm1, %v486_v37, %v1867_v54 }
  0x34   : > { %519 = vmatpush.msrb.mxu1 %v1302_v63  ;;  %312 = vmatmul.f32.gmra.mxu0 %v1702_v60  ;;  %v695_v63 = vrot.slane %v1666_v50, 2  ;;  %v1365_v50 = vld [vmem:[%s2345_s1 + $0x2f8] sm:$0xff] }
  0x35   : > { %1290 = vmatmul.msk.f32.gmra.mxu1 %vm277_vm0, %v1705_v61  ;;  %575 = vmatpush.msrb.mxu0 %v1319_v0  ;;  %v1367_v0 = vld [vmem:[%s2345_s1 + $0x308] sm:$0xff] }
  0x36   : > { %520 = vmatpush.msrb.mxu1 %v1300_v1  ;;  %v1348_v1 = vld [vmem:[%s2345_s1 + $0x270] sm:$0xff]  ;;  %v1898_v3 = vsel %vm682_vm2, %v691_v46, %v695_v63  ;;  %v1359_v61 = vld [vmem:[%s2345_s1 + $0x2c8] sm:$0xff] }
  0x37   : > { %576 = vmatpush.msrb.mxu0 %v1317_v6  ;;  %v1363_v6 = vld [vmem:[%s2345_s1 + $0x2e8] sm:$0xff] }
  0x38   : > { %521 = vmatpush.msrb.mxu1 %v1298_v5  ;;  %v1344_v5 = vld [vmem:[%s2345_s1 + $0x250] sm:$0xff] }
  0x39   : > { %577 = vmatpush.msrb.mxu0 %v1315_v11  ;;  %v1357_v11 = vld [vmem:[%s2345_s1 + $0x2b8] sm:$0xff] }
  0x3a   : > { %522 = vmatpush.msrb.mxu1 %v1296_v10  ;;  %1332 = vmatmul.msk.f32.vlgmr.msrb.gmra.mxu3 %vm277_vm0, %v1751_v14  ;;  %v1927_v10 = vsel %vm682_vm2, %v695_v63, %v1917_v7  ;;  %v1404_v63 = vld [vmem:[%s2347_s3 + $0xe8] sm:$0xff] }
  0x3b   : > { %379 = vmatmul.f32.gmra.mxu2 %v1748_v12  ;;  %578 = vmatpush.msrb.mxu0 %v1313_v15  ;;  %v683_v15 = vrot.slane %v1663_v49, 2  ;;  %v1349_v49 = vld [vmem:[%s2345_s1 + $0x278] sm:$0xff] }
  0x3c   : > { %716 = vmatpush.msra.mxu1 %v1372_v16  ;;  %315 = vmatmul.f32.gmra.mxu0 %v1748_v12  ;;  %v684_v16 = vrot.slane %v1702_v60, 2  ;;  %v1347_v60 = vld [vmem:[%s2345_s1 + $0x268] sm:$0xff]  ;;  %v693_v12 = vrot.slane %v1793_v30, 2 }
  0x3d   : > { %523 = vmatmul.f32.vlgmr.msrb.gmra.mxu1 %v1760_v17  ;;  %579 = vmatpush.msrb.mxu0 %v1311_v18  ;;  %v1351_v18 = vld [vmem:[%s2345_s1 + $0x288] sm:$0xff] }
  0x3e   : > { %717 = vmatpush.msra.mxu1 %v1370_v19  ;;  %v685_v19 = vsel %vm682_vm2, %v683_v15, %v684_v16  ;;  %v690_v24 = vsel %vm682_vm2, %v684_v16, %v689_v20  ;;  %v694_v25 = vsel %vm682_vm2, %v689_v20, %v693_v12  ;;  %v1984_v27 = vsel %vm682_vm2, %v693_v12, %v697_v26  ;;  %v1399_v15 = vld [vmem:[%s2347_s3 + $0xc0] sm:$0xff]  ;;  %v869_v16 = vld [vmem:[%s2347_s3 + $0x8] sm:$0xff] }
  0x3f   : > { %580 = vmatpush.msrb.mxu0 %v1309_v21  ;;  %v1345_v21 = vld [vmem:[%s2345_s1 + $0x258] sm:$0xff]  ;;  %1186 = vrot.lane.b32.xlu0 %v685_v19, %s1456_s15  ;;  %v1428_v20 = vld [vmem:[%s2347_s3 + $0x188] sm:$0xff] }
  0x40   : > { %718 = vmatpush.msra.mxu1 %v1368_v22  ;;  %v1343_v22 = vld [vmem:[%s2345_s1 + $0x248] sm:$0xff]  ;;  %1190 = vrot.lane.b32.xlu1 %v690_v24, %s1456_s15 }
  0x41   : > { %581 = vmatpush.msrb.mxu0 %v1307_v28  ;;  %1194 = vrot.lane.b32.xlu2 %v694_v25, %s1456_s15 }
  0x42   : > { %719 = vmatpush.msra.mxu1 %v1366_v29  ;;  %1333 = vmatmul.msk.f32.gmra.mxu3 %vm277_vm0, %v1796_v31 }
  0x43   : > { %382 = vmatmul.f32.gmra.mxu2 %v1793_v30  ;;  %582 = vmatpush.msrb.mxu0 %v1305_v13 }
  0x44   : > { %720 = vmatpush.msra.mxu1 %v1364_v23  ;;  %318 = vmatmul.f32.gmra.mxu0 %v1793_v30 }
  0x45   : > { %526 = vmatmul.f32.gmra.mxu1 %v1805_v32  ;;  %583 = vmatpush.msrb.mxu0 %v1303_v34 }
  0x46   : > { %721 = vmatpush.msra.mxu1 %v1362_v35  ;;  %v883_v35 = vld [vmem:[%s2347_s3 + $0x78] sm:$0xff] }
  0x47   : > { %584 = vmatpush.msrb.mxu0 %v1301_v39  ;;  %1188 = vrot.lane.b32.xlu0 %v1808_v33, %s1456_s15 }
  0x48   : > { %722 = vmatpush.msra.mxu1 %v1360_v40  ;;  %v882_v40 = vld [vmem:[%s2347_s3 + $0x70] sm:$0xff]  ;;  %1192 = vrot.lane.b32.xlu1 %v1855_v52, %s1456_s15 }
  0x49   : > { %585 = vmatpush.msrb.mxu0 %v1299_v42  ;;  %v880_v42 = vld [vmem:[%s2347_s3 + $0x60] sm:$0xff]  ;;  %1196 = vrot.lane.b32.xlu2 %v1898_v3, %s1456_s15 }
  0x4a   : > { %723 = vmatpush.msra.mxu1 %v1358_v43  ;;  %1334 = vmatmul.msk.f32.gmra.mxu3 %vm277_vm0, %v1842_v45 }
  0x4b   : > { %385 = vmatmul.f32.gmra.mxu2 %v1839_v44  ;;  %586 = vmatpush.msrb.mxu0 %v1297_v47 }
  0x4c   : > { %724 = vmatpush.msra.mxu1 %v1356_v48  ;;  %321 = vmatmul.f32.gmra.mxu0 %v1839_v44 }
  0x4d   : > { %529 = vmatmul.f32.gmra.mxu1 %v1852_v51  ;;  %780 = vmatpush.msra.mxu0 %v1373_v36  ;;  %v1407_v36 = vld [vmem:[%s2347_s3 + $0x100] sm:$0xff] }
  0x4e   : > { %725 = vmatpush.msra.mxu1 %v1354_v53  ;;  %v1406_v53 = vld [vmem:[%s2347_s3 + $0xf8] sm:$0xff] }
  0x4f   : > { %781 = vmatpush.msra.mxu0 %v1371_v55  ;;  %1198 = vrot.lane.b32.xlu0 %v1984_v27, %s1456_s15 }
  0x50   : > { %726 = vmatpush.msra.mxu1 %v1352_v56  ;;  %v884_v56 = vld [vmem:[%s2347_s3 + $0x80] sm:$0xff]  ;;  %1200 = vrot.lane.b32.xlu1 %v1927_v10, %s1456_s15 }
  0x51   : > { %782 = vmatpush.msra.mxu0 %v1369_v58  ;;  %942 = vmatpush.msrb.mxu3 %v884_v56  ;;  %v875_v58 = vld [vmem:[%s2347_s3 + $0x38] sm:$0xff] }
  0x52   : > { %727 = vmatpush.msra.mxu1 %v1350_v59  ;;  %1335 = vmatmul.msk.f32.gmra.mxu3 %vm277_vm0, %v491_v62 }
  0x53   : > { %1337 = vmatmul.msk.f32.vlgmr.msrb.gmra.mxu2 %vm277_vm0, %v1751_v14  ;;  %783 = vmatpush.msra.mxu0 %v1367_v0  ;;  %v1355_v14 = vld [vmem:[%s2345_s1 + $0x2a8] sm:$0xff] }
  0x54   : > { %728 = vmatpush.msra.mxu1 %v1348_v1  ;;  %587 = vmatmul.f32.vlgmr.msrb.gmra.mxu0 %v1760_v17  ;;  %v1353_v17 = vld [vmem:[%s2345_s1 + $0x298] sm:$0xff]  ;;  %v874_v1 = vld [vmem:[%s2347_s3 + $0x30] sm:$0xff] }
  0x55   : > { %532 = vmatmul.f32.gmra.mxu1 %v489_v2  ;;  %784 = vmatpush.msra.mxu0 %v1365_v50  ;;  %v1402_v50 = vld [vmem:[%s2347_s3 + $0xd8] sm:$0xff] }
  0x56   : > { %729 = vmatpush.msra.mxu1 %v1346_v4  ;;  %v872_v4 = vld [vmem:[%s2347_s3 + $0x20] sm:$0xff] }
  0x57   : > { %785 = vmatpush.msra.mxu0 %v1363_v6 }
  0x58   : > { %730 = vmatpush.msra.mxu1 %v1344_v5 }
  0x59   : > { %786 = vmatpush.msra.mxu0 %v1361_v9 }
  0x5a   : > { %731 = vmatpush.msra.mxu1 %v1342_v8  ;;  %1336 = vmatmul.msk.f32.gmra.mxu3 %vm277_vm0, %v1867_v54  ;;  %v871_v8 = vld [vmem:[%s2347_s3 + $0x18] sm:$0xff] }
  0x5b   : > { %1338 = vmatmul.msk.f32.gmra.mxu2 %vm277_vm0, %v1796_v31  ;;  %787 = vmatpush.msra.mxu0 %v1359_v61  ;;  %v1400_v61 = vld [vmem:[%s2347_s3 + $0xc8] sm:$0xff] }
  0x5c   : > { %590 = vmatmul.f32.gmra.mxu0 %v1805_v32  ;;  %898 = vmatpush.msrb.mxu1 %v883_v35  ;;  %v1425_v35 = vld [vmem:[%s2347_s3 + $0x170] sm:$0xff] }
  0x5d   : > { %535 = vmatmul.f32.gmra.mxu1 %v1878_v57  ;;  %788 = vmatpush.msra.mxu0 %v1357_v11 }
  0x5e   : > { %899 = vmatpush.msrb.mxu1 %v882_v40 }
  0x5f   : > { %789 = vmatpush.msra.mxu0 %v1355_v14  ;;  %v870_v14 = vld [vmem:[%s2347_s3 + $0x10] sm:$0xff] }
  0x60   : > { %900 = vmatpush.msrb.mxu1 %v881_v41 }
  0x61   : > { %790 = vmatpush.msra.mxu0 %v1353_v17 }
  0x62   : > { %1378 = vmatmul.msk.f32.vlgmr.msra.gmra.mxu3 %vm277_vm0, %v1808_v33  ;;  %901 = vmatpush.msrb.mxu1 %v880_v42  ;;  %v1392_v42 = vld [vmem:[%s2347_s3 + $0x88] sm:$0xff] }
  0x63   : > { %1339 = vmatmul.msk.f32.gmra.mxu2 %vm277_vm0, %v1842_v45  ;;  %791 = vmatpush.msra.mxu0 %v1351_v18  ;;  %v879_v45 = vld [vmem:[%s2347_s3 + $0x58] sm:$0xff] }
  0x64   : > { %593 = vmatmul.f32.gmra.mxu0 %v1852_v51  ;;  %902 = vmatpush.msrb.mxu1 %v879_v45  ;;  %v878_v51 = vld [vmem:[%s2347_s3 + $0x50] sm:$0xff]  ;;  %v1423_v45 = vld [vmem:[%s2347_s3 + $0x160] sm:$0xff] }
  0x65   : > { %732 = vmatmul.f32.vlgmr.msra.gmra.mxu1 %v685_v19  ;;  %792 = vmatpush.msra.mxu0 %v1349_v49  ;;  %v868_v49 = vld [vmem:[%s2347_s3] sm:$0xff] }
  0x66   : > { %903 = vmatpush.msrb.mxu1 %v878_v51 }
  0x67   : > { %793 = vmatpush.msra.mxu0 %v1347_v60  ;;  %v1397_v60 = vld [vmem:[%s2347_s3 + $0xb0] sm:$0xff] }
  0x69   : > { %794 = vmatpush.msra.mxu0 %v1345_v21 }
  0x6a   : > { %1379 = vmatmul.msk.f32.gmra.mxu3 %vm277_vm0, %v1855_v52 }
  0x6b   : > { %1340 = vmatmul.msk.f32.gmra.mxu2 %vm277_vm0, %v491_v62  ;;  %795 = vmatpush.msra.mxu0 %v1343_v22 }
  0x6c   : > { %596 = vmatmul.f32.gmra.mxu0 %v489_v2  ;;  %v1403_v2 = vld [vmem:[%s2347_s3 + $0xe0] sm:$0xff] }
  0x6d   : > { %735 = vmatmul.f32.gmra.mxu1 %v690_v24  ;;  %1014 = vmatpush.msrb.mxu0 %v1407_v36  ;;  %v1408_v36 = vld [vmem:[%s2347_s3 + $0x108] sm:$0xff] }
  0x6e   : > { %1058 = vmatpush.msrb.mxu2 %v1408_v36 }
  0x6f   : > { %1015 = vmatpush.msrb.mxu0 %v1406_v53  ;;  %v1420_v53 = vld [vmem:[%s2347_s3 + $0x148] sm:$0xff] }
  0x72   : > { %1380 = vmatmul.msk.f32.gmra.mxu3 %vm277_vm0, %v1898_v3 }
  0x73   : > { %1341 = vmatmul.msk.f32.gmra.mxu2 %vm277_vm0, %v1867_v54 }
  0x74   : > { %599 = vmatmul.f32.gmra.mxu0 %v1878_v57  ;;  %v1405_v57 = vld [vmem:[%s2347_s3 + $0xf0] sm:$0xff] }
  0x75   : > { %738 = vmatmul.f32.gmra.mxu1 %v694_v25  ;;  %1016 = vmatpush.msrb.mxu0 %v1405_v57 }
  0x77   : > { %1017 = vmatpush.msrb.mxu0 %v1404_v63 }
  0x79   : > { %1018 = vmatpush.msrb.mxu0 %v1403_v2 }
  0x7a   : > { %1381 = vmatmul.msk.f32.gmra.mxu3 %vm277_vm0, %v1927_v10 }
  0x7b   : > { %1383 = vmatmul.msk.f32.vlgmr.msra.gmra.mxu2 %vm277_vm0, %v1808_v33  ;;  %v877_v33 = vld [vmem:[%s2347_s3 + $0x48] sm:$0xff]  ;;  %1019 = vmatpush.msrb.mxu0 %v1402_v50 }
  0x7c   : > { %796 = vmatmul.f32.vlgmr.msra.gmra.mxu0 %v685_v19  ;;  %904 = vmatpush.msrb.mxu1 %v877_v33  ;;  %v1398_v19 = vld [vmem:[%s2347_s3 + $0xb8] sm:$0xff]  ;;  %v1421_v33 = vld [vmem:[%s2347_s3 + $0x150] sm:$0xff] }
  0x7d   : > { %741 = vmatmul.f32.gmra.mxu1 %v1984_v27 }
  0x82   : > { %1382 = vmatmul.msk.f32.gmra.mxu3 %vm277_vm0, %v1917_v7 }
  0x83   : > { %1384 = vmatmul.msk.f32.gmra.mxu2 %vm277_vm0, %v1855_v52  ;;  %v876_v52 = vld [vmem:[%s2347_s3 + $0x40] sm:$0xff] }
  0x84   : > { %799 = vmatmul.f32.gmra.mxu0 %v690_v24  ;;  %905 = vmatpush.msrb.mxu1 %v876_v52  ;;  %v1396_v24 = vld [vmem:[%s2347_s3 + $0xa8] sm:$0xff]  ;;  %v235_v52 = vld [vmem:[%s2346_s2] sm:$0x3] }
  0x85   : > { %744 = vmatmul.f32.gmra.mxu1 %v697_v26 }
  0x86   : > { %906 = vmatpush.msrb.mxu1 %v875_v58  ;;  %v1419_v58 = vld [vmem:[%s2347_s3 + $0x140] sm:$0xff] }
  0x88   : > { %907 = vmatpush.msrb.mxu1 %v874_v1  ;;  %v1418_v1 = vld [vmem:[%s2347_s3 + $0x138] sm:$0xff] }
  0x8b   : > { %1385 = vmatmul.msk.f32.gmra.mxu2 %vm277_vm0, %v1898_v3  ;;  %v873_v3 = vld [vmem:[%s2347_s3 + $0x28] sm:$0xff] }
  0x8c   : > { %802 = vmatmul.f32.gmra.mxu0 %v694_v25  ;;  %908 = vmatpush.msrb.mxu1 %v873_v3  ;;  %v1427_v25 = vld [vmem:[%s2347_s3 + $0x180] sm:$0xff] }
  0x8e   : > { %909 = vmatpush.msrb.mxu1 %v872_v4  ;;  %v1417_v4 = vld [vmem:[%s2347_s3 + $0x130] sm:$0xff] }
  0x90   : > { %v1997_v28 = vpop.f32.mrf.mxu1  ;;  %910 = vmatpush.msrb.mxu1 %v871_v8 }
  0x92   : > { %911 = vmatpush.msrb.mxu1 %v870_v14 }
  0x93   : > { %1386 = vmatmul.msk.f32.gmra.mxu2 %vm277_vm0, %v1927_v10 }
  0x94   : > { %805 = vmatmul.f32.gmra.mxu0 %v1984_v27  ;;  %v406_v29 = vpop.f32.mrf.mxu3  ;;  %912 = vmatpush.msrb.mxu1 %v869_v16  ;;  %v1426_v27 = vld [vmem:[%s2347_s3 + $0x178] sm:$0xff] }
  0x95   : > { %v1414_v16 = vld [vmem:[%s2347_s3 + $0x118] sm:$0xff] }
  0x96   : > { %913 = vmatpush.msrb.mxu1 %v868_v49 }
  0x98   : > { %v2002_v30 = vpop.f32.mrf.mxu1  ;;  %1124 = vmatpush.msra.mxu1 %v1428_v20 }
  0x9a   : > { %1125 = vmatpush.msra.mxu1 %v1427_v25 }
  0x9b   : > { %1387 = vmatmul.msk.f32.gmra.mxu2 %vm277_vm0, %v1917_v7  ;;  %v1401_v7 = vld [vmem:[%s2347_s3 + $0xd0] sm:$0xff] }
  0x9c   : > { %808 = vmatmul.f32.gmra.mxu0 %v697_v26  ;;  %v409_v31 = vpop.f32.mrf.mxu3  ;;  %v1395_v26 = vld [vmem:[%s2347_s3 + $0xa0] sm:$0xff]  ;;  %1126 = vmatpush.msra.mxu1 %v1426_v27 }
  0x9d   : > { %1020 = vmatpush.msrb.mxu0 %v1401_v7 }
  0x9e   : > { %1127 = vmatpush.msra.mxu1 %v1425_v35 }
  0x9f   : > { %1021 = vmatpush.msrb.mxu0 %v1400_v61  ;;  %v1415_v61 = vld [vmem:[%s2347_s3 + $0x120] sm:$0xff] }
  0xa0   : > { %v2006_v13 = vpop.f32.mrf.mxu1 }
  0xa1   : > { %1022 = vmatpush.msrb.mxu0 %v1399_v15 }
  0xa3   : > { %1023 = vmatpush.msrb.mxu0 %v1398_v19 }
  0xa4   : > { %v412_v23 = vpop.f32.mrf.mxu3 }
  0xa5   : > { %1024 = vmatpush.msrb.mxu0 %v1397_v60 }
  0xa7   : > { %1025 = vmatpush.msrb.mxu0 %v1396_v24 }
  0xa8   : > { %v2008_v32 = vpop.f32.mrf.mxu0 }
  0xa9   : > { %v2010_v34 = vpop.f32.mrf.mxu1  ;;  %1026 = vmatpush.msrb.mxu0 %v1395_v26  ;;  %v343_v63 = vadd.f32 %v1997_v28, %v2008_v32  ;;  %v1429_v28 = vld [vmem:[%s2347_s3 + $0x190] sm:$0xff]  ;;  %v1416_v32 = vld [vmem:[%s2347_s3 + $0x128] sm:$0xff] }
  0xaa   : > { %1168 = vmatpush.msra.mxu3 %v1429_v28 }
  0xac   : > { %v2015_v38 = vpop.f32.mrf.mxu3 }
  0xae   : > { %v374_v37 = vpop.f32.mrf.mxu2 }
  0xaf   : > { %v2018_v39 = vadd.f32 %v406_v29, %v374_v37  ;;  %v1393_v37 = vld [vmem:[%s2347_s3 + $0x90] sm:$0xff] }
  0xb1   : > { %v2031_v43 = vpop.f32.mrf.mxu0 }
  0xb2   : > { %v2033_v44 = vpop.f32.mrf.mxu1  ;;  %v346_v14 = vadd.f32 %v2002_v30, %v2031_v43 }
  0xb5   : > { %v2038_v47 = vpop.f32.mrf.mxu3 }
  0xb6   : > { %v377_v46 = vpop.f32.mrf.mxu2 }
  0xb7   : > { %v2042_v48 = vadd.f32 %v409_v31, %v377_v46  ;;  %v1422_v46 = vld [vmem:[%s2347_s3 + $0x158] sm:$0xff] }
  0xb9   : > { %v2063_v54 = vpop.f32.mrf.mxu0 }
  0xba   : > { %v2065_v55 = vpop.f32.mrf.mxu1  ;;  %v349_v27 = vadd.f32 %v2006_v13, %v2063_v54 }
  0xbd   : > { %v2076_v62 = vpop.f32.mrf.mxu3 }
  0xbe   : > { %v380_v59 = vpop.f32.mrf.mxu2  ;;  %v557_v50 = vadd.f32 %v2076_v62, %v2065_v55 }
  0xbf   : > { %v2083_v0 = vadd.f32 %v412_v23, %v380_v59  ;;  %v1394_v23 = vld [vmem:[%s2347_s3 + $0x98] sm:$0xff]  ;;  %v2214_v59 = vperm.slane %v235_v52, 0 }
  0xc0   : > { %1027 = vmatpush.msrb.mxu0 %v1394_v23 }
  0xc1   : > { %v2102_v5 = vpop.f32.mrf.mxu0  ;;  %v421_v7 = vadd.f32 %v343_v63, %v2214_v59  ;;  %v423_v30 = vadd.f32 %v346_v14, %v2214_v59 }
  0xc2   : > { %v2104_v6 = vpop.f32.mrf.mxu1  ;;  %1028 = vmatpush.msrb.mxu0 %v1393_v37 }
  0xc3   : > { %v635_v55 = vadd.f32 %v557_v50, %v421_v7 }
  0xc4   : > { %1029 = vmatpush.msrb.mxu0 %v1392_v42 }
  0xc5   : > { %v2112_v10 = vpop.f32.mrf.mxu3 }
  0xc6   : > { %v383_v9 = vpop.f32.mrf.mxu2  ;;  %v560_v60 = vadd.f32 %v2112_v10, %v2104_v6 }
  0xc7   : > { %v2118_v11 = vadd.f32 %v2015_v38, %v383_v9  ;;  %v1424_v38 = vld [vmem:[%s2347_s3 + $0x168] sm:$0xff] }
  0xc8   : > { %1128 = vmatpush.msra.mxu1 %v1424_v38  ;;  %v637_v25 = vadd.f32 %v560_v60, %v423_v30  ;;  %v425_v38 = vadd.f32 %v349_v27, %v2214_v59 }
  0xc9   : > { %v2129_v17 = vpop.f32.mrf.mxu0 }
  0xca   : > { %v2131_v18 = vpop.f32.mrf.mxu1  ;;  %1129 = vmatpush.msra.mxu1 %v1423_v45 }
  0xcc   : > { %1130 = vmatpush.msra.mxu1 %v1422_v46 }
  0xcd   : > { %v2145_v22 = vpop.f32.mrf.mxu3 }
  0xce   : > { %v386_v21 = vpop.f32.mrf.mxu2  ;;  %1131 = vmatpush.msra.mxu1 %v1421_v33  ;;  %v563_v10 = vadd.f32 %v2145_v22, %v2131_v18  ;;  %v352_v18 = vadd.f32 %v2010_v34, %v2102_v5 }
  0xcf   : > { %v2151_v12 = vadd.f32 %v2038_v47, %v386_v21  ;;  %v1413_v21 = vld [vmem:[%s2347_s3 + $0x110] sm:$0xff] }
  0xd0   : > { %1132 = vmatpush.msra.mxu1 %v1420_v53 }
  0xd1   : > { %v2164_v31 = vpop.f32.mrf.mxu0 }
  0xd2   : > { %v2162_v29 = vpop.f32.mrf.mxu1  ;;  %1133 = vmatpush.msra.mxu1 %v1419_v58  ;;  %v639_v58 = vadd.f32 %v563_v10, %v425_v38 }
  0xd4   : > { %1134 = vmatpush.msra.mxu1 %v1418_v1  ;;  %v2266_v1 = vperm.slane %v235_v52, 1  ;;  %v427_v52 = vadd.f32 %v352_v18, %v2214_v59 }
  0xd5   : > { %v2178_v40 = vpop.f32.mrf.mxu3 }
  0xd6   : > { %v2180_v41 = vpop.f32.mrf.mxu2  ;;  %1135 = vmatpush.msra.mxu1 %v1417_v4  ;;  %v424_v30 = vadd.f32 %v2042_v48, %v2266_v1 }
  0xd7   : > { %v621_v50 = vadd.f32 %v2180_v41, %v2164_v31  ;;  %v355_v41 = vadd.f32 %v2033_v44, %v2129_v17 }
  0xd8   : > { %1136 = vmatpush.msra.mxu1 %v1416_v32  ;;  %v422_v32 = vadd.f32 %v2018_v39, %v2266_v1 }
  0xd9   : > { %v2193_v51 = vpop.f32.mrf.mxu0 }
  0xda   : > { %v2191_v47 = vpop.f32.mrf.mxu1  ;;  %1137 = vmatpush.msra.mxu1 %v1415_v61  ;;  %v636_v5 = vadd.f32 %v621_v50, %v422_v32  ;;  %v428_v32 = vadd.f32 %v2118_v11, %v2266_v1 }
  0xdc   : > { %1138 = vmatpush.msra.mxu1 %v1414_v16 }
  0xdd   : > { %v2207_v56 = vpop.f32.mrf.mxu3 }
  0xde   : > { %v2209_v57 = vpop.f32.mrf.mxu2  ;;  %1139 = vmatpush.msra.mxu1 %v1413_v21  ;;  %v569_v16 = vadd.f32 %v2207_v56, %v2191_v47 }
  0xe1   : > { %v2221_v2 = vpop.f32.mrf.mxu0 }
  0xe2   : > { %v733_v3 = vpop.f32.mrf.mxu1 }
  0xe5   : > { %v765_v9 = vpop.f32.mrf.mxu3 }
  0xe6   : > { %v2235_v8 = vpop.f32.mrf.mxu2  ;;  %v766_v62 = vadd.f32 %v765_v9, %v733_v3  ;;  %v566_v3 = vadd.f32 %v2178_v40, %v2162_v29 }
  0xe8   : > { %v844_v15 = vadd.f32 %v766_v62, %v635_v55  ;;  %v641_v34 = vadd.f32 %v566_v3, %v427_v52 }
  0xe9   : > { %v2245_v19 = vpop.f32.mrf.mxu0 }
  0xea   : > { %v736_v49 = vpop.f32.mrf.mxu1  ;;  %v854_v20 = vmax.f32 %v844_v15, 0.0 }
  0xec   : > { %914 = vmatmul.f32.vlgmr.msrb.gmra.mxu1 %v854_v20  ;;  %v984_v42 = vrot.slane %v854_v20, 1  ;;  %v1094_v45 = vrot.slane %v854_v20, 2 }
  0xed   : > { %v768_v24 = vpop.f32.mrf.mxu3 }
  0xee   : > { %v2253_v43 = vpop.f32.mrf.mxu2  ;;  %v769_v26 = vadd.f32 %v768_v24, %v736_v49  ;;  %v624_v49 = vadd.f32 %v2209_v57, %v2193_v51  ;;  %v429_v24 = vadd.f32 %v355_v41, %v2214_v59  ;;  %v627_v59 = vadd.f32 %v2235_v8, %v2221_v2 }
  0xf0   : > { %v846_v23 = vadd.f32 %v769_v26, %v637_v25  ;;  %v643_v26 = vadd.f32 %v569_v16, %v429_v24  ;;  %v638_v47 = vadd.f32 %v624_v49, %v424_v30 }
  0xf1   : > { %v2257_v35 = vpop.f32.mrf.mxu0 }
  0xf2   : > { %v739_v6 = vpop.f32.mrf.mxu1  ;;  %v856_v37 = vmax.f32 %v846_v23, 0.0 }
  0xf4   : > { %v985_v46 = vrot.slane %v856_v37, 1  ;;  %v1095_v36 = vrot.slane %v856_v37, 2  ;;  %917 = vmatmul.f32.gmra.mxu1 %v856_v37 }
  0xf5   : > { %v771_v53 = vpop.f32.mrf.mxu3 }
  0xf6   : > { %v2262_v33 = vpop.f32.mrf.mxu2  ;;  %v772_v13 = vadd.f32 %v771_v53, %v739_v6  ;;  %v986_v54 = vsel %vm473_vm1, %v984_v42, %v985_v46  ;;  %v1096_v63 = vsel %vm682_vm2, %v1094_v45, %v1095_v36  ;;  %v426_v45 = vadd.f32 %v2083_v0, %v2266_v1 }
  0xf7   : > { %1030 = vmatmul.f32.vlgmr.msrb.gmra.mxu0 %v986_v54 }
  0xf8   : > { %v848_v22 = vadd.f32 %v772_v13, %v639_v58  ;;  %v640_v54 = vadd.f32 %v627_v59, %v426_v45 }
  0xf9   : > { %v797_v7 = vpop.f32.mrf.mxu0 }
  0xfa   : > { %v742_v4 = vpop.f32.mrf.mxu1  ;;  %v858_v28 = vmax.f32 %v848_v22, 0.0 }
  0xfc   : > { %920 = vmatmul.f32.gmra.mxu1 %v858_v28  ;;  %v990_v9 = vrot.slane %v858_v28, 1  ;;  %v1100_v55 = vrot.slane %v858_v28, 2 }
  0xfd   : > { %v774_v62 = vpop.f32.mrf.mxu3 }
  0xfe   : > { %v829_v61 = vpop.f32.mrf.mxu2  ;;  %v775_v14 = vadd.f32 %v774_v62, %v742_v4  ;;  %v991_v40 = vsel %vm473_vm1, %v985_v46, %v990_v9  ;;  %v1101_v31 = vsel %vm682_vm2, %v1095_v36, %v1100_v55 }
  0xff   : > { %v830_v29 = vadd.f32 %v829_v61, %v797_v7  ;;  %1033 = vmatmul.f32.gmra.mxu0 %v991_v40 }
 0x100   : > { %v850_v39 = vadd.f32 %v775_v14, %v641_v34 }
 0x101   : > { %v845_v15 = vadd.f32 %v830_v29, %v636_v5  ;;  %v800_v60 = vpop.f32.mrf.mxu0  ;;  %v430_v29 = vadd.f32 %v2151_v12, %v2266_v1 }
 0x102   : > { %v860_v20 = vmax.f32 %v850_v39, 0.0  ;;  %v745_v25 = vpop.f32.mrf.mxu1 }
 0x103   : > { %v855_v21 = vmax.f32 %v845_v15, 0.0 }
 0x104   : > { %923 = vmatmul.f32.gmra.mxu1 %v860_v20  ;;  %v994_v44 = vrot.slane %v860_v20, 1  ;;  %v1104_v17 = vrot.slane %v860_v20, 2 }
 0x105   : > { %1388 = vmatmul.msk.f32.vlgmr.msrb.gmra.mxu3 %vm885_vm3, %v855_v21  ;;  %v777_v56 = vpop.f32.mrf.mxu3  ;;  %v987_v46 = vrot.slane %v855_v21, 1  ;;  %v1097_v18 = vrot.slane %v855_v21, 2 }
 0x106   : > { %v832_v27 = vpop.f32.mrf.mxu2  ;;  %v778_v51 = vadd.f32 %v777_v56, %v745_v25  ;;  %v995_v23 = vsel %vm473_vm1, %v990_v9, %v994_v44  ;;  %v1105_v6 = vsel %vm682_vm2, %v1100_v55, %v1104_v17  ;;  %v1187_v56 = vpop.permute.xlu0 %1186 }
 0x107   : > { %v833_v57 = vadd.f32 %v832_v27, %v800_v60  ;;  %1036 = vmatmul.f32.gmra.mxu0 %v995_v23  ;;  %v1447_v23 = vld [vmem:[%s2348_s4] ss:$0 sm:$0xff] }
 0x108   : > { %v852_v48 = vadd.f32 %v778_v51, %v643_v26 }
 0x109   : > { %v847_v10 = vadd.f32 %v833_v57, %v638_v47  ;;  %v803_v37 = vpop.f32.mrf.mxu0 }
 0x10a   : > { %v862_v38 = vmax.f32 %v852_v48, 0.0 }
 0x10b   : > { %v857_v42 = vmax.f32 %v847_v10, 0.0  ;;  %v1191_v10 = vpop.permute.xlu1 %1190 }
 0x10c   : > { %1140 = vmatmul.f32.vlgmr.msra.gmra.mxu1 %v1096_v63  ;;  %v998_v58 = vrot.slane %v862_v38, 1  ;;  %v1108_v13 = vrot.slane %v862_v38, 2  ;;  %v630_v63 = vadd.f32 %v2253_v43, %v2245_v19  ;;  %v633_v19 = vadd.f32 %v2262_v33, %v2257_v35 }
 0x10d   : > { %v988_v36 = vrot.slane %v857_v42, 1  ;;  %v1098_v53 = vrot.slane %v857_v42, 2  ;;  %1389 = vmatmul.msk.f32.gmra.mxu3 %vm885_vm3, %v857_v42 }
 0x10e   : > { %v835_v22 = vpop.f32.mrf.mxu2  ;;  %v999_v2 = vsel %vm473_vm1, %v994_v44, %v998_v58  ;;  %v1109_v50 = vsel %vm682_vm2, %v1104_v17, %v1108_v13  ;;  %v642_v34 = vadd.f32 %v630_v63, %v428_v32  ;;  %v644_v39 = vadd.f32 %v633_v19, %v430_v29  ;;  %v1189_v38 = vpop.permute.xlu0 %1188 }
 0x10f   : > { %v836_v3 = vadd.f32 %v835_v22, %v803_v37  ;;  %v989_v8 = vsel %vm473_vm1, %v987_v46, %v988_v36  ;;  %1039 = vmatmul.f32.gmra.mxu0 %v999_v2  ;;  %v1099_v0 = vsel %vm682_vm2, %v1097_v18, %v1098_v53 }
 0x110   : > { %1409 = vmatmul.msk.f32.vlgmr.msrb.gmra.mxu2 %vm885_vm3, %v989_v8 }
 0x111   : > { %v849_v4 = vadd.f32 %v836_v3, %v640_v54  ;;  %v806_v7 = vpop.f32.mrf.mxu0  ;;  %v1195_v3 = vpop.permute.xlu2 %1194 }
 0x113   : > { %v859_v28 = vmax.f32 %v849_v4, 0.0 }
 0x114   : > { %1143 = vmatmul.f32.gmra.mxu1 %v1101_v31 }
 0x115   : > { %1390 = vmatmul.msk.f32.gmra.mxu3 %vm885_vm3, %v859_v28  ;;  %v992_v52 = vrot.slane %v859_v28, 1  ;;  %v1102_v9 = vrot.slane %v859_v28, 2 }
 0x116   : > { %v838_v55 = vpop.f32.mrf.mxu2 }
 0x117   : > { %v839_v5 = vadd.f32 %v838_v55, %v806_v7  ;;  %v993_v62 = vsel %vm473_vm1, %v988_v36, %v992_v52  ;;  %v1103_v61 = vsel %vm682_vm2, %v1098_v53, %v1102_v9  ;;  %v1203_v53 = vsel %vm1202_vm4, %v1187_v56, %v1189_v38 }
 0x118   : > { %1410 = vmatmul.msk.f32.gmra.mxu2 %vm885_vm3, %v993_v62 }
 0x119   : > { %v851_v14 = vadd.f32 %v839_v5, %v642_v34  ;;  %v809_v11 = vpop.f32.mrf.mxu0 }
 0x11b   : > { %v861_v43 = vmax.f32 %v851_v14, 0.0  ;;  %v1197_v14 = vpop.permute.xlu2 %1196 }
 0x11c   : > { %1146 = vmatmul.f32.gmra.mxu1 %v1105_v6 }
 0x11d   : > { %1391 = vmatmul.msk.f32.gmra.mxu3 %vm885_vm3, %v861_v43  ;;  %v996_v40 = vrot.slane %v861_v43, 1  ;;  %v1106_v31 = vrot.slane %v861_v43, 2 }
 0x11e   : > { %v841_v41 = vpop.f32.mrf.mxu2 }
 0x11f   : > { %v842_v15 = vadd.f32 %v841_v41, %v809_v11  ;;  %v997_v16 = vsel %vm473_vm1, %v992_v52, %v996_v40  ;;  %v1107_v49 = vsel %vm682_vm2, %v1102_v9, %v1106_v31 }
 0x120   : > { %1411 = vmatmul.msk.f32.gmra.mxu2 %vm885_vm3, %v997_v16 }
 0x121   : > { %v853_v35 = vadd.f32 %v842_v15, %v644_v39 }
 0x123   : > { %v863_v33 = vmax.f32 %v853_v35, 0.0 }
 0x124   : > { %1149 = vmatmul.f32.gmra.mxu1 %v1109_v50  ;;  %v1193_v50 = vpop.permute.xlu1 %1192 }
 0x125   : > { %v1000_v60 = vrot.slane %v863_v33, 1  ;;  %v1110_v20 = vrot.slane %v863_v33, 2  ;;  %1430 = vmatmul.msk.f32.vlgmr.msra.gmra.mxu3 %vm885_vm3, %v1099_v0  ;;  %v1204_v32 = vsel %vm1202_vm4, %v1191_v10, %v1193_v50 }
 0x127   : > { %v1001_v12 = vsel %vm473_vm1, %v996_v40, %v1000_v60  ;;  %v1111_v1 = vsel %vm682_vm2, %v1106_v31, %v1110_v20  ;;  %v1205_v40 = vsel %vm1202_vm4, %v1195_v3, %v1197_v14  ;;  %v1199_v60 = vpop.permute.xlu0 %1198 }
 0x128   : > { %1412 = vmatmul.msk.f32.gmra.mxu2 %vm885_vm3, %v1001_v12 }
 0x12c   : > { %v1201_v33 = vpop.permute.xlu1 %1200 }
 0x12d   : > { %1431 = vmatmul.msk.f32.gmra.mxu3 %vm885_vm3, %v1103_v61 }
 0x135   : > { %1432 = vmatmul.msk.f32.gmra.mxu3 %vm885_vm3, %v1107_v49 }
 0x13d   : > { %1433 = vmatmul.msk.f32.gmra.mxu3 %vm885_vm3, %v1111_v1 }
 0x169   : > { %v915_v21 = vpop.f32.mrf.mxu1 }
 0x171   : > { %v918_v30 = vpop.f32.mrf.mxu1 }
 0x174   : > { %v1031_v27 = vpop.f32.mrf.mxu0 }
 0x179   : > { %v921_v25 = vpop.f32.mrf.mxu1 }
 0x17c   : > { %v1034_v42 = vpop.f32.mrf.mxu0 }
 0x181   : > { %v924_v17 = vpop.f32.mrf.mxu1 }
 0x184   : > { %v1037_v28 = vpop.f32.mrf.mxu0 }
 0x188   : > { %v944_v24 = vpop.f32.mrf.mxu3 }
 0x189   : > { %v1141_v57 = vpop.f32.mrf.mxu1  ;;  %v945_v6 = vadd.f32 %v944_v24, %v915_v21 }
 0x18b   : > { %v956_v37 = vadd.f32 %v1447_v23, %v945_v6 }
 0x18c   : > { %v1040_v39 = vpop.f32.mrf.mxu0 }
 0x190   : > { %v947_v44 = vpop.f32.mrf.mxu3 }
 0x191   : > { %v948_v58 = vadd.f32 %v947_v44, %v918_v30  ;;  %v1144_v54 = vpop.f32.mrf.mxu1  ;;  %v1206_v30 = vsel %vm1202_vm4, %v1199_v60, %v1201_v33 }
 0x193   : > { %v1060_v47 = vpop.f32.mrf.mxu2  ;;  %v957_v2 = vadd.f32 %v1447_v23, %v948_v58 }
 0x194   : > { %v1061_v48 = vadd.f32 %v1060_v47, %v1031_v27 }
 0x196   : > { %v1072_v46 = vadd.f32 %v1061_v48, %v956_v37 }
 0x198   : > { %v950_v26 = vpop.f32.mrf.mxu3 }
 0x199   : > { %v951_v52 = vadd.f32 %v950_v26, %v921_v25  ;;  %v1147_v5 = vpop.f32.mrf.mxu1 }
 0x19b   : > { %v1063_v59 = vpop.f32.mrf.mxu2  ;;  %v958_v62 = vadd.f32 %v1447_v23, %v951_v52 }
 0x19c   : > { %v1064_v18 = vadd.f32 %v1063_v59, %v1034_v42 }
 0x19e   : > { %v1073_v7 = vadd.f32 %v1064_v18, %v957_v2 }
 0x1a0   : > { %v953_v51 = vpop.f32.mrf.mxu3 }
 0x1a1   : > { %v954_v31 = vadd.f32 %v953_v51, %v924_v17  ;;  %v1150_v20 = vpop.f32.mrf.mxu1 }
 0x1a3   : > { %v1066_v0 = vpop.f32.mrf.mxu2  ;;  %v959_v49 = vadd.f32 %v1447_v23, %v954_v31 }
 0x1a4   : > { %v1067_v55 = vadd.f32 %v1066_v0, %v1037_v28 }
 0x1a6   : > { %v1074_v43 = vadd.f32 %v1067_v55, %v958_v62 }
 0x1a8   : > { %v1170_v45 = vpop.f32.mrf.mxu3 }
 0x1a9   : > { %v1171_v36 = vadd.f32 %v1170_v45, %v1141_v57 }
 0x1ab   : > { %v1182_v13 = vadd.f32 %v1171_v36, %v1072_v46  ;;  %v1069_v29 = vpop.f32.mrf.mxu2 }
 0x1ac   : > { %v1070_v15 = vadd.f32 %v1069_v29, %v1040_v39 }
 0x1ad   : > { %v1211_v22 = vadd.f32 %v1203_v53, %v1182_v13 }
 0x1ae   : > { %v1075_v1 = vadd.f32 %v1070_v15, %v959_v49 }
 0x1af   : > { %v1215_v8 = vmax.f32 %v1211_v22, 0.0 }
 0x1b0   : > { %v1173_v4 = vpop.f32.mrf.mxu3 }
 0x1b1   : > { %1219 = vst [vmem:[%s2332_s9] sm:$0xff] %v1215_v8  ;;  %v1174_v63 = vadd.f32 %v1173_v4, %v1144_v54 }
 0x1b3   : > { %v1183_v9 = vadd.f32 %v1174_v63, %v1073_v7 }
 0x1b5   : > { %v1212_v34 = vadd.f32 %v1204_v32, %v1183_v9 }
 0x1b7   : > { %v1216_v61 = vmax.f32 %v1212_v34, 0.0 }
 0x1b8   : > { %v1176_v19 = vpop.f32.mrf.mxu3 }
 0x1b9   : > { %1220 = vst [vmem:[%s2332_s9 + $0x8] sm:$0xff] %v1216_v61  ;;  %v1177_v11 = vadd.f32 %v1176_v19, %v1147_v5 }
 0x1bb   : > { %v1184_v41 = vadd.f32 %v1177_v11, %v1074_v43 }
 0x1bd   : > { %v1213_v16 = vadd.f32 %v1205_v40, %v1184_v41 }
 0x1bf   : > { %v1217_v35 = vmax.f32 %v1213_v16, 0.0 }
 0x1c0   : > { %v1179_v12 = vpop.f32.mrf.mxu3 }
 0x1c1   : > { %1221 = vst [vmem:[%s2332_s9 + $0x10] sm:$0xff] %v1217_v35  ;;  %v1180_v21 = vadd.f32 %v1179_v12, %v1150_v20 }
 0x1c3   : > { %v1185_v24 = vadd.f32 %v1180_v21, %v1075_v1 }
 0x1c5   : > { %v1214_v25 = vadd.f32 %v1206_v30, %v1185_v24 }
 0x1c7   : > { %v1218_v44 = vmax.f32 %v1214_v25, 0.0 }
 0x1c9   : > { %1222 = vst [vmem:[%s2332_s9 + $0x18] sm:$0xff] %v1218_v44 }
 0x1ca PF: > { %s15_s18 = sadd.s32 1, %s1454_s18  }
 0x1cb   : > { %p12_p4 = scmp.ge.s32.totalorder %s15_s18, 4  }
 0x1cd   :  { %14 = sbr.rel (!%p12_p4) target bundleno = 1 (0x1), region = 74 }

// kernel: crop_resnet_pool_forward.11
= control target key start
LH: loop header
LB: loop body
LE: loop exit
PB: predicated region body
PF: predicated region fallthrough
CT: control target
= control target key end

     0   :  { %s855_s18 = smov 0   ;;  %s1236_s0 = inlined_call_operand.vmem [shape: f32[2,32,128], index: 0, kind: input, shape index: {}]   ;;  %s1237_s1 = inlined_call_operand.vmem [shape: f32[3,128,120], index: 1, kind: input, shape index: {}]   ;;  %s1238_s2 = inlined_call_operand.vmem [shape: f32[1,120], index: 2, kind: input, shape index: {}]   ;;  %s1239_s3 = inlined_call_operand.vmem [shape: f32[3,120,112], index: 3, kind: input, shape index: {}]   ;;  %s1240_s4 = inlined_call_operand.vmem [shape: f32[1,112], index: 4, kind: input, shape index: {}]   ;;  %s1241_s5 = inlined_call_operand.vmem [shape: f32[2,28,112], index: 5, kind: output, shape index: {}]  }
   0x1 LB: > { %s688_s19 = sadd.s32 4294967295, %s822_s18   ;;  %p692_p0 = scmp.ge.s32.totalorder %s822_s18, 1  ;;  %s822_s18 = sphi %s855_s18, %s15_s18  }
   0x2   : > { %p187_p1 = scmp.lt.s32.totalorder %s822_s18, 3 }
   0x4   : > { %p188_p2 = pnand %p692_p0, %p187_p1 }
   0x5   : > { %p215_p3 = scmp.lt.s32.totalorder (!%p188_p2), %s688_s19, 1  ;;  %s824_s27 = smov (!%p188_p2), 120  }
   0x6   : > { %191 = sbr.rel (%p188_p2) target bundleno = 368 (0x170), region = 40 }
   0xb   : > { %v728_v0 = vld [vmem:[%s1237_s1 + $0x178] sm:$0xff]  ;;  %v727_v2 = vld [vmem:[%s1237_s1 + $0x170] sm:$0xff]  ;;  %v726_v5 = vld [vmem:[%s1237_s1 + $0x168] sm:$0xff]  ;;  %s1243_s19 = smov (!%p215_p3, %s688_s19), 1  ;;  %vm365_vm0 = vcmask 1045504   ;;  %vm303_vm1 = vcmask 1046528  }
   0xc   : > { %v248_v1 = vld [vmem:[%s1237_s1 + $0x78] sm:$0xff]  ;;  %377 = vmatpush.msra.mxu2 %v728_v0  ;;  %v247_v3 = vld [vmem:[%s1237_s1 + $0x70] sm:$0xff]  ;;  %v246_v6 = vld [vmem:[%s1237_s1 + $0x68] sm:$0xff]  ;;  %s773_s7 = sshll.u32 %s1243_s19, 5  ;;  %vm433_vm2 = vcmask 982016   ;;  %vm627_vm3 = vcmask 916480  }
   0xd   : > { %249 = vmatpush.msra.mxu0 %v248_v1  ;;  %v712_v4 = vld [vmem:[%s1237_s1 + $0xf8] sm:$0xff]  ;;  %v711_v7 = vld [vmem:[%s1237_s1 + $0xf0] sm:$0xff]  ;;  %v710_v8 = vld [vmem:[%s1237_s1 + $0xe8] sm:$0xff]  ;;  %s974_s20 = scalar_lea.vmem %s1236_s0, %s773_s7  ;;  %s1224_s15 = scalar_lea.vmem %s1241_s5, %s773_s7  ;;  %vm631_vm4 = vcmask 912384  }
   0xe   : > { %315 = vmatpush.msra.mxu1 %v712_v4  ;;  %378 = vmatpush.msra.mxu2 %v727_v2  ;;  %v725_v9 = vld [vmem:[%s1237_s1 + $0x160] sm:$0xff]  ;;  %v724_v12 = vld [vmem:[%s1237_s1 + $0x158] sm:$0xff]  ;;  %v723_v15 = vld [vmem:[%s1237_s1 + $0x150] sm:$0xff] }
   0xf   : > { %250 = vmatpush.msra.mxu0 %v247_v3  ;;  %v245_v10 = vld [vmem:[%s1237_s1 + $0x60] sm:$0xff]  ;;  %v244_v13 = vld [vmem:[%s1237_s1 + $0x58] sm:$0xff]  ;;  %v243_v16 = vld [vmem:[%s1237_s1 + $0x50] sm:$0xff] }
  0x10   : > { %316 = vmatpush.msra.mxu1 %v711_v7  ;;  %379 = vmatpush.msra.mxu2 %v726_v5  ;;  %v709_v11 = vld [vmem:[%s1237_s1 + $0xe0] sm:$0xff]  ;;  %v708_v14 = vld [vmem:[%s1237_s1 + $0xd8] sm:$0xff]  ;;  %v707_v17 = vld [vmem:[%s1237_s1 + $0xd0] sm:$0xff] }
  0x11   : > { %251 = vmatpush.msra.mxu0 %v246_v6  ;;  %v722_v18 = vld [vmem:[%s1237_s1 + $0x148] sm:$0xff]  ;;  %v721_v21 = vld [vmem:[%s1237_s1 + $0x140] sm:$0xff]  ;;  %v720_v24 = vld [vmem:[%s1237_s1 + $0x138] sm:$0xff] }
  0x12   : > { %317 = vmatpush.msra.mxu1 %v710_v8  ;;  %380 = vmatpush.msra.mxu2 %v725_v9  ;;  %v242_v19 = vld [vmem:[%s1237_s1 + $0x48] sm:$0xff]  ;;  %v241_v22 = vld [vmem:[%s1237_s1 + $0x40] sm:$0xff]  ;;  %v240_v25 = vld [vmem:[%s1237_s1 + $0x38] sm:$0xff] }
  0x13   : > { %252 = vmatpush.msra.mxu0 %v245_v10  ;;  %v706_v20 = vld [vmem:[%s1237_s1 + $0xc8] sm:$0xff]  ;;  %v705_v23 = vld [vmem:[%s1237_s1 + $0xc0] sm:$0xff]  ;;  %v704_v26 = vld [vmem:[%s1237_s1 + $0xb8] sm:$0xff] }
  0x14   : > { %318 = vmatpush.msra.mxu1 %v709_v11  ;;  %381 = vmatpush.msra.mxu2 %v724_v12  ;;  %v719_v27 = vld [vmem:[%s1237_s1 + $0x130] sm:$0xff]  ;;  %v718_v30 = vld [vmem:[%s1237_s1 + $0x128] sm:$0xff]  ;;  %v717_v33 = vld [vmem:[%s1237_s1 + $0x120] sm:$0xff] }
  0x15   : > { %253 = vmatpush.msra.mxu0 %v244_v13  ;;  %v239_v28 = vld [vmem:[%s1237_s1 + $0x30] sm:$0xff]  ;;  %v238_v31 = vld [vmem:[%s1237_s1 + $0x28] sm:$0xff]  ;;  %v237_v34 = vld [vmem:[%s1237_s1 + $0x20] sm:$0xff] }
  0x16   : > { %319 = vmatpush.msra.mxu1 %v708_v14  ;;  %382 = vmatpush.msra.mxu2 %v723_v15  ;;  %v703_v29 = vld [vmem:[%s1237_s1 + $0xb0] sm:$0xff]  ;;  %v702_v32 = vld [vmem:[%s1237_s1 + $0xa8] sm:$0xff]  ;;  %v716_v35 = vld [vmem:[%s1237_s1 + $0x118] sm:$0xff] }
  0x17   : > { %254 = vmatpush.msra.mxu0 %v243_v16  ;;  %v701_v36 = vld [vmem:[%s1237_s1 + $0xa0] sm:$0xff]  ;;  %v236_v37 = vld [vmem:[%s1237_s1 + $0x18] sm:$0xff]  ;;  %v993_v39 = vld [vmem:[%s974_s20 + $0x8] sm:$0xff] }
  0x18   : > { %320 = vmatpush.msra.mxu1 %v707_v17  ;;  %383 = vmatpush.msra.mxu2 %v722_v18  ;;  %v225_v38 = vld [vmem:[%s974_s20] sm:$0xff]  ;;  %v700_v40 = vld [vmem:[%s1237_s1 + $0x98] sm:$0xff]  ;;  %v715_v41 = vld [vmem:[%s1237_s1 + $0x110] sm:$0xff]  ;;  %v367_v45 = vrot.slane %v993_v39, 2  ;;  %v305_v51 = vrot.slane %v993_v39, 1 }
  0x19   : > { %255 = vmatpush.msra.mxu0 %v242_v19  ;;  %v235_v42 = vld [vmem:[%s1237_s1 + $0x10] sm:$0xff]  ;;  %v366_v44 = vrot.slane %v225_v38, 2  ;;  %v714_v46 = vld [vmem:[%s1237_s1 + $0x108] sm:$0xff]  ;;  %v304_v50 = vrot.slane %v225_v38, 1  ;;  %v713_v53 = vld [vmem:[%s1237_s1 + $0x100] sm:$0xff] }
  0x1a   : > { %321 = vmatpush.msra.mxu1 %v706_v20  ;;  %384 = vmatpush.msra.mxu2 %v721_v21  ;;  %v699_v43 = vld [vmem:[%s1237_s1 + $0x90] sm:$0xff]  ;;  %v234_v47 = vld [vmem:[%s1237_s1 + $0x8] sm:$0xff]  ;;  %v233_v54 = vld [vmem:[%s1237_s1] sm:$0xff] }
  0x1b   : > { %256 = vmatpush.msra.mxu0 %v241_v22  ;;  %v432_v48 = vld [vmem:[%s1239_s3 + $0x70] sm:$0xff]  ;;  %v698_v49 = vld [vmem:[%s1237_s1 + $0x88] sm:$0xff]  ;;  %v1031_v55 = vsel %vm365_vm0, %v366_v44, %v367_v45  ;;  %v697_v56 = vld [vmem:[%s1237_s1 + $0x80] sm:$0xff]  ;;  %v306_v59 = vsel %vm303_vm1, %v304_v50, %v305_v51 }
  0x1c   : > { %322 = vmatpush.msra.mxu1 %v705_v23  ;;  %385 = vmatpush.msra.mxu2 %v720_v24  ;;  %v431_v52 = vld [vmem:[%s1239_s3 + $0x68] sm:$0xff]  ;;  %v227_v57 = vld [vmem:[%s974_s20 + $0x10] sm:$0xff]  ;;  %v430_v58 = vld [vmem:[%s1239_s3 + $0x60] sm:$0xff] }
  0x1d   : > { %257 = vmatpush.msra.mxu0 %v240_v25  ;;  %447 = vmatpush.msra.mxu3 %v432_v48  ;;  %v1044_v60 = vld [vmem:[%s1239_s3 + $0xe8] sm:$0xff]  ;;  %v429_v61 = vld [vmem:[%s1239_s3 + $0x58] sm:$0xff]  ;;  %v766_v62 = vld [vmem:[%s1239_s3 + $0x160] sm:$0xff]  ;;  %v369_v63 = vrot.slane %v227_v57, 2  ;;  %v307_v3 = vrot.slane %v227_v57, 1 }
  0x1e   : > { %323 = vmatpush.msra.mxu1 %v704_v26  ;;  %386 = vmatpush.msra.mxu2 %v719_v27  ;;  %v1056_v0 = vld [vmem:[%s1239_s3 + $0xe0] sm:$0xff]  ;;  %v428_v1 = vld [vmem:[%s1239_s3 + $0x50] sm:$0xff]  ;;  %v765_v2 = vld [vmem:[%s1239_s3 + $0x158] sm:$0xff] }
  0x1f   : > { %258 = vmatpush.msra.mxu0 %v239_v28  ;;  %448 = vmatpush.msra.mxu3 %v431_v52  ;;  %v1068_v4 = vld [vmem:[%s1239_s3 + $0xd8] sm:$0xff]  ;;  %v427_v5 = vld [vmem:[%s1239_s3 + $0x48] sm:$0xff]  ;;  %v764_v6 = vld [vmem:[%s1239_s3 + $0x150] sm:$0xff]  ;;  %v370_v7 = vsel %vm365_vm0, %v367_v45, %v369_v63  ;;  %v308_v11 = vsel %vm303_vm1, %v305_v51, %v307_v3 }
  0x20   : > { %324 = vmatpush.msra.mxu1 %v703_v29  ;;  %387 = vmatpush.msra.mxu2 %v718_v30  ;;  %v228_v8 = vld [vmem:[%s974_s20 + $0x18] sm:$0xff]  ;;  %v426_v9 = vld [vmem:[%s1239_s3 + $0x40] sm:$0xff]  ;;  %v1086_v10 = vld [vmem:[%s1239_s3 + $0xd0] sm:$0xff] }
  0x21   : > { %259 = vmatpush.msra.mxu0 %v238_v31  ;;  %449 = vmatpush.msra.mxu3 %v430_v58  ;;  %v763_v12 = vld [vmem:[%s1239_s3 + $0x148] sm:$0xff]  ;;  %v425_v13 = vld [vmem:[%s1239_s3 + $0x38] sm:$0xff]  ;;  %v371_v15 = vrot.slane %v228_v8, 2  ;;  %v762_v16 = vld [vmem:[%s1239_s3 + $0x140] sm:$0xff]  ;;  %v309_v18 = vrot.slane %v228_v8, 1 }
  0x22   : > { %325 = vmatpush.msra.mxu1 %v702_v32  ;;  %388 = vmatpush.msra.mxu2 %v717_v33  ;;  %v1099_v14 = vld [vmem:[%s1239_s3 + $0xc8] sm:$0xff]  ;;  %v424_v17 = vld [vmem:[%s1239_s3 + $0x30] sm:$0xff]  ;;  %v422_v22 = vld [vmem:[%s1239_s3 + $0x20] sm:$0xff] }
  0x23   : > { %260 = vmatpush.msra.mxu0 %v237_v34  ;;  %450 = vmatpush.msra.mxu3 %v429_v61  ;;  %v423_v19 = vld [vmem:[%s1239_s3 + $0x28] sm:$0xff]  ;;  %v372_v20 = vsel %vm365_vm0, %v369_v63, %v371_v15  ;;  %v310_v21 = vsel %vm303_vm1, %v307_v3, %v309_v18  ;;  %v742_v23 = vld [vmem:[%s1239_s3 + $0xc0] sm:$0xff]  ;;  %v761_v24 = vld [vmem:[%s1239_s3 + $0x138] sm:$0xff] }
  0x24   : > { %326 = vmatpush.msra.mxu1 %v701_v36  ;;  %389 = vmatpush.msra.mxu2 %v716_v35  ;;  %v421_v25 = vld [vmem:[%s1239_s3 + $0x18] sm:$0xff]  ;;  %v760_v27 = vld [vmem:[%s1239_s3 + $0x130] sm:$0xff]  ;;  %v759_v30 = vld [vmem:[%s1239_s3 + $0x128] sm:$0xff] }
  0x25   : > { %261 = vmatpush.msra.mxu0 %v236_v37  ;;  %451 = vmatpush.msra.mxu3 %v428_v1  ;;  %v741_v26 = vld [vmem:[%s1239_s3 + $0xb8] sm:$0xff]  ;;  %v420_v28 = vld [vmem:[%s1239_s3 + $0x10] sm:$0xff]  ;;  %v419_v31 = vld [vmem:[%s1239_s3 + $0x8] sm:$0xff] }
  0x26   : > { %327 = vmatpush.msra.mxu1 %v700_v40  ;;  %390 = vmatpush.msra.mxu2 %v715_v41  ;;  %v740_v29 = vld [vmem:[%s1239_s3 + $0xb0] sm:$0xff]  ;;  %v739_v32 = vld [vmem:[%s1239_s3 + $0xa8] sm:$0xff]  ;;  %v758_v33 = vld [vmem:[%s1239_s3 + $0x120] sm:$0xff] }
  0x27   : > { %262 = vmatpush.msra.mxu0 %v235_v42  ;;  %452 = vmatpush.msra.mxu3 %v427_v5  ;;  %v418_v34 = vld [vmem:[%s1239_s3] sm:$0xff]  ;;  %v757_v36 = vld [vmem:[%s1239_s3 + $0x118] sm:$0xff]  ;;  %v755_v40 = vld [vmem:[%s1239_s3 + $0x108] sm:$0xff] }
  0x28   : > { %328 = vmatpush.msra.mxu1 %v699_v43  ;;  %391 = vmatpush.msra.mxu2 %v714_v46  ;;  %v738_v35 = vld [vmem:[%s1239_s3 + $0xa0] sm:$0xff]  ;;  %v737_v37 = vld [vmem:[%s1239_s3 + $0x98] sm:$0xff]  ;;  %v735_v41 = vld [vmem:[%s1239_s3 + $0x88] sm:$0xff] }
  0x29   : > { %263 = vmatpush.msra.mxu0 %v234_v47  ;;  %453 = vmatpush.msra.mxu3 %v426_v9  ;;  %v754_v42 = vld [vmem:[%s1239_s3 + $0x100] sm:$0xff]  ;;  %v753_v44 = vld [vmem:[%s1239_s3 + $0xf8] sm:$0xff]  ;;  %v752_v46 = vld [vmem:[%s1239_s3 + $0xf0] sm:$0xff] }
  0x2a   : > { %329 = vmatpush.msra.mxu1 %v698_v49  ;;  %392 = vmatpush.msra.mxu2 %v713_v53  ;;  %v734_v43 = vld [vmem:[%s1239_s3 + $0x80] sm:$0xff]  ;;  %v733_v45 = vld [vmem:[%s1239_s3 + $0x78] sm:$0xff] }
  0x2b   : > { %264 = vmatpush.msra.mxu0 %v233_v54  ;;  %393 = vmatmul.f32.vlgmr.msra.gmra.mxu2 %v1031_v55  ;;  %v814_v47 = vld [vmem:[%s1238_s2] ss:$0 sm:$0xff] }
  0x2c   : > { %265 = vmatmul.f32.vlgmr.msra.gmra.mxu0 %v225_v38  ;;  %330 = vmatpush.msra.mxu1 %v697_v56  ;;  %v756_v38 = vld [vmem:[%s1239_s3 + $0x110] sm:$0xff] }
  0x2d   : > { %331 = vmatmul.f32.vlgmr.msra.gmra.mxu1 %v306_v59  ;;  %511 = vmatpush.msrb.mxu2 %v1044_v60 }
  0x2e   : > { %575 = vmatpush.msrb.mxu0 %v766_v62  ;;  %790 = vmatpush.msrb.mxu1 %v766_v62 }
  0x2f   : > { %512 = vmatpush.msrb.mxu2 %v1056_v0  ;;  %454 = vmatpush.msra.mxu3 %v425_v13 }
  0x30   : > { %576 = vmatpush.msrb.mxu0 %v765_v2  ;;  %791 = vmatpush.msrb.mxu1 %v765_v2 }
  0x31   : > { %513 = vmatpush.msrb.mxu2 %v1068_v4  ;;  %455 = vmatpush.msra.mxu3 %v424_v17 }
  0x32   : > { %577 = vmatpush.msrb.mxu0 %v764_v6  ;;  %792 = vmatpush.msrb.mxu1 %v764_v6 }
  0x33   : > { %396 = vmatmul.f32.gmra.mxu2 %v370_v7  ;;  %456 = vmatpush.msra.mxu3 %v423_v19 }
  0x34   : > { %268 = vmatmul.f32.gmra.mxu0 %v993_v39  ;;  %514 = vmatpush.msrb.mxu2 %v1086_v10  ;;  %v736_v39 = vld [vmem:[%s1239_s3 + $0x90] sm:$0xff] }
  0x35   : > { %334 = vmatmul.f32.gmra.mxu1 %v308_v11  ;;  %578 = vmatpush.msrb.mxu0 %v763_v12 }
  0x36   : > { %515 = vmatpush.msrb.mxu2 %v1099_v14  ;;  %793 = vmatpush.msrb.mxu1 %v763_v12 }
  0x37   : > { %579 = vmatpush.msrb.mxu0 %v762_v16  ;;  %607 = vrot.lane.b32.xlu0 %v1031_v55, %s824_s27 }
  0x38   : > { %794 = vmatpush.msrb.mxu1 %v762_v16  ;;  %611 = vrot.lane.b32.xlu1 %v372_v20, %s824_s27 }
  0x39   : > { %457 = vmatpush.msra.mxu3 %v422_v22  ;;  %516 = vmatpush.msrb.mxu2 %v742_v23 }
  0x3a   : > { %580 = vmatpush.msrb.mxu0 %v761_v24  ;;  %795 = vmatpush.msrb.mxu1 %v761_v24 }
  0x3b   : > { %399 = vmatmul.f32.gmra.mxu2 %v372_v20  ;;  %458 = vmatpush.msra.mxu3 %v421_v25 }
  0x3c   : > { %271 = vmatmul.f32.gmra.mxu0 %v227_v57  ;;  %517 = vmatpush.msrb.mxu2 %v741_v26 }
  0x3d   : > { %337 = vmatmul.f32.gmra.mxu1 %v310_v21  ;;  %581 = vmatpush.msrb.mxu0 %v760_v27 }
  0x3e   : > { %796 = vmatpush.msrb.mxu1 %v760_v27  ;;  %459 = vmatpush.msra.mxu3 %v420_v28  ;;  %v815_v27 = vld [vmem:[%s1240_s4] ss:$0 sm:$0xff] }
  0x3f   : > { %609 = vrot.lane.b32.xlu0 %v370_v7, %s824_s27  ;;  %518 = vmatpush.msrb.mxu2 %v740_v29 }
  0x40   : > { %613 = vrot.lane.b32.xlu1 %v371_v15, %s824_s27  ;;  %582 = vmatpush.msrb.mxu0 %v759_v30 }
  0x41   : > { %460 = vmatpush.msra.mxu3 %v419_v31  ;;  %797 = vmatpush.msrb.mxu1 %v759_v30 }
  0x42   : > { %519 = vmatpush.msrb.mxu2 %v739_v32  ;;  %583 = vmatpush.msrb.mxu0 %v758_v33 }
  0x43   : > { %402 = vmatmul.f32.gmra.mxu2 %v371_v15  ;;  %461 = vmatpush.msra.mxu3 %v418_v34 }
  0x44   : > { %274 = vmatmul.f32.gmra.mxu0 %v228_v8  ;;  %798 = vmatpush.msrb.mxu1 %v758_v33 }
  0x45   : > { %340 = vmatmul.f32.gmra.mxu1 %v309_v18  ;;  %775 = vmatpush.msrb.mxu3 %v1044_v60 }
  0x46   : > { %520 = vmatpush.msrb.mxu2 %v738_v35  ;;  %584 = vmatpush.msrb.mxu0 %v757_v36 }
  0x47   : > { %799 = vmatpush.msrb.mxu1 %v757_v36  ;;  %776 = vmatpush.msrb.mxu3 %v1056_v0 }
  0x48   : > { %521 = vmatpush.msrb.mxu2 %v737_v37  ;;  %585 = vmatpush.msrb.mxu0 %v756_v38 }
  0x49   : > { %800 = vmatpush.msrb.mxu1 %v756_v38  ;;  %777 = vmatpush.msrb.mxu3 %v1068_v4 }
  0x4a   : > { %522 = vmatpush.msrb.mxu2 %v736_v39  ;;  %586 = vmatpush.msrb.mxu0 %v755_v40 }
  0x4b   : > { %801 = vmatpush.msrb.mxu1 %v755_v40  ;;  %778 = vmatpush.msrb.mxu3 %v1086_v10 }
  0x4c   : > { %523 = vmatpush.msrb.mxu2 %v735_v41  ;;  %587 = vmatpush.msrb.mxu0 %v754_v42 }
  0x4d   : > { %802 = vmatpush.msrb.mxu1 %v754_v42  ;;  %779 = vmatpush.msrb.mxu3 %v1099_v14 }
  0x4e   : > { %524 = vmatpush.msrb.mxu2 %v734_v43  ;;  %588 = vmatpush.msrb.mxu0 %v753_v44 }
  0x4f   : > { %803 = vmatpush.msrb.mxu1 %v753_v44  ;;  %780 = vmatpush.msrb.mxu3 %v742_v23 }
  0x50   : > { %525 = vmatpush.msrb.mxu2 %v733_v45  ;;  %589 = vmatpush.msrb.mxu0 %v752_v46 }
  0x51   : > { %804 = vmatpush.msrb.mxu1 %v752_v46  ;;  %781 = vmatpush.msrb.mxu3 %v741_v26 }
  0x53   : > { %782 = vmatpush.msrb.mxu3 %v740_v29 }
  0x55   : > { %783 = vmatpush.msrb.mxu3 %v739_v32 }
  0x57   : > { %784 = vmatpush.msrb.mxu3 %v738_v35 }
  0x59   : > { %785 = vmatpush.msrb.mxu3 %v737_v37 }
  0x5b   : > { %786 = vmatpush.msrb.mxu3 %v736_v39 }
  0x5d   : > { %787 = vmatpush.msrb.mxu3 %v735_v41 }
  0x5f   : > { %788 = vmatpush.msrb.mxu3 %v734_v43 }
  0x61   : > { %789 = vmatpush.msrb.mxu3 %v733_v45 }
  0xa9   : > { %v266_v48 = vpop.f32.mrf.mxu0  ;;  %v608_v33 = vpop.permute.xlu0 %607 }
  0xaa   : > { %v278_v49 = vadd.f32 %v814_v47, %v266_v48  ;;  %v332_v50 = vpop.f32.mrf.mxu1  ;;  %v612_v48 = vpop.permute.xlu1 %611 }
  0xac   : > { %v344_v51 = vadd.f32 %v332_v50, %v278_v49 }
  0xae   : > { %v394_v52 = vpop.f32.mrf.mxu2 }
  0xaf   : > { %v406_v53 = vadd.f32 %v394_v52, %v344_v51 }
  0xb1   : > { %v269_v54 = vpop.f32.mrf.mxu0  ;;  %v410_v55 = vmax.f32 %v406_v53, 0.0  ;;  %v610_v43 = vpop.permute.xlu0 %609 }
  0xb2   : > { %v279_v56 = vadd.f32 %v814_v47, %v269_v54  ;;  %v335_v57 = vpop.f32.mrf.mxu1 }
  0xb3   : > { %729 = vmatmul.msk.f32.vlgmr.msra.gmra.mxu3 %vm433_vm2, %v410_v55  ;;  %v495_v0 = vrot.slane %v410_v55, 1  ;;  %v559_v2 = vrot.slane %v410_v55, 2 }
  0xb4   : > { %v345_v58 = vadd.f32 %v335_v57, %v279_v56 }
  0xb6   : > { %v397_v59 = vpop.f32.mrf.mxu2 }
  0xb7   : > { %v407_v60 = vadd.f32 %v397_v59, %v345_v58  ;;  %v614_v59 = vpop.permute.xlu1 %613 }
  0xb9   : > { %v272_v61 = vpop.f32.mrf.mxu0  ;;  %v411_v62 = vmax.f32 %v407_v60, 0.0 }
  0xba   : > { %v280_v63 = vadd.f32 %v814_v47, %v272_v61  ;;  %v338_v1 = vpop.f32.mrf.mxu1 }
  0xbb   : > { %v496_v3 = vrot.slane %v411_v62, 1  ;;  %v560_v4 = vrot.slane %v411_v62, 2  ;;  %730 = vmatmul.msk.f32.gmra.mxu3 %vm433_vm2, %v411_v62 }
  0xbc   : > { %v346_v5 = vadd.f32 %v338_v1, %v280_v63 }
  0xbd   : > { %v497_v6 = vsel %vm303_vm1, %v495_v0, %v496_v3  ;;  %v561_v7 = vsel %vm365_vm0, %v559_v2, %v560_v4 }
  0xbe   : > { %v400_v8 = vpop.f32.mrf.mxu2  ;;  %748 = vmatmul.msk.f32.vlgmr.msrb.gmra.mxu2 %vm433_vm2, %v497_v6  ;;  %767 = vmatmul.msk.f32.vlgmr.msrb.gmra.mxu0 %vm433_vm2, %v561_v7 }
  0xbf   : > { %v408_v9 = vadd.f32 %v400_v8, %v346_v5 }
  0xc1   : > { %v275_v10 = vpop.f32.mrf.mxu0  ;;  %v412_v11 = vmax.f32 %v408_v9, 0.0 }
  0xc2   : > { %v281_v12 = vadd.f32 %v814_v47, %v275_v10  ;;  %v341_v13 = vpop.f32.mrf.mxu1 }
  0xc3   : > { %v562_v14 = vrot.slane %v412_v11, 2  ;;  %731 = vmatmul.msk.f32.gmra.mxu3 %vm433_vm2, %v412_v11  ;;  %v498_v22 = vrot.slane %v412_v11, 1 }
  0xc4   : > { %v347_v15 = vadd.f32 %v341_v13, %v281_v12 }
  0xc5   : > { %v563_v16 = vsel %vm365_vm0, %v560_v4, %v562_v14  ;;  %v499_v23 = vsel %vm303_vm1, %v496_v3, %v498_v22 }
  0xc6   : > { %v403_v17 = vpop.f32.mrf.mxu2  ;;  %768 = vmatmul.msk.f32.gmra.mxu0 %vm433_vm2, %v563_v16 }
  0xc7   : > { %v409_v18 = vadd.f32 %v403_v17, %v347_v15 }
  0xc9   : > { %v413_v19 = vmax.f32 %v409_v18, 0.0 }
  0xcb   : > { %v564_v20 = vrot.slane %v413_v19, 2  ;;  %732 = vmatmul.msk.f32.gmra.mxu3 %vm433_vm2, %v413_v19  ;;  %v500_v24 = vrot.slane %v413_v19, 1 }
  0xcd   : > { %v565_v21 = vsel %vm365_vm0, %v562_v14, %v564_v20  ;;  %v501_v25 = vsel %vm303_vm1, %v498_v22, %v500_v24 }
  0xce   : > { %769 = vmatmul.msk.f32.vlgmr.msrb.gmra.mxu1 %vm433_vm2, %v565_v21 }
  0xd3   : > { %749 = vmatmul.msk.f32.vlgmr.msrb.gmra.mxu3 %vm433_vm2, %v499_v23 }
  0xd6   : > { %770 = vmatmul.msk.f32.gmra.mxu1 %vm433_vm2, %v564_v20 }
  0xdb   : > { %750 = vmatmul.msk.f32.gmra.mxu3 %vm433_vm2, %v501_v25 }
  0xe3   : > { %751 = vmatmul.msk.f32.gmra.mxu3 %vm433_vm2, %v500_v24 }
 0x136   : > { %v463_v26 = vpop.f32.mrf.mxu3 }
 0x137   : > { %v475_v29 = vadd.f32 %v815_v27, %v463_v26 }
 0x13b   : > { %v591_v32 = vpop.f32.mrf.mxu0 }
 0x13e   : > { %v466_v28 = vpop.f32.mrf.mxu3 }
 0x13f   : > { %v476_v39 = vadd.f32 %v815_v27, %v466_v28 }
 0x141   : > { %v527_v30 = vpop.f32.mrf.mxu2 }
 0x142   : > { %v539_v31 = vadd.f32 %v527_v30, %v475_v29 }
 0x143   : > { %v594_v42 = vpop.f32.mrf.mxu0 }
 0x144   : > { %v603_v34 = vadd.f32 %v591_v32, %v539_v31 }
 0x146   : > { %v619_v35 = vadd.f32 %v608_v33, %v603_v34  ;;  %v469_v36 = vpop.f32.mrf.mxu3 }
 0x147   : > { %v477_v46 = vadd.f32 %v815_v27, %v469_v36 }
 0x148   : > { %v623_v37 = vmax.f32 %v619_v35, 0.0 }
 0x14a   : > { %628 = vst.msk [vmem:[%s1224_s15] sm:$0xff] %vm627_vm3, %v623_v37 }
 0x14b   : > { %v597_v49 = vpop.f32.mrf.mxu1 }
 0x14e   : > { %v472_v38 = vpop.f32.mrf.mxu3 }
 0x14f   : > { %v478_v54 = vadd.f32 %v815_v27, %v472_v38 }
 0x153   : > { %v600_v58 = vpop.f32.mrf.mxu1 }
 0x156   : > { %v530_v40 = vpop.f32.mrf.mxu3 }
 0x157   : > { %v540_v41 = vadd.f32 %v530_v40, %v476_v39 }
 0x159   : > { %v604_v44 = vadd.f32 %v594_v42, %v540_v41 }
 0x15b   : > { %v620_v45 = vadd.f32 %v610_v43, %v604_v44 }
 0x15d   : > { %v624_v47 = vmax.f32 %v620_v45, 0.0 }
 0x15e   : > { %v533_v50 = vpop.f32.mrf.mxu3 }
 0x15f   : > { %629 = vst.msk [vmem:[%s1224_s15 + $0x8] sm:$0xff] %vm627_vm3, %v624_v47  ;;  %v541_v51 = vadd.f32 %v533_v50, %v477_v46 }
 0x161   : > { %v605_v52 = vadd.f32 %v597_v49, %v541_v51 }
 0x163   : > { %v621_v53 = vadd.f32 %v612_v48, %v605_v52 }
 0x165   : > { %v625_v55 = vmax.f32 %v621_v53, 0.0 }
 0x166   : > { %v536_v56 = vpop.f32.mrf.mxu3 }
 0x167   : > { %630 = vst.msk [vmem:[%s1224_s15 + $0x10] sm:$0xff] %vm627_vm3, %v625_v55  ;;  %v542_v57 = vadd.f32 %v536_v56, %v478_v54 }
 0x169   : > { %v606_v60 = vadd.f32 %v600_v58, %v542_v57 }
 0x16b   : > { %v622_v61 = vadd.f32 %v614_v59, %v606_v60 }
 0x16d   : > { %v626_v62 = vmax.f32 %v622_v61, 0.0 }
 0x16f   : > { %632 = vst.msk [vmem:[%s1224_s15 + $0x18] sm:$0xf] %vm631_vm4, %v626_v62 }
 0x170 PF: > { %s15_s18 = sadd.s32 1, %s822_s18  }
 0x171   : > { %p12_p4 = scmp.ge.s32.totalorder %s15_s18, 4  }
 0x173   :  { %14 = sbr.rel (!%p12_p4) target bundleno = 1 (0x1), region = 74 }

// kernel: crop_resnet_pool_forward.9
= control target key start
LH: loop header
LB: loop body
LE: loop exit
PB: predicated region body
PF: predicated region fallthrough
CT: control target
= control target key end

     0   :  { %s1916_s18 = smov 0   ;;  %s3289_s0 = inlined_call_operand.vmem [shape: f32[2,40,160], index: 0, kind: input, shape index: {}]   ;;  %s3290_s1 = inlined_call_operand.vmem [shape: f32[3,160,152], index: 1, kind: input, shape index: {}]   ;;  %s3291_s2 = inlined_call_operand.vmem [shape: f32[1,152], index: 2, kind: input, shape index: {}]   ;;  %s3292_s3 = inlined_call_operand.vmem [shape: f32[3,152,144], index: 3, kind: input, shape index: {}]   ;;  %s3293_s4 = inlined_call_operand.vmem [shape: f32[1,144], index: 4, kind: input, shape index: {}]   ;;  %s3294_s5 = inlined_call_operand.vmem [shape: f32[2,36,144], index: 5, kind: output, shape index: {}]  }
   0x1 LB: > { %s1622_s19 = sadd.s32 4294967295, %s1883_s18   ;;  %p1626_p0 = scmp.ge.s32.totalorder %s1883_s18, 1  ;;  %s1883_s18 = sphi %s1916_s18, %s15_s18  }
   0x2   : > { %p187_p1 = scmp.lt.s32.totalorder %s1883_s18, 3 }
   0x4   : > { %p188_p2 = pnand %p1626_p0, %p187_p1 }
   0x5   : > { %p215_p3 = scmp.lt.s32.totalorder (!%p188_p2), %s1622_s19, 1  ;;  %s1885_s13 = smov (!%p188_p2), 120  }
   0x6   : > { %191 = sbr.rel (%p188_p2) target bundleno = 510 (0x1fe), region = 40 }
   0xb   : > { %v271_v0 = vld [vmem:[%s3290_s1 + $0xf0] sm:$0xff]  ;;  %v272_v1 = vld [vmem:[%s3290_s1 + $0xf8] sm:$0xff]  ;;  %v269_v3 = vld [vmem:[%s3290_s1 + $0xe0] sm:$0xff]  ;;  %s3296_s19 = smov (!%p215_p3, %s1622_s19), 1  ;;  %vm281_vm0 = vcmask 261120   ;;  %vm481_vm1 = vcmask 1046528  }
   0xc   : > { %v280_v2 = vld [vmem:[%s3290_s1 + $0x138] sm:$0xff]  ;;  %297 = vmatpush.msra.mxu0 %v271_v0  ;;  %361 = vmatpush.msra.mxu2 %v272_v1  ;;  %v270_v4 = vld [vmem:[%s3290_s1 + $0xe8] sm:$0xff]  ;;  %v267_v6 = vld [vmem:[%s3290_s1 + $0xd0] sm:$0xff]  ;;  %s1867_s21 = smul.u32 80, %s3296_s19  ;;  %vm694_vm2 = vcmask 1045504   ;;  %vm920_vm3 = vcmask 195584  }
   0xd   : > { %v278_v5 = vld [vmem:[%s3290_s1 + $0x128] sm:$0xff]  ;;  %405 = vmatpush.msra.mxu3 %v280_v2  ;;  %v268_v7 = vld [vmem:[%s3290_s1 + $0xd8] sm:$0xff]  ;;  %v279_v9 = vld [vmem:[%s3290_s1 + $0x130] sm:$0xff]  ;;  %vm1519_vm4 = vcmask 982016   ;;  %vm1556_vm5 = vcmask 130048   ;;  %vm1565_vm6 = vcmask 125952  }
   0xe   : > { %298 = vmatpush.msra.mxu0 %v269_v3  ;;  %362 = vmatpush.msra.mxu2 %v270_v4  ;;  %v276_v8 = vld [vmem:[%s3290_s1 + $0x118] sm:$0xff]  ;;  %v265_v10 = vld [vmem:[%s3290_s1 + $0xc0] sm:$0xff]  ;;  %v266_v11 = vld [vmem:[%s3290_s1 + $0xc8] sm:$0xff]  ;;  %s1977_s30 = scalar_lea.vmem %s3289_s0, %s1867_s21  ;;  %s3242_s22 = scalar_lea.vmem %s3294_s5, %s1867_s21 }
   0xf   : > { %406 = vmatpush.msra.mxu3 %v278_v5  ;;  %341 = vmatpush.msra.mxu1 %v279_v9  ;;  %v277_v12 = vld [vmem:[%s3290_s1 + $0x120] sm:$0xff]  ;;  %v274_v13 = vld [vmem:[%s3290_s1 + $0x108] sm:$0xff]  ;;  %v275_v14 = vld [vmem:[%s3290_s1 + $0x110] sm:$0xff] }
  0x10   : > { %299 = vmatpush.msra.mxu0 %v267_v6  ;;  %363 = vmatpush.msra.mxu2 %v268_v7  ;;  %v263_v15 = vld [vmem:[%s3290_s1 + $0xb0] sm:$0xff]  ;;  %v1983_v16 = vld [vmem:[%s1977_s30 + $0x8] sm:$0xff]  ;;  %v264_v17 = vld [vmem:[%s3290_s1 + $0xb8] sm:$0xff] }
  0x11   : > { %407 = vmatpush.msra.mxu3 %v276_v8  ;;  %342 = vmatpush.msra.mxu1 %v277_v12  ;;  %v273_v18 = vld [vmem:[%s3290_s1 + $0x100] sm:$0xff]  ;;  %v262_v20 = vld [vmem:[%s3290_s1 + $0xa8] sm:$0xff]  ;;  %v1677_v21 = vld [vmem:[%s3290_s1 + $0x270] sm:$0xff] }
  0x12   : > { %300 = vmatpush.msra.mxu0 %v265_v10  ;;  %364 = vmatpush.msra.mxu2 %v266_v11  ;;  %v261_v19 = vld [vmem:[%s3290_s1 + $0xa0] sm:$0xff]  ;;  %v259_v22 = vld [vmem:[%s3290_s1 + $0x90] sm:$0xff]  ;;  %v260_v23 = vld [vmem:[%s3290_s1 + $0x98] sm:$0xff]  ;;  %v485_v11 = vrot.slane %v1983_v16, 1 }
  0x13   : > { %408 = vmatpush.msra.mxu3 %v274_v13  ;;  %343 = vmatpush.msra.mxu1 %v275_v14  ;;  %v1669_v24 = vld [vmem:[%s3290_s1 + $0x230] sm:$0xff]  ;;  %v257_v25 = vld [vmem:[%s3290_s1 + $0x80] sm:$0xff]  ;;  %v258_v26 = vld [vmem:[%s3290_s1 + $0x88] sm:$0xff] }
  0x14   : > { %1634 = vmatmul.msk.f32.vlgmr.msra.gmra.mxu3 %vm281_vm0, %v1983_v16  ;;  %301 = vmatpush.msra.mxu0 %v263_v15  ;;  %v1667_v27 = vld [vmem:[%s3290_s1 + $0x220] sm:$0xff]  ;;  %v2026_v29 = vld [vmem:[%s1977_s30 + $0x18] sm:$0xff]  ;;  %v255_v30 = vld [vmem:[%s3290_s1 + $0x70] sm:$0xff] }
  0x15   : > { %365 = vmatpush.msra.mxu2 %v264_v17  ;;  %344 = vmatpush.msra.mxu1 %v273_v18  ;;  %v1675_v28 = vld [vmem:[%s3290_s1 + $0x260] sm:$0xff]  ;;  %v256_v31 = vld [vmem:[%s3290_s1 + $0x78] sm:$0xff]  ;;  %v1665_v32 = vld [vmem:[%s3290_s1 + $0x210] sm:$0xff]  ;;  %v486_v12 = vrot.slane %v2026_v29, 1 }
  0x16   : > { %302 = vmatpush.msra.mxu0 %v261_v19  ;;  %1629 = vmatmul.msk.f32.vlgmr.msra.gmra.mxu1 %vm281_vm0, %v1983_v16  ;;  %v253_v33 = vld [vmem:[%s3290_s1 + $0x60] sm:$0xff]  ;;  %v254_v34 = vld [vmem:[%s3290_s1 + $0x68] sm:$0xff]  ;;  %v251_v36 = vld [vmem:[%s3290_s1 + $0x50] sm:$0xff] }
  0x17   : > { %366 = vmatpush.msra.mxu2 %v262_v20  ;;  %559 = vmatpush.msrb.mxu3 %v1677_v21  ;;  %v1663_v35 = vld [vmem:[%s3290_s1 + $0x200] sm:$0xff]  ;;  %v252_v37 = vld [vmem:[%s3290_s1 + $0x58] sm:$0xff]  ;;  %v1661_v38 = vld [vmem:[%s3290_s1 + $0x1f0] sm:$0xff]  ;;  %v2203_v21 = vsel %vm481_vm1, %v485_v11, %v486_v12 }
  0x18   : > { %303 = vmatpush.msra.mxu0 %v259_v22  ;;  %515 = vmatpush.msrb.mxu1 %v1669_v24  ;;  %v1673_v39 = vld [vmem:[%s3290_s1 + $0x250] sm:$0xff]  ;;  %v249_v40 = vld [vmem:[%s3290_s1 + $0x40] sm:$0xff]  ;;  %v250_v41 = vld [vmem:[%s3290_s1 + $0x48] sm:$0xff] }
  0x19   : > { %367 = vmatpush.msra.mxu2 %v260_v23  ;;  %560 = vmatpush.msrb.mxu3 %v1675_v28  ;;  %v1659_v42 = vld [vmem:[%s3290_s1 + $0x1e0] sm:$0xff]  ;;  %v2072_v43 = vld [vmem:[%s1977_s30 + $0x28] sm:$0xff]  ;;  %v247_v44 = vld [vmem:[%s3290_s1 + $0x30] sm:$0xff] }
  0x1a   : > { %304 = vmatpush.msra.mxu0 %v257_v25  ;;  %516 = vmatpush.msrb.mxu1 %v1667_v27  ;;  %v248_v45 = vld [vmem:[%s3290_s1 + $0x38] sm:$0xff]  ;;  %v1657_v46 = vld [vmem:[%s3290_s1 + $0x1d0] sm:$0xff]  ;;  %v245_v47 = vld [vmem:[%s3290_s1 + $0x20] sm:$0xff]  ;;  %v490_v27 = vrot.slane %v2072_v43, 1 }
  0x1b   : > { %368 = vmatpush.msra.mxu2 %v258_v26  ;;  %561 = vmatpush.msrb.mxu3 %v1673_v39  ;;  %v246_v48 = vld [vmem:[%s3290_s1 + $0x28] sm:$0xff]  ;;  %v1655_v49 = vld [vmem:[%s3290_s1 + $0x1c0] sm:$0xff]  ;;  %v243_v50 = vld [vmem:[%s3290_s1 + $0x10] sm:$0xff] }
  0x1c   : > { %1635 = vmatmul.msk.f32.gmra.mxu3 %vm281_vm0, %v2026_v29  ;;  %305 = vmatpush.msra.mxu0 %v255_v30  ;;  %v1671_v51 = vld [vmem:[%s3290_s1 + $0x240] sm:$0xff]  ;;  %v244_v52 = vld [vmem:[%s3290_s1 + $0x18] sm:$0xff]  ;;  %v1653_v53 = vld [vmem:[%s3290_s1 + $0x1b0] sm:$0xff] }
  0x1d   : > { %369 = vmatpush.msra.mxu2 %v256_v31  ;;  %517 = vmatpush.msrb.mxu1 %v1665_v32  ;;  %v241_v54 = vld [vmem:[%s3290_s1] sm:$0xff]  ;;  %v242_v55 = vld [vmem:[%s3290_s1 + $0x8] sm:$0xff]  ;;  %v2118_v57 = vld [vmem:[%s1977_s30 + $0x38] sm:$0xff] }
  0x1e   : > { %306 = vmatpush.msra.mxu0 %v253_v33  ;;  %1630 = vmatmul.msk.f32.gmra.mxu1 %vm281_vm0, %v2026_v29  ;;  %v2115_v56 = vld [vmem:[%s1977_s30] sm:$0xff]  ;;  %v1678_v58 = vld [vmem:[%s3290_s1 + $0x278] sm:$0xff]  ;;  %v1668_v60 = vld [vmem:[%s3290_s1 + $0x228] sm:$0xff] }
  0x1f   : > { %370 = vmatpush.msra.mxu2 %v254_v34  ;;  %518 = vmatpush.msrb.mxu1 %v1663_v35  ;;  %v1670_v59 = vld [vmem:[%s3290_s1 + $0x238] sm:$0xff]  ;;  %v1651_v61 = vld [vmem:[%s3290_s1 + $0x1a0] sm:$0xff]  ;;  %v1676_v62 = vld [vmem:[%s3290_s1 + $0x268] sm:$0xff]  ;;  %v482_v15 = vrot.slane %v2115_v56, 1  ;;  %v2243_v35 = vsel %vm481_vm1, %v486_v12, %v490_v27 }
  0x20   : > { %307 = vmatpush.msra.mxu0 %v251_v36  ;;  %562 = vmatpush.msrb.mxu3 %v1671_v51  ;;  %v1666_v63 = vld [vmem:[%s3290_s1 + $0x218] sm:$0xff]  ;;  %v1649_v0 = vld [vmem:[%s3290_s1 + $0x190] sm:$0xff]  ;;  %v1647_v3 = vld [vmem:[%s3290_s1 + $0x180] sm:$0xff] }
  0x21   : > { %371 = vmatpush.msra.mxu2 %v252_v37  ;;  %519 = vmatpush.msrb.mxu1 %v1661_v38  ;;  %v1674_v1 = vld [vmem:[%s3290_s1 + $0x258] sm:$0xff]  ;;  %v2151_v2 = vld [vmem:[%s1977_s30 + $0x10] sm:$0xff]  ;;  %v2157_v4 = vld [vmem:[%s1977_s30 + $0x48] sm:$0xff] }
  0x22   : > { %308 = vmatpush.msra.mxu0 %v249_v40  ;;  %1847 = vmatpush.msra.mxu3 %v1678_v58  ;;  %v1672_v5 = vld [vmem:[%s3290_s1 + $0x248] sm:$0xff]  ;;  %v1645_v7 = vld [vmem:[%s3290_s1 + $0x170] sm:$0xff]  ;;  %v1662_v8 = vld [vmem:[%s3290_s1 + $0x1f8] sm:$0xff]  ;;  %v483_v17 = vrot.slane %v2151_v2, 1 }
  0x23   : > { %372 = vmatpush.msra.mxu2 %v250_v41  ;;  %520 = vmatpush.msrb.mxu1 %v1659_v42  ;;  %v1664_v6 = vld [vmem:[%s3290_s1 + $0x208] sm:$0xff]  ;;  %v1643_v9 = vld [vmem:[%s3290_s1 + $0x160] sm:$0xff]  ;;  %v1728_v10 = vld [vmem:[%s3290_s1 + $0x3b8] sm:$0xff]  ;;  %v494_v42 = vrot.slane %v2118_v57, 1 }
  0x24   : > { %1636 = vmatmul.msk.f32.gmra.mxu3 %vm281_vm0, %v2072_v43  ;;  %309 = vmatpush.msra.mxu0 %v247_v44  ;;  %v1660_v13 = vld [vmem:[%s3290_s1 + $0x1e8] sm:$0xff]  ;;  %v1641_v14 = vld [vmem:[%s3290_s1 + $0x150] sm:$0xff]  ;;  %v1658_v18 = vld [vmem:[%s3290_s1 + $0x1d8] sm:$0xff]  ;;  %v2209_v23 = vsel %vm481_vm1, %v482_v15, %v483_v17 }
  0x25   : > { %373 = vmatpush.msra.mxu2 %v248_v45  ;;  %521 = vmatpush.msrb.mxu1 %v1657_v46  ;;  %v1639_v19 = vld [vmem:[%s3290_s1 + $0x140] sm:$0xff]  ;;  %v1656_v22 = vld [vmem:[%s3290_s1 + $0x1c8] sm:$0xff]  ;;  %v1654_v24 = vld [vmem:[%s3290_s1 + $0x1b8] sm:$0xff] }
  0x26   : > { %310 = vmatpush.msra.mxu0 %v245_v47  ;;  %1631 = vmatmul.msk.f32.gmra.mxu1 %vm281_vm0, %v2072_v43  ;;  %v2200_v20 = vld [vmem:[%s1977_s30 + $0x20] sm:$0xff]  ;;  %v1719_v25 = vld [vmem:[%s3290_s1 + $0x370] sm:$0xff]  ;;  %v1652_v26 = vld [vmem:[%s3290_s1 + $0x1a8] sm:$0xff] }
  0x27   : > { %374 = vmatpush.msra.mxu2 %v246_v48  ;;  %522 = vmatpush.msrb.mxu1 %v1655_v49  ;;  %v1717_v28 = vld [vmem:[%s3290_s1 + $0x360] sm:$0xff]  ;;  %v1726_v30 = vld [vmem:[%s3290_s1 + $0x3a8] sm:$0xff]  ;;  %v488_v31 = vrot.slane %v2200_v20, 1  ;;  %v1650_v32 = vld [vmem:[%s3290_s1 + $0x198] sm:$0xff]  ;;  %v698_v49 = vrot.slane %v1983_v16, 2 }
  0x28   : > { %311 = vmatpush.msra.mxu0 %v243_v50  ;;  %1848 = vmatpush.msra.mxu3 %v1676_v62  ;;  %v1715_v33 = vld [vmem:[%s3290_s1 + $0x350] sm:$0xff]  ;;  %v1648_v36 = vld [vmem:[%s3290_s1 + $0x188] sm:$0xff]  ;;  %v1646_v38 = vld [vmem:[%s3290_s1 + $0x178] sm:$0xff]  ;;  %v699_v50 = vrot.slane %v2026_v29, 2 }
  0x29   : > { %375 = vmatpush.msra.mxu2 %v244_v52  ;;  %523 = vmatpush.msrb.mxu1 %v1653_v53  ;;  %v2240_v34 = vld [vmem:[%s1977_s30 + $0x30] sm:$0xff]  ;;  %v2249_v37 = vsel %vm481_vm1, %v483_v17, %v488_v31  ;;  %v1713_v39 = vld [vmem:[%s3290_s1 + $0x340] sm:$0xff]  ;;  %v1644_v40 = vld [vmem:[%s3290_s1 + $0x168] sm:$0xff] }
  0x2a   : > { %312 = vmatpush.msra.mxu0 %v241_v54  ;;  %1849 = vmatpush.msra.mxu3 %v1674_v1  ;;  %v1727_v41 = vld [vmem:[%s3290_s1 + $0x3b0] sm:$0xff]  ;;  %v1724_v45 = vld [vmem:[%s3290_s1 + $0x398] sm:$0xff]  ;;  %v1725_v46 = vld [vmem:[%s3290_s1 + $0x3a0] sm:$0xff]  ;;  %v492_v47 = vrot.slane %v2240_v34, 1  ;;  %v2294_v54 = vsel %vm481_vm1, %v490_v27, %v494_v42 }
  0x2b   : > { %376 = vmatpush.msra.mxu2 %v242_v55  ;;  %313 = vmatmul.f32.vlgmr.msra.gmra.mxu0 %v2115_v56  ;;  %v1711_v44 = vld [vmem:[%s3290_s1 + $0x330] sm:$0xff]  ;;  %v1642_v51 = vld [vmem:[%s3290_s1 + $0x158] sm:$0xff]  ;;  %v1709_v52 = vld [vmem:[%s3290_s1 + $0x320] sm:$0xff] }
  0x2c   : > { %377 = vmatmul.f32.vlgmr.msra.gmra.mxu2 %v2115_v56  ;;  %1637 = vmatmul.msk.f32.gmra.mxu3 %vm281_vm0, %v2118_v57  ;;  %v1723_v48 = vld [vmem:[%s3290_s1 + $0x390] sm:$0xff]  ;;  %v2291_v53 = vld [vmem:[%s1977_s30 + $0x40] sm:$0xff]  ;;  %v1640_v16 = vld [vmem:[%s3290_s1 + $0x148] sm:$0xff]  ;;  %v2300_v29 = vsel %vm481_vm1, %v488_v31, %v492_v47 }
  0x2d   : > { %579 = vmatpush.msrb.mxu0 %v1670_v59  ;;  %623 = vmatpush.msrb.mxu2 %v1678_v58  ;;  %v1720_v55 = vld [vmem:[%s3290_s1 + $0x378] sm:$0xff]  ;;  %v1707_v58 = vld [vmem:[%s3290_s1 + $0x310] sm:$0xff]  ;;  %v1721_v59 = vld [vmem:[%s3290_s1 + $0x380] sm:$0xff] }
  0x2e   : > { %1632 = vmatmul.msk.f32.gmra.mxu1 %vm281_vm0, %v2118_v57  ;;  %1850 = vmatpush.msra.mxu3 %v1672_v5  ;;  %v1701_v11 = vld [vmem:[%s3290_s1 + $0x2e0] sm:$0xff]  ;;  %v1708_v17 = vld [vmem:[%s3290_s1 + $0x318] sm:$0xff] }
  0x2f   : > { %580 = vmatpush.msrb.mxu0 %v1668_v60  ;;  %524 = vmatpush.msrb.mxu1 %v1651_v61  ;;  %v2314_v60 = vsel %vm694_vm2, %v698_v49, %v699_v50  ;;  %v1718_v61 = vld [vmem:[%s3290_s1 + $0x368] sm:$0xff]  ;;  %v1700_v27 = vld [vmem:[%s3290_s1 + $0x2d8] sm:$0xff] }
  0x30   : > { %624 = vmatpush.msrb.mxu2 %v1676_v62  ;;  %v1722_v62 = vld [vmem:[%s3290_s1 + $0x388] sm:$0xff]  ;;  %v1696_v31 = vld [vmem:[%s3290_s1 + $0x2b8] sm:$0xff] }
  0x31   : > { %581 = vmatpush.msrb.mxu0 %v1666_v63  ;;  %525 = vmatpush.msrb.mxu1 %v1649_v0  ;;  %v2326_v63 = vrot.slane %v2157_v4, 1  ;;  %v1705_v0 = vld [vmem:[%s3290_s1 + $0x300] sm:$0xff] }
  0x32   : > { %625 = vmatpush.msrb.mxu2 %v1674_v1  ;;  %v1716_v1 = vld [vmem:[%s3290_s1 + $0x358] sm:$0xff] }
  0x33   : > { %316 = vmatmul.f32.gmra.mxu0 %v2151_v2  ;;  %526 = vmatpush.msrb.mxu1 %v1647_v3  ;;  %v2335_v3 = vrot.slane %v2291_v53, 1 }
  0x34   : > { %380 = vmatmul.f32.gmra.mxu2 %v2151_v2  ;;  %1638 = vmatmul.msk.f32.gmra.mxu3 %vm281_vm0, %v2157_v4 }
  0x35   : > { %582 = vmatpush.msrb.mxu0 %v1664_v6  ;;  %527 = vmatpush.msrb.mxu1 %v1645_v7  ;;  %v2342_v6 = vsel %vm481_vm1, %v494_v42, %v2326_v63  ;;  %v1714_v7 = vld [vmem:[%s3290_s1 + $0x348] sm:$0xff] }
  0x36   : > { %1633 = vmatmul.msk.f32.gmra.mxu1 %vm281_vm0, %v2157_v4  ;;  %626 = vmatpush.msrb.mxu2 %v1672_v5  ;;  %v1703_v5 = vld [vmem:[%s3290_s1 + $0x2f0] sm:$0xff] }
  0x37   : > { %583 = vmatpush.msrb.mxu0 %v1662_v8  ;;  %528 = vmatpush.msrb.mxu1 %v1643_v9  ;;  %v703_v8 = vrot.slane %v2072_v43, 2  ;;  %v497_v9 = vsel %vm481_vm1, %v492_v47, %v2335_v3  ;;  %v707_v43 = vrot.slane %v2118_v57, 2 }
  0x38   : > { %836 = vmatpush.msra.mxu2 %v1728_v10  ;;  %v1712_v10 = vld [vmem:[%s3290_s1 + $0x338] sm:$0xff] }
  0x39   : > { %584 = vmatpush.msrb.mxu0 %v1660_v13  ;;  %529 = vmatpush.msrb.mxu1 %v1641_v14  ;;  %v2360_v12 = vsel %vm694_vm2, %v699_v50, %v703_v8  ;;  %v1710_v13 = vld [vmem:[%s3290_s1 + $0x328] sm:$0xff]  ;;  %v1699_v14 = vld [vmem:[%s3290_s1 + $0x2d0] sm:$0xff]  ;;  %v2374_v15 = vsel %vm694_vm2, %v703_v8, %v707_v43  ;;  %v905_v8 = vld [vmem:[%s3292_s3 + $0xb8] sm:$0xff] }
  0x3a   : > { %837 = vmatpush.msra.mxu2 %v1726_v30  ;;  %v1698_v30 = vld [vmem:[%s3290_s1 + $0x2c8] sm:$0xff] }
  0x3b   : > { %585 = vmatpush.msrb.mxu0 %v1658_v18  ;;  %530 = vmatpush.msrb.mxu1 %v1639_v19  ;;  %v1697_v18 = vld [vmem:[%s3290_s1 + $0x2c0] sm:$0xff]  ;;  %v1706_v19 = vld [vmem:[%s3290_s1 + $0x308] sm:$0xff] }
  0x3c   : > { %319 = vmatmul.f32.gmra.mxu0 %v2200_v20  ;;  %383 = vmatmul.f32.gmra.mxu2 %v2200_v20 }
  0x3d   : > { %1679 = vmatmul.msk.f32.vlgmr.msrb.gmra.mxu3 %vm281_vm0, %v2203_v21  ;;  %586 = vmatpush.msrb.mxu0 %v1656_v22  ;;  %v1695_v22 = vld [vmem:[%s3290_s1 + $0x2b0] sm:$0xff] }
  0x3e   : > { %531 = vmatmul.f32.vlgmr.msrb.gmra.mxu1 %v2209_v23  ;;  %772 = vmatpush.msrb.mxu3 %v1727_v41 }
  0x3f   : > { %587 = vmatpush.msrb.mxu0 %v1654_v24  ;;  %728 = vmatpush.msra.mxu1 %v1719_v25  ;;  %v1693_v24 = vld [vmem:[%s3290_s1 + $0x2a0] sm:$0xff]  ;;  %v695_v25 = vrot.slane %v2115_v56, 2 }
  0x40   : > { %838 = vmatpush.msra.mxu2 %v1724_v45  ;;  %773 = vmatpush.msrb.mxu3 %v1725_v46  ;;  %v1689_v56 = vld [vmem:[%s3290_s1 + $0x280] sm:$0xff] }
  0x41   : > { %588 = vmatpush.msrb.mxu0 %v1652_v26  ;;  %729 = vmatpush.msra.mxu1 %v1717_v28  ;;  %v696_v26 = vrot.slane %v2151_v2, 2  ;;  %v1691_v28 = vld [vmem:[%s3290_s1 + $0x290] sm:$0xff] }
  0x42   : > { %774 = vmatpush.msrb.mxu3 %v1723_v48  ;;  %839 = vmatpush.msra.mxu2 %v1722_v62  ;;  %v918_v62 = vld [vmem:[%s3292_s3 + $0x120] sm:$0xff] }
  0x43   : > { %589 = vmatpush.msrb.mxu0 %v1650_v32  ;;  %730 = vmatpush.msra.mxu1 %v1715_v33  ;;  %v2421_v2 = vsel %vm694_vm2, %v695_v25, %v696_v26  ;;  %v1694_v32 = vld [vmem:[%s3290_s1 + $0x2a8] sm:$0xff]  ;;  %v1692_v33 = vld [vmem:[%s3290_s1 + $0x298] sm:$0xff] }
  0x44   : > { %322 = vmatmul.f32.gmra.mxu0 %v2240_v34  ;;  %386 = vmatmul.f32.gmra.mxu2 %v2240_v34  ;;  %v897_v25 = vld [vmem:[%s3292_s3 + $0x78] sm:$0xff] }
  0x45   : > { %1680 = vmatmul.msk.f32.gmra.mxu3 %vm281_vm0, %v2243_v35  ;;  %590 = vmatpush.msrb.mxu0 %v1648_v36  ;;  %v1690_v36 = vld [vmem:[%s3290_s1 + $0x288] sm:$0xff] }
  0x46   : > { %534 = vmatmul.f32.gmra.mxu1 %v2249_v37  ;;  %775 = vmatpush.msrb.mxu3 %v1721_v59  ;;  %v911_v59 = vld [vmem:[%s3292_s3 + $0xe8] sm:$0xff] }
  0x47   : > { %591 = vmatpush.msrb.mxu0 %v1646_v38  ;;  %731 = vmatpush.msra.mxu1 %v1713_v39  ;;  %v2458_v39 = vrot.slane %v2291_v53, 2 }
  0x48   : > { %1499 = vrot.lane.b32.xlu0 %v2421_v2, %s1885_s13 }
  0x49   : > { %592 = vmatpush.msrb.mxu0 %v1644_v40  ;;  %732 = vmatpush.msra.mxu1 %v1711_v44  ;;  %v2470_v40 = vrot.slane %v2157_v4, 2 }
  0x4b   : > { %593 = vmatpush.msrb.mxu0 %v1642_v51  ;;  %733 = vmatpush.msra.mxu1 %v1709_v52  ;;  %v2477_v41 = vsel %vm694_vm2, %v707_v43, %v2470_v40  ;;  %v903_v43 = vld [vmem:[%s3292_s3 + $0xa8] sm:$0xff] }
  0x4c   : > { %325 = vmatmul.f32.gmra.mxu0 %v2291_v53  ;;  %389 = vmatmul.f32.gmra.mxu2 %v2291_v53  ;;  %v912_v53 = vld [vmem:[%s3292_s3 + $0xf0] sm:$0xff] }
  0x4d   : > { %1681 = vmatmul.msk.f32.gmra.mxu3 %vm281_vm0, %v2294_v54  ;;  %594 = vmatpush.msrb.mxu0 %v1640_v16 }
  0x4e   : > { %537 = vmatmul.f32.gmra.mxu1 %v2300_v29 }
  0x4f   : > { %792 = vmatpush.msra.mxu0 %v1720_v55  ;;  %734 = vmatpush.msra.mxu1 %v1707_v58  ;;  %v910_v58 = vld [vmem:[%s3292_s3 + $0xe0] sm:$0xff] }
  0x50   : > { %1501 = vrot.lane.b32.xlu0 %v2314_v60, %s1885_s13 }
  0x51   : > { %793 = vmatpush.msra.mxu0 %v1718_v61  ;;  %735 = vmatpush.msra.mxu1 %v1705_v0  ;;  %v908_v0 = vld [vmem:[%s3292_s3 + $0xd0] sm:$0xff] }
  0x53   : > { %794 = vmatpush.msra.mxu0 %v1716_v1  ;;  %736 = vmatpush.msra.mxu1 %v1703_v5  ;;  %v909_v1 = vld [vmem:[%s3292_s3 + $0xd8] sm:$0xff]  ;;  %v907_v5 = vld [vmem:[%s3292_s3 + $0xc8] sm:$0xff] }
  0x54   : > { %595 = vmatmul.f32.vlgmr.msrb.gmra.mxu0 %v2209_v23  ;;  %1684 = vmatmul.msk.f32.vlgmr.msrb.gmra.mxu2 %vm281_vm0, %v2203_v21  ;;  %v1704_v21 = vld [vmem:[%s3290_s1 + $0x2f8] sm:$0xff]  ;;  %v1702_v23 = vld [vmem:[%s3290_s1 + $0x2e8] sm:$0xff] }
  0x55   : > { %1682 = vmatmul.msk.f32.gmra.mxu3 %vm281_vm0, %v2342_v6  ;;  %795 = vmatpush.msra.mxu0 %v1714_v7  ;;  %v904_v7 = vld [vmem:[%s3292_s3 + $0xb0] sm:$0xff] }
  0x56   : > { %540 = vmatmul.f32.gmra.mxu1 %v497_v9 }
  0x57   : > { %796 = vmatpush.msra.mxu0 %v1712_v10  ;;  %737 = vmatpush.msra.mxu1 %v1701_v11  ;;  %v902_v11 = vld [vmem:[%s3292_s3 + $0xa0] sm:$0xff] }
  0x59   : > { %797 = vmatpush.msra.mxu0 %v1710_v13  ;;  %738 = vmatpush.msra.mxu1 %v1699_v14  ;;  %v900_v14 = vld [vmem:[%s3292_s3 + $0x90] sm:$0xff] }
  0x5b   : > { %798 = vmatpush.msra.mxu0 %v1708_v17  ;;  %739 = vmatpush.msra.mxu1 %v1697_v18  ;;  %v901_v17 = vld [vmem:[%s3292_s3 + $0x98] sm:$0xff]  ;;  %v898_v18 = vld [vmem:[%s3292_s3 + $0x80] sm:$0xff] }
  0x5c   : > { %598 = vmatmul.f32.gmra.mxu0 %v2249_v37  ;;  %1685 = vmatmul.msk.f32.gmra.mxu2 %vm281_vm0, %v2243_v35  ;;  %v701_v35 = vrot.slane %v2200_v20, 2  ;;  %v705_v20 = vrot.slane %v2240_v34, 2 }
  0x5d   : > { %1683 = vmatmul.msk.f32.gmra.mxu3 %vm281_vm0, %v2326_v63  ;;  %799 = vmatpush.msra.mxu0 %v1706_v19  ;;  %v899_v19 = vld [vmem:[%s3292_s3 + $0x88] sm:$0xff] }
  0x5e   : > { %543 = vmatmul.f32.gmra.mxu1 %v2335_v3  ;;  %v2442_v37 = vsel %vm694_vm2, %v696_v26, %v701_v35  ;;  %v2452_v38 = vsel %vm694_vm2, %v701_v35, %v705_v20  ;;  %v2465_v34 = vsel %vm694_vm2, %v705_v20, %v2458_v39  ;;  %v891_v35 = vld [vmem:[%s3292_s3 + $0x48] sm:$0xff]  ;;  %v888_v20 = vld [vmem:[%s3292_s3 + $0x30] sm:$0xff] }
  0x5f   : > { %800 = vmatpush.msra.mxu0 %v1704_v21  ;;  %740 = vmatpush.msra.mxu1 %v1695_v22  ;;  %v916_v21 = vld [vmem:[%s3292_s3 + $0x110] sm:$0xff]  ;;  %v917_v22 = vld [vmem:[%s3292_s3 + $0x118] sm:$0xff] }
  0x60   : > { %1503 = vrot.lane.b32.xlu1 %v2442_v37, %s1885_s13  ;;  %1507 = vrot.lane.b32.xlu2 %v2452_v38, %s1885_s13 }
  0x61   : > { %801 = vmatpush.msra.mxu0 %v1702_v23  ;;  %741 = vmatpush.msra.mxu1 %v1693_v24  ;;  %v896_v24 = vld [vmem:[%s3292_s3 + $0x70] sm:$0xff] }
  0x62   : > { %1511 = vrot.lane.b32.xlu0 %v2465_v34, %s1885_s13 }
  0x63   : > { %802 = vmatpush.msra.mxu0 %v1700_v27  ;;  %742 = vmatpush.msra.mxu1 %v1691_v28  ;;  %v894_v28 = vld [vmem:[%s3292_s3 + $0x60] sm:$0xff] }
  0x64   : > { %601 = vmatmul.f32.gmra.mxu0 %v2300_v29  ;;  %1686 = vmatmul.msk.f32.gmra.mxu2 %vm281_vm0, %v2294_v54  ;;  %v913_v29 = vld [vmem:[%s3292_s3 + $0xf8] sm:$0xff] }
  0x65   : > { %1688 = vmatmul.msk.f32.vlgmr.msra.gmra.mxu3 %vm281_vm0, %v2326_v63  ;;  %803 = vmatpush.msra.mxu0 %v1698_v30  ;;  %v919_v63 = vld [vmem:[%s3292_s3 + $0x128] sm:$0xff] }
  0x66   : > { %743 = vmatpush.msra.mxu1 %v1689_v56  ;;  %981 = vmatpush.msra.mxu3 %v918_v62  ;;  %v895_v30 = vld [vmem:[%s3292_s3 + $0x68] sm:$0xff]  ;;  %v892_v56 = vld [vmem:[%s3292_s3 + $0x50] sm:$0xff] }
  0x67   : > { %744 = vmatmul.f32.vlgmr.msra.gmra.mxu1 %v2421_v2  ;;  %804 = vmatpush.msra.mxu0 %v1696_v31  ;;  %v893_v31 = vld [vmem:[%s3292_s3 + $0x58] sm:$0xff]  ;;  %v887_v62 = vld [vmem:[%s3292_s3 + $0x28] sm:$0xff] }
  0x68   : > { %936 = vmatpush.msrb.mxu1 %v912_v53  ;;  %1045 = vmatpush.msrb.mxu2 %v919_v63  ;;  %v889_v53 = vld [vmem:[%s3292_s3 + $0x38] sm:$0xff]  ;;  %v884_v63 = vld [vmem:[%s3292_s3 + $0x10] sm:$0xff] }
  0x69   : > { %805 = vmatpush.msra.mxu0 %v1694_v32  ;;  %982 = vmatpush.msra.mxu3 %v916_v21  ;;  %v1780_v21 = vld [vmem:[%s3292_s3 + $0x228] sm:$0xff] }
  0x6a   : > { %937 = vmatpush.msrb.mxu1 %v910_v58  ;;  %1046 = vmatpush.msrb.mxu2 %v917_v22 }
  0x6b   : > { %806 = vmatpush.msra.mxu0 %v1692_v33  ;;  %v890_v33 = vld [vmem:[%s3292_s3 + $0x40] sm:$0xff]  ;;  %1505 = vrot.lane.b32.xlu1 %v2360_v12, %s1885_s13 }
  0x6c   : > { %604 = vmatmul.f32.gmra.mxu0 %v497_v9  ;;  %1687 = vmatmul.msk.f32.gmra.mxu2 %vm281_vm0, %v2342_v6 }
  0x6d   : > { %1729 = vmatmul.msk.f32.vlgmr.msrb.gmra.mxu3 %vm281_vm0, %v2314_v60  ;;  %807 = vmatpush.msra.mxu0 %v1690_v36 }
  0x6e   : > { %938 = vmatpush.msrb.mxu1 %v908_v0  ;;  %v885_v0 = vld [vmem:[%s3292_s3 + $0x18] sm:$0xff]  ;;  %1509 = vrot.lane.b32.xlu2 %v2374_v15, %s1885_s13 }
  0x6f   : > { %747 = vmatmul.f32.gmra.mxu1 %v2442_v37  ;;  %1000 = vmatpush.msrb.mxu0 %v913_v29 }
  0x70   : > { %1517 = vrot.lane.b32.xlu0 %v2470_v40, %s1885_s13 }
  0x71   : > { %1001 = vmatpush.msrb.mxu0 %v911_v59  ;;  %v886_v59 = vld [vmem:[%s3292_s3 + $0x20] sm:$0xff] }
  0x73   : > { %1002 = vmatpush.msrb.mxu0 %v909_v1  ;;  %1513 = vrot.lane.b32.xlu1 %v2477_v41, %s1885_s13 }
  0x74   : > { %607 = vmatmul.f32.gmra.mxu0 %v2335_v3  ;;  %1734 = vmatmul.msk.f32.vlgmr.msra.gmra.mxu2 %vm281_vm0, %v2314_v60  ;;  %v906_v3 = vld [vmem:[%s3292_s3 + $0xc0] sm:$0xff]  ;;  %v1785_v60 = vld [vmem:[%s3292_s3 + $0x250] sm:$0xff] }
  0x75   : > { %1730 = vmatmul.msk.f32.gmra.mxu3 %vm281_vm0, %v2360_v12  ;;  %939 = vmatpush.msrb.mxu1 %v906_v3  ;;  %v914_v3 = vld [vmem:[%s3292_s3 + $0x100] sm:$0xff] }
  0x76   : > { %1003 = vmatpush.msrb.mxu0 %v907_v5  ;;  %v915_v5 = vld [vmem:[%s3292_s3 + $0x108] sm:$0xff]  ;;  %983 = vmatpush.msra.mxu3 %v914_v3  ;;  %v1767_v3 = vld [vmem:[%s3292_s3 + $0x1c0] sm:$0xff] }
  0x77   : > { %750 = vmatmul.f32.gmra.mxu1 %v2452_v38  ;;  %1047 = vmatpush.msrb.mxu2 %v915_v5  ;;  %v1768_v5 = vld [vmem:[%s3292_s3 + $0x1c8] sm:$0xff] }
  0x78   : > { %940 = vmatpush.msrb.mxu1 %v904_v7  ;;  %1004 = vmatpush.msrb.mxu0 %v905_v8  ;;  %v882_v7 = vld [vmem:[%s3292_s3] sm:$0xff]  ;;  %v883_v8 = vld [vmem:[%s3292_s3 + $0x8] sm:$0xff] }
  0x79   : > { %1196 = vmatpush.msrb.mxu3 %v1785_v60  ;;  %1515 = vrot.lane.b32.xlu2 %v2458_v39, %s1885_s13  ;;  %v1762_v60 = vld [vmem:[%s3292_s3 + $0x198] sm:$0xff] }
  0x7a   : > { %941 = vmatpush.msrb.mxu1 %v902_v11  ;;  %1005 = vmatpush.msrb.mxu0 %v903_v43 }
  0x7c   : > { %808 = vmatmul.f32.vlgmr.msra.gmra.mxu0 %v2421_v2  ;;  %1735 = vmatmul.msk.f32.gmra.mxu2 %vm281_vm0, %v2360_v12  ;;  %v1786_v12 = vld [vmem:[%s3292_s3 + $0x258] sm:$0xff] }
  0x7d   : > { %1731 = vmatmul.msk.f32.gmra.mxu3 %vm281_vm0, %v2374_v15  ;;  %942 = vmatpush.msrb.mxu1 %v900_v14 }
  0x7e   : > { %1006 = vmatpush.msrb.mxu0 %v901_v17  ;;  %1260 = vmatpush.msra.mxu2 %v1786_v12 }
  0x7f   : > { %753 = vmatmul.f32.gmra.mxu1 %v2465_v34 }
  0x80   : > { %943 = vmatpush.msrb.mxu1 %v898_v18  ;;  %1007 = vmatpush.msrb.mxu0 %v899_v19  ;;  %v1779_v19 = vld [vmem:[%s3292_s3 + $0x220] sm:$0xff] }
  0x82   : > { %944 = vmatpush.msrb.mxu1 %v896_v24  ;;  %1008 = vmatpush.msrb.mxu0 %v897_v25  ;;  %v1775_v24 = vld [vmem:[%s3292_s3 + $0x200] sm:$0xff]  ;;  %v1776_v25 = vld [vmem:[%s3292_s3 + $0x208] sm:$0xff] }
  0x84   : > { %811 = vmatmul.f32.gmra.mxu0 %v2442_v37  ;;  %1736 = vmatmul.msk.f32.gmra.mxu2 %vm281_vm0, %v2374_v15  ;;  %v1777_v37 = vld [vmem:[%s3292_s3 + $0x210] sm:$0xff]  ;;  %v1774_v15 = vld [vmem:[%s3292_s3 + $0x1f8] sm:$0xff] }
  0x85   : > { %1732 = vmatmul.msk.f32.gmra.mxu3 %vm281_vm0, %v2477_v41  ;;  %945 = vmatpush.msrb.mxu1 %v894_v28  ;;  %v1773_v28 = vld [vmem:[%s3292_s3 + $0x1f0] sm:$0xff] }
  0x86   : > { %1009 = vmatpush.msrb.mxu0 %v895_v30 }
  0x87   : > { %756 = vmatmul.f32.gmra.mxu1 %v2458_v39 }
  0x88   : > { %946 = vmatpush.msrb.mxu1 %v892_v56  ;;  %1010 = vmatpush.msrb.mxu0 %v893_v31  ;;  %v1771_v31 = vld [vmem:[%s3292_s3 + $0x1e0] sm:$0xff] }
  0x8a   : > { %947 = vmatpush.msrb.mxu1 %v890_v33  ;;  %1011 = vmatpush.msrb.mxu0 %v891_v35  ;;  %v1772_v33 = vld [vmem:[%s3292_s3 + $0x1e8] sm:$0xff]  ;;  %v235_v35 = vld [vmem:[%s3291_s2] sm:$0x3] }
  0x8c   : > { %814 = vmatmul.f32.gmra.mxu0 %v2452_v38  ;;  %1737 = vmatmul.msk.f32.gmra.mxu2 %vm281_vm0, %v2477_v41  ;;  %v1778_v38 = vld [vmem:[%s3292_s3 + $0x218] sm:$0xff]  ;;  %v1765_v41 = vld [vmem:[%s3292_s3 + $0x1b0] sm:$0xff] }
  0x8d   : > { %1733 = vmatmul.msk.f32.gmra.mxu3 %vm281_vm0, %v2470_v40  ;;  %948 = vmatpush.msrb.mxu1 %v888_v20 }
  0x8e   : > { %1012 = vmatpush.msrb.mxu0 %v889_v53 }
  0x8f   : > { %949 = vmatpush.msrb.mxu1 %v886_v59  ;;  %v1769_v59 = vld [vmem:[%s3292_s3 + $0x1d0] sm:$0xff] }
  0x90   : > { %1013 = vmatpush.msrb.mxu0 %v887_v62  ;;  %v1770_v62 = vld [vmem:[%s3292_s3 + $0x1d8] sm:$0xff] }
  0x91   : > { %950 = vmatpush.msrb.mxu1 %v884_v63  ;;  %v2745_v63 = vperm.slane %v235_v35, 0 }
  0x92   : > { %1014 = vmatpush.msrb.mxu0 %v885_v0 }
  0x93   : > { %v2490_v57 = vpop.f32.mrf.mxu1  ;;  %951 = vmatpush.msrb.mxu1 %v882_v7 }
  0x94   : > { %817 = vmatmul.f32.gmra.mxu0 %v2465_v34  ;;  %1738 = vmatmul.msk.f32.gmra.mxu2 %vm281_vm0, %v2470_v40 }
  0x95   : > { %1015 = vmatpush.msrb.mxu0 %v883_v8  ;;  %1151 = vmatpush.msra.mxu1 %v1779_v19 }
  0x97   : > { %v2495_v4 = vpop.f32.mrf.mxu3  ;;  %1215 = vmatpush.msra.mxu0 %v1780_v21  ;;  %1152 = vmatpush.msra.mxu1 %v1777_v37  ;;  %v1764_v21 = vld [vmem:[%s3292_s3 + $0x1a8] sm:$0xff] }
  0x99   : > { %1216 = vmatpush.msra.mxu0 %v1778_v38  ;;  %1153 = vmatpush.msra.mxu1 %v1775_v24 }
  0x9b   : > { %v2497_v42 = vpop.f32.mrf.mxu1  ;;  %1217 = vmatpush.msra.mxu0 %v1776_v25  ;;  %1154 = vmatpush.msra.mxu1 %v1773_v28  ;;  %v1761_v25 = vld [vmem:[%s3292_s3 + $0x190] sm:$0xff] }
  0x9c   : > { %820 = vmatmul.f32.gmra.mxu0 %v2458_v39  ;;  %v1783_v39 = vld [vmem:[%s3292_s3 + $0x240] sm:$0xff] }
  0x9d   : > { %1218 = vmatpush.msra.mxu0 %v1774_v15  ;;  %1155 = vmatpush.msra.mxu1 %v1771_v31  ;;  %v1760_v15 = vld [vmem:[%s3292_s3 + $0x188] sm:$0xff]  ;;  %v2798_v31 = vperm.slane %v235_v35, 1 }
  0x9e   : > { %1197 = vmatpush.msrb.mxu3 %v1783_v39 }
  0x9f   : > { %v2500_v44 = vpop.f32.mrf.mxu3  ;;  %1219 = vmatpush.msra.mxu0 %v1772_v33  ;;  %1156 = vmatpush.msra.mxu1 %v1769_v59  ;;  %v1758_v59 = vld [vmem:[%s3292_s3 + $0x178] sm:$0xff] }
  0xa1   : > { %1220 = vmatpush.msra.mxu0 %v1770_v62  ;;  %1157 = vmatpush.msra.mxu1 %v1767_v3 }
  0xa3   : > { %v2502_v45 = vpop.f32.mrf.mxu1  ;;  %1221 = vmatpush.msra.mxu0 %v1768_v5  ;;  %1158 = vmatpush.msra.mxu1 %v1765_v41  ;;  %v1753_v5 = vld [vmem:[%s3292_s3 + $0x150] sm:$0xff] }
  0xa7   : > { %v2504_v46 = vpop.f32.mrf.mxu3 }
  0xa8   : > { %v2506_v47 = vpop.f32.mrf.mxu0 }
  0xa9   : > { %v347_v0 = vadd.f32 %v2490_v57, %v2506_v47  ;;  %v1766_v57 = vld [vmem:[%s3292_s3 + $0x1b8] sm:$0xff] }
  0xaa   : > { %1222 = vmatpush.msra.mxu0 %v1766_v57 }
  0xab   : > { %v2508_v48 = vpop.f32.mrf.mxu1  ;;  %v425_v47 = vadd.f32 %v347_v0, %v2745_v63 }
  0xac   : > { %1223 = vmatpush.msra.mxu0 %v1764_v21 }
  0xae   : > { %1224 = vmatpush.msra.mxu0 %v1762_v60 }
  0xaf   : > { %v2510_v49 = vpop.f32.mrf.mxu2  ;;  %v2512_v50 = vpop.f32.mrf.mxu3 }
  0xb0   : > { %v2514_v51 = vpop.f32.mrf.mxu0  ;;  %v411_v33 = vadd.f32 %v2495_v4, %v2510_v49  ;;  %1225 = vmatpush.msra.mxu0 %v1760_v15 }
  0xb1   : > { %v350_v12 = vadd.f32 %v2497_v42, %v2514_v51  ;;  %v1757_v51 = vld [vmem:[%s3292_s3 + $0x170] sm:$0xff] }
  0xb2   : > { %v426_v62 = vadd.f32 %v411_v33, %v2798_v31  ;;  %1226 = vmatpush.msra.mxu0 %v1758_v59 }
  0xb3   : > { %v2516_v52 = vpop.f32.mrf.mxu1  ;;  %v427_v4 = vadd.f32 %v350_v12, %v2745_v63 }
  0xb7   : > { %v2521_v54 = vpop.f32.mrf.mxu2  ;;  %v2523_v16 = vpop.f32.mrf.mxu3 }
  0xb9   : > { %v2528_v55 = vpop.f32.mrf.mxu0 }
  0xba   : > { %v353_v39 = vadd.f32 %v2502_v45, %v2528_v55 }
  0xbb   : > { %v2536_v61 = vpop.f32.mrf.mxu1 }
  0xbf   : > { %v2556_v6 = vpop.f32.mrf.mxu2 }
  0xc0   : > { %v2564_v9 = vpop.f32.mrf.mxu3 }
  0xc1   : > { %v2566_v10 = vpop.f32.mrf.mxu0  ;;  %v565_v34 = vadd.f32 %v2564_v9, %v2536_v61  ;;  %v1784_v61 = vld [vmem:[%s3292_s3 + $0x248] sm:$0xff]  ;;  %v1763_v9 = vld [vmem:[%s3292_s3 + $0x1a0] sm:$0xff] }
  0xc2   : > { %1261 = vmatpush.msra.mxu2 %v1784_v61  ;;  %1159 = vmatpush.msra.mxu1 %v1763_v9  ;;  %v1751_v9 = vld [vmem:[%s3292_s3 + $0x140] sm:$0xff] }
  0xc3   : > { %v2574_v13 = vpop.f32.mrf.mxu1  ;;  %v643_v37 = vadd.f32 %v565_v34, %v425_v47  ;;  %v1754_v34 = vld [vmem:[%s3292_s3 + $0x158] sm:$0xff] }
  0xc4   : > { %1160 = vmatpush.msra.mxu1 %v1761_v25  ;;  %v1781_v25 = vld [vmem:[%s3292_s3 + $0x230] sm:$0xff] }
  0xc5   : > { %1198 = vmatpush.msrb.mxu3 %v1781_v25 }
  0xc7   : > { %v2594_v23 = vpop.f32.mrf.mxu2 }
  0xc8   : > { %v2602_v26 = vpop.f32.mrf.mxu3 }
  0xc9   : > { %v2604_v27 = vpop.f32.mrf.mxu0  ;;  %v568_v40 = vadd.f32 %v2602_v26, %v2574_v13  ;;  %v1755_v13 = vld [vmem:[%s3292_s3 + $0x160] sm:$0xff]  ;;  %v1756_v26 = vld [vmem:[%s3292_s3 + $0x168] sm:$0xff] }
  0xca   : > { %1227 = vmatpush.msra.mxu0 %v1756_v26  ;;  %v359_v25 = vadd.f32 %v2516_v52, %v2604_v27 }
  0xcb   : > { %v2618_v32 = vpop.f32.mrf.mxu1 }
  0xcc   : > { %1228 = vmatpush.msra.mxu0 %v1754_v34  ;;  %v1834_v34 = vld [vmem:[%s3292_s3 + $0x388] sm:$0xff] }
  0xcf   : > { %v2626_v36 = vpop.f32.mrf.mxu2 }
  0xd0   : > { %v2634_v29 = vpop.f32.mrf.mxu3 }
  0xd1   : > { %v2636_v58 = vpop.f32.mrf.mxu0 }
  0xd3   : > { %v2650_v1 = vpop.f32.mrf.mxu1 }
  0xd7   : > { %v2664_v11 = vpop.f32.mrf.mxu2 }
  0xd8   : > { %v2666_v43 = vpop.f32.mrf.mxu3  ;;  %v629_v35 = vadd.f32 %v2664_v11, %v2636_v58  ;;  %v645_v58 = vadd.f32 %v568_v40, %v427_v4 }
  0xd9   : > { %v2668_v14 = vpop.f32.mrf.mxu0 }
  0xda   : > { %v644_v41 = vadd.f32 %v629_v35, %v426_v62  ;;  %v356_v35 = vadd.f32 %v2508_v48, %v2566_v10  ;;  %v574_v62 = vadd.f32 %v2666_v43, %v2650_v1 }
  0xdb   : > { %v2676_v17 = vpop.f32.mrf.mxu1 }
  0xdf   : > { %v2678_v18 = vpop.f32.mrf.mxu2 }
  0xe0   : > { %v2686_v22 = vpop.f32.mrf.mxu3  ;;  %v632_v45 = vadd.f32 %v2678_v18, %v2668_v14  ;;  %v1750_v14 = vld [vmem:[%s3292_s3 + $0x138] sm:$0xff] }
  0xe1   : > { %v2688_v2 = vpop.f32.mrf.mxu0 }
  0xe4   : > { %v745_v30 = vpop.f32.mrf.mxu1 }
  0xe7   : > { %v2720_v56 = vpop.f32.mrf.mxu2 }
  0xe8   : > { %v2731_v20 = vpop.f32.mrf.mxu3 }
  0xe9   : > { %v2733_v53 = vpop.f32.mrf.mxu0 }
  0xec   : > { %v748_v19 = vpop.f32.mrf.mxu1 }
  0xef   : > { %v2766_v7 = vpop.f32.mrf.mxu2 }
  0xf0   : > { %v777_v8 = vpop.f32.mrf.mxu3 }
  0xf1   : > { %v778_v38 = vadd.f32 %v777_v8, %v745_v30  ;;  %v2780_v24 = vpop.f32.mrf.mxu0  ;;  %v1759_v30 = vld [vmem:[%s3292_s3 + $0x180] sm:$0xff]  ;;  %v1752_v8 = vld [vmem:[%s3292_s3 + $0x148] sm:$0xff] }
  0xf2   : > { %1161 = vmatpush.msra.mxu1 %v1759_v30  ;;  %1229 = vmatpush.msra.mxu0 %v1752_v8 }
  0xf3   : > { %v856_v28 = vadd.f32 %v778_v38, %v643_v37  ;;  %v571_v37 = vadd.f32 %v2634_v29, %v2618_v32  ;;  %v1749_v29 = vld [vmem:[%s3292_s3 + $0x130] sm:$0xff] }
  0xf4   : > { %1162 = vmatpush.msra.mxu1 %v1757_v51  ;;  %v751_v47 = vpop.f32.mrf.mxu1  ;;  %1230 = vmatpush.msra.mxu0 %v1750_v14 }
  0xf5   : > { %v2804_v42 = vmax.f32 %v856_v28, 0.0 }
  0xf6   : > { %1163 = vmatpush.msra.mxu1 %v1755_v13 }
  0xf7   : > { %952 = vmatmul.f32.vlgmr.msrb.gmra.mxu1 %v2804_v42  ;;  %1016 = vmatmul.f32.vlgmr.msrb.gmra.mxu0 %v2804_v42  ;;  %v841_v49 = vpop.f32.mrf.mxu2  ;;  %v1328_v18 = vrot.slane %v2804_v42, 2 }
  0xf8   : > { %v780_v0 = vpop.f32.mrf.mxu3  ;;  %1164 = vmatpush.msra.mxu1 %v1753_v5  ;;  %v1833_v5 = vld [vmem:[%s3292_s3 + $0x380] sm:$0xff] }
  0xf9   : > { %v781_v11 = vadd.f32 %v780_v0, %v748_v19  ;;  %v809_v3 = vpop.f32.mrf.mxu0  ;;  %v414_v19 = vadd.f32 %v2500_v44, %v2521_v54  ;;  %v1782_v44 = vld [vmem:[%s3292_s3 + $0x238] sm:$0xff]  ;;  %v429_v54 = vadd.f32 %v353_v39, %v2745_v63 }
  0xfa   : > { %v842_v57 = vadd.f32 %v841_v49, %v809_v3  ;;  %1165 = vmatpush.msra.mxu1 %v1751_v9  ;;  %1262 = vmatpush.msra.mxu2 %v1782_v44  ;;  %v417_v49 = vadd.f32 %v2504_v46, %v2556_v6  ;;  %v431_v3 = vadd.f32 %v356_v35, %v2745_v63  ;;  %v1827_v46 = vld [vmem:[%s3292_s3 + $0x350] sm:$0xff]  ;;  %v2894_v6 = vld [vmem:[%s3292_s3 + $0x358] sm:$0xff] }
  0xfb   : > { %v858_v61 = vadd.f32 %v781_v11, %v645_v58  ;;  %v428_v12 = vadd.f32 %v414_v19, %v2798_v31  ;;  %v647_v30 = vadd.f32 %v571_v37, %v429_v54  ;;  %v635_v58 = vadd.f32 %v2720_v56, %v2688_v2  ;;  %1425 = vmatpush.msrb.mxu0 %v2894_v6  ;;  %v2928_v37 = vld [vmem:[%s3292_s3 + $0x338] sm:$0xff] }
  0xfc   : > { %v857_v21 = vadd.f32 %v842_v57, %v644_v41  ;;  %1166 = vmatpush.msra.mxu1 %v1749_v29  ;;  %v754_v26 = vpop.f32.mrf.mxu1  ;;  %v430_v1 = vadd.f32 %v417_v49, %v2798_v31  ;;  %v1825_v41 = vld [vmem:[%s3292_s3 + $0x340] sm:$0xff]  ;;  %v649_v57 = vadd.f32 %v574_v62, %v431_v3  ;;  %v420_v54 = vadd.f32 %v2512_v50, %v2594_v23  ;;  %v2953_v50 = vld [vmem:[%s3292_s3 + $0x328] sm:$0xff] }
  0xfd   : > { %v2842_v38 = vmax.f32 %v858_v61, 0.0  ;;  %v646_v51 = vadd.f32 %v632_v45, %v428_v12  ;;  %v2917_v61 = vld [vmem:[%s3292_s3 + $0x348] sm:$0xff]  ;;  %v577_v29 = vadd.f32 %v2686_v22, %v2676_v17  ;;  %v433_v23 = vadd.f32 %v359_v25, %v2745_v63  ;;  %v1819_v63 = vld [vmem:[%s3292_s3 + $0x310] sm:$0xff]  ;;  %v2970_v12 = vld [vmem:[%s3292_s3 + $0x318] sm:$0xff] }
  0xfe   : > { %v2846_v55 = vmax.f32 %v857_v21, 0.0  ;;  %1361 = vmatpush.msrb.mxu1 %v1827_v46  ;;  %v648_v8 = vadd.f32 %v635_v58, %v430_v1  ;;  %v1823_v21 = vld [vmem:[%s3292_s3 + $0x330] sm:$0xff]  ;;  %1426 = vmatpush.msrb.mxu0 %v2917_v61  ;;  %v2983_v49 = vld [vmem:[%s3292_s3 + $0x308] sm:$0xff]  ;;  %v423_v62 = vadd.f32 %v2523_v16, %v2626_v36  ;;  %v3004_v1 = vld [vmem:[%s3292_s3 + $0x2f8] sm:$0xff] }
  0xff   : > { %955 = vmatmul.f32.gmra.mxu1 %v2842_v38  ;;  %1019 = vmatmul.f32.gmra.mxu0 %v2842_v38  ;;  %v844_v32 = vpop.f32.mrf.mxu2  ;;  %v1329_v60 = vrot.slane %v2842_v38, 2  ;;  %v1831_v36 = vld [vmem:[%s3292_s3 + $0x370] sm:$0xff] }
 0x100   : > { %v783_v28 = vpop.f32.mrf.mxu3  ;;  %1739 = vmatmul.msk.f32.vlgmr.msra.gmra.mxu3 %vm920_vm3, %v2846_v55  ;;  %1744 = vmatmul.msk.f32.vlgmr.msrb.gmra.mxu2 %vm920_vm3, %v2846_v55  ;;  %v1331_v43 = vrot.slane %v2846_v55, 2 }
 0x101   : > { %v784_v15 = vadd.f32 %v783_v28, %v751_v47  ;;  %v812_v33 = vpop.f32.mrf.mxu0  ;;  %v2871_v40 = vsel %vm694_vm2, %v1328_v18, %v1329_v60  ;;  %1406 = vmatpush.msra.mxu3 %v1833_v5  ;;  %1470 = vmatpush.msrb.mxu2 %v1834_v34  ;;  %v638_v18 = vadd.f32 %v2766_v7, %v2733_v53 }
 0x102   : > { %v845_v59 = vadd.f32 %v844_v32, %v812_v33  ;;  %1362 = vmatpush.msrb.mxu1 %v1825_v41  ;;  %1427 = vmatpush.msrb.mxu0 %v2928_v37  ;;  %v432_v53 = vadd.f32 %v420_v54, %v2798_v31  ;;  %v1809_v54 = vld [vmem:[%s3292_s3 + $0x2c0] sm:$0xff] }
 0x103   : > { %v860_v4 = vadd.f32 %v784_v15, %v647_v30  ;;  %v651_v30 = vadd.f32 %v577_v29, %v433_v23  ;;  %1407 = vmatpush.msra.mxu3 %v1831_v36  ;;  %v3072_v29 = vld [vmem:[%s3292_s3 + $0x2b8] sm:$0xff] }
 0x104   : > { %v859_v13 = vadd.f32 %v845_v59, %v646_v51  ;;  %1363 = vmatpush.msrb.mxu1 %v1823_v21  ;;  %v757_v27 = vpop.f32.mrf.mxu1  ;;  %1428 = vmatpush.msrb.mxu0 %v2953_v50  ;;  %v650_v59 = vadd.f32 %v638_v18, %v432_v53 }
 0x105   : > { %v2879_v0 = vmax.f32 %v860_v4, 0.0  ;;  %v1817_v4 = vld [vmem:[%s3292_s3 + $0x300] sm:$0xff] }
 0x106   : > { %v2883_v11 = vmax.f32 %v859_v13, 0.0  ;;  %1429 = vmatpush.msrb.mxu0 %v2970_v12 }
 0x107   : > { %958 = vmatmul.f32.gmra.mxu1 %v2879_v0  ;;  %1022 = vmatmul.f32.gmra.mxu0 %v2879_v0  ;;  %v847_v48 = vpop.f32.mrf.mxu2  ;;  %v1334_v10 = vrot.slane %v2879_v0, 2  ;;  %v1124_v23 = vrot.slane %v2879_v0, 1  ;;  %v1121_v0 = vrot.slane %v2846_v55, 1  ;;  %v1801_v55 = vld [vmem:[%s3292_s3 + $0x280] sm:$0xff] }
 0x108   : > { %v1332_v2 = vrot.slane %v2883_v11, 2  ;;  %v786_v56 = vpop.f32.mrf.mxu3  ;;  %1740 = vmatmul.msk.f32.gmra.mxu3 %vm920_vm3, %v2883_v11  ;;  %1745 = vmatmul.msk.f32.gmra.mxu2 %vm920_vm3, %v2883_v11 }
 0x109   : > { %v787_v47 = vadd.f32 %v786_v56, %v754_v26  ;;  %v815_v39 = vpop.f32.mrf.mxu0  ;;  %v2920_v9 = vsel %vm694_vm2, %v1329_v60, %v1334_v10  ;;  %v1821_v60 = vld [vmem:[%s3292_s3 + $0x320] sm:$0xff]  ;;  %1430 = vmatpush.msrb.mxu0 %v2983_v49  ;;  %v3028_v56 = vld [vmem:[%s3292_s3 + $0x2e8] sm:$0xff] }
 0x10a   : > { %v848_v19 = vadd.f32 %v847_v48, %v815_v39  ;;  %v2931_v45 = vsel %vm694_vm2, %v1331_v43, %v1332_v2  ;;  %1364 = vmatpush.msrb.mxu1 %v1821_v60  ;;  %v641_v48 = vadd.f32 %v2731_v20, %v2780_v24  ;;  %v1832_v20 = vld [vmem:[%s3292_s3 + $0x378] sm:$0xff]  ;;  %v434_v43 = vadd.f32 %v423_v62, %v2798_v31  ;;  %v1811_v39 = vld [vmem:[%s3292_s3 + $0x2d0] sm:$0xff]  ;;  %v1830_v60 = vld [vmem:[%s3292_s3 + $0x368] sm:$0xff] }
 0x10b   : > { %v862_v44 = vadd.f32 %v787_v47, %v649_v57  ;;  %1431 = vmatpush.msrb.mxu0 %v3004_v1  ;;  %v1119_v47 = vrot.slane %v2842_v38, 1  ;;  %1471 = vmatpush.msrb.mxu2 %v1832_v20  ;;  %v1118_v38 = vrot.slane %v2804_v42, 1  ;;  %v1807_v42 = vld [vmem:[%s3292_s3 + $0x2b0] sm:$0xff]  ;;  %v1798_v62 = vld [vmem:[%s3292_s3 + $0x268] sm:$0xff] }
 0x10c   : > { %v861_v32 = vadd.f32 %v848_v19, %v648_v8  ;;  %1365 = vmatpush.msrb.mxu1 %v1819_v63  ;;  %v652_v41 = vadd.f32 %v641_v48, %v434_v43  ;;  %v3043_v8 = vld [vmem:[%s3292_s3 + $0x2d8] sm:$0xff] }
 0x10d   : > { %v2940_v14 = vmax.f32 %v862_v44, 0.0  ;;  %1432 = vmatpush.msrb.mxu0 %v3028_v56  ;;  %v1120_v44 = vsel %vm481_vm1, %v1118_v38, %v1119_v47  ;;  %1472 = vmatpush.msrb.mxu2 %v1830_v60  ;;  %v1125_v63 = vsel %vm481_vm1, %v1119_v47, %v1124_v23 }
 0x10e   : > { %v2945_v52 = vmax.f32 %v861_v32, 0.0  ;;  %1366 = vmatpush.msrb.mxu1 %v1817_v4  ;;  %v3060_v32 = vld [vmem:[%s3292_s3 + $0x2c8] sm:$0xff] }
 0x10f   : > { %961 = vmatmul.f32.gmra.mxu1 %v2940_v14  ;;  %1025 = vmatmul.f32.gmra.mxu0 %v2940_v14  ;;  %v850_v17 = vpop.f32.mrf.mxu2  ;;  %v1338_v22 = vrot.slane %v2940_v14, 2 }
 0x110   : > { %v789_v7 = vpop.f32.mrf.mxu3  ;;  %1741 = vmatmul.msk.f32.gmra.mxu3 %vm920_vm3, %v2945_v52  ;;  %1746 = vmatmul.msk.f32.gmra.mxu2 %vm920_vm3, %v2945_v52  ;;  %v1336_v28 = vrot.slane %v2945_v52, 2  ;;  %v1126_v4 = vrot.slane %v2945_v52, 1 }
 0x111   : > { %v790_v15 = vadd.f32 %v789_v7, %v757_v27  ;;  %v818_v33 = vpop.f32.mrf.mxu0  ;;  %v2975_v51 = vsel %vm694_vm2, %v1334_v10, %v1338_v22  ;;  %v1815_v10 = vld [vmem:[%s3292_s3 + $0x2f0] sm:$0xff]  ;;  %1433 = vmatpush.msrb.mxu0 %v3043_v8  ;;  %v1829_v27 = vld [vmem:[%s3292_s3 + $0x360] sm:$0xff]  ;;  %v1122_v7 = vrot.slane %v2883_v11, 1 }
 0x112   : > { %v851_v35 = vadd.f32 %v850_v17, %v818_v33  ;;  %v2986_v13 = vsel %vm694_vm2, %v1332_v2, %v1336_v28  ;;  %v1813_v2 = vld [vmem:[%s3292_s3 + $0x2e0] sm:$0xff]  ;;  %1367 = vmatpush.msrb.mxu1 %v1815_v10  ;;  %1408 = vmatpush.msra.mxu3 %v1829_v27  ;;  %v1128_v33 = vrot.slane %v2940_v14, 1 }
 0x113   : > { %v864_v26 = vadd.f32 %v790_v15, %v651_v30  ;;  %1434 = vmatpush.msrb.mxu0 %v3060_v32  ;;  %v1805_v17 = vld [vmem:[%s3292_s3 + $0x2a0] sm:$0xff]  ;;  %v1804_v30 = vld [vmem:[%s3292_s3 + $0x298] sm:$0xff]  ;;  %v1123_v11 = vsel %vm481_vm1, %v1121_v0, %v1122_v7  ;;  %v1802_v15 = vld [vmem:[%s3292_s3 + $0x288] sm:$0xff] }
 0x114   : > { %v863_v58 = vadd.f32 %v851_v35, %v650_v59  ;;  %1368 = vmatpush.msrb.mxu1 %v1813_v2  ;;  %v1799_v59 = vld [vmem:[%s3292_s3 + $0x270] sm:$0xff]  ;;  %v1800_v35 = vld [vmem:[%s3292_s3 + $0x278] sm:$0xff]  ;;  %v1797_v14 = vld [vmem:[%s3292_s3 + $0x260] sm:$0xff] }
 0x115   : > { %v2991_v3 = vmax.f32 %v864_v26, 0.0  ;;  %1435 = vmatpush.msrb.mxu0 %v3072_v29  ;;  %v1129_v26 = vsel %vm481_vm1, %v1124_v23, %v1128_v33 }
 0x116   : > { %v2996_v46 = vmax.f32 %v863_v58, 0.0  ;;  %1369 = vmatpush.msrb.mxu1 %v1811_v39  ;;  %v1127_v58 = vsel %vm481_vm1, %v1122_v7, %v1126_v4 }
 0x117   : > { %964 = vmatmul.f32.gmra.mxu1 %v2991_v3  ;;  %1028 = vmatmul.f32.gmra.mxu0 %v2991_v3  ;;  %v853_v16 = vpop.f32.mrf.mxu2  ;;  %v3015_v24 = vrot.slane %v2991_v3, 2  ;;  %v1132_v52 = vrot.slane %v2991_v3, 1 }
 0x118   : > { %1742 = vmatmul.msk.f32.gmra.mxu3 %vm920_vm3, %v2996_v46  ;;  %1747 = vmatmul.msk.f32.gmra.mxu2 %vm920_vm3, %v2996_v46  ;;  %v1340_v5 = vrot.slane %v2996_v46, 2  ;;  %v1130_v48 = vrot.slane %v2996_v46, 1 }
 0x119   : > { %v821_v34 = vpop.f32.mrf.mxu0  ;;  %v3034_v31 = vsel %vm694_vm2, %v1338_v22, %v3015_v24  ;;  %1370 = vmatpush.msrb.mxu1 %v1809_v54  ;;  %v3091_v22 = vld [vmem:[%s3292_s3 + $0x2a8] sm:$0xff]  ;;  %v1133_v10 = vsel %vm481_vm1, %v1128_v33, %v1132_v52  ;;  %v876_v33 = vld [vmem:[%s3293_s4] sm:$0x3] }
 0x11a   : > { %v854_v57 = vadd.f32 %v853_v16, %v821_v34  ;;  %v3046_v19 = vsel %vm694_vm2, %v1336_v28, %v1340_v5  ;;  %1436 = vmatpush.msrb.mxu0 %v3091_v22  ;;  %v1803_v28 = vld [vmem:[%s3292_s3 + $0x290] sm:$0xff]  ;;  %v1131_v16 = vsel %vm481_vm1, %v1126_v4, %v1130_v48 }
 0x11b   : > { %1371 = vmatpush.msrb.mxu1 %v1807_v42 }
 0x11c   : > { %v865_v21 = vadd.f32 %v854_v57, %v652_v41  ;;  %1437 = vmatpush.msrb.mxu0 %v1804_v30 }
 0x11d   : > { %1372 = vmatpush.msrb.mxu1 %v1805_v17 }
 0x11e   : > { %v3051_v25 = vmax.f32 %v865_v21, 0.0  ;;  %1438 = vmatpush.msrb.mxu0 %v1802_v15 }
 0x11f   : > { %1167 = vmatmul.f32.vlgmr.msra.gmra.mxu1 %v1120_v44  ;;  %1231 = vmatmul.f32.vlgmr.msra.gmra.mxu0 %v1120_v44 }
 0x120   : > { %1743 = vmatmul.msk.f32.gmra.mxu3 %vm920_vm3, %v3051_v25  ;;  %1748 = vmatmul.msk.f32.gmra.mxu2 %vm920_vm3, %v3051_v25  ;;  %v3075_v18 = vrot.slane %v3051_v25, 2 }
 0x121   : > { %1373 = vmatpush.msrb.mxu1 %v1803_v28  ;;  %1439 = vmatpush.msrb.mxu0 %v1800_v35 }
 0x122   : > { %v3095_v53 = vsel %vm694_vm2, %v1340_v5, %v3075_v18 }
 0x123   : > { %1374 = vmatpush.msrb.mxu1 %v1801_v55  ;;  %1440 = vmatpush.msrb.mxu0 %v1798_v62 }
 0x125   : > { %1375 = vmatpush.msrb.mxu1 %v1799_v59 }
 0x127   : > { %1170 = vmatmul.f32.gmra.mxu1 %v1125_v63  ;;  %1234 = vmatmul.f32.gmra.mxu0 %v1125_v63 }
 0x128   : > { %1787 = vmatmul.msk.f32.vlgmr.msrb.gmra.mxu3 %vm920_vm3, %v1123_v11  ;;  %1792 = vmatmul.msk.f32.vlgmr.msra.gmra.mxu2 %vm920_vm3, %v1123_v11 }
 0x129   : > { %1376 = vmatpush.msrb.mxu1 %v1797_v14  ;;  %v3228_v14 = vperm.slane %v876_v33, 0 }
 0x12b   : > { %1851 = vmatpush.msra.mxu1 %v2894_v6  ;;  %v1134_v6 = vrot.slane %v3051_v25, 1 }
 0x12d   : > { %1852 = vmatpush.msra.mxu1 %v2917_v61  ;;  %v1135_v61 = vsel %vm481_vm1, %v1130_v48, %v1134_v6  ;;  %v1504_v48 = vpop.permute.xlu1 %1503 }
 0x12f   : > { %1173 = vmatmul.f32.gmra.mxu1 %v1129_v26  ;;  %1237 = vmatmul.f32.gmra.mxu0 %v1129_v26 }
 0x130   : > { %1788 = vmatmul.msk.f32.gmra.mxu3 %vm920_vm3, %v1127_v58  ;;  %1793 = vmatmul.msk.f32.gmra.mxu2 %vm920_vm3, %v1127_v58 }
 0x131   : > { %1853 = vmatpush.msra.mxu1 %v2928_v37 }
 0x133   : > { %1854 = vmatpush.msra.mxu1 %v2953_v50 }
 0x135   : > { %1855 = vmatpush.msra.mxu1 %v2970_v12 }
 0x137   : > { %1176 = vmatmul.f32.gmra.mxu1 %v1133_v10  ;;  %1240 = vmatmul.f32.gmra.mxu0 %v1133_v10 }
 0x138   : > { %1789 = vmatmul.msk.f32.gmra.mxu3 %vm920_vm3, %v1131_v16  ;;  %1794 = vmatmul.msk.f32.gmra.mxu2 %vm920_vm3, %v1131_v16 }
 0x139   : > { %1856 = vmatpush.msra.mxu1 %v2983_v49 }
 0x13b   : > { %1857 = vmatpush.msra.mxu1 %v3004_v1 }
 0x13d   : > { %1858 = vmatpush.msra.mxu1 %v3028_v56 }
 0x13f   : > { %1179 = vmatmul.f32.gmra.mxu1 %v1132_v52  ;;  %1243 = vmatmul.f32.gmra.mxu0 %v1132_v52 }
 0x140   : > { %1790 = vmatmul.msk.f32.gmra.mxu3 %vm920_vm3, %v1135_v61  ;;  %1795 = vmatmul.msk.f32.gmra.mxu2 %vm920_vm3, %v1135_v61 }
 0x141   : > { %1859 = vmatpush.msra.mxu1 %v3043_v8 }
 0x143   : > { %1860 = vmatpush.msra.mxu1 %v3060_v32 }
 0x145   : > { %1861 = vmatpush.msra.mxu1 %v3072_v29 }
 0x147   : > { %1377 = vmatmul.f32.vlgmr.msrb.gmra.mxu1 %v2871_v40  ;;  %1441 = vmatmul.f32.vlgmr.msrb.gmra.mxu0 %v2871_v40 }
 0x148   : > { %1791 = vmatmul.msk.f32.gmra.mxu3 %vm920_vm3, %v1134_v6  ;;  %1796 = vmatmul.msk.f32.gmra.mxu2 %vm920_vm3, %v1134_v6 }
 0x149   : > { %1862 = vmatpush.msra.mxu1 %v3091_v22 }
 0x14b   : > { %1863 = vmatpush.msra.mxu1 %v1804_v30 }
 0x14d   : > { %1864 = vmatpush.msra.mxu1 %v1802_v15  ;;  %v1500_v15 = vpop.permute.xlu0 %1499 }
 0x14f   : > { %1380 = vmatmul.f32.gmra.mxu1 %v2920_v9  ;;  %1444 = vmatmul.f32.gmra.mxu0 %v2920_v9 }
 0x150   : > { %1835 = vmatmul.msk.f32.vlgmr.msra.gmra.mxu3 %vm920_vm3, %v2931_v45  ;;  %1840 = vmatmul.msk.f32.vlgmr.msrb.gmra.mxu2 %vm920_vm3, %v2931_v45 }
 0x151   : > { %1865 = vmatpush.msra.mxu1 %v1800_v35 }
 0x153   : > { %1866 = vmatpush.msra.mxu1 %v1798_v62  ;;  %v3230_v62 = vperm.slane %v876_v33, 1 }
 0x155   : > { %v1502_v6 = vpop.permute.xlu0 %1501 }
 0x157   : > { %1383 = vmatmul.f32.gmra.mxu1 %v2975_v51  ;;  %1447 = vmatmul.f32.gmra.mxu0 %v2975_v51 }
 0x158   : > { %1836 = vmatmul.msk.f32.gmra.mxu3 %vm920_vm3, %v2986_v13  ;;  %1841 = vmatmul.msk.f32.gmra.mxu2 %vm920_vm3, %v2986_v13 }
 0x15f   : > { %1386 = vmatmul.f32.gmra.mxu1 %v3034_v31  ;;  %1450 = vmatmul.f32.gmra.mxu0 %v3034_v31 }
 0x160   : > { %1837 = vmatmul.msk.f32.gmra.mxu3 %vm920_vm3, %v3046_v19  ;;  %1842 = vmatmul.msk.f32.gmra.mxu2 %vm920_vm3, %v3046_v19 }
 0x167   : > { %1389 = vmatmul.f32.gmra.mxu1 %v3015_v24 }
 0x168   : > { %1838 = vmatmul.msk.f32.gmra.mxu3 %vm920_vm3, %v3095_v53  ;;  %1843 = vmatmul.msk.f32.gmra.mxu2 %vm920_vm3, %v3095_v53 }
 0x16f   : > { %1453 = vmatmul.f32.vlgmr.msra.gmra.mxu1 %v3015_v24 }
 0x170   : > { %1839 = vmatmul.msk.f32.gmra.mxu3 %vm920_vm3, %v3075_v18  ;;  %1844 = vmatmul.msk.f32.gmra.mxu2 %vm920_vm3, %v3075_v18 }
 0x174   : > { %v953_v40 = vpop.f32.mrf.mxu1  ;;  %v1017_v9 = vpop.f32.mrf.mxu0 }
 0x17c   : > { %v956_v37 = vpop.f32.mrf.mxu1  ;;  %v1020_v45 = vpop.f32.mrf.mxu0 }
 0x183   : > { %v985_v50 = vpop.f32.mrf.mxu3  ;;  %v1049_v12 = vpop.f32.mrf.mxu2 }
 0x184   : > { %v959_v51 = vpop.f32.mrf.mxu1  ;;  %v986_v49 = vadd.f32 %v985_v50, %v953_v40  ;;  %v1023_v13 = vpop.f32.mrf.mxu0  ;;  %v1050_v3 = vadd.f32 %v1049_v12, %v1017_v9 }
 0x186   : > { %v1064_v10 = vadd.f32 %v986_v49, %v3228_v14  ;;  %v1065_v16 = vadd.f32 %v1050_v3, %v3230_v62  ;;  %v1508_v3 = vpop.permute.xlu2 %1507 }
 0x18b   : > { %v988_v46 = vpop.f32.mrf.mxu3  ;;  %v1052_v1 = vpop.f32.mrf.mxu2 }
 0x18c   : > { %v962_v36 = vpop.f32.mrf.mxu1  ;;  %v3189_v20 = vadd.f32 %v988_v46, %v956_v37  ;;  %v1026_v24 = vpop.f32.mrf.mxu0  ;;  %v3191_v43 = vadd.f32 %v1052_v1, %v1020_v45 }
 0x193   : > { %v991_v2 = vpop.f32.mrf.mxu3  ;;  %v1055_v56 = vpop.f32.mrf.mxu2 }
 0x194   : > { %v965_v5 = vpop.f32.mrf.mxu1  ;;  %v3193_v34 = vadd.f32 %v991_v2, %v959_v51  ;;  %v1029_v31 = vpop.f32.mrf.mxu0  ;;  %v3195_v41 = vadd.f32 %v1055_v56, %v1023_v13  ;;  %v1520_v51 = vsel %vm1519_vm4, %v1500_v15, %v1502_v6  ;;  %v1066_v56 = vadd.f32 %v3189_v20, %v3228_v14 }
 0x19b   : > { %v994_v57 = vpop.f32.mrf.mxu3  ;;  %v1058_v47 = vpop.f32.mrf.mxu2 }
 0x19c   : > { %v3197_v39 = vadd.f32 %v994_v57, %v962_v36  ;;  %v3199_v8 = vadd.f32 %v1058_v47, %v1026_v24  ;;  %v1168_v19 = vpop.f32.mrf.mxu1  ;;  %v1232_v21 = vpop.f32.mrf.mxu0 }
 0x19d   : > { %v1506_v47 = vpop.permute.xlu1 %1505 }
 0x1a3   : > { %v997_v38 = vpop.f32.mrf.mxu3  ;;  %v1061_v25 = vpop.f32.mrf.mxu2 }
 0x1a4   : > { %v3201_v44 = vadd.f32 %v997_v38, %v965_v5  ;;  %v3203_v54 = vadd.f32 %v1061_v25, %v1029_v31  ;;  %v1171_v32 = vpop.f32.mrf.mxu1  ;;  %v1235_v42 = vpop.f32.mrf.mxu0  ;;  %v1067_v5 = vadd.f32 %v3191_v43, %v3230_v62 }
 0x1ab   : > { %v1200_v29 = vpop.f32.mrf.mxu3  ;;  %v1264_v18 = vpop.f32.mrf.mxu2 }
 0x1ac   : > { %v3205_v27 = vpop.f32.mrf.mxu1  ;;  %v3207_v60 = vpop.f32.mrf.mxu0  ;;  %v1201_v58 = vadd.f32 %v1200_v29, %v1168_v19  ;;  %v1265_v52 = vadd.f32 %v1264_v18, %v1232_v21 }
 0x1ae   : > { %v1279_v9 = vadd.f32 %v1201_v58, %v1064_v10  ;;  %v1280_v37 = vadd.f32 %v1265_v52, %v1065_v16 }
 0x1b3   : > { %v1203_v23 = vpop.f32.mrf.mxu3  ;;  %v1267_v17 = vpop.f32.mrf.mxu2 }
 0x1b4   : > { %v3209_v22 = vpop.f32.mrf.mxu1  ;;  %v3211_v53 = vpop.f32.mrf.mxu0  ;;  %v1204_v36 = vadd.f32 %v1203_v23, %v1171_v32  ;;  %v1268_v24 = vadd.f32 %v1267_v17, %v1235_v42  ;;  %v1521_v42 = vsel %vm1519_vm4, %v1504_v48, %v1506_v47 }
 0x1b5   : > { %v1510_v48 = vpop.permute.xlu2 %1509 }
 0x1b6   : > { %v1281_v38 = vadd.f32 %v1204_v36, %v1066_v56  ;;  %v1282_v25 = vadd.f32 %v1268_v24, %v1067_v5  ;;  %v1514_v36 = vpop.permute.xlu1 %1513 }
 0x1bb   : > { %v1206_v7 = vpop.f32.mrf.mxu3  ;;  %v1270_v0 = vpop.f32.mrf.mxu2 }
 0x1bc   : > { %v3213_v63 = vpop.f32.mrf.mxu1  ;;  %v3215_v28 = vpop.f32.mrf.mxu0  ;;  %v1207_v43 = vadd.f32 %v1206_v7, %v3205_v27  ;;  %v1271_v17 = vadd.f32 %v1270_v0, %v3207_v60  ;;  %v1522_v7 = vsel %vm1519_vm4, %v1508_v3, %v1510_v48 }
 0x1c3   : > { %v3217_v30 = vpop.f32.mrf.mxu3  ;;  %v3219_v11 = vpop.f32.mrf.mxu2 }
 0x1c4   : > { %v1378_v55 = vpop.f32.mrf.mxu1  ;;  %v1442_v4 = vpop.f32.mrf.mxu0 }
 0x1cb   : > { %v3224_v59 = vpop.f32.mrf.mxu3  ;;  %v3226_v35 = vpop.f32.mrf.mxu2 }
 0x1cc   : > { %v1381_v26 = vpop.f32.mrf.mxu1  ;;  %v1445_v13 = vpop.f32.mrf.mxu0  ;;  %v1277_v56 = vadd.f32 %v3226_v35, %v3215_v28 }
 0x1d3   : > { %v1410_v61 = vpop.f32.mrf.mxu3  ;;  %v1474_v40 = vpop.f32.mrf.mxu2 }
 0x1d4   : > { %v1384_v45 = vpop.f32.mrf.mxu1  ;;  %v1411_v50 = vadd.f32 %v1410_v61, %v1378_v55  ;;  %v1475_v12 = vadd.f32 %v1474_v40, %v1442_v4  ;;  %v1448_v55 = vpop.f32.mrf.mxu0  ;;  %v1068_v4 = vadd.f32 %v3193_v34, %v3228_v14  ;;  %v1210_v34 = vadd.f32 %v3217_v30, %v3209_v22 }
 0x1d6   : > { %v1489_v46 = vadd.f32 %v1411_v50, %v1279_v9  ;;  %v1490_v1 = vadd.f32 %v1475_v12, %v1280_v37  ;;  %v1512_v12 = vpop.permute.xlu0 %1511 }
 0x1d8   : > { %v1535_v49 = vadd.f32 %v1520_v51, %v1489_v46  ;;  %v1536_v2 = vadd.f32 %v1502_v6, %v1490_v1  ;;  %v1283_v6 = vadd.f32 %v1207_v43, %v1068_v4  ;;  %v1071_v51 = vadd.f32 %v3199_v8, %v3230_v62 }
 0x1d9   : > { %v1213_v8 = vadd.f32 %v3224_v59, %v3213_v63 }
 0x1da   : > { %v1545_v31 = vmax.f32 %v1535_v49, 0.0  ;;  %v1546_v57 = vmax.f32 %v1536_v2, 0.0  ;;  %v1523_v2 = vsel %vm1519_vm4, %v1512_v12, %v1514_v36 }
 0x1db   : > { %v1413_v19 = vpop.f32.mrf.mxu3  ;;  %v1477_v21 = vpop.f32.mrf.mxu2 }
 0x1dc   : > { %1555 = vst [vmem:[%s3242_s22] sm:$0xff] %v1545_v31  ;;  %v1414_v20 = vadd.f32 %v1413_v19, %v1381_v26  ;;  %v1478_v32 = vadd.f32 %v1477_v21, %v1445_v13  ;;  %v1387_v29 = vpop.f32.mrf.mxu1  ;;  %v1069_v26 = vadd.f32 %v3195_v41, %v3230_v62  ;;  %v1274_v41 = vadd.f32 %v3219_v11, %v3211_v53  ;;  %v1451_v13 = vpop.f32.mrf.mxu0 }
 0x1dd   : > { %1557 = vst.msk [vmem:[%s3242_s22 + $0x8] sm:$0xff] %vm1556_vm5, %v1546_v57  ;;  %v1516_v57 = vpop.permute.xlu2 %1515  ;;  %v1073_v19 = vadd.f32 %v3203_v54, %v3230_v62 }
 0x1de   : > { %v1491_v18 = vadd.f32 %v1414_v20, %v1281_v38  ;;  %v1492_v23 = vadd.f32 %v1478_v32, %v1282_v25  ;;  %v1284_v61 = vadd.f32 %v1271_v17, %v1069_v26  ;;  %v1286_v49 = vadd.f32 %v1274_v41, %v1071_v51  ;;  %v1518_v20 = vpop.permute.xlu0 %1517 }
 0x1df   : > { %v1288_v28 = vadd.f32 %v1277_v56, %v1073_v19 }
 0x1e0   : > { %v1537_v15 = vadd.f32 %v1521_v42, %v1491_v18  ;;  %v1538_v33 = vadd.f32 %v1506_v47, %v1492_v23  ;;  %v1072_v47 = vadd.f32 %v3201_v44, %v3228_v14  ;;  %v1524_v44 = vsel %vm1519_vm4, %v1516_v57, %v1518_v20 }
 0x1e2   : > { %v1547_v58 = vmax.f32 %v1537_v15, 0.0  ;;  %v1548_v52 = vmax.f32 %v1538_v33, 0.0  ;;  %v1287_v59 = vadd.f32 %v1213_v8, %v1072_v47 }
 0x1e3   : > { %v1416_v10 = vpop.f32.mrf.mxu3  ;;  %v1480_v16 = vpop.f32.mrf.mxu2 }
 0x1e4   : > { %1558 = vst [vmem:[%s3242_s22 + $0x10] sm:$0xff] %v1547_v58  ;;  %v1417_v27 = vadd.f32 %v1416_v10, %v1384_v45  ;;  %v1481_v60 = vadd.f32 %v1480_v16, %v1448_v55  ;;  %v1390_v9 = vpop.f32.mrf.mxu1  ;;  %v1070_v45 = vadd.f32 %v3197_v39, %v3228_v14 }
 0x1e5   : > { %1559 = vst.msk [vmem:[%s3242_s22 + $0x18] sm:$0xff] %vm1556_vm5, %v1548_v52 }
 0x1e6   : > { %v1493_v0 = vadd.f32 %v1417_v27, %v1283_v6  ;;  %v1494_v40 = vadd.f32 %v1481_v60, %v1284_v61  ;;  %v1285_v24 = vadd.f32 %v1210_v34, %v1070_v45 }
 0x1e8   : > { %v1539_v37 = vadd.f32 %v1522_v7, %v1493_v0  ;;  %v1540_v50 = vadd.f32 %v1510_v48, %v1494_v40 }
 0x1ea   : > { %v1549_v46 = vmax.f32 %v1539_v37, 0.0  ;;  %v1550_v1 = vmax.f32 %v1540_v50, 0.0 }
 0x1eb   : > { %v1419_v22 = vpop.f32.mrf.mxu3  ;;  %v1483_v30 = vpop.f32.mrf.mxu2 }
 0x1ec   : > { %1560 = vst [vmem:[%s3242_s22 + $0x20] sm:$0xff] %v1549_v46  ;;  %v1420_v53 = vadd.f32 %v1419_v22, %v1387_v29  ;;  %v1484_v11 = vadd.f32 %v1483_v30, %v1451_v13  ;;  %v1454_v21 = vpop.f32.mrf.mxu1 }
 0x1ed   : > { %1561 = vst.msk [vmem:[%s3242_s22 + $0x28] sm:$0xff] %vm1556_vm5, %v1550_v1 }
 0x1ee   : > { %v1495_v3 = vadd.f32 %v1420_v53, %v1285_v24  ;;  %v1496_v39 = vadd.f32 %v1484_v11, %v1286_v49 }
 0x1f0   : > { %v1542_v5 = vadd.f32 %v1514_v36, %v1496_v39  ;;  %v1541_v31 = vadd.f32 %v1523_v2, %v1495_v3 }
 0x1f2   : > { %v1552_v38 = vmax.f32 %v1542_v5, 0.0  ;;  %v1551_v25 = vmax.f32 %v1541_v31, 0.0 }
 0x1f3   : > { %v1422_v32 = vpop.f32.mrf.mxu3  ;;  %v1486_v63 = vpop.f32.mrf.mxu2 }
 0x1f4   : > { %1563 = vst.msk [vmem:[%s3242_s22 + $0x38] sm:$0xff] %vm1556_vm5, %v1552_v38  ;;  %v1423_v35 = vadd.f32 %v1422_v32, %v1390_v9  ;;  %v1487_v42 = vadd.f32 %v1486_v63, %v1454_v21 }
 0x1f5   : > { %1562 = vst [vmem:[%s3242_s22 + $0x30] sm:$0xff] %v1551_v25 }
 0x1f6   : > { %v1497_v14 = vadd.f32 %v1423_v35, %v1287_v59  ;;  %v1498_v29 = vadd.f32 %v1487_v42, %v1288_v28 }
 0x1f8   : > { %v1543_v54 = vadd.f32 %v1524_v44, %v1497_v14  ;;  %v1544_v62 = vadd.f32 %v1518_v20, %v1498_v29 }
 0x1fa   : > { %v1553_v18 = vmax.f32 %v1543_v54, 0.0  ;;  %v1554_v23 = vmax.f32 %v1544_v62, 0.0 }
 0x1fc   : > { %1564 = vst [vmem:[%s3242_s22 + $0x40] sm:$0xf] %v1553_v18 }
 0x1fd   : > { %1566 = vst.msk [vmem:[%s3242_s22 + $0x48] sm:$0xf] %vm1565_vm6, %v1554_v23 }
 0x1fe PF: > { %s15_s18 = sadd.s32 1, %s1883_s18  }
 0x1ff   : > { %p12_p4 = scmp.ge.s32.totalorder %s15_s18, 4  }
 0x201   :  { %14 = sbr.rel (!%p12_p4) target bundleno = 1 (0x1), region = 74 }

// kernel: crop_resnet_pool_forward.12
= control target key start
LH: loop header
LB: loop body
LE: loop exit
PB: predicated region body
PF: predicated region fallthrough
CT: control target
= control target key end

     0   :  { %s831_s18 = smov 0   ;;  %s1152_s0 = inlined_call_operand.vmem [shape: f32[2,28,112], index: 0, kind: input, shape index: {}]   ;;  %s1153_s1 = inlined_call_operand.vmem [shape: f32[3,112,104], index: 1, kind: input, shape index: {}]   ;;  %s1154_s2 = inlined_call_operand.vmem [shape: f32[1,104], index: 2, kind: input, shape index: {}]   ;;  %s1155_s3 = inlined_call_operand.vmem [shape: f32[3,104,96], index: 3, kind: input, shape index: {}]   ;;  %s1156_s4 = inlined_call_operand.vmem [shape: f32[1,96], index: 4, kind: input, shape index: {}]   ;;  %s1157_s5 = inlined_call_operand.vmem [shape: f32[2,24,96], index: 5, kind: output, shape index: {}]  }
   0x1 LB: > { %s668_s19 = sadd.s32 4294967295, %s798_s18   ;;  %p672_p0 = scmp.ge.s32.totalorder %s798_s18, 1  ;;  %s798_s18 = sphi %s831_s18, %s15_s18  }
   0x2   : > { %p187_p1 = scmp.lt.s32.totalorder %s798_s18, 3 }
   0x4   : > { %p188_p2 = pnand %p672_p0, %p187_p1 }
   0x5   : > { %p215_p3 = scmp.lt.s32.totalorder (!%p188_p2), %s668_s19, 1  ;;  %s800_s16 = smov (!%p188_p2), 120  }
   0x6   : > { %191 = sbr.rel (%p188_p2) target bundleno = 356 (0x164), region = 40 }
   0xb   : > { %v711_v0 = vld [vmem:[%s1153_s1 + $0x148] sm:$0xff]  ;;  %v710_v2 = vld [vmem:[%s1153_s1 + $0x140] sm:$0xff]  ;;  %v693_v4 = vld [vmem:[%s1153_s1 + $0xd8] sm:$0xff]  ;;  %s1159_s19 = smov (!%p215_p3, %s668_s19), 1  ;;  %vm372_vm0 = vcmask 1045504   ;;  %vm308_vm1 = vcmask 1046528  }
   0xc   : > { %v246_v1 = vld [vmem:[%s1153_s1 + $0x68] sm:$0xff]  ;;  %390 = vmatpush.msra.mxu2 %v711_v0  ;;  %v245_v3 = vld [vmem:[%s1153_s1 + $0x60] sm:$0xff]  ;;  %326 = vmatpush.msra.mxu1 %v693_v4  ;;  %v709_v5 = vld [vmem:[%s1153_s1 + $0x138] sm:$0xff]  ;;  %s753_s20 = sshll.u32 %s1159_s19, 5  ;;  %vm247_vm2 = vcmask 916480   ;;  %vm442_vm3 = vcmask 850944  }
   0xd   : > { %262 = vmatpush.msra.mxu0 %v246_v1  ;;  %v244_v6 = vld [vmem:[%s1153_s1 + $0x58] sm:$0xff]  ;;  %v692_v7 = vld [vmem:[%s1153_s1 + $0xd0] sm:$0xff]  ;;  %v691_v8 = vld [vmem:[%s1153_s1 + $0xc8] sm:$0xff]  ;;  %s930_s6 = scalar_lea.vmem %s1152_s0, %s753_s20  ;;  %s780_s7 = smul.u32 24, %s1159_s19  ;;  %vm609_vm4 = vcmask 785408  }
   0xe   : > { %391 = vmatpush.msra.mxu2 %v710_v2  ;;  %327 = vmatpush.msra.mxu1 %v692_v7  ;;  %v708_v9 = vld [vmem:[%s1153_s1 + $0x130] sm:$0xff]  ;;  %v690_v11 = vld [vmem:[%s1153_s1 + $0xc0] sm:$0xff]  ;;  %v707_v12 = vld [vmem:[%s1153_s1 + $0x128] sm:$0xff] }
   0xf   : > { %263 = vmatpush.msra.mxu0 %v245_v3  ;;  %v243_v10 = vld [vmem:[%s1153_s1 + $0x50] sm:$0xff]  ;;  %v242_v13 = vld [vmem:[%s1153_s1 + $0x48] sm:$0xff]  ;;  %v689_v14 = vld [vmem:[%s1153_s1 + $0xb8] sm:$0xff]  ;;  %s224_s10 = scalar_lea.vmem %s1157_s5, %s780_s7 }
  0x10   : > { %392 = vmatpush.msra.mxu2 %v709_v5  ;;  %328 = vmatpush.msra.mxu1 %v691_v8  ;;  %v706_v15 = vld [vmem:[%s1153_s1 + $0x120] sm:$0xff]  ;;  %v688_v17 = vld [vmem:[%s1153_s1 + $0xb0] sm:$0xff]  ;;  %v705_v18 = vld [vmem:[%s1153_s1 + $0x118] sm:$0xff] }
  0x11   : > { %264 = vmatpush.msra.mxu0 %v244_v6  ;;  %v241_v16 = vld [vmem:[%s1153_s1 + $0x40] sm:$0xff]  ;;  %v240_v19 = vld [vmem:[%s1153_s1 + $0x38] sm:$0xff]  ;;  %v687_v20 = vld [vmem:[%s1153_s1 + $0xa8] sm:$0xff] }
  0x12   : > { %393 = vmatpush.msra.mxu2 %v708_v9  ;;  %329 = vmatpush.msra.mxu1 %v690_v11  ;;  %v704_v21 = vld [vmem:[%s1153_s1 + $0x110] sm:$0xff]  ;;  %v686_v23 = vld [vmem:[%s1153_s1 + $0xa0] sm:$0xff]  ;;  %v703_v24 = vld [vmem:[%s1153_s1 + $0x108] sm:$0xff] }
  0x13   : > { %265 = vmatpush.msra.mxu0 %v243_v10  ;;  %v239_v22 = vld [vmem:[%s1153_s1 + $0x30] sm:$0xff]  ;;  %v238_v25 = vld [vmem:[%s1153_s1 + $0x28] sm:$0xff]  ;;  %v685_v26 = vld [vmem:[%s1153_s1 + $0x98] sm:$0xff] }
  0x14   : > { %394 = vmatpush.msra.mxu2 %v707_v12  ;;  %330 = vmatpush.msra.mxu1 %v689_v14  ;;  %v702_v27 = vld [vmem:[%s1153_s1 + $0x100] sm:$0xff]  ;;  %v701_v29 = vld [vmem:[%s1153_s1 + $0xf8] sm:$0xff]  ;;  %v684_v30 = vld [vmem:[%s1153_s1 + $0x90] sm:$0xff] }
  0x15   : > { %266 = vmatpush.msra.mxu0 %v242_v13  ;;  %v237_v28 = vld [vmem:[%s1153_s1 + $0x20] sm:$0xff]  ;;  %v236_v31 = vld [vmem:[%s1153_s1 + $0x18] sm:$0xff]  ;;  %v949_v33 = vld [vmem:[%s930_s6 + $0x8] sm:$0xff] }
  0x16   : > { %395 = vmatpush.msra.mxu2 %v706_v15  ;;  %331 = vmatpush.msra.mxu1 %v688_v17  ;;  %v225_v32 = vld [vmem:[%s930_s6] sm:$0xff]  ;;  %v683_v34 = vld [vmem:[%s1153_s1 + $0x88] sm:$0xff]  ;;  %v700_v35 = vld [vmem:[%s1153_s1 + $0xf0] sm:$0xff]  ;;  %v374_v39 = vrot.slane %v949_v33, 2  ;;  %v310_v45 = vrot.slane %v949_v33, 1 }
  0x17   : > { %267 = vmatpush.msra.mxu0 %v241_v16  ;;  %v235_v36 = vld [vmem:[%s1153_s1 + $0x10] sm:$0xff]  ;;  %v682_v37 = vld [vmem:[%s1153_s1 + $0x80] sm:$0xff]  ;;  %v373_v38 = vrot.slane %v225_v32, 2  ;;  %v699_v40 = vld [vmem:[%s1153_s1 + $0xe8] sm:$0xff]  ;;  %v309_v44 = vrot.slane %v225_v32, 1 }
  0x18   : > { %396 = vmatpush.msra.mxu2 %v705_v18  ;;  %332 = vmatpush.msra.mxu1 %v687_v20  ;;  %v234_v41 = vld [vmem:[%s1153_s1 + $0x8] sm:$0xff]  ;;  %v441_v42 = vld [vmem:[%s1155_s3 + $0x60] sm:$0xff]  ;;  %v681_v43 = vld [vmem:[%s1153_s1 + $0x78] sm:$0xff] }
  0x19   : > { %268 = vmatpush.msra.mxu0 %v240_v19  ;;  %v440_v46 = vld [vmem:[%s1155_s3 + $0x58] sm:$0xff]  ;;  %v698_v47 = vld [vmem:[%s1153_s1 + $0xe0] sm:$0xff]  ;;  %455 = vmatpush.msra.mxu3 %v441_v42  ;;  %v375_v49 = vsel %vm372_vm0, %v373_v38, %v374_v39  ;;  %v680_v50 = vld [vmem:[%s1153_s1 + $0x70] sm:$0xff]  ;;  %v311_v53 = vsel %vm308_vm1, %v309_v44, %v310_v45 }
  0x1a   : > { %397 = vmatpush.msra.mxu2 %v704_v21  ;;  %333 = vmatpush.msra.mxu1 %v686_v23  ;;  %v233_v48 = vld [vmem:[%s1153_s1] sm:$0xff]  ;;  %v227_v51 = vld [vmem:[%s930_s6 + $0x10] sm:$0xff]  ;;  %v438_v55 = vld [vmem:[%s1155_s3 + $0x48] sm:$0xff] }
  0x1b   : > { %269 = vmatpush.msra.mxu0 %v239_v22  ;;  %456 = vmatpush.msra.mxu3 %v440_v46  ;;  %v439_v52 = vld [vmem:[%s1155_s3 + $0x50] sm:$0xff]  ;;  %v376_v56 = vrot.slane %v227_v51, 2  ;;  %v746_v57 = vld [vmem:[%s1155_s3 + $0x128] sm:$0xff]  ;;  %v437_v58 = vld [vmem:[%s1155_s3 + $0x40] sm:$0xff]  ;;  %v312_v59 = vrot.slane %v227_v51, 1 }
  0x1c   : > { %398 = vmatpush.msra.mxu2 %v703_v24  ;;  %334 = vmatpush.msra.mxu1 %v685_v26  ;;  %v747_v54 = vld [vmem:[%s1155_s3 + $0x130] sm:$0xff]  ;;  %v745_v60 = vld [vmem:[%s1155_s3 + $0x120] sm:$0xff]  ;;  %v436_v61 = vld [vmem:[%s1155_s3 + $0x38] sm:$0xff] }
  0x1d   : > { %270 = vmatpush.msra.mxu0 %v238_v25  ;;  %457 = vmatpush.msra.mxu3 %v439_v52  ;;  %v377_v62 = vsel %vm372_vm0, %v374_v39, %v376_v56  ;;  %v228_v63 = vld [vmem:[%s930_s6 + $0x18] sm:$0xf]  ;;  %v435_v0 = vld [vmem:[%s1155_s3 + $0x30] sm:$0xff]  ;;  %v313_v1 = vsel %vm308_vm1, %v310_v45, %v312_v59  ;;  %v434_v2 = vld [vmem:[%s1155_s3 + $0x28] sm:$0xff] }
  0x1e   : > { %399 = vmatpush.msra.mxu2 %v702_v27  ;;  %335 = vmatpush.msra.mxu1 %v684_v30  ;;  %v378_v3 = vrot.slane %v228_v63, 2  ;;  %v433_v4 = vld [vmem:[%s1155_s3 + $0x20] sm:$0xff]  ;;  %v314_v5 = vrot.slane %v228_v63, 1  ;;  %v432_v8 = vld [vmem:[%s1155_s3 + $0x18] sm:$0xff]  ;;  %v431_v10 = vld [vmem:[%s1155_s3 + $0x10] sm:$0xff] }
  0x1f   : > { %271 = vmatpush.msra.mxu0 %v237_v28  ;;  %458 = vmatpush.msra.mxu3 %v438_v55  ;;  %v744_v9 = vld [vmem:[%s1155_s3 + $0x118] sm:$0xff]  ;;  %v743_v11 = vld [vmem:[%s1155_s3 + $0x110] sm:$0xff]  ;;  %v430_v12 = vld [vmem:[%s1155_s3 + $0x8] sm:$0xff] }
  0x20   : > { %400 = vmatpush.msra.mxu2 %v701_v29  ;;  %336 = vmatpush.msra.mxu1 %v683_v34  ;;  %v379_v6 = vsel %vm372_vm0, %v376_v56, %v378_v3  ;;  %v315_v7 = vsel %vm308_vm1, %v312_v59, %v314_v5  ;;  %v742_v13 = vld [vmem:[%s1155_s3 + $0x108] sm:$0xff]  ;;  %v429_v14 = vld [vmem:[%s1155_s3] sm:$0xff]  ;;  %v740_v17 = vld [vmem:[%s1155_s3 + $0xf8] sm:$0xff] }
  0x21   : > { %272 = vmatpush.msra.mxu0 %v236_v31  ;;  %459 = vmatpush.msra.mxu3 %v437_v58  ;;  %v741_v15 = vld [vmem:[%s1155_s3 + $0x100] sm:$0xff]  ;;  %v731_v16 = vld [vmem:[%s1155_s3 + $0xc8] sm:$0xff]  ;;  %v739_v19 = vld [vmem:[%s1155_s3 + $0xf0] sm:$0xff] }
  0x22   : > { %401 = vmatpush.msra.mxu2 %v700_v35  ;;  %337 = vmatpush.msra.mxu1 %v682_v37  ;;  %v730_v18 = vld [vmem:[%s1155_s3 + $0xc0] sm:$0xff]  ;;  %v729_v20 = vld [vmem:[%s1155_s3 + $0xb8] sm:$0xff]  ;;  %v738_v21 = vld [vmem:[%s1155_s3 + $0xe8] sm:$0xff] }
  0x23   : > { %273 = vmatpush.msra.mxu0 %v235_v36  ;;  %460 = vmatpush.msra.mxu3 %v436_v61  ;;  %v728_v22 = vld [vmem:[%s1155_s3 + $0xb0] sm:$0xff]  ;;  %v737_v23 = vld [vmem:[%s1155_s3 + $0xe0] sm:$0xff]  ;;  %v727_v24 = vld [vmem:[%s1155_s3 + $0xa8] sm:$0xff] }
  0x24   : > { %402 = vmatpush.msra.mxu2 %v699_v40  ;;  %338 = vmatpush.msra.mxu1 %v681_v43  ;;  %v736_v25 = vld [vmem:[%s1155_s3 + $0xd8] sm:$0xff]  ;;  %v726_v26 = vld [vmem:[%s1155_s3 + $0xa0] sm:$0xff]  ;;  %v735_v27 = vld [vmem:[%s1155_s3 + $0xd0] sm:$0xff] }
  0x25   : > { %274 = vmatpush.msra.mxu0 %v234_v41  ;;  %461 = vmatpush.msra.mxu3 %v435_v0  ;;  %v725_v28 = vld [vmem:[%s1155_s3 + $0x98] sm:$0xff]  ;;  %v724_v29 = vld [vmem:[%s1155_s3 + $0x90] sm:$0xff]  ;;  %v723_v30 = vld [vmem:[%s1155_s3 + $0x88] sm:$0xff] }
  0x26   : > { %403 = vmatpush.msra.mxu2 %v698_v47  ;;  %339 = vmatpush.msra.mxu1 %v680_v50  ;;  %v722_v31 = vld [vmem:[%s1155_s3 + $0x80] sm:$0xff]  ;;  %v720_v34 = vld [vmem:[%s1155_s3 + $0x70] sm:$0xff]  ;;  %v719_v37 = vld [vmem:[%s1155_s3 + $0x68] sm:$0xff] }
  0x27   : > { %275 = vmatpush.msra.mxu0 %v233_v48  ;;  %712 = vmatmul.msk.f32.vlgmr.msra.gmra.mxu2 %vm247_vm2, %v375_v49 }
  0x28   : > { %676 = vmatmul.msk.f32.vlgmr.msra.gmra.mxu0 %vm247_vm2, %v225_v32  ;;  %694 = vmatmul.msk.f32.vlgmr.msra.gmra.mxu1 %vm247_vm2, %v311_v53  ;;  %v790_v32 = vld [vmem:[%s1154_s2] ss:$0 sm:$0xff] }
  0x29   : > { %568 = vmatpush.msrb.mxu0 %v747_v54  ;;  %754 = vmatpush.msrb.mxu1 %v747_v54 }
  0x2a   : > { %755 = vmatpush.msrb.mxu2 %v747_v54  ;;  %462 = vmatpush.msra.mxu3 %v434_v2 }
  0x2b   : > { %569 = vmatpush.msrb.mxu0 %v746_v57  ;;  %756 = vmatpush.msrb.mxu1 %v746_v57 }
  0x2c   : > { %757 = vmatpush.msrb.mxu2 %v746_v57  ;;  %463 = vmatpush.msra.mxu3 %v433_v4 }
  0x2d   : > { %570 = vmatpush.msrb.mxu0 %v745_v60  ;;  %758 = vmatpush.msrb.mxu1 %v745_v60 }
  0x2e   : > { %759 = vmatpush.msrb.mxu2 %v745_v60  ;;  %594 = vrot.lane.b32.xlu0 %v375_v49, %s800_s16 }
  0x2f   : > { %713 = vmatmul.msk.f32.gmra.mxu2 %vm247_vm2, %v377_v62  ;;  %598 = vrot.lane.b32.xlu1 %v379_v6, %s800_s16 }
  0x30   : > { %677 = vmatmul.msk.f32.gmra.mxu0 %vm247_vm2, %v949_v33  ;;  %695 = vmatmul.msk.f32.gmra.mxu1 %vm247_vm2, %v313_v1  ;;  %v721_v33 = vld [vmem:[%s1155_s3 + $0x78] sm:$0xff] }
  0x31   : > { %464 = vmatpush.msra.mxu3 %v432_v8  ;;  %571 = vmatpush.msrb.mxu0 %v744_v9 }
  0x32   : > { %760 = vmatpush.msrb.mxu1 %v744_v9  ;;  %761 = vmatpush.msrb.mxu2 %v744_v9 }
  0x33   : > { %465 = vmatpush.msra.mxu3 %v431_v10  ;;  %572 = vmatpush.msrb.mxu0 %v743_v11 }
  0x34   : > { %762 = vmatpush.msrb.mxu1 %v743_v11  ;;  %763 = vmatpush.msrb.mxu2 %v743_v11 }
  0x35   : > { %466 = vmatpush.msra.mxu3 %v430_v12  ;;  %573 = vmatpush.msrb.mxu0 %v742_v13 }
  0x36   : > { %596 = vrot.lane.b32.xlu0 %v377_v62, %s800_s16  ;;  %764 = vmatpush.msrb.mxu1 %v742_v13 }
  0x37   : > { %714 = vmatmul.msk.f32.gmra.mxu2 %vm247_vm2, %v379_v6  ;;  %467 = vmatpush.msra.mxu3 %v429_v14 }
  0x38   : > { %678 = vmatmul.msk.f32.gmra.mxu0 %vm247_vm2, %v227_v51  ;;  %696 = vmatmul.msk.f32.gmra.mxu1 %vm247_vm2, %v315_v7 }
  0x39   : > { %765 = vmatpush.msrb.mxu2 %v742_v13  ;;  %574 = vmatpush.msrb.mxu0 %v741_v15 }
  0x3a   : > { %512 = vmatpush.msrb.mxu3 %v731_v16  ;;  %766 = vmatpush.msrb.mxu1 %v741_v15 }
  0x3b   : > { %575 = vmatpush.msrb.mxu0 %v740_v17  ;;  %767 = vmatpush.msrb.mxu2 %v741_v15 }
  0x3c   : > { %513 = vmatpush.msrb.mxu3 %v730_v18  ;;  %768 = vmatpush.msrb.mxu1 %v740_v17 }
  0x3d   : > { %576 = vmatpush.msrb.mxu0 %v739_v19  ;;  %769 = vmatpush.msrb.mxu2 %v740_v17  ;;  %v791_v17 = vld [vmem:[%s1156_s4] ss:$0 sm:$0xff] }
  0x3e   : > { %514 = vmatpush.msrb.mxu3 %v729_v20  ;;  %770 = vmatpush.msrb.mxu1 %v739_v19 }
  0x3f   : > { %715 = vmatmul.msk.f32.gmra.mxu2 %vm247_vm2, %v378_v3  ;;  %577 = vmatpush.msrb.mxu0 %v738_v21 }
  0x40   : > { %679 = vmatmul.msk.f32.gmra.mxu0 %vm247_vm2, %v228_v63  ;;  %697 = vmatmul.msk.f32.gmra.mxu1 %vm247_vm2, %v314_v5 }
  0x41   : > { %771 = vmatpush.msrb.mxu2 %v739_v19  ;;  %515 = vmatpush.msrb.mxu3 %v728_v22 }
  0x42   : > { %772 = vmatpush.msrb.mxu1 %v738_v21  ;;  %578 = vmatpush.msrb.mxu0 %v737_v23 }
  0x43   : > { %773 = vmatpush.msrb.mxu2 %v738_v21  ;;  %516 = vmatpush.msrb.mxu3 %v727_v24 }
  0x44   : > { %774 = vmatpush.msrb.mxu1 %v737_v23  ;;  %579 = vmatpush.msrb.mxu0 %v736_v25 }
  0x45   : > { %775 = vmatpush.msrb.mxu2 %v737_v23  ;;  %517 = vmatpush.msrb.mxu3 %v726_v26 }
  0x46   : > { %776 = vmatpush.msrb.mxu1 %v736_v25  ;;  %580 = vmatpush.msrb.mxu0 %v735_v27 }
  0x47   : > { %777 = vmatpush.msrb.mxu2 %v736_v25  ;;  %518 = vmatpush.msrb.mxu3 %v725_v28 }
  0x48   : > { %778 = vmatpush.msrb.mxu1 %v735_v27 }
  0x49   : > { %779 = vmatpush.msrb.mxu2 %v735_v27  ;;  %519 = vmatpush.msrb.mxu3 %v724_v29 }
  0x4b   : > { %520 = vmatpush.msrb.mxu3 %v723_v30 }
  0x4d   : > { %521 = vmatpush.msrb.mxu3 %v722_v31 }
  0x4f   : > { %522 = vmatpush.msrb.mxu3 %v721_v33 }
  0x51   : > { %523 = vmatpush.msrb.mxu3 %v720_v34 }
  0x53   : > { %524 = vmatpush.msrb.mxu3 %v719_v37 }
  0xa0   : > { %v595_v20 = vpop.permute.xlu0 %594 }
  0xa5   : > { %v277_v35 = vpop.f32.mrf.mxu0  ;;  %v341_v38 = vpop.f32.mrf.mxu1 }
  0xa6   : > { %v289_v36 = vadd.f32 %v790_v32, %v277_v35 }
  0xa8   : > { %v353_v39 = vadd.f32 %v341_v38, %v289_v36  ;;  %v597_v30 = vpop.permute.xlu0 %596  ;;  %v599_v38 = vpop.permute.xlu1 %598 }
  0xaa   : > { %v405_v40 = vpop.f32.mrf.mxu2 }
  0xab   : > { %v417_v41 = vadd.f32 %v405_v40, %v353_v39 }
  0xad   : > { %v280_v42 = vpop.f32.mrf.mxu0  ;;  %v421_v43 = vmax.f32 %v417_v41, 0.0  ;;  %v344_v45 = vpop.f32.mrf.mxu1 }
  0xae   : > { %v290_v44 = vadd.f32 %v790_v32, %v280_v42 }
  0xaf   : > { %716 = vmatmul.msk.f32.vlgmr.msra.gmra.mxu3 %vm442_vm3, %v421_v43  ;;  %v552_v53 = vrot.slane %v421_v43, 2  ;;  %v496_v5 = vrot.slane %v421_v43, 1 }
  0xb0   : > { %v354_v46 = vadd.f32 %v344_v45, %v290_v44 }
  0xb2   : > { %v408_v47 = vpop.f32.mrf.mxu2 }
  0xb3   : > { %v418_v48 = vadd.f32 %v408_v47, %v354_v46 }
  0xb5   : > { %v283_v49 = vpop.f32.mrf.mxu0  ;;  %v422_v50 = vmax.f32 %v418_v48, 0.0  ;;  %v347_v52 = vpop.f32.mrf.mxu1 }
  0xb6   : > { %v291_v51 = vadd.f32 %v790_v32, %v283_v49 }
  0xb7   : > { %v553_v54 = vrot.slane %v422_v50, 2  ;;  %717 = vmatmul.msk.f32.gmra.mxu3 %vm442_vm3, %v422_v50  ;;  %v497_v2 = vrot.slane %v422_v50, 1 }
  0xb8   : > { %v355_v55 = vadd.f32 %v347_v52, %v291_v51 }
  0xb9   : > { %v554_v56 = vsel %vm372_vm0, %v552_v53, %v553_v54  ;;  %v498_v7 = vsel %vm308_vm1, %v496_v5, %v497_v2 }
  0xba   : > { %v411_v57 = vpop.f32.mrf.mxu2  ;;  %748 = vmatmul.msk.f32.vlgmr.msrb.gmra.mxu0 %vm442_vm3, %v554_v56 }
  0xbb   : > { %v419_v58 = vadd.f32 %v411_v57, %v355_v55 }
  0xbd   : > { %v286_v59 = vpop.f32.mrf.mxu0  ;;  %v423_v60 = vmax.f32 %v419_v58, 0.0  ;;  %v350_v62 = vpop.f32.mrf.mxu1 }
  0xbe   : > { %v292_v61 = vadd.f32 %v790_v32, %v286_v59 }
  0xbf   : > { %v555_v63 = vrot.slane %v423_v60, 2  ;;  %718 = vmatmul.msk.f32.gmra.mxu3 %vm442_vm3, %v423_v60  ;;  %v499_v10 = vrot.slane %v423_v60, 1 }
  0xc0   : > { %v356_v0 = vadd.f32 %v350_v62, %v292_v61 }
  0xc1   : > { %v556_v1 = vsel %vm372_vm0, %v553_v54, %v555_v63  ;;  %v500_v11 = vsel %vm308_vm1, %v497_v2, %v499_v10 }
  0xc2   : > { %v414_v3 = vpop.f32.mrf.mxu2  ;;  %749 = vmatmul.msk.f32.vlgmr.msrb.gmra.mxu1 %vm442_vm3, %v556_v1 }
  0xc3   : > { %v420_v4 = vadd.f32 %v414_v3, %v356_v0 }
  0xc5   : > { %v424_v6 = vmax.f32 %v420_v4, 0.0 }
  0xc7   : > { %v557_v8 = vrot.slane %v424_v6, 2  ;;  %732 = vmatmul.msk.f32.vlgmr.msrb.gmra.mxu3 %vm442_vm3, %v498_v7  ;;  %v501_v12 = vrot.slane %v424_v6, 1 }
  0xc9   : > { %v558_v9 = vsel %vm372_vm0, %v555_v63, %v557_v8  ;;  %v502_v13 = vsel %vm308_vm1, %v499_v10, %v501_v12 }
  0xca   : > { %750 = vmatmul.msk.f32.vlgmr.msrb.gmra.mxu2 %vm442_vm3, %v558_v9 }
  0xcf   : > { %733 = vmatmul.msk.f32.gmra.mxu3 %vm442_vm3, %v500_v11 }
  0xd7   : > { %734 = vmatmul.msk.f32.gmra.mxu3 %vm442_vm3, %v502_v13 }
 0x132   : > { %v469_v14 = vpop.f32.mrf.mxu3 }
 0x133   : > { %v478_v18 = vadd.f32 %v791_v17, %v469_v14 }
 0x137   : > { %v582_v22 = vpop.f32.mrf.mxu0 }
 0x13a   : > { %v472_v15 = vpop.f32.mrf.mxu3 }
 0x13b   : > { %v479_v25 = vadd.f32 %v791_v17, %v472_v15 }
 0x13f   : > { %v585_v29 = vpop.f32.mrf.mxu1 }
 0x142   : > { %v475_v16 = vpop.f32.mrf.mxu3 }
 0x143   : > { %v480_v33 = vadd.f32 %v791_v17, %v475_v16 }
 0x14a   : > { %v526_v19 = vpop.f32.mrf.mxu3 }
 0x14b   : > { %v535_v21 = vadd.f32 %v526_v19, %v478_v18 }
 0x14d   : > { %v591_v23 = vadd.f32 %v582_v22, %v535_v21  ;;  %v588_v37 = vpop.f32.mrf.mxu2 }
 0x14f   : > { %v603_v24 = vadd.f32 %v595_v20, %v591_v23 }
 0x151   : > { %v606_v26 = vmax.f32 %v603_v24, 0.0 }
 0x152   : > { %v529_v27 = vpop.f32.mrf.mxu3 }
 0x153   : > { %610 = vst.msk [vmem:[%s224_s10] sm:$0xff] %vm609_vm4, %v606_v26  ;;  %v536_v28 = vadd.f32 %v529_v27, %v479_v25 }
 0x155   : > { %v592_v31 = vadd.f32 %v585_v29, %v536_v28 }
 0x157   : > { %v604_v32 = vadd.f32 %v597_v30, %v592_v31 }
 0x159   : > { %v607_v34 = vmax.f32 %v604_v32, 0.0 }
 0x15a   : > { %v532_v35 = vpop.f32.mrf.mxu3 }
 0x15b   : > { %611 = vst.msk [vmem:[%s224_s10 + $0x8] sm:$0xff] %vm609_vm4, %v607_v34  ;;  %v537_v36 = vadd.f32 %v532_v35, %v480_v33 }
 0x15d   : > { %v593_v39 = vadd.f32 %v588_v37, %v537_v36 }
 0x15f   : > { %v605_v40 = vadd.f32 %v599_v38, %v593_v39 }
 0x161   : > { %v608_v41 = vmax.f32 %v605_v40, 0.0 }
 0x163   : > { %612 = vst.msk [vmem:[%s224_s10 + $0x10] sm:$0xff] %vm609_vm4, %v608_v41 }
 0x164 PF: > { %s15_s18 = sadd.s32 1, %s798_s18  }
 0x165   : > { %p12_p4 = scmp.ge.s32.totalorder %s15_s18, 4  }
 0x167   :  { %14 = sbr.rel (!%p12_p4) target bundleno = 1 (0x1), region = 74 }

// kernel: crop_resnet_pool_forward.15
= control target key start
LH: loop header
LB: loop body
LE: loop exit
PB: predicated region body
PF: predicated region fallthrough
CT: control target
= control target key end

     0   :  { %s742_s18 = smov 0   ;;  %s1066_s0 = inlined_call_operand.vmem [shape: f32[2,16,128], index: 0, kind: input, shape index: {}]   ;;  %s1067_s1 = inlined_call_operand.vmem [shape: f32[3,128,112], index: 1, kind: input, shape index: {}]   ;;  %s1068_s2 = inlined_call_operand.vmem [shape: f32[1,112], index: 2, kind: input, shape index: {}]   ;;  %s1069_s3 = inlined_call_operand.vmem [shape: f32[3,112,96], index: 3, kind: input, shape index: {}]   ;;  %s1070_s4 = inlined_call_operand.vmem [shape: f32[1,96], index: 4, kind: input, shape index: {}]   ;;  %s1071_s5 = inlined_call_operand.vmem [shape: f32[2,12,96], index: 5, kind: output, shape index: {}]  }
   0x1 LB: > { %s585_s19 = sadd.s32 4294967295, %s709_s18   ;;  %p589_p0 = scmp.ge.s32.totalorder %s709_s18, 1  ;;  %s709_s18 = sphi %s742_s18, %s15_s18  }
   0x2   : > { %p187_p1 = scmp.lt.s32.totalorder %s709_s18, 3 }
   0x4   : > { %p188_p2 = pnand %p589_p0, %p187_p1 }
   0x5   : > { %p215_p3 = scmp.lt.s32.totalorder (!%p188_p2), %s585_s19, 1  ;;  %s711_s29 = smov (!%p188_p2), 112  }
   0x6   : > { %191 = sbr.rel (%p188_p2) target bundleno = 336 (0x150), region = 40 }
   0xb   : > { %v625_v0 = vld [vmem:[%s1067_s1 + $0x178] sm:$0xff]  ;;  %v624_v2 = vld [vmem:[%s1067_s1 + $0x170] sm:$0xff]  ;;  %v623_v5 = vld [vmem:[%s1067_s1 + $0x168] sm:$0xff]  ;;  %s1073_s19 = smov (!%p215_p3, %s585_s19), 1  ;;  %vm339_vm0 = vcmask 1045504   ;;  %vm291_vm1 = vcmask 1046528  }
   0xc   : > { %v246_v1 = vld [vmem:[%s1067_s1 + $0x78] sm:$0xff]  ;;  %345 = vmatpush.msra.mxu2 %v625_v0  ;;  %v245_v3 = vld [vmem:[%s1067_s1 + $0x70] sm:$0xff]  ;;  %v244_v6 = vld [vmem:[%s1067_s1 + $0x68] sm:$0xff]  ;;  %s662_s7 = sshll.u32 %s1073_s19, 4  ;;  %vm390_vm2 = vcmask 916480   ;;  %vm526_vm3 = vcmask 785408  }
   0xd   : > { %247 = vmatpush.msra.mxu0 %v246_v1  ;;  %v609_v4 = vld [vmem:[%s1067_s1 + $0xf8] sm:$0xff]  ;;  %v608_v7 = vld [vmem:[%s1067_s1 + $0xf0] sm:$0xff]  ;;  %v607_v8 = vld [vmem:[%s1067_s1 + $0xe8] sm:$0xff]  ;;  %s219_s24 = scalar_lea.vmem %s1066_s0, %s662_s7  ;;  %s224_s8 = scalar_lea.vmem %s1071_s5, %s662_s7  ;;  %vm528_vm4 = vcmask 781312  }
   0xe   : > { %297 = vmatpush.msra.mxu1 %v609_v4  ;;  %346 = vmatpush.msra.mxu2 %v624_v2  ;;  %v622_v9 = vld [vmem:[%s1067_s1 + $0x160] sm:$0xff]  ;;  %v621_v12 = vld [vmem:[%s1067_s1 + $0x158] sm:$0xff]  ;;  %v620_v15 = vld [vmem:[%s1067_s1 + $0x150] sm:$0xff] }
   0xf   : > { %248 = vmatpush.msra.mxu0 %v245_v3  ;;  %v243_v10 = vld [vmem:[%s1067_s1 + $0x60] sm:$0xff]  ;;  %v242_v13 = vld [vmem:[%s1067_s1 + $0x58] sm:$0xff]  ;;  %v241_v16 = vld [vmem:[%s1067_s1 + $0x50] sm:$0xff] }
  0x10   : > { %298 = vmatpush.msra.mxu1 %v608_v7  ;;  %347 = vmatpush.msra.mxu2 %v623_v5  ;;  %v606_v11 = vld [vmem:[%s1067_s1 + $0xe0] sm:$0xff]  ;;  %v605_v14 = vld [vmem:[%s1067_s1 + $0xd8] sm:$0xff]  ;;  %v604_v17 = vld [vmem:[%s1067_s1 + $0xd0] sm:$0xff] }
  0x11   : > { %249 = vmatpush.msra.mxu0 %v244_v6  ;;  %v619_v18 = vld [vmem:[%s1067_s1 + $0x148] sm:$0xff]  ;;  %v618_v21 = vld [vmem:[%s1067_s1 + $0x140] sm:$0xff]  ;;  %v617_v24 = vld [vmem:[%s1067_s1 + $0x138] sm:$0xff] }
  0x12   : > { %299 = vmatpush.msra.mxu1 %v607_v8  ;;  %348 = vmatpush.msra.mxu2 %v622_v9  ;;  %v240_v19 = vld [vmem:[%s1067_s1 + $0x48] sm:$0xff]  ;;  %v239_v22 = vld [vmem:[%s1067_s1 + $0x40] sm:$0xff]  ;;  %v238_v25 = vld [vmem:[%s1067_s1 + $0x38] sm:$0xff] }
  0x13   : > { %250 = vmatpush.msra.mxu0 %v243_v10  ;;  %v603_v20 = vld [vmem:[%s1067_s1 + $0xc8] sm:$0xff]  ;;  %v602_v23 = vld [vmem:[%s1067_s1 + $0xc0] sm:$0xff]  ;;  %v601_v26 = vld [vmem:[%s1067_s1 + $0xb8] sm:$0xff] }
  0x14   : > { %300 = vmatpush.msra.mxu1 %v606_v11  ;;  %349 = vmatpush.msra.mxu2 %v621_v12  ;;  %v616_v27 = vld [vmem:[%s1067_s1 + $0x130] sm:$0xff]  ;;  %v389_v30 = vld [vmem:[%s1069_s3 + $0x68] sm:$0xff]  ;;  %v388_v31 = vld [vmem:[%s1069_s3 + $0x60] sm:$0xff] }
  0x15   : > { %251 = vmatpush.msra.mxu0 %v242_v13  ;;  %v237_v28 = vld [vmem:[%s1067_s1 + $0x30] sm:$0xff]  ;;  %v615_v32 = vld [vmem:[%s1067_s1 + $0x128] sm:$0xff]  ;;  %399 = vmatpush.msra.mxu3 %v389_v30  ;;  %v387_v35 = vld [vmem:[%s1069_s3 + $0x58] sm:$0xff] }
  0x16   : > { %301 = vmatpush.msra.mxu1 %v605_v14  ;;  %350 = vmatpush.msra.mxu2 %v620_v15  ;;  %v600_v29 = vld [vmem:[%s1067_s1 + $0xb0] sm:$0xff]  ;;  %v236_v33 = vld [vmem:[%s1067_s1 + $0x28] sm:$0xff]  ;;  %v614_v36 = vld [vmem:[%s1067_s1 + $0x120] sm:$0xff] }
  0x17   : > { %252 = vmatpush.msra.mxu0 %v241_v16  ;;  %v599_v34 = vld [vmem:[%s1067_s1 + $0xa8] sm:$0xff]  ;;  %v235_v37 = vld [vmem:[%s1067_s1 + $0x20] sm:$0xff]  ;;  %400 = vmatpush.msra.mxu3 %v388_v31  ;;  %v613_v38 = vld [vmem:[%s1067_s1 + $0x118] sm:$0xff] }
  0x18   : > { %302 = vmatpush.msra.mxu1 %v604_v17  ;;  %351 = vmatpush.msra.mxu2 %v619_v18  ;;  %v598_v39 = vld [vmem:[%s1067_s1 + $0xa0] sm:$0xff]  ;;  %v386_v40 = vld [vmem:[%s1069_s3 + $0x50] sm:$0xff]  ;;  %v234_v41 = vld [vmem:[%s1067_s1 + $0x18] sm:$0xff] }
  0x19   : > { %253 = vmatpush.msra.mxu0 %v240_v19  ;;  %v225_v42 = vld [vmem:[%s219_s24] sm:$0xff]  ;;  %v888_v43 = vld [vmem:[%s219_s24 + $0x8] sm:$0xff]  ;;  %401 = vmatpush.msra.mxu3 %v387_v35  ;;  %v597_v44 = vld [vmem:[%s1067_s1 + $0x98] sm:$0xff] }
  0x1a   : > { %303 = vmatpush.msra.mxu1 %v603_v20  ;;  %352 = vmatpush.msra.mxu2 %v618_v21  ;;  %v385_v45 = vld [vmem:[%s1069_s3 + $0x48] sm:$0xff]  ;;  %v612_v46 = vld [vmem:[%s1067_s1 + $0x110] sm:$0xff]  ;;  %v340_v49 = vrot.slane %v225_v42, 2  ;;  %v906_v50 = vrot.slane %v888_v43, 2  ;;  %v384_v51 = vld [vmem:[%s1069_s3 + $0x40] sm:$0xff]  ;;  %v292_v55 = vrot.slane %v225_v42, 1 }
  0x1b   : > { %254 = vmatpush.msra.mxu0 %v239_v22  ;;  %v233_v47 = vld [vmem:[%s1067_s1 + $0x10] sm:$0xff]  ;;  %402 = vmatpush.msra.mxu3 %v386_v40  ;;  %v611_v52 = vld [vmem:[%s1067_s1 + $0x108] sm:$0xff]  ;;  %v293_v56 = vrot.slane %v888_v43, 1  ;;  %v383_v57 = vld [vmem:[%s1069_s3 + $0x38] sm:$0xff] }
  0x1c   : > { %304 = vmatpush.msra.mxu1 %v602_v23  ;;  %353 = vmatpush.msra.mxu2 %v617_v24  ;;  %v596_v48 = vld [vmem:[%s1067_s1 + $0x90] sm:$0xff]  ;;  %v232_v53 = vld [vmem:[%s1067_s1 + $0x8] sm:$0xff]  ;;  %v610_v58 = vld [vmem:[%s1067_s1 + $0x100] sm:$0xff]  ;;  %v342_v60 = vsel %vm339_vm0, %v340_v49, %v906_v50 }
  0x1d   : > { %255 = vmatpush.msra.mxu0 %v238_v25  ;;  %403 = vmatpush.msra.mxu3 %v385_v45  ;;  %v595_v54 = vld [vmem:[%s1067_s1 + $0x88] sm:$0xff]  ;;  %v231_v59 = vld [vmem:[%s1067_s1] sm:$0xff]  ;;  %v382_v62 = vld [vmem:[%s1069_s3 + $0x30] sm:$0xff]  ;;  %v294_v63 = vsel %vm291_vm1, %v292_v55, %v293_v56 }
  0x1e   : > { %305 = vmatpush.msra.mxu1 %v601_v26  ;;  %354 = vmatpush.msra.mxu2 %v616_v27  ;;  %v594_v61 = vld [vmem:[%s1067_s1 + $0x80] sm:$0xff]  ;;  %v641_v0 = vld [vmem:[%s1069_s3 + $0xd8] sm:$0xff]  ;;  %v381_v1 = vld [vmem:[%s1069_s3 + $0x28] sm:$0xff] }
  0x1f   : > { %256 = vmatpush.msra.mxu0 %v237_v28  ;;  %404 = vmatpush.msra.mxu3 %v384_v51  ;;  %v657_v2 = vld [vmem:[%s1069_s3 + $0x148] sm:$0xff]  ;;  %v640_v3 = vld [vmem:[%s1069_s3 + $0xd0] sm:$0xff]  ;;  %v380_v4 = vld [vmem:[%s1069_s3 + $0x20] sm:$0xff] }
  0x20   : > { %306 = vmatpush.msra.mxu1 %v600_v29  ;;  %355 = vmatpush.msra.mxu2 %v615_v32  ;;  %v656_v5 = vld [vmem:[%s1069_s3 + $0x140] sm:$0xff]  ;;  %v639_v6 = vld [vmem:[%s1069_s3 + $0xc8] sm:$0xff]  ;;  %v379_v7 = vld [vmem:[%s1069_s3 + $0x18] sm:$0xff] }
  0x21   : > { %257 = vmatpush.msra.mxu0 %v236_v33  ;;  %405 = vmatpush.msra.mxu3 %v383_v57  ;;  %v655_v8 = vld [vmem:[%s1069_s3 + $0x138] sm:$0xff]  ;;  %v378_v9 = vld [vmem:[%s1069_s3 + $0x10] sm:$0xff]  ;;  %v638_v10 = vld [vmem:[%s1069_s3 + $0xc0] sm:$0xff] }
  0x22   : > { %307 = vmatpush.msra.mxu1 %v599_v34  ;;  %356 = vmatpush.msra.mxu2 %v614_v36  ;;  %v377_v11 = vld [vmem:[%s1069_s3 + $0x8] sm:$0xff]  ;;  %v654_v12 = vld [vmem:[%s1069_s3 + $0x130] sm:$0xff]  ;;  %v376_v13 = vld [vmem:[%s1069_s3] sm:$0xff] }
  0x23   : > { %258 = vmatpush.msra.mxu0 %v235_v37  ;;  %406 = vmatpush.msra.mxu3 %v382_v62  ;;  %v653_v14 = vld [vmem:[%s1069_s3 + $0x128] sm:$0xff]  ;;  %v637_v15 = vld [vmem:[%s1069_s3 + $0xb8] sm:$0xff]  ;;  %v652_v16 = vld [vmem:[%s1069_s3 + $0x120] sm:$0xff] }
  0x24   : > { %308 = vmatpush.msra.mxu1 %v598_v39  ;;  %357 = vmatpush.msra.mxu2 %v613_v38  ;;  %v636_v17 = vld [vmem:[%s1069_s3 + $0xb0] sm:$0xff]  ;;  %v651_v18 = vld [vmem:[%s1069_s3 + $0x118] sm:$0xff]  ;;  %v635_v19 = vld [vmem:[%s1069_s3 + $0xa8] sm:$0xff] }
  0x25   : > { %259 = vmatpush.msra.mxu0 %v234_v41  ;;  %407 = vmatpush.msra.mxu3 %v381_v1  ;;  %v650_v20 = vld [vmem:[%s1069_s3 + $0x110] sm:$0xff]  ;;  %v634_v21 = vld [vmem:[%s1069_s3 + $0xa0] sm:$0xff]  ;;  %v649_v22 = vld [vmem:[%s1069_s3 + $0x108] sm:$0xff] }
  0x26   : > { %309 = vmatpush.msra.mxu1 %v597_v44  ;;  %358 = vmatpush.msra.mxu2 %v612_v46  ;;  %v633_v23 = vld [vmem:[%s1069_s3 + $0x98] sm:$0xff]  ;;  %v648_v24 = vld [vmem:[%s1069_s3 + $0x100] sm:$0xff]  ;;  %v632_v25 = vld [vmem:[%s1069_s3 + $0x90] sm:$0xff] }
  0x27   : > { %260 = vmatpush.msra.mxu0 %v233_v47  ;;  %408 = vmatpush.msra.mxu3 %v380_v4  ;;  %v647_v26 = vld [vmem:[%s1069_s3 + $0xf8] sm:$0xff]  ;;  %v631_v27 = vld [vmem:[%s1069_s3 + $0x88] sm:$0xff]  ;;  %v646_v28 = vld [vmem:[%s1069_s3 + $0xf0] sm:$0xff] }
  0x28   : > { %310 = vmatpush.msra.mxu1 %v596_v48  ;;  %359 = vmatpush.msra.mxu2 %v611_v52  ;;  %v630_v29 = vld [vmem:[%s1069_s3 + $0x80] sm:$0xff]  ;;  %v645_v30 = vld [vmem:[%s1069_s3 + $0xe8] sm:$0xff]  ;;  %v629_v31 = vld [vmem:[%s1069_s3 + $0x78] sm:$0xff] }
  0x29   : > { %261 = vmatpush.msra.mxu0 %v232_v53  ;;  %409 = vmatpush.msra.mxu3 %v379_v7  ;;  %v644_v32 = vld [vmem:[%s1069_s3 + $0xe0] sm:$0xff]  ;;  %v628_v33 = vld [vmem:[%s1069_s3 + $0x70] sm:$0xff] }
  0x2a   : > { %311 = vmatpush.msra.mxu1 %v595_v54  ;;  %360 = vmatpush.msra.mxu2 %v610_v58  ;;  %v701_v34 = vld [vmem:[%s1068_s2] ss:$0 sm:$0xff] }
  0x2b   : > { %262 = vmatpush.msra.mxu0 %v231_v59  ;;  %361 = vmatmul.f32.vlgmr.msra.gmra.mxu2 %v342_v60 }
  0x2c   : > { %263 = vmatmul.f32.vlgmr.msra.gmra.mxu0 %v225_v42  ;;  %312 = vmatpush.msra.mxu1 %v594_v61 }
  0x2d   : > { %313 = vmatmul.f32.vlgmr.msra.gmra.mxu1 %v294_v63  ;;  %446 = vmatpush.msrb.mxu2 %v641_v0 }
  0x2e   : > { %678 = vmatpush.msrb.mxu1 %v657_v2  ;;  %493 = vmatpush.msrb.mxu0 %v657_v2 }
  0x2f   : > { %447 = vmatpush.msrb.mxu2 %v640_v3  ;;  %410 = vmatpush.msra.mxu3 %v378_v9 }
  0x30   : > { %679 = vmatpush.msrb.mxu1 %v656_v5  ;;  %494 = vmatpush.msrb.mxu0 %v656_v5 }
  0x31   : > { %448 = vmatpush.msrb.mxu2 %v639_v6  ;;  %411 = vmatpush.msra.mxu3 %v377_v11 }
  0x32   : > { %680 = vmatpush.msrb.mxu1 %v655_v8  ;;  %495 = vmatpush.msrb.mxu0 %v655_v8 }
  0x33   : > { %364 = vmatmul.f32.gmra.mxu2 %v906_v50  ;;  %412 = vmatpush.msra.mxu3 %v376_v13 }
  0x34   : > { %266 = vmatmul.f32.gmra.mxu0 %v888_v43  ;;  %449 = vmatpush.msrb.mxu2 %v638_v10 }
  0x35   : > { %316 = vmatmul.f32.gmra.mxu1 %v293_v56  ;;  %496 = vmatpush.msrb.mxu0 %v654_v12  ;;  %v702_v56 = vld [vmem:[%s1070_s4] ss:$0 sm:$0xff] }
  0x36   : > { %681 = vmatpush.msrb.mxu1 %v654_v12  ;;  %664 = vmatpush.msrb.mxu3 %v641_v0 }
  0x37   : > { %516 = vrot.lane.b32.xlu0 %v342_v60, %s711_s29  ;;  %450 = vmatpush.msrb.mxu2 %v637_v15 }
  0x38   : > { %665 = vmatpush.msrb.mxu3 %v640_v3  ;;  %682 = vmatpush.msrb.mxu1 %v653_v14 }
  0x39   : > { %497 = vmatpush.msrb.mxu0 %v653_v14  ;;  %451 = vmatpush.msrb.mxu2 %v636_v17 }
  0x3a   : > { %666 = vmatpush.msrb.mxu3 %v639_v6  ;;  %683 = vmatpush.msrb.mxu1 %v652_v16 }
  0x3b   : > { %498 = vmatpush.msrb.mxu0 %v652_v16  ;;  %452 = vmatpush.msrb.mxu2 %v635_v19 }
  0x3c   : > { %667 = vmatpush.msrb.mxu3 %v638_v10  ;;  %684 = vmatpush.msrb.mxu1 %v651_v18 }
  0x3d   : > { %499 = vmatpush.msrb.mxu0 %v651_v18  ;;  %453 = vmatpush.msrb.mxu2 %v634_v21 }
  0x3e   : > { %668 = vmatpush.msrb.mxu3 %v637_v15  ;;  %685 = vmatpush.msrb.mxu1 %v650_v20 }
  0x3f   : > { %518 = vrot.lane.b32.xlu0 %v906_v50, %s711_s29  ;;  %500 = vmatpush.msrb.mxu0 %v650_v20 }
  0x40   : > { %669 = vmatpush.msrb.mxu3 %v636_v17  ;;  %686 = vmatpush.msrb.mxu1 %v649_v22 }
  0x41   : > { %454 = vmatpush.msrb.mxu2 %v633_v23  ;;  %501 = vmatpush.msrb.mxu0 %v649_v22 }
  0x42   : > { %670 = vmatpush.msrb.mxu3 %v635_v19  ;;  %687 = vmatpush.msrb.mxu1 %v648_v24 }
  0x43   : > { %455 = vmatpush.msrb.mxu2 %v632_v25  ;;  %502 = vmatpush.msrb.mxu0 %v648_v24 }
  0x44   : > { %671 = vmatpush.msrb.mxu3 %v634_v21  ;;  %688 = vmatpush.msrb.mxu1 %v647_v26 }
  0x45   : > { %456 = vmatpush.msrb.mxu2 %v631_v27  ;;  %503 = vmatpush.msrb.mxu0 %v647_v26 }
  0x46   : > { %672 = vmatpush.msrb.mxu3 %v633_v23  ;;  %689 = vmatpush.msrb.mxu1 %v646_v28 }
  0x47   : > { %457 = vmatpush.msrb.mxu2 %v630_v29  ;;  %504 = vmatpush.msrb.mxu0 %v646_v28 }
  0x48   : > { %673 = vmatpush.msrb.mxu3 %v632_v25  ;;  %690 = vmatpush.msrb.mxu1 %v645_v30 }
  0x49   : > { %458 = vmatpush.msrb.mxu2 %v629_v31  ;;  %505 = vmatpush.msrb.mxu0 %v645_v30 }
  0x4a   : > { %674 = vmatpush.msrb.mxu3 %v631_v27  ;;  %691 = vmatpush.msrb.mxu1 %v644_v32 }
  0x4b   : > { %459 = vmatpush.msrb.mxu2 %v628_v33  ;;  %506 = vmatpush.msrb.mxu0 %v644_v32 }
  0x4c   : > { %675 = vmatpush.msrb.mxu3 %v630_v29 }
  0x4e   : > { %676 = vmatpush.msrb.mxu3 %v629_v31 }
  0x50   : > { %677 = vmatpush.msrb.mxu3 %v628_v33 }
  0xa9   : > { %v264_v35 = vpop.f32.mrf.mxu0  ;;  %v517_v58 = vpop.permute.xlu0 %516 }
  0xaa   : > { %v270_v36 = vadd.f32 %v701_v34, %v264_v35  ;;  %v314_v37 = vpop.f32.mrf.mxu1 }
  0xac   : > { %v320_v38 = vadd.f32 %v314_v37, %v270_v36 }
  0xae   : > { %v362_v39 = vpop.f32.mrf.mxu2 }
  0xaf   : > { %v368_v40 = vadd.f32 %v362_v39, %v320_v38 }
  0xb1   : > { %v267_v41 = vpop.f32.mrf.mxu0  ;;  %v370_v42 = vmax.f32 %v368_v40, 0.0  ;;  %v519_v6 = vpop.permute.xlu0 %518 }
  0xb2   : > { %v271_v43 = vadd.f32 %v701_v34, %v267_v41  ;;  %v317_v44 = vpop.f32.mrf.mxu1 }
  0xb3   : > { %626 = vmatmul.msk.f32.vlgmr.msra.gmra.mxu3 %vm390_vm2, %v370_v42  ;;  %v437_v49 = vrot.slane %v370_v42, 1  ;;  %v484_v50 = vrot.slane %v370_v42, 2 }
  0xb4   : > { %v321_v45 = vadd.f32 %v317_v44, %v271_v43 }
  0xb6   : > { %v365_v46 = vpop.f32.mrf.mxu2 }
  0xb7   : > { %v369_v47 = vadd.f32 %v365_v46, %v321_v45 }
  0xb9   : > { %v371_v48 = vmax.f32 %v369_v47, 0.0 }
  0xbb   : > { %v438_v51 = vrot.slane %v371_v48, 1  ;;  %v485_v52 = vrot.slane %v371_v48, 2  ;;  %627 = vmatmul.msk.f32.gmra.mxu3 %vm390_vm2, %v371_v48 }
  0xbd   : > { %659 = vmatmul.msk.f32.vlgmr.msrb.gmra.mxu1 %vm390_vm2, %v485_v52  ;;  %v439_v53 = vsel %vm291_vm1, %v437_v49, %v438_v51  ;;  %v486_v54 = vsel %vm339_vm0, %v484_v50, %v485_v52 }
  0xbe   : > { %642 = vmatmul.msk.f32.vlgmr.msrb.gmra.mxu2 %vm390_vm2, %v439_v53  ;;  %658 = vmatmul.msk.f32.vlgmr.msrb.gmra.mxu0 %vm390_vm2, %v486_v54 }
  0xc3   : > { %643 = vmatmul.msk.f32.vlgmr.msrb.gmra.mxu3 %vm390_vm2, %v438_v51 }
 0x136   : > { %v414_v55 = vpop.f32.mrf.mxu3 }
 0x137   : > { %v420_v59 = vadd.f32 %v702_v56, %v414_v55 }
 0x13a   : > { %v511_v4 = vpop.f32.mrf.mxu1 }
 0x13b   : > { %v508_v62 = vpop.f32.mrf.mxu0 }
 0x13e   : > { %v417_v57 = vpop.f32.mrf.mxu3 }
 0x13f   : > { %v421_v0 = vadd.f32 %v702_v56, %v417_v57 }
 0x141   : > { %v461_v60 = vpop.f32.mrf.mxu2 }
 0x142   : > { %v467_v61 = vadd.f32 %v461_v60, %v420_v59 }
 0x144   : > { %v514_v63 = vadd.f32 %v508_v62, %v467_v61 }
 0x146   : > { %v522_v1 = vadd.f32 %v517_v58, %v514_v63  ;;  %v464_v2 = vpop.f32.mrf.mxu3 }
 0x147   : > { %v468_v3 = vadd.f32 %v464_v2, %v421_v0 }
 0x148   : > { %v524_v5 = vmax.f32 %v522_v1, 0.0 }
 0x149   : > { %v515_v7 = vadd.f32 %v511_v4, %v468_v3 }
 0x14a   : > { %527 = vst.msk [vmem:[%s224_s8] sm:$0xff] %vm526_vm3, %v524_v5 }
 0x14b   : > { %v523_v8 = vadd.f32 %v519_v6, %v515_v7 }
 0x14d   : > { %v525_v9 = vmax.f32 %v523_v8, 0.0 }
 0x14f   : > { %529 = vst.msk [vmem:[%s224_s8 + $0x8] sm:$0xf] %vm528_vm4, %v525_v9 }
 0x150 PF: > { %s15_s18 = sadd.s32 1, %s709_s18  }
 0x151   : > { %p12_p4 = scmp.ge.s32.totalorder %s15_s18, 4  }
 0x153   :  { %14 = sbr.rel (!%p12_p4) target bundleno = 1 (0x1), region = 74 }

// kernel: crop_resnet_pool_forward.13
= control target key start
LH: loop header
LB: loop body
LE: loop exit
PB: predicated region body
PF: predicated region fallthrough
CT: control target
= control target key end

     0   :  { %s1684_s18 = smov 0   ;;  %s2913_s0 = inlined_call_operand.vmem [shape: f32[2,24,192], index: 0, kind: input, shape index: {}]   ;;  %s2914_s1 = inlined_call_operand.vmem [shape: f32[3,192,176], index: 1, kind: input, shape index: {}]   ;;  %s2915_s2 = inlined_call_operand.vmem [shape: f32[1,176], index: 2, kind: input, shape index: {}]   ;;  %s2916_s3 = inlined_call_operand.vmem [shape: f32[3,176,160], index: 3, kind: input, shape index: {}]   ;;  %s2917_s4 = inlined_call_operand.vmem [shape: f32[1,160], index: 4, kind: input, shape index: {}]   ;;  %s2918_s5 = inlined_call_operand.vmem [shape: f32[2,20,160], index: 5, kind: output, shape index: {}]  }
   0x1 LB: > { %s1390_s19 = sadd.s32 4294967295, %s1651_s18   ;;  %p1394_p0 = scmp.ge.s32.totalorder %s1651_s18, 1  ;;  %s1651_s18 = sphi %s1684_s18, %s15_s18  }
   0x2   : > { %p187_p1 = scmp.lt.s32.totalorder %s1651_s18, 3 }
   0x4   : > { %p188_p2 = pnand %p1394_p0, %p187_p1 }
   0x5   : > { %p1701_p3 = scmp.lt.s32.totalorder (!%p188_p2), %s1390_s19, 1  ;;  %s1653_s9 = smov (!%p188_p2), 112  }
   0x6   : > { %191 = sbr.rel (%p188_p2) target bundleno = 452 (0x1c4), region = 40 }
   0xb   : > { %v267_v0 = vld [vmem:[%s2914_s1 + $0xf0] sm:$0xff]  ;;  %v268_v2 = vld [vmem:[%s2914_s1 + $0xf8] sm:$0xff]  ;;  %v265_v4 = vld [vmem:[%s2914_s1 + $0xe0] sm:$0xff]  ;;  %s2921_s19 = smov (!%p1701_p3, %s1390_s19), 1  ;;  %vm285_vm0 = vcmask 523264   ;;  %vm457_vm1 = vcmask 1046528  }
   0xc   : > { %v283_v1 = vld [vmem:[%s2914_s1 + $0x170] sm:$0xff]  ;;  %295 = vmatpush.msra.mxu0 %v267_v0  ;;  %v284_v3 = vld [vmem:[%s2914_s1 + $0x178] sm:$0xff]  ;;  %v281_v5 = vld [vmem:[%s2914_s1 + $0x160] sm:$0xff]  ;;  %347 = vmatpush.msra.mxu2 %v268_v2  ;;  %s1635_s17 = smul.u32 48, %s2921_s19  ;;  %vm636_vm2 = vcmask 1045504   ;;  %vm822_vm3 = vcmask 392192  }
   0xd   : > { %329 = vmatpush.msra.mxu1 %v283_v1  ;;  %381 = vmatpush.msra.mxu3 %v284_v3  ;;  %v266_v6 = vld [vmem:[%s2914_s1 + $0xe8] sm:$0xff]  ;;  %v263_v8 = vld [vmem:[%s2914_s1 + $0xd0] sm:$0xff]  ;;  %v264_v10 = vld [vmem:[%s2914_s1 + $0xd8] sm:$0xff]  ;;  %vm1305_vm4 = vcmask 916480   ;;  %vm1328_vm5 = vcmask 261120   ;;  %vm1333_vm6 = vcmask 257024  }
   0xe   : > { %v282_v7 = vld [vmem:[%s2914_s1 + $0x168] sm:$0xff]  ;;  %296 = vmatpush.msra.mxu0 %v265_v4  ;;  %v279_v9 = vld [vmem:[%s2914_s1 + $0x150] sm:$0xff]  ;;  %v280_v11 = vld [vmem:[%s2914_s1 + $0x158] sm:$0xff]  ;;  %348 = vmatpush.msra.mxu2 %v266_v6  ;;  %s1796_s13 = scalar_lea.vmem %s2913_s0, %s1635_s17  ;;  %s2891_s14 = scalar_lea.vmem %s2918_s5, %s1635_s17 }
   0xf   : > { %330 = vmatpush.msra.mxu1 %v281_v5  ;;  %382 = vmatpush.msra.mxu3 %v282_v7  ;;  %v261_v12 = vld [vmem:[%s2914_s1 + $0xc0] sm:$0xff]  ;;  %v262_v14 = vld [vmem:[%s2914_s1 + $0xc8] sm:$0xff]  ;;  %v259_v16 = vld [vmem:[%s2914_s1 + $0xb0] sm:$0xff] }
  0x10   : > { %v277_v13 = vld [vmem:[%s2914_s1 + $0x140] sm:$0xff]  ;;  %297 = vmatpush.msra.mxu0 %v263_v8  ;;  %v278_v15 = vld [vmem:[%s2914_s1 + $0x148] sm:$0xff]  ;;  %349 = vmatpush.msra.mxu2 %v264_v10  ;;  %v275_v17 = vld [vmem:[%s2914_s1 + $0x130] sm:$0xff] }
  0x11   : > { %331 = vmatpush.msra.mxu1 %v279_v9  ;;  %383 = vmatpush.msra.mxu3 %v280_v11  ;;  %v260_v18 = vld [vmem:[%s2914_s1 + $0xb8] sm:$0xff]  ;;  %v257_v20 = vld [vmem:[%s2914_s1 + $0xa0] sm:$0xff]  ;;  %v258_v22 = vld [vmem:[%s2914_s1 + $0xa8] sm:$0xff] }
  0x12   : > { %298 = vmatpush.msra.mxu0 %v261_v12  ;;  %v276_v19 = vld [vmem:[%s2914_s1 + $0x138] sm:$0xff]  ;;  %350 = vmatpush.msra.mxu2 %v262_v14  ;;  %v273_v21 = vld [vmem:[%s2914_s1 + $0x120] sm:$0xff]  ;;  %v274_v23 = vld [vmem:[%s2914_s1 + $0x128] sm:$0xff] }
  0x13   : > { %332 = vmatpush.msra.mxu1 %v277_v13  ;;  %384 = vmatpush.msra.mxu3 %v278_v15  ;;  %v255_v24 = vld [vmem:[%s2914_s1 + $0x90] sm:$0xff]  ;;  %v256_v26 = vld [vmem:[%s2914_s1 + $0x98] sm:$0xff]  ;;  %v253_v28 = vld [vmem:[%s2914_s1 + $0x80] sm:$0xff] }
  0x14   : > { %299 = vmatpush.msra.mxu0 %v259_v16  ;;  %351 = vmatpush.msra.mxu2 %v260_v18  ;;  %v271_v25 = vld [vmem:[%s2914_s1 + $0x110] sm:$0xff]  ;;  %v272_v27 = vld [vmem:[%s2914_s1 + $0x118] sm:$0xff]  ;;  %v269_v29 = vld [vmem:[%s2914_s1 + $0x100] sm:$0xff] }
  0x15   : > { %333 = vmatpush.msra.mxu1 %v275_v17  ;;  %385 = vmatpush.msra.mxu3 %v276_v19  ;;  %v254_v30 = vld [vmem:[%s2914_s1 + $0x88] sm:$0xff]  ;;  %v1433_v32 = vld [vmem:[%s2914_s1 + $0x270] sm:$0xff]  ;;  %v252_v35 = vld [vmem:[%s2914_s1 + $0x78] sm:$0xff] }
  0x16   : > { %300 = vmatpush.msra.mxu0 %v257_v20  ;;  %352 = vmatpush.msra.mxu2 %v258_v22  ;;  %v270_v31 = vld [vmem:[%s2914_s1 + $0x108] sm:$0xff]  ;;  %v251_v33 = vld [vmem:[%s2914_s1 + $0x70] sm:$0xff]  ;;  %v1431_v36 = vld [vmem:[%s2914_s1 + $0x260] sm:$0xff] }
  0x17   : > { %334 = vmatpush.msra.mxu1 %v273_v21  ;;  %386 = vmatpush.msra.mxu3 %v274_v23  ;;  %v1811_v34 = vld [vmem:[%s1796_s13 + $0x8] sm:$0xff]  ;;  %v249_v37 = vld [vmem:[%s2914_s1 + $0x60] sm:$0xff]  ;;  %v1449_v38 = vld [vmem:[%s2914_s1 + $0x2f0] sm:$0xff] }
  0x18   : > { %301 = vmatpush.msra.mxu0 %v255_v24  ;;  %353 = vmatpush.msra.mxu2 %v256_v26  ;;  %v250_v39 = vld [vmem:[%s2914_s1 + $0x68] sm:$0xff]  ;;  %v1429_v40 = vld [vmem:[%s2914_s1 + $0x250] sm:$0xff]  ;;  %v1447_v42 = vld [vmem:[%s2914_s1 + $0x2e0] sm:$0xff]  ;;  %v461_v15 = vrot.slane %v1811_v34, 1 }
  0x19   : > { %335 = vmatpush.msra.mxu1 %v271_v25  ;;  %387 = vmatpush.msra.mxu3 %v272_v27  ;;  %v247_v41 = vld [vmem:[%s2914_s1 + $0x50] sm:$0xff]  ;;  %v248_v43 = vld [vmem:[%s2914_s1 + $0x58] sm:$0xff]  ;;  %v1427_v44 = vld [vmem:[%s2914_s1 + $0x240] sm:$0xff] }
  0x1a   : > { %302 = vmatpush.msra.mxu0 %v253_v28  ;;  %354 = vmatpush.msra.mxu2 %v254_v30  ;;  %v245_v45 = vld [vmem:[%s2914_s1 + $0x40] sm:$0xff]  ;;  %v1445_v46 = vld [vmem:[%s2914_s1 + $0x2d0] sm:$0xff]  ;;  %v246_v47 = vld [vmem:[%s2914_s1 + $0x48] sm:$0xff] }
  0x1b   : > { %336 = vmatpush.msra.mxu1 %v269_v29  ;;  %388 = vmatpush.msra.mxu3 %v270_v31  ;;  %v1425_v48 = vld [vmem:[%s2914_s1 + $0x230] sm:$0xff]  ;;  %v1861_v50 = vld [vmem:[%s1796_s13 + $0x18] sm:$0xff]  ;;  %v1443_v51 = vld [vmem:[%s2914_s1 + $0x2c0] sm:$0xff] }
  0x1c   : > { %303 = vmatpush.msra.mxu0 %v251_v33  ;;  %1400 = vmatmul.msk.f32.vlgmr.msra.gmra.mxu3 %vm285_vm0, %v1811_v34  ;;  %v243_v49 = vld [vmem:[%s2914_s1 + $0x30] sm:$0xff]  ;;  %v244_v52 = vld [vmem:[%s2914_s1 + $0x38] sm:$0xff]  ;;  %v1423_v53 = vld [vmem:[%s2914_s1 + $0x220] sm:$0xff]  ;;  %v462_v16 = vrot.slane %v1861_v50, 1 }
  0x1d   : > { %477 = vmatpush.msrb.mxu1 %v1433_v32  ;;  %355 = vmatpush.msra.mxu2 %v252_v35  ;;  %v241_v54 = vld [vmem:[%s2914_s1 + $0x20] sm:$0xff]  ;;  %v1441_v55 = vld [vmem:[%s2914_s1 + $0x2b0] sm:$0xff]  ;;  %v242_v56 = vld [vmem:[%s2914_s1 + $0x28] sm:$0xff] }
  0x1e   : > { %304 = vmatpush.msra.mxu0 %v249_v37  ;;  %511 = vmatpush.msrb.mxu3 %v1449_v38  ;;  %v1421_v57 = vld [vmem:[%s2914_s1 + $0x210] sm:$0xff]  ;;  %v1439_v59 = vld [vmem:[%s2914_s1 + $0x2a0] sm:$0xff]  ;;  %v240_v60 = vld [vmem:[%s2914_s1 + $0x18] sm:$0xff]  ;;  %v1983_v24 = vsel %vm457_vm1, %v461_v15, %v462_v16 }
  0x1f   : > { %478 = vmatpush.msrb.mxu1 %v1431_v36  ;;  %356 = vmatpush.msra.mxu2 %v250_v39  ;;  %v239_v58 = vld [vmem:[%s2914_s1 + $0x10] sm:$0xff]  ;;  %v1419_v61 = vld [vmem:[%s2914_s1 + $0x200] sm:$0xff]  ;;  %v238_v0 = vld [vmem:[%s2914_s1 + $0x8] sm:$0xff] }
  0x20   : > { %305 = vmatpush.msra.mxu0 %v247_v41  ;;  %512 = vmatpush.msrb.mxu3 %v1447_v42  ;;  %v237_v62 = vld [vmem:[%s2914_s1] sm:$0xff]  ;;  %v1437_v63 = vld [vmem:[%s2914_s1 + $0x290] sm:$0xff]  ;;  %v1434_v2 = vld [vmem:[%s2914_s1 + $0x278] sm:$0xff] }
  0x21   : > { %479 = vmatpush.msrb.mxu1 %v1429_v40  ;;  %357 = vmatpush.msra.mxu2 %v248_v43  ;;  %v1417_v1 = vld [vmem:[%s2914_s1 + $0x1f0] sm:$0xff]  ;;  %v1916_v3 = vld [vmem:[%s1796_s13] sm:$0xff]  ;;  %v1921_v4 = vld [vmem:[%s1796_s13 + $0x28] sm:$0xff] }
  0x22   : > { %306 = vmatpush.msra.mxu0 %v245_v45  ;;  %1397 = vmatmul.msk.f32.vlgmr.msra.gmra.mxu1 %vm285_vm0, %v1811_v34  ;;  %v1450_v5 = vld [vmem:[%s2914_s1 + $0x2f8] sm:$0xff]  ;;  %v1435_v6 = vld [vmem:[%s2914_s1 + $0x280] sm:$0xff]  ;;  %v1432_v8 = vld [vmem:[%s2914_s1 + $0x268] sm:$0xff]  ;;  %v458_v32 = vrot.slane %v1916_v3, 1  ;;  %v2024_v39 = vrot.slane %v1921_v4, 1 }
  0x23   : > { %480 = vmatpush.msrb.mxu1 %v1427_v44  ;;  %513 = vmatpush.msrb.mxu3 %v1445_v46  ;;  %v1415_v7 = vld [vmem:[%s2914_s1 + $0x1e0] sm:$0xff]  ;;  %v1487_v9 = vld [vmem:[%s2914_s1 + $0x3f0] sm:$0xff]  ;;  %v1448_v11 = vld [vmem:[%s2914_s1 + $0x2e8] sm:$0xff] }
  0x24   : > { %358 = vmatpush.msra.mxu2 %v246_v47  ;;  %307 = vmatpush.msra.mxu0 %v243_v49  ;;  %v1413_v10 = vld [vmem:[%s2914_s1 + $0x1d0] sm:$0xff]  ;;  %v1430_v12 = vld [vmem:[%s2914_s1 + $0x258] sm:$0xff]  ;;  %v1485_v13 = vld [vmem:[%s2914_s1 + $0x3e0] sm:$0xff]  ;;  %v2047_v46 = vsel %vm457_vm1, %v462_v16, %v2024_v39 }
  0x25   : > { %481 = vmatpush.msrb.mxu1 %v1425_v48  ;;  %1401 = vmatmul.msk.f32.gmra.mxu3 %vm285_vm0, %v1861_v50  ;;  %v1411_v14 = vld [vmem:[%s2914_s1 + $0x1c0] sm:$0xff]  ;;  %v1428_v17 = vld [vmem:[%s2914_s1 + $0x248] sm:$0xff]  ;;  %v1483_v18 = vld [vmem:[%s2914_s1 + $0x3d0] sm:$0xff] }
  0x26   : > { %514 = vmatpush.msrb.mxu3 %v1443_v51  ;;  %359 = vmatpush.msra.mxu2 %v244_v52  ;;  %v1446_v19 = vld [vmem:[%s2914_s1 + $0x2d8] sm:$0xff]  ;;  %v1409_v20 = vld [vmem:[%s2914_s1 + $0x1b0] sm:$0xff]  ;;  %v1481_v22 = vld [vmem:[%s2914_s1 + $0x3c0] sm:$0xff] }
  0x27   : > { %482 = vmatpush.msrb.mxu1 %v1423_v53  ;;  %308 = vmatpush.msra.mxu0 %v241_v54  ;;  %v1426_v21 = vld [vmem:[%s2914_s1 + $0x238] sm:$0xff]  ;;  %v1978_v23 = vld [vmem:[%s1796_s13 + $0x10] sm:$0xff]  ;;  %v1444_v25 = vld [vmem:[%s2914_s1 + $0x2c8] sm:$0xff] }
  0x28   : > { %515 = vmatpush.msrb.mxu3 %v1441_v55  ;;  %360 = vmatpush.msra.mxu2 %v242_v56  ;;  %v1407_v26 = vld [vmem:[%s2914_s1 + $0x1a0] sm:$0xff]  ;;  %v1424_v27 = vld [vmem:[%s2914_s1 + $0x228] sm:$0xff]  ;;  %v1479_v28 = vld [vmem:[%s2914_s1 + $0x3b0] sm:$0xff]  ;;  %v459_v33 = vrot.slane %v1978_v23, 1 }
  0x29   : > { %483 = vmatpush.msrb.mxu1 %v1421_v57  ;;  %309 = vmatpush.msra.mxu0 %v239_v58  ;;  %v1442_v29 = vld [vmem:[%s2914_s1 + $0x2b8] sm:$0xff]  ;;  %v1405_v30 = vld [vmem:[%s2914_s1 + $0x190] sm:$0xff]  ;;  %v1477_v35 = vld [vmem:[%s2914_s1 + $0x3a0] sm:$0xff] }
  0x2a   : > { %516 = vmatpush.msrb.mxu3 %v1439_v59  ;;  %361 = vmatpush.msra.mxu2 %v240_v60  ;;  %v1422_v31 = vld [vmem:[%s2914_s1 + $0x218] sm:$0xff]  ;;  %v1440_v36 = vld [vmem:[%s2914_s1 + $0x2a8] sm:$0xff]  ;;  %v1403_v37 = vld [vmem:[%s2914_s1 + $0x180] sm:$0xff]  ;;  %v2030_v41 = vsel %vm457_vm1, %v458_v32, %v459_v33 }
  0x2b   : > { %484 = vmatpush.msrb.mxu1 %v1419_v61  ;;  %310 = vmatpush.msra.mxu0 %v237_v62  ;;  %v1420_v38 = vld [vmem:[%s2914_s1 + $0x208] sm:$0xff]  ;;  %v1475_v40 = vld [vmem:[%s2914_s1 + $0x390] sm:$0xff]  ;;  %v1438_v42 = vld [vmem:[%s2914_s1 + $0x298] sm:$0xff] }
  0x2c   : > { %1398 = vmatmul.msk.f32.gmra.mxu1 %vm285_vm0, %v1861_v50  ;;  %517 = vmatpush.msrb.mxu3 %v1437_v63  ;;  %v1418_v43 = vld [vmem:[%s2914_s1 + $0x1f8] sm:$0xff]  ;;  %v1473_v44 = vld [vmem:[%s2914_s1 + $0x380] sm:$0xff]  ;;  %v1436_v47 = vld [vmem:[%s2914_s1 + $0x288] sm:$0xff] }
  0x2d   : > { %362 = vmatpush.msra.mxu2 %v238_v0  ;;  %485 = vmatpush.msrb.mxu1 %v1417_v1  ;;  %v2043_v45 = vld [vmem:[%s1796_s13 + $0x20] sm:$0xff]  ;;  %v1416_v48 = vld [vmem:[%s2914_s1 + $0x1e8] sm:$0xff]  ;;  %v1471_v49 = vld [vmem:[%s2914_s1 + $0x370] sm:$0xff] }
  0x2e   : > { %529 = vmatpush.msrb.mxu0 %v1434_v2  ;;  %363 = vmatmul.f32.vlgmr.msra.gmra.mxu2 %v1916_v3  ;;  %v1488_v51 = vld [vmem:[%s2914_s1 + $0x3f8] sm:$0xff]  ;;  %v2069_v53 = vrot.slane %v2043_v45, 1  ;;  %v1503_v54 = vld [vmem:[%s2914_s1 + $0x470] sm:$0xff]  ;;  %v1469_v55 = vld [vmem:[%s2914_s1 + $0x360] sm:$0xff] }
  0x2f   : > { %1402 = vmatmul.msk.f32.gmra.mxu3 %vm285_vm0, %v1921_v4  ;;  %563 = vmatpush.msrb.mxu2 %v1450_v5  ;;  %v1414_v52 = vld [vmem:[%s2914_s1 + $0x1d8] sm:$0xff]  ;;  %v1486_v56 = vld [vmem:[%s2914_s1 + $0x3e8] sm:$0xff]  ;;  %v1501_v58 = vld [vmem:[%s2914_s1 + $0x460] sm:$0xff] }
  0x30   : > { %518 = vmatpush.msrb.mxu3 %v1435_v6  ;;  %486 = vmatpush.msrb.mxu1 %v1415_v7  ;;  %v1412_v57 = vld [vmem:[%s2914_s1 + $0x1c8] sm:$0xff]  ;;  %v1467_v59 = vld [vmem:[%s2914_s1 + $0x350] sm:$0xff]  ;;  %v1484_v60 = vld [vmem:[%s2914_s1 + $0x3d8] sm:$0xff]  ;;  %v2094_v61 = vsel %vm457_vm1, %v459_v33, %v2069_v53 }
  0x31   : > { %530 = vmatpush.msrb.mxu0 %v1432_v8  ;;  %564 = vmatpush.msrb.mxu2 %v1448_v11  ;;  %v1410_v62 = vld [vmem:[%s2914_s1 + $0x1b8] sm:$0xff]  ;;  %v1465_v63 = vld [vmem:[%s2914_s1 + $0x340] sm:$0xff]  ;;  %v1482_v0 = vld [vmem:[%s2914_s1 + $0x3c8] sm:$0xff] }
  0x32   : > { %656 = vmatpush.msra.mxu3 %v1487_v9  ;;  %487 = vmatpush.msrb.mxu1 %v1413_v10  ;;  %v1408_v1 = vld [vmem:[%s2914_s1 + $0x1a8] sm:$0xff]  ;;  %v1463_v2 = vld [vmem:[%s2914_s1 + $0x330] sm:$0xff]  ;;  %v1480_v5 = vld [vmem:[%s2914_s1 + $0x3b8] sm:$0xff] }
  0x33   : > { %531 = vmatpush.msrb.mxu0 %v1430_v12  ;;  %565 = vmatpush.msrb.mxu2 %v1446_v19  ;;  %v1406_v6 = vld [vmem:[%s2914_s1 + $0x198] sm:$0xff]  ;;  %v1499_v7 = vld [vmem:[%s2914_s1 + $0x450] sm:$0xff]  ;;  %v1461_v8 = vld [vmem:[%s2914_s1 + $0x320] sm:$0xff]  ;;  %v637_v12 = vrot.slane %v1916_v3, 2 }
  0x34   : > { %657 = vmatpush.msra.mxu3 %v1485_v13  ;;  %488 = vmatpush.msrb.mxu1 %v1411_v14  ;;  %v1478_v9 = vld [vmem:[%s2914_s1 + $0x3a8] sm:$0xff]  ;;  %v1497_v11 = vld [vmem:[%s2914_s1 + $0x440] sm:$0xff]  ;;  %v638_v13 = vrot.slane %v1978_v23, 2  ;;  %v1459_v14 = vld [vmem:[%s2914_s1 + $0x310] sm:$0xff] }
  0x35   : > { %311 = vmatmul.f32.vlgmr.msra.gmra.mxu0 %v1916_v3  ;;  %1399 = vmatmul.msk.f32.gmra.mxu1 %vm285_vm0, %v1921_v4  ;;  %v1404_v10 = vld [vmem:[%s2914_s1 + $0x188] sm:$0xff]  ;;  %v1476_v15 = vld [vmem:[%s2914_s1 + $0x398] sm:$0xff]  ;;  %v1457_v16 = vld [vmem:[%s2914_s1 + $0x300] sm:$0xff] }
  0x36   : > { %532 = vmatpush.msrb.mxu0 %v1428_v17  ;;  %658 = vmatpush.msra.mxu3 %v1483_v18  ;;  %v1504_v3 = vld [vmem:[%s2914_s1 + $0x478] sm:$0xff]  ;;  %v1495_v17 = vld [vmem:[%s2914_s1 + $0x430] sm:$0xff]  ;;  %v1474_v18 = vld [vmem:[%s2914_s1 + $0x388] sm:$0xff]  ;;  %v2161_v19 = vsel %vm636_vm2, %v637_v12, %v638_v13 }
  0x37   : > { %489 = vmatpush.msrb.mxu1 %v1409_v20  ;;  %366 = vmatmul.f32.gmra.mxu2 %v1978_v23  ;;  %v1493_v20 = vld [vmem:[%s2914_s1 + $0x420] sm:$0xff]  ;;  %v1464_v33 = vld [vmem:[%s2914_s1 + $0x338] sm:$0xff] }
  0x38   : > { %533 = vmatpush.msrb.mxu0 %v1426_v21  ;;  %659 = vmatpush.msra.mxu3 %v1481_v22  ;;  %v1472_v21 = vld [vmem:[%s2914_s1 + $0x378] sm:$0xff]  ;;  %v640_v22 = vrot.slane %v1811_v34, 2  ;;  %v1470_v34 = vld [vmem:[%s2914_s1 + $0x368] sm:$0xff]  ;;  %v786_v12 = vld [vmem:[%s2916_s3 + $0x40] sm:$0xff] }
  0x39   : > { %1451 = vmatmul.msk.f32.vlgmr.msrb.gmra.mxu3 %vm285_vm0, %v1983_v24  ;;  %566 = vmatpush.msrb.mxu2 %v1444_v25  ;;  %v1491_v25 = vld [vmem:[%s2914_s1 + $0x410] sm:$0xff] }
  0x3a   : > { %490 = vmatpush.msrb.mxu1 %v1407_v26  ;;  %534 = vmatpush.msrb.mxu0 %v1424_v27  ;;  %v1500_v26 = vld [vmem:[%s2914_s1 + $0x458] sm:$0xff]  ;;  %v1489_v27 = vld [vmem:[%s2914_s1 + $0x400] sm:$0xff] }
  0x3b   : > { %660 = vmatpush.msra.mxu3 %v1479_v28  ;;  %567 = vmatpush.msrb.mxu2 %v1442_v29  ;;  %v1468_v28 = vld [vmem:[%s2914_s1 + $0x358] sm:$0xff] }
  0x3c   : > { %491 = vmatpush.msrb.mxu1 %v1405_v30  ;;  %535 = vmatpush.msrb.mxu0 %v1422_v31  ;;  %v1466_v30 = vld [vmem:[%s2914_s1 + $0x348] sm:$0xff] }
  0x3d   : > { %661 = vmatpush.msra.mxu3 %v1477_v35  ;;  %568 = vmatpush.msrb.mxu2 %v1440_v36  ;;  %v1498_v31 = vld [vmem:[%s2914_s1 + $0x448] sm:$0xff]  ;;  %v1496_v35 = vld [vmem:[%s2914_s1 + $0x438] sm:$0xff]  ;;  %v2218_v36 = vrot.slane %v1921_v4, 2 }
  0x3e   : > { %492 = vmatpush.msrb.mxu1 %v1403_v37  ;;  %536 = vmatpush.msrb.mxu0 %v1420_v38  ;;  %v1462_v37 = vld [vmem:[%s2914_s1 + $0x328] sm:$0xff]  ;;  %v1460_v4 = vld [vmem:[%s2914_s1 + $0x318] sm:$0xff] }
  0x3f   : > { %662 = vmatpush.msra.mxu3 %v1475_v40  ;;  %314 = vmatmul.f32.gmra.mxu0 %v1978_v23  ;;  %v641_v23 = vrot.slane %v1861_v50, 2  ;;  %v2184_v50 = vrot.slane %v2043_v45, 2  ;;  %v1494_v38 = vld [vmem:[%s2914_s1 + $0x428] sm:$0xff] }
  0x40   : > { %493 = vmatmul.f32.vlgmr.msrb.gmra.mxu1 %v2030_v41  ;;  %569 = vmatpush.msrb.mxu2 %v1438_v42  ;;  %v1490_v42 = vld [vmem:[%s2914_s1 + $0x408] sm:$0xff] }
  0x41   : > { %537 = vmatpush.msrb.mxu0 %v1418_v43  ;;  %663 = vmatpush.msra.mxu3 %v1473_v44  ;;  %v2196_v29 = vsel %vm636_vm2, %v640_v22, %v641_v23  ;;  %v2206_v32 = vsel %vm636_vm2, %v638_v13, %v2184_v50  ;;  %v2237_v40 = vsel %vm636_vm2, %v641_v23, %v2218_v36  ;;  %v808_v43 = vld [vmem:[%s2916_s3 + $0xf0] sm:$0xff]  ;;  %v809_v44 = vld [vmem:[%s2916_s3 + $0xf8] sm:$0xff]  ;;  %v787_v13 = vld [vmem:[%s2916_s3 + $0x48] sm:$0xff] }
  0x42   : > { %369 = vmatmul.f32.gmra.mxu2 %v2043_v45  ;;  %1452 = vmatmul.msk.f32.gmra.mxu3 %vm285_vm0, %v2047_v46  ;;  %v781_v22 = vld [vmem:[%s2916_s3 + $0x18] sm:$0xff] }
  0x43   : > { %570 = vmatpush.msrb.mxu2 %v1436_v47  ;;  %538 = vmatpush.msrb.mxu0 %v1416_v48  ;;  %v806_v47 = vld [vmem:[%s2916_s3 + $0xe0] sm:$0xff]  ;;  %v807_v48 = vld [vmem:[%s2916_s3 + $0xe8] sm:$0xff] }
  0x44   : > { %664 = vmatpush.msra.mxu3 %v1471_v49  ;;  %690 = vmatpush.msra.mxu1 %v1503_v54  ;;  %v804_v49 = vld [vmem:[%s2916_s3 + $0xd0] sm:$0xff] }
  0x45   : > { %708 = vmatpush.msra.mxu2 %v1488_v51  ;;  %539 = vmatpush.msrb.mxu0 %v1414_v52  ;;  %v805_v51 = vld [vmem:[%s2916_s3 + $0xd8] sm:$0xff]  ;;  %v802_v52 = vld [vmem:[%s2916_s3 + $0xc0] sm:$0xff]  ;;  %v800_v54 = vld [vmem:[%s2916_s3 + $0xb0] sm:$0xff] }
  0x46   : > { %665 = vmatpush.msra.mxu3 %v1469_v55  ;;  %691 = vmatpush.msra.mxu1 %v1501_v58  ;;  %v801_v55 = vld [vmem:[%s2916_s3 + $0xb8] sm:$0xff]  ;;  %v798_v58 = vld [vmem:[%s2916_s3 + $0xa0] sm:$0xff] }
  0x47   : > { %709 = vmatpush.msra.mxu2 %v1486_v56  ;;  %540 = vmatpush.msrb.mxu0 %v1412_v57 }
  0x48   : > { %666 = vmatpush.msra.mxu3 %v1467_v59  ;;  %317 = vmatmul.f32.gmra.mxu0 %v2043_v45  ;;  %v799_v59 = vld [vmem:[%s2916_s3 + $0xa8] sm:$0xff] }
  0x49   : > { %710 = vmatpush.msra.mxu2 %v1484_v60  ;;  %496 = vmatmul.f32.gmra.mxu1 %v2094_v61  ;;  %v796_v60 = vld [vmem:[%s2916_s3 + $0x90] sm:$0xff] }
  0x4a   : > { %541 = vmatpush.msrb.mxu0 %v1410_v62  ;;  %667 = vmatpush.msra.mxu3 %v1465_v63  ;;  %v794_v62 = vld [vmem:[%s2916_s3 + $0x80] sm:$0xff]  ;;  %v795_v63 = vld [vmem:[%s2916_s3 + $0x88] sm:$0xff] }
  0x4b   : > { %711 = vmatpush.msra.mxu2 %v1482_v0  ;;  %1453 = vmatmul.msk.f32.gmra.mxu3 %vm285_vm0, %v2024_v39  ;;  %v792_v0 = vld [vmem:[%s2916_s3 + $0x70] sm:$0xff] }
  0x4c   : > { %1454 = vmatmul.msk.f32.vlgmr.msrb.gmra.mxu2 %vm285_vm0, %v1983_v24  ;;  %542 = vmatpush.msrb.mxu0 %v1408_v1  ;;  %v1502_v24 = vld [vmem:[%s2914_s1 + $0x468] sm:$0xff]  ;;  %v793_v1 = vld [vmem:[%s2916_s3 + $0x78] sm:$0xff] }
  0x4d   : > { %668 = vmatpush.msra.mxu3 %v1463_v2  ;;  %712 = vmatpush.msra.mxu2 %v1480_v5  ;;  %v790_v5 = vld [vmem:[%s2916_s3 + $0x60] sm:$0xff] }
  0x4e   : > { %543 = vmatpush.msrb.mxu0 %v1406_v6  ;;  %692 = vmatpush.msra.mxu1 %v1499_v7  ;;  %v791_v6 = vld [vmem:[%s2916_s3 + $0x68] sm:$0xff] }
  0x4f   : > { %669 = vmatpush.msra.mxu3 %v1461_v8  ;;  %713 = vmatpush.msra.mxu2 %v1478_v9 }
  0x50   : > { %544 = vmatpush.msrb.mxu0 %v1404_v10  ;;  %693 = vmatpush.msra.mxu1 %v1497_v11  ;;  %v788_v10 = vld [vmem:[%s2916_s3 + $0x50] sm:$0xff]  ;;  %v789_v11 = vld [vmem:[%s2916_s3 + $0x58] sm:$0xff] }
  0x51   : > { %670 = vmatpush.msra.mxu3 %v1459_v14  ;;  %714 = vmatpush.msra.mxu2 %v1476_v15  ;;  %v820_v14 = vld [vmem:[%s2916_s3 + $0x150] sm:$0xff] }
  0x52   : > { %499 = vmatmul.f32.gmra.mxu1 %v2069_v53  ;;  %545 = vmatmul.f32.vlgmr.msrb.gmra.mxu0 %v2030_v41  ;;  %v1458_v41 = vld [vmem:[%s2914_s1 + $0x308] sm:$0xff]  ;;  %v784_v15 = vld [vmem:[%s2916_s3 + $0x30] sm:$0xff] }
  0x53   : > { %742 = vmatpush.msra.mxu0 %v1504_v3  ;;  %671 = vmatpush.msra.mxu3 %v1457_v16  ;;  %v785_v3 = vld [vmem:[%s2916_s3 + $0x38] sm:$0xff]  ;;  %v782_v16 = vld [vmem:[%s2916_s3 + $0x20] sm:$0xff] }
  0x54   : > { %694 = vmatpush.msra.mxu1 %v1495_v17  ;;  %715 = vmatpush.msra.mxu2 %v1474_v18  ;;  %v783_v17 = vld [vmem:[%s2916_s3 + $0x28] sm:$0xff] }
  0x55   : > { %1455 = vmatmul.msk.f32.gmra.mxu2 %vm285_vm0, %v2047_v46  ;;  %672 = vmatmul.f32.vlgmr.msra.gmra.mxu3 %v2161_v19 }
  0x56   : > { %695 = vmatpush.msra.mxu1 %v1493_v20  ;;  %716 = vmatpush.msra.mxu2 %v1472_v21  ;;  %v780_v21 = vld [vmem:[%s2916_s3 + $0x10] sm:$0xff] }
  0x57   : > { %743 = vmatpush.msra.mxu0 %v1502_v24  ;;  %1293 = vrot.lane.b32.xlu0 %v2161_v19, %s1653_s9  ;;  %v821_v24 = vld [vmem:[%s2916_s3 + $0x158] sm:$0xff] }
  0x58   : > { %696 = vmatpush.msra.mxu1 %v1491_v25  ;;  %717 = vmatpush.msra.mxu2 %v1470_v34  ;;  %v818_v25 = vld [vmem:[%s2916_s3 + $0x140] sm:$0xff] }
  0x59   : > { %744 = vmatpush.msra.mxu0 %v1500_v26  ;;  %1297 = vrot.lane.b32.xlu1 %v2206_v32, %s1653_s9  ;;  %v778_v34 = vld [vmem:[%s2916_s3] sm:$0xff]  ;;  %v819_v26 = vld [vmem:[%s2916_s3 + $0x148] sm:$0xff] }
  0x5a   : > { %697 = vmatpush.msra.mxu1 %v1489_v27  ;;  %718 = vmatpush.msra.mxu2 %v1468_v28  ;;  %v816_v27 = vld [vmem:[%s2916_s3 + $0x130] sm:$0xff]  ;;  %v817_v28 = vld [vmem:[%s2916_s3 + $0x138] sm:$0xff] }
  0x5b   : > { %548 = vmatmul.f32.gmra.mxu0 %v2094_v61  ;;  %1505 = vmatmul.msk.f32.vlgmr.msra.gmra.mxu1 %vm285_vm0, %v2196_v29  ;;  %v797_v61 = vld [vmem:[%s2916_s3 + $0x98] sm:$0xff] }
  0x5c   : > { %719 = vmatpush.msra.mxu2 %v1466_v30  ;;  %745 = vmatpush.msra.mxu0 %v1498_v31  ;;  %v815_v30 = vld [vmem:[%s2916_s3 + $0x128] sm:$0xff] }
  0x5d   : > { %1456 = vmatmul.msk.f32.gmra.mxu2 %vm285_vm0, %v2024_v39  ;;  %675 = vmatmul.f32.gmra.mxu3 %v2206_v32  ;;  %v1492_v39 = vld [vmem:[%s2914_s1 + $0x418] sm:$0xff] }
  0x5e   : > { %720 = vmatpush.msra.mxu2 %v1464_v33  ;;  %746 = vmatpush.msra.mxu0 %v1496_v35  ;;  %v812_v33 = vld [vmem:[%s2916_s3 + $0x110] sm:$0xff]  ;;  %v813_v35 = vld [vmem:[%s2916_s3 + $0x118] sm:$0xff] }
  0x5f   : > { %832 = vmatpush.msrb.mxu1 %v808_v43  ;;  %1301 = vrot.lane.b32.xlu2 %v2184_v50, %s1653_s9  ;;  %v1545_v43 = vld [vmem:[%s2916_s3 + $0x240] sm:$0xff] }
  0x60   : > { %721 = vmatpush.msra.mxu2 %v1462_v37  ;;  %747 = vmatpush.msra.mxu0 %v1494_v38  ;;  %v810_v38 = vld [vmem:[%s2916_s3 + $0x100] sm:$0xff] }
  0x61   : > { %833 = vmatpush.msrb.mxu1 %v806_v47  ;;  %1295 = vrot.lane.b32.xlu0 %v2196_v29, %s1653_s9  ;;  %v1546_v47 = vld [vmem:[%s2916_s3 + $0x248] sm:$0xff] }
  0x62   : > { %722 = vmatpush.msra.mxu2 %v1460_v4  ;;  %748 = vmatpush.msra.mxu0 %v1492_v39  ;;  %v811_v4 = vld [vmem:[%s2916_s3 + $0x108] sm:$0xff]  ;;  %v1547_v39 = vld [vmem:[%s2916_s3 + $0x250] sm:$0xff] }
  0x63   : > { %551 = vmatmul.f32.gmra.mxu0 %v2069_v53  ;;  %1506 = vmatmul.msk.f32.gmra.mxu1 %vm285_vm0, %v2237_v40  ;;  %v803_v53 = vld [vmem:[%s2916_s3 + $0xc8] sm:$0xff] }
  0x64   : > { %723 = vmatpush.msra.mxu2 %v1458_v41  ;;  %749 = vmatpush.msra.mxu0 %v1490_v42  ;;  %v1548_v41 = vld [vmem:[%s2916_s3 + $0x258] sm:$0xff] }
  0x65   : > { %678 = vmatmul.f32.gmra.mxu3 %v2184_v50  ;;  %724 = vmatmul.f32.vlgmr.msra.gmra.mxu2 %v2161_v19  ;;  %v1560_v42 = vld [vmem:[%s2916_s3 + $0x2b8] sm:$0xff] }
  0x66   : > { %884 = vmatpush.msrb.mxu0 %v809_v44  ;;  %834 = vmatpush.msrb.mxu1 %v804_v49  ;;  %v1557_v44 = vld [vmem:[%s2916_s3 + $0x2a0] sm:$0xff]  ;;  %v1543_v49 = vld [vmem:[%s2916_s3 + $0x230] sm:$0xff] }
  0x67   : > { %1299 = vrot.lane.b32.xlu1 %v2237_v40, %s1653_s9  ;;  %868 = vmatpush.msrb.mxu3 %v820_v14  ;;  %v1550_v14 = vld [vmem:[%s2916_s3 + $0x268] sm:$0xff] }
  0x68   : > { %885 = vmatpush.msrb.mxu0 %v807_v48  ;;  %835 = vmatpush.msrb.mxu1 %v802_v52  ;;  %v1558_v48 = vld [vmem:[%s2916_s3 + $0x2a8] sm:$0xff]  ;;  %v1544_v52 = vld [vmem:[%s2916_s3 + $0x238] sm:$0xff] }
  0x69   : > { %1303 = vrot.lane.b32.xlu2 %v2218_v36, %s1653_s9  ;;  %920 = vmatpush.msrb.mxu2 %v821_v24 }
  0x6a   : > { %886 = vmatpush.msrb.mxu0 %v805_v51  ;;  %836 = vmatpush.msrb.mxu1 %v800_v54  ;;  %v1555_v51 = vld [vmem:[%s2916_s3 + $0x290] sm:$0xff] }
  0x6b   : > { %1507 = vmatmul.msk.f32.gmra.mxu1 %vm285_vm0, %v2218_v36  ;;  %1508 = vmatmul.msk.f32.vlgmr.msra.gmra.mxu0 %vm285_vm0, %v2196_v29  ;;  %v814_v29 = vld [vmem:[%s2916_s3 + $0x120] sm:$0xff] }
  0x6c   : > { %887 = vmatpush.msrb.mxu0 %v803_v53  ;;  %837 = vmatpush.msrb.mxu1 %v798_v58  ;;  %v1556_v53 = vld [vmem:[%s2916_s3 + $0x298] sm:$0xff]  ;;  %v1553_v58 = vld [vmem:[%s2916_s3 + $0x280] sm:$0xff] }
  0x6d   : > { %727 = vmatmul.f32.gmra.mxu2 %v2206_v32  ;;  %869 = vmatpush.msrb.mxu3 %v818_v25 }
  0x6e   : > { %888 = vmatpush.msrb.mxu0 %v801_v55  ;;  %838 = vmatpush.msrb.mxu1 %v796_v60  ;;  %v1541_v55 = vld [vmem:[%s2916_s3 + $0x220] sm:$0xff] }
  0x6f   : > { %921 = vmatpush.msrb.mxu2 %v819_v26  ;;  %870 = vmatpush.msrb.mxu3 %v816_v27 }
  0x70   : > { %889 = vmatpush.msrb.mxu0 %v799_v59  ;;  %839 = vmatpush.msrb.mxu1 %v794_v62  ;;  %v1542_v59 = vld [vmem:[%s2916_s3 + $0x228] sm:$0xff] }
  0x71   : > { %922 = vmatpush.msrb.mxu2 %v817_v28  ;;  %871 = vmatpush.msrb.mxu3 %v814_v29  ;;  %v1554_v62 = vld [vmem:[%s2916_s3 + $0x288] sm:$0xff]  ;;  %v1529_v28 = vld [vmem:[%s2916_s3 + $0x1c0] sm:$0xff] }
  0x72   : > { %890 = vmatpush.msrb.mxu0 %v797_v61  ;;  %840 = vmatpush.msrb.mxu1 %v792_v0  ;;  %v1539_v0 = vld [vmem:[%s2916_s3 + $0x210] sm:$0xff]  ;;  %v1530_v29 = vld [vmem:[%s2916_s3 + $0x1c8] sm:$0xff] }
  0x73   : > { %1509 = vmatmul.msk.f32.gmra.mxu0 %vm285_vm0, %v2237_v40  ;;  %923 = vmatpush.msrb.mxu2 %v815_v30  ;;  %v1559_v40 = vld [vmem:[%s2916_s3 + $0x2b0] sm:$0xff] }
  0x74   : > { %891 = vmatpush.msrb.mxu0 %v795_v63  ;;  %841 = vmatpush.msrb.mxu1 %v790_v5  ;;  %v1540_v5 = vld [vmem:[%s2916_s3 + $0x218] sm:$0xff] }
  0x75   : > { %730 = vmatmul.f32.gmra.mxu2 %v2184_v50  ;;  %v779_v50 = vld [vmem:[%s2916_s3 + $0x8] sm:$0xff]  ;;  %872 = vmatpush.msrb.mxu3 %v812_v33 }
  0x76   : > { %892 = vmatpush.msrb.mxu0 %v793_v1  ;;  %842 = vmatpush.msrb.mxu1 %v788_v10  ;;  %v1551_v1 = vld [vmem:[%s2916_s3 + $0x270] sm:$0xff]  ;;  %v1552_v10 = vld [vmem:[%s2916_s3 + $0x278] sm:$0xff] }
  0x77   : > { %924 = vmatpush.msrb.mxu2 %v813_v35  ;;  %873 = vmatpush.msrb.mxu3 %v810_v38  ;;  %v1527_v35 = vld [vmem:[%s2916_s3 + $0x1b0] sm:$0xff]  ;;  %v1528_v38 = vld [vmem:[%s2916_s3 + $0x1b8] sm:$0xff] }
  0x78   : > { %893 = vmatpush.msrb.mxu0 %v791_v6  ;;  %843 = vmatpush.msrb.mxu1 %v786_v12  ;;  %v2504_v6 = vld [vmem:[%s2915_s2] sm:$0x3] }
  0x79   : > { %925 = vmatpush.msrb.mxu2 %v811_v4  ;;  %1009 = vmatpush.msra.mxu3 %v1547_v39  ;;  %v1549_v12 = vld [vmem:[%s2916_s3 + $0x260] sm:$0xff] }
  0x7a   : > { %894 = vmatpush.msrb.mxu0 %v789_v11  ;;  %844 = vmatpush.msrb.mxu1 %v784_v15  ;;  %v1537_v11 = vld [vmem:[%s2916_s3 + $0x200] sm:$0xff]  ;;  %v2522_v15 = vperm.slane %v2504_v6, 0 }
  0x7b   : > { %1510 = vmatmul.msk.f32.gmra.mxu0 %vm285_vm0, %v2218_v36  ;;  %1061 = vmatpush.msra.mxu2 %v1548_v41  ;;  %v1525_v4 = vld [vmem:[%s2916_s3 + $0x1a0] sm:$0xff]  ;;  %v1526_v41 = vld [vmem:[%s2916_s3 + $0x1a8] sm:$0xff] }
  0x7c   : > { %895 = vmatpush.msrb.mxu0 %v787_v13  ;;  %845 = vmatpush.msrb.mxu1 %v782_v16  ;;  %v1538_v13 = vld [vmem:[%s2916_s3 + $0x208] sm:$0xff]  ;;  %v1535_v16 = vld [vmem:[%s2916_s3 + $0x1f0] sm:$0xff] }
  0x7d   : > { %1010 = vmatpush.msra.mxu3 %v1545_v43  ;;  %1062 = vmatpush.msra.mxu2 %v1546_v47  ;;  %v2599_v47 = vld [vmem:[%s2916_s3 + $0x3a8] sm:$0xff] }
  0x7e   : > { %896 = vmatpush.msrb.mxu0 %v785_v3  ;;  %846 = vmatpush.msrb.mxu1 %v780_v21  ;;  %v1533_v21 = vld [vmem:[%s2916_s3 + $0x1e0] sm:$0xff] }
  0x7f   : > { %1011 = vmatpush.msra.mxu3 %v1543_v49  ;;  %1063 = vmatpush.msra.mxu2 %v1544_v52  ;;  %v1521_v52 = vld [vmem:[%s2916_s3 + $0x180] sm:$0xff] }
  0x80   : > { %897 = vmatpush.msrb.mxu0 %v783_v17  ;;  %847 = vmatpush.msrb.mxu1 %v778_v34  ;;  %v1536_v17 = vld [vmem:[%s2916_s3 + $0x1f8] sm:$0xff]  ;;  %v1531_v34 = vld [vmem:[%s2916_s3 + $0x1d0] sm:$0xff] }
  0x81   : > { %1012 = vmatpush.msra.mxu3 %v1541_v55  ;;  %1064 = vmatpush.msra.mxu2 %v1542_v59  ;;  %v2614_v59 = vld [vmem:[%s2916_s3 + $0x398] sm:$0xff] }
  0x82   : > { %898 = vmatpush.msrb.mxu0 %v781_v22  ;;  %1045 = vmatpush.msra.mxu1 %v1559_v40 }
  0x83   : > { %1013 = vmatpush.msra.mxu3 %v1539_v0  ;;  %1065 = vmatpush.msra.mxu2 %v1540_v5  ;;  %v1519_v5 = vld [vmem:[%s2916_s3 + $0x170] sm:$0xff] }
  0x84   : > { %899 = vmatpush.msrb.mxu0 %v779_v50  ;;  %1046 = vmatpush.msra.mxu1 %v1557_v44  ;;  %v1595_v44 = vld [vmem:[%s2916_s3 + $0x3a0] sm:$0xff] }
  0x85   : > { %1014 = vmatpush.msra.mxu3 %v1537_v11  ;;  %1066 = vmatpush.msra.mxu2 %v1538_v13  ;;  %v2651_v13 = vld [vmem:[%s2916_s3 + $0x378] sm:$0xff] }
  0x86   : > { %1097 = vmatpush.msra.mxu0 %v1560_v42  ;;  %1047 = vmatpush.msra.mxu1 %v1555_v51  ;;  %v1524_v51 = vld [vmem:[%s2916_s3 + $0x198] sm:$0xff] }
  0x87   : > { %1015 = vmatpush.msra.mxu3 %v1535_v16  ;;  %1067 = vmatpush.msra.mxu2 %v1536_v17  ;;  %v1587_v16 = vld [vmem:[%s2916_s3 + $0x360] sm:$0xff]  ;;  %v2670_v17 = vld [vmem:[%s2916_s3 + $0x368] sm:$0xff] }
  0x88   : > { %1098 = vmatpush.msra.mxu0 %v1558_v48  ;;  %1048 = vmatpush.msra.mxu1 %v1553_v58  ;;  %v1593_v58 = vld [vmem:[%s2916_s3 + $0x390] sm:$0xff] }
  0x89   : > { %1016 = vmatpush.msra.mxu3 %v1533_v21 }
  0x8a   : > { %1099 = vmatpush.msra.mxu0 %v1556_v53  ;;  %1049 = vmatpush.msra.mxu1 %v1551_v1  ;;  %v1522_v1 = vld [vmem:[%s2916_s3 + $0x188] sm:$0xff] }
  0x8b   : > { %1017 = vmatpush.msra.mxu3 %v1531_v34 }
  0x8c   : > { %1100 = vmatpush.msra.mxu0 %v1554_v62  ;;  %1050 = vmatpush.msra.mxu1 %v1549_v12  ;;  %v2617_v62 = vperm.slane %v2504_v6, 1  ;;  %v1591_v6 = vld [vmem:[%s2916_s3 + $0x380] sm:$0xff]  ;;  %v1589_v12 = vld [vmem:[%s2916_s3 + $0x370] sm:$0xff] }
  0x8d   : > { %1018 = vmatpush.msra.mxu3 %v1529_v28 }
  0x8e   : > { %1101 = vmatpush.msra.mxu0 %v1552_v10 }
  0x8f   : > { %1019 = vmatpush.msra.mxu3 %v1527_v35 }
  0x90   : > { %1102 = vmatpush.msra.mxu0 %v1550_v14 }
  0x91   : > { %1020 = vmatpush.msra.mxu3 %v1525_v4  ;;  %v1581_v4 = vld [vmem:[%s2916_s3 + $0x330] sm:$0xff] }
  0x9f   : > { %v2266_v45 = vpop.f32.mrf.mxu1  ;;  %v2268_v46 = vpop.f32.mrf.mxu3 }
  0xa8   : > { %v2294_v56 = vpop.f32.mrf.mxu3 }
  0xa9   : > { %v2296_v57 = vpop.f32.mrf.mxu1 }
  0xb1   : > { %v2328_v2 = vpop.f32.mrf.mxu2 }
  0xb2   : > { %v2338_v7 = vpop.f32.mrf.mxu0  ;;  %v2340_v8 = vpop.f32.mrf.mxu3  ;;  %v391_v0 = vadd.f32 %v2268_v46, %v2328_v2  ;;  %v2636_v46 = vld [vmem:[%s2916_s3 + $0x388] sm:$0xff] }
  0xb3   : > { %v2342_v9 = vpop.f32.mrf.mxu1  ;;  %v339_v3 = vadd.f32 %v2266_v45, %v2338_v7  ;;  %v1534_v45 = vld [vmem:[%s2916_s3 + $0x1e8] sm:$0xff] }
  0xb4   : > { %1068 = vmatpush.msra.mxu2 %v1534_v45 }
  0xb5   : > { %v399_v7 = vadd.f32 %v339_v3, %v2522_v15 }
  0xba   : > { %v2375_v18 = vpop.f32.mrf.mxu2 }
  0xbc   : > { %v2377_v19 = vpop.f32.mrf.mxu0  ;;  %v2379_v20 = vpop.f32.mrf.mxu3 }
  0xbd   : > { %v2387_v23 = vpop.f32.mrf.mxu1  ;;  %v342_v30 = vadd.f32 %v2296_v57, %v2377_v19  ;;  %v1597_v57 = vld [vmem:[%s2916_s3 + $0x3b0] sm:$0xff]  ;;  %v2578_v19 = vld [vmem:[%s2916_s3 + $0x3b8] sm:$0xff] }
  0xbe   : > { %v521_v22 = vadd.f32 %v2379_v20, %v2387_v23  ;;  %v1532_v20 = vld [vmem:[%s2916_s3 + $0x1d8] sm:$0xff] }
  0xbf   : > { %1069 = vmatpush.msra.mxu2 %v1532_v20 }
  0xc0   : > { %v581_v26 = vadd.f32 %v521_v22, %v399_v7 }
  0xc1   : > { %1070 = vmatpush.msra.mxu2 %v1530_v29 }
  0xc3   : > { %1071 = vmatpush.msra.mxu2 %v1528_v38 }
  0xc5   : > { %v2416_v31 = vpop.f32.mrf.mxu2  ;;  %v2418_v32 = vpop.f32.mrf.mxu3  ;;  %1072 = vmatpush.msra.mxu2 %v1526_v41 }
  0xc6   : > { %v2426_v36 = vpop.f32.mrf.mxu0  ;;  %v2428_v37 = vpop.f32.mrf.mxu1 }
  0xc7   : > { %v524_v39 = vadd.f32 %v2418_v32, %v2428_v37  ;;  %v1523_v32 = vld [vmem:[%s2916_s3 + $0x190] sm:$0xff]  ;;  %v401_v37 = vadd.f32 %v342_v30, %v2522_v15  ;;  %v345_v10 = vadd.f32 %v2342_v9, %v2426_v36  ;;  %1073 = vmatpush.msra.mxu2 %v1524_v51  ;;  %v397_v51 = vadd.f32 %v2340_v8, %v2416_v31  ;;  %v2755_v31 = vld [vmem:[%s2916_s3 + $0x318] sm:$0xff] }
  0xc8   : > { %1021 = vmatpush.msra.mxu3 %v1523_v32  ;;  %v1577_v8 = vld [vmem:[%s2916_s3 + $0x310] sm:$0xff] }
  0xc9   : > { %v583_v53 = vadd.f32 %v524_v39, %v401_v37  ;;  %1074 = vmatpush.msra.mxu2 %v1522_v1  ;;  %v2718_v39 = vld [vmem:[%s2916_s3 + $0x338] sm:$0xff]  ;;  %v1607_v37 = vld [vmem:[%s2916_s3 + $0x400] sm:$0xff] }
  0xca   : > { %1022 = vmatpush.msra.mxu3 %v1521_v52 }
  0xcc   : > { %1023 = vmatpush.msra.mxu3 %v1519_v5  ;;  %v1606_v5 = vld [vmem:[%s2916_s3 + $0x3f8] sm:$0xff] }
  0xce   : > { %v2472_v54 = vpop.f32.mrf.mxu3 }
  0xcf   : > { %v2483_v60 = vpop.f32.mrf.mxu1  ;;  %v2485_v61 = vpop.f32.mrf.mxu0 }
  0xd0   : > { %v2490_v63 = vpop.f32.mrf.mxu2  ;;  %v527_v9 = vadd.f32 %v2472_v54, %v2483_v60  ;;  %v1520_v54 = vld [vmem:[%s2916_s3 + $0x178] sm:$0xff]  ;;  %v1517_v60 = vld [vmem:[%s2916_s3 + $0x160] sm:$0xff] }
  0xd1   : > { %v573_v2 = vadd.f32 %v2490_v63, %v2485_v61  ;;  %v400_v61 = vadd.f32 %v391_v0, %v2617_v62  ;;  %v403_v63 = vadd.f32 %v345_v10, %v2522_v15  ;;  %v1518_v15 = vld [vmem:[%s2916_s3 + $0x168] sm:$0xff]  ;;  %1075 = vmatpush.msra.mxu2 %v1520_v54  ;;  %1024 = vmatpush.msra.mxu3 %v1517_v60  ;;  %v1603_v0 = vld [vmem:[%s2916_s3 + $0x3e0] sm:$0xff]  ;;  %v1573_v54 = vld [vmem:[%s2916_s3 + $0x2f0] sm:$0xff] }
  0xd2   : > { %v2791_v60 = vld [vmem:[%s2916_s3 + $0x2f8] sm:$0xff] }
  0xd3   : > { %v582_v21 = vadd.f32 %v573_v2, %v400_v61  ;;  %v585_v34 = vadd.f32 %v527_v9, %v403_v63  ;;  %1076 = vmatpush.msra.mxu2 %v1518_v15  ;;  %v1601_v61 = vld [vmem:[%s2916_s3 + $0x3d0] sm:$0xff]  ;;  %v1604_v63 = vld [vmem:[%s2916_s3 + $0x3e8] sm:$0xff] }
  0xd8   : > { %v2541_v24 = vpop.f32.mrf.mxu0  ;;  %v2543_v25 = vpop.f32.mrf.mxu2 }
  0xd9   : > { %v673_v23 = vpop.f32.mrf.mxu3  ;;  %v699_v50 = vpop.f32.mrf.mxu1  ;;  %v576_v29 = vadd.f32 %v2543_v25, %v2541_v24  ;;  %v1609_v24 = vld [vmem:[%s2916_s3 + $0x410] sm:$0xff] }
  0xda   : > { %v700_v27 = vadd.f32 %v699_v50, %v673_v23  ;;  %v1585_v23 = vld [vmem:[%s2916_s3 + $0x350] sm:$0xff]  ;;  %v2682_v50 = vld [vmem:[%s2916_s3 + $0x358] sm:$0xff] }
  0xdc   : > { %v760_v33 = vadd.f32 %v700_v27, %v581_v26  ;;  %v394_v26 = vadd.f32 %v2294_v56, %v2375_v18  ;;  %v1583_v56 = vld [vmem:[%s2916_s3 + $0x340] sm:$0xff]  ;;  %v2700_v18 = vld [vmem:[%s2916_s3 + $0x348] sm:$0xff] }
  0xde   : > { %v2570_v40 = vmax.f32 %v760_v33, 0.0  ;;  %v402_v35 = vadd.f32 %v394_v26, %v2617_v62 }
  0xe0   : > { %848 = vmatmul.f32.vlgmr.msrb.gmra.mxu1 %v2570_v40  ;;  %900 = vmatmul.f32.vlgmr.msrb.gmra.mxu0 %v2570_v40  ;;  %v2589_v42 = vpop.f32.mrf.mxu0  ;;  %v2591_v43 = vpop.f32.mrf.mxu2  ;;  %v584_v41 = vadd.f32 %v576_v29, %v402_v35  ;;  %v990_v29 = vrot.slane %v2570_v40, 1 }
  0xe1   : > { %v676_v48 = vpop.f32.mrf.mxu3  ;;  %v702_v49 = vpop.f32.mrf.mxu1  ;;  %1183 = vmatpush.msrb.mxu1 %v1597_v57  ;;  %1235 = vmatpush.msrb.mxu0 %v2578_v19  ;;  %v1610_v57 = vld [vmem:[%s2916_s3 + $0x418] sm:$0xff] }
  0xe2   : > { %v703_v55 = vadd.f32 %v702_v49, %v676_v48  ;;  %v2733_v48 = vld [vmem:[%s2916_s3 + $0x328] sm:$0xff] }
  0xe3   : > { %1184 = vmatpush.msrb.mxu1 %v1595_v44  ;;  %1236 = vmatpush.msrb.mxu0 %v2599_v47  ;;  %v1579_v44 = vld [vmem:[%s2916_s3 + $0x320] sm:$0xff]  ;;  %v1608_v49 = vld [vmem:[%s2916_s3 + $0x408] sm:$0xff] }
  0xe4   : > { %v762_v11 = vadd.f32 %v703_v55, %v583_v53  ;;  %v1605_v53 = vld [vmem:[%s2916_s3 + $0x3f0] sm:$0xff]  ;;  %v579_v55 = vadd.f32 %v2591_v43, %v2589_v42  ;;  %v404_v42 = vadd.f32 %v397_v51, %v2617_v62  ;;  %v1575_v62 = vld [vmem:[%s2916_s3 + $0x300] sm:$0xff] }
  0xe5   : > { %1185 = vmatpush.msrb.mxu1 %v1593_v58  ;;  %1237 = vmatpush.msrb.mxu0 %v2614_v59 }
  0xe6   : > { %v2643_v36 = vmax.f32 %v762_v11, 0.0  ;;  %v586_v2 = vadd.f32 %v579_v55, %v404_v42 }
  0xe7   : > { %1186 = vmatpush.msrb.mxu1 %v1591_v6  ;;  %1238 = vmatpush.msrb.mxu0 %v2636_v46  ;;  %v2777_v6 = vld [vmem:[%s2916_s3 + $0x308] sm:$0xff] }
  0xe8   : > { %851 = vmatmul.f32.gmra.mxu1 %v2643_v36  ;;  %903 = vmatmul.f32.gmra.mxu0 %v2643_v36  ;;  %v725_v14 = vpop.f32.mrf.mxu2  ;;  %v751_v3 = vpop.f32.mrf.mxu0  ;;  %v991_v26 = vrot.slane %v2643_v36, 1 }
  0xe9   : > { %v679_v22 = vpop.f32.mrf.mxu3  ;;  %v705_v45 = vpop.f32.mrf.mxu1  ;;  %v752_v7 = vadd.f32 %v751_v3, %v725_v14  ;;  %1187 = vmatpush.msrb.mxu1 %v1589_v12  ;;  %1239 = vmatpush.msrb.mxu0 %v2651_v13  ;;  %v1599_v3 = vld [vmem:[%s2916_s3 + $0x3c0] sm:$0xff] }
  0xea   : > { %v706_v20 = vadd.f32 %v705_v45, %v679_v22  ;;  %v1571_v22 = vld [vmem:[%s2916_s3 + $0x2e0] sm:$0xff]  ;;  %v2810_v45 = vld [vmem:[%s2916_s3 + $0x2e8] sm:$0xff] }
  0xeb   : > { %v761_v27 = vadd.f32 %v752_v7, %v582_v21  ;;  %1188 = vmatpush.msrb.mxu1 %v1587_v16  ;;  %1240 = vmatpush.msrb.mxu0 %v2670_v17  ;;  %v1602_v16 = vld [vmem:[%s2916_s3 + $0x3d8] sm:$0xff]  ;;  %v1600_v7 = vld [vmem:[%s2916_s3 + $0x3c8] sm:$0xff] }
  0xec   : > { %v764_v28 = vadd.f32 %v706_v20, %v585_v34  ;;  %v1569_v34 = vld [vmem:[%s2916_s3 + $0x2d0] sm:$0xff]  ;;  %v1570_v20 = vld [vmem:[%s2916_s3 + $0x2d8] sm:$0xff] }
  0xed   : > { %v2689_v30 = vmax.f32 %v761_v27, 0.0  ;;  %1189 = vmatpush.msrb.mxu1 %v1585_v23  ;;  %1241 = vmatpush.msrb.mxu0 %v2682_v50  ;;  %v1567_v27 = vld [vmem:[%s2916_s3 + $0x2c0] sm:$0xff] }
  0xee   : > { %v2692_v33 = vmax.f32 %v764_v28, 0.0  ;;  %v1568_v28 = vld [vmem:[%s2916_s3 + $0x2c8] sm:$0xff] }
  0xef   : > { %1511 = vmatmul.msk.f32.vlgmr.msrb.gmra.mxu3 %vm822_vm3, %v2689_v30  ;;  %1514 = vmatmul.msk.f32.vlgmr.msrb.gmra.mxu2 %vm822_vm3, %v2689_v30  ;;  %v993_v43 = vrot.slane %v2689_v30, 1 }
  0xf0   : > { %854 = vmatmul.f32.gmra.mxu1 %v2692_v33  ;;  %906 = vmatmul.f32.gmra.mxu0 %v2692_v33  ;;  %v728_v25 = vpop.f32.mrf.mxu2  ;;  %v754_v38 = vpop.f32.mrf.mxu0  ;;  %v996_v35 = vrot.slane %v2692_v33, 1 }
  0xf1   : > { %v755_v32 = vadd.f32 %v754_v38, %v728_v25  ;;  %1190 = vmatpush.msrb.mxu1 %v1583_v56  ;;  %1242 = vmatpush.msrb.mxu0 %v2700_v18  ;;  %v992_v56 = vsel %vm457_vm1, %v990_v29, %v991_v26  ;;  %v1164_v38 = vrot.slane %v2570_v40, 2 }
  0xf2   : > { %1219 = vmatpush.msrb.mxu3 %v1609_v24  ;;  %1271 = vmatpush.msrb.mxu2 %v1610_v57  ;;  %v1165_v24 = vrot.slane %v2643_v36, 2  ;;  %v997_v25 = vsel %vm457_vm1, %v991_v26, %v996_v35 }
  0xf3   : > { %v763_v52 = vadd.f32 %v755_v32, %v584_v41  ;;  %1191 = vmatpush.msrb.mxu1 %v1581_v4  ;;  %1243 = vmatpush.msrb.mxu0 %v2718_v39 }
  0xf4   : > { %1220 = vmatpush.msrb.mxu3 %v1607_v37  ;;  %1272 = vmatpush.msrb.mxu2 %v1608_v49 }
  0xf5   : > { %v2746_v58 = vmax.f32 %v763_v52, 0.0  ;;  %1192 = vmatpush.msrb.mxu1 %v1579_v44  ;;  %1244 = vmatpush.msrb.mxu0 %v2733_v48 }
  0xf6   : > { %1221 = vmatpush.msrb.mxu3 %v1605_v53  ;;  %1273 = vmatpush.msrb.mxu2 %v1606_v5 }
  0xf7   : > { %1512 = vmatmul.msk.f32.gmra.mxu3 %vm822_vm3, %v2746_v58  ;;  %1515 = vmatmul.msk.f32.gmra.mxu2 %vm822_vm3, %v2746_v58  ;;  %v994_v1 = vrot.slane %v2746_v58, 1  ;;  %v1168_v40 = vrot.slane %v2746_v58, 2 }
  0xf8   : > { %v731_v10 = vpop.f32.mrf.mxu2  ;;  %v757_v11 = vpop.f32.mrf.mxu0  ;;  %1193 = vmatpush.msrb.mxu1 %v1577_v8  ;;  %1245 = vmatpush.msrb.mxu0 %v2755_v31 }
  0xf9   : > { %v758_v9 = vadd.f32 %v757_v11, %v731_v10  ;;  %v995_v12 = vsel %vm457_vm1, %v993_v43, %v994_v1  ;;  %1222 = vmatpush.msrb.mxu3 %v1603_v0  ;;  %1274 = vmatpush.msrb.mxu2 %v1604_v63  ;;  %v1294_v43 = vpop.permute.xlu0 %1293 }
  0xfa   : > { %1561 = vmatmul.msk.f32.vlgmr.msra.gmra.mxu1 %vm822_vm3, %v995_v12  ;;  %1564 = vmatmul.msk.f32.vlgmr.msra.gmra.mxu0 %vm822_vm3, %v995_v12 }
  0xfb   : > { %v765_v14 = vadd.f32 %v758_v9, %v586_v2  ;;  %1194 = vmatpush.msrb.mxu1 %v1575_v62  ;;  %1246 = vmatpush.msrb.mxu0 %v2777_v6 }
  0xfc   : > { %1223 = vmatpush.msrb.mxu3 %v1601_v61  ;;  %1275 = vmatpush.msrb.mxu2 %v1602_v16 }
  0xfd   : > { %v771_v21 = vmax.f32 %v765_v14, 0.0  ;;  %1195 = vmatpush.msrb.mxu1 %v1573_v54  ;;  %1247 = vmatpush.msrb.mxu0 %v2791_v60 }
  0xfe   : > { %1224 = vmatpush.msrb.mxu3 %v1599_v3  ;;  %1276 = vmatpush.msrb.mxu2 %v1600_v7 }
  0xff   : > { %1513 = vmatmul.msk.f32.gmra.mxu3 %vm822_vm3, %v771_v21  ;;  %1516 = vmatmul.msk.f32.gmra.mxu2 %vm822_vm3, %v771_v21  ;;  %v998_v15 = vrot.slane %v771_v21, 1 }
 0x100   : > { %1196 = vmatpush.msrb.mxu1 %v1571_v22  ;;  %1248 = vmatpush.msrb.mxu0 %v2810_v45 }
 0x101   : > { %v999_v23 = vsel %vm457_vm1, %v994_v1, %v998_v15  ;;  %v772_v1 = vld [vmem:[%s2917_s4] sm:$0x3]  ;;  %v1296_v3 = vpop.permute.xlu0 %1295 }
 0x102   : > { %1562 = vmatmul.msk.f32.gmra.mxu1 %vm822_vm3, %v999_v23  ;;  %1565 = vmatmul.msk.f32.gmra.mxu0 %vm822_vm3, %v999_v23  ;;  %v774_v11 = vperm.slane %v772_v1, 0 }
 0x103   : > { %1197 = vmatpush.msrb.mxu1 %v1569_v34  ;;  %1249 = vmatpush.msrb.mxu0 %v1570_v20 }
 0x105   : > { %1198 = vmatpush.msrb.mxu1 %v1567_v27  ;;  %1250 = vmatpush.msrb.mxu0 %v1568_v28 }
 0x107   : > { %1025 = vmatmul.f32.vlgmr.msra.gmra.mxu3 %v992_v56  ;;  %1077 = vmatmul.f32.vlgmr.msra.gmra.mxu2 %v992_v56 }
 0x108   : > { %1619 = vmatpush.msra.mxu3 %v2578_v19  ;;  %v1166_v19 = vsel %vm636_vm2, %v1164_v38, %v1165_v24 }
 0x10a   : > { %1563 = vmatmul.msk.f32.gmra.mxu1 %vm822_vm3, %v998_v15  ;;  %1566 = vmatmul.msk.f32.gmra.mxu0 %vm822_vm3, %v998_v15 }
 0x10b   : > { %1620 = vmatpush.msra.mxu3 %v2599_v47  ;;  %v1170_v47 = vrot.slane %v2692_v33, 2 }
 0x10d   : > { %1621 = vmatpush.msra.mxu3 %v2614_v59  ;;  %v1171_v59 = vsel %vm636_vm2, %v1165_v24, %v1170_v47  ;;  %v1302_v24 = vpop.permute.xlu2 %1301 }
 0x10f   : > { %1028 = vmatmul.f32.gmra.mxu3 %v997_v25  ;;  %1080 = vmatmul.f32.gmra.mxu2 %v997_v25 }
 0x110   : > { %1622 = vmatpush.msra.mxu3 %v2636_v46  ;;  %v1167_v46 = vrot.slane %v2689_v30, 2 }
 0x112   : > { %1199 = vmatmul.f32.vlgmr.msrb.gmra.mxu1 %v1166_v19  ;;  %1251 = vmatmul.f32.vlgmr.msrb.gmra.mxu0 %v1166_v19  ;;  %v1169_v36 = vsel %vm636_vm2, %v1167_v46, %v1168_v40 }
 0x113   : > { %1623 = vmatpush.msra.mxu3 %v2651_v13  ;;  %v1172_v13 = vrot.slane %v771_v21, 2 }
 0x115   : > { %1624 = vmatpush.msra.mxu3 %v2670_v17  ;;  %v1173_v17 = vsel %vm636_vm2, %v1168_v40, %v1172_v13 }
 0x117   : > { %1031 = vmatmul.f32.gmra.mxu3 %v996_v35  ;;  %1083 = vmatmul.f32.gmra.mxu2 %v996_v35 }
 0x118   : > { %1625 = vmatpush.msra.mxu3 %v2682_v50 }
 0x11a   : > { %1202 = vmatmul.f32.gmra.mxu1 %v1171_v59  ;;  %1254 = vmatmul.f32.gmra.mxu0 %v1171_v59 }
 0x11b   : > { %1626 = vmatpush.msra.mxu3 %v2700_v18 }
 0x11d   : > { %1627 = vmatpush.msra.mxu3 %v2718_v39 }
 0x11f   : > { %1611 = vmatmul.msk.f32.vlgmr.msrb.gmra.mxu3 %vm822_vm3, %v1169_v36  ;;  %1614 = vmatmul.msk.f32.vlgmr.msrb.gmra.mxu2 %vm822_vm3, %v1169_v36 }
 0x120   : > { %1628 = vmatpush.msra.mxu3 %v2733_v48 }
 0x122   : > { %1205 = vmatmul.f32.gmra.mxu1 %v1170_v47  ;;  %1629 = vmatpush.msra.mxu3 %v2755_v31 }
 0x124   : > { %1630 = vmatpush.msra.mxu3 %v2777_v6  ;;  %v2882_v6 = vperm.slane %v772_v1, 1 }
 0x126   : > { %1631 = vmatpush.msra.mxu3 %v2791_v60  ;;  %v1298_v60 = vpop.permute.xlu1 %1297 }
 0x127   : > { %1612 = vmatmul.msk.f32.gmra.mxu3 %vm822_vm3, %v1173_v17  ;;  %1615 = vmatmul.msk.f32.gmra.mxu2 %vm822_vm3, %v1173_v17 }
 0x128   : > { %1632 = vmatpush.msra.mxu3 %v2810_v45 }
 0x12a   : > { %1633 = vmatpush.msra.mxu3 %v1570_v20  ;;  %v1306_v20 = vsel %vm1305_vm4, %v1294_v43, %v1296_v3 }
 0x12c   : > { %1634 = vmatpush.msra.mxu3 %v1568_v28 }
 0x12e   : > { %v1300_v46 = vpop.permute.xlu1 %1299 }
 0x12f   : > { %1613 = vmatmul.msk.f32.gmra.mxu3 %vm822_vm3, %v1172_v13  ;;  %1616 = vmatmul.msk.f32.gmra.mxu2 %vm822_vm3, %v1172_v13 }
 0x137   : > { %1257 = vmatmul.f32.vlgmr.msra.gmra.mxu3 %v1170_v47 }
 0x15d   : > { %v849_v50 = vpop.f32.mrf.mxu1  ;;  %v901_v30 = vpop.f32.mrf.mxu0 }
 0x165   : > { %v852_v33 = vpop.f32.mrf.mxu1  ;;  %v904_v18 = vpop.f32.mrf.mxu0 }
 0x16d   : > { %v2869_v57 = vpop.f32.mrf.mxu1  ;;  %v2871_v41 = vpop.f32.mrf.mxu0 }
 0x172   : > { %v875_v4 = vpop.f32.mrf.mxu3  ;;  %v927_v39 = vpop.f32.mrf.mxu2 }
 0x173   : > { %v876_v62 = vadd.f32 %v875_v4, %v849_v50  ;;  %v928_v2 = vadd.f32 %v927_v39, %v901_v30 }
 0x175   : > { %v936_v63 = vadd.f32 %v876_v62, %v774_v11  ;;  %v937_v14 = vadd.f32 %v928_v2, %v2882_v6 }
 0x177   : > { %v1052_v44 = vpop.f32.mrf.mxu1  ;;  %v1104_v48 = vpop.f32.mrf.mxu0 }
 0x17a   : > { %v878_v32 = vpop.f32.mrf.mxu3  ;;  %v930_v37 = vpop.f32.mrf.mxu2 }
 0x17b   : > { %v879_v34 = vadd.f32 %v878_v32, %v852_v33  ;;  %v931_v23 = vadd.f32 %v930_v37, %v904_v18  ;;  %v1307_v18 = vsel %vm1305_vm4, %v1298_v60, %v1300_v46 }
 0x17d   : > { %v938_v25 = vadd.f32 %v879_v34, %v774_v11  ;;  %v939_v19 = vadd.f32 %v931_v23, %v2882_v6 }
 0x17f   : > { %v1055_v52 = vpop.f32.mrf.mxu1  ;;  %v1107_v58 = vpop.f32.mrf.mxu0 }
 0x182   : > { %v881_v49 = vpop.f32.mrf.mxu3  ;;  %v2873_v51 = vpop.f32.mrf.mxu2 }
 0x183   : > { %v882_v4 = vadd.f32 %v881_v49, %v2869_v57  ;;  %v934_v57 = vadd.f32 %v2873_v51, %v2871_v41 }
 0x187   : > { %v1058_v0 = vpop.f32.mrf.mxu1  ;;  %v2875_v42 = vpop.f32.mrf.mxu0 }
 0x18a   : > { %v1026_v53 = vpop.f32.mrf.mxu3  ;;  %v1078_v55 = vpop.f32.mrf.mxu2 }
 0x18b   : > { %v1053_v12 = vadd.f32 %v1052_v44, %v1026_v53  ;;  %v1105_v61 = vadd.f32 %v1104_v48, %v1078_v55 }
 0x18d   : > { %v1113_v22 = vadd.f32 %v1053_v12, %v936_v63  ;;  %v1114_v45 = vadd.f32 %v1105_v61, %v937_v14 }
 0x18f   : > { %v1200_v9 = vpop.f32.mrf.mxu1  ;;  %v1252_v54 = vpop.f32.mrf.mxu0 }
 0x192   : > { %v1029_v8 = vpop.f32.mrf.mxu3  ;;  %v1081_v31 = vpop.f32.mrf.mxu2 }
 0x193   : > { %v1056_v28 = vadd.f32 %v1055_v52, %v1029_v8  ;;  %v1108_v29 = vadd.f32 %v1107_v58, %v1081_v31  ;;  %v940_v52 = vadd.f32 %v882_v4, %v774_v11  ;;  %v1304_v58 = vpop.permute.xlu2 %1303  ;;  %v941_v11 = vadd.f32 %v934_v57, %v2882_v6 }
 0x194   : > { %v1308_v62 = vsel %vm1305_vm4, %v1302_v24, %v1304_v58 }
 0x195   : > { %v1115_v17 = vadd.f32 %v1056_v28, %v938_v25  ;;  %v1116_v50 = vadd.f32 %v1108_v29, %v939_v19 }
 0x197   : > { %v1203_v38 = vpop.f32.mrf.mxu1  ;;  %v1255_v47 = vpop.f32.mrf.mxu0 }
 0x19a   : > { %v1032_v5 = vpop.f32.mrf.mxu3  ;;  %v2880_v10 = vpop.f32.mrf.mxu2 }
 0x19b   : > { %v1059_v37 = vadd.f32 %v1058_v0, %v1032_v5  ;;  %v1111_v0 = vadd.f32 %v2875_v42, %v2880_v10 }
 0x19d   : > { %v1117_v43 = vadd.f32 %v1059_v37, %v940_v52  ;;  %v1118_v61 = vadd.f32 %v1111_v0, %v941_v11 }
 0x19f   : > { %v1206_v8 = vpop.f32.mrf.mxu1 }
 0x1a2   : > { %v1226_v16 = vpop.f32.mrf.mxu3  ;;  %v1278_v21 = vpop.f32.mrf.mxu2 }
 0x1a3   : > { %v1227_v7 = vadd.f32 %v1226_v16, %v1200_v9  ;;  %v1279_v15 = vadd.f32 %v1278_v21, %v1252_v54 }
 0x1a5   : > { %v1287_v26 = vadd.f32 %v1227_v7, %v1113_v22  ;;  %v1288_v27 = vadd.f32 %v1279_v15, %v1114_v45 }
 0x1a7   : > { %v1315_v56 = vadd.f32 %v1306_v20, %v1287_v26  ;;  %v1316_v35 = vadd.f32 %v1296_v3, %v1288_v27 }
 0x1a9   : > { %v1321_v59 = vmax.f32 %v1315_v56, 0.0  ;;  %v1322_v40 = vmax.f32 %v1316_v35, 0.0 }
 0x1aa   : > { %v1229_v36 = vpop.f32.mrf.mxu3  ;;  %v1281_v13 = vpop.f32.mrf.mxu2 }
 0x1ab   : > { %1327 = vst [vmem:[%s2891_s14] sm:$0xff] %v1321_v59  ;;  %v1230_v30 = vadd.f32 %v1229_v36, %v1203_v38  ;;  %v1282_v33 = vadd.f32 %v1281_v13, %v1255_v47 }
 0x1ac   : > { %1329 = vst.msk [vmem:[%s2891_s14 + $0x8] sm:$0xff] %vm1328_vm5, %v1322_v40 }
 0x1ad   : > { %v1289_v39 = vadd.f32 %v1230_v30, %v1115_v17  ;;  %v1290_v32 = vadd.f32 %v1282_v33, %v1116_v50 }
 0x1af   : > { %v1317_v44 = vadd.f32 %v1307_v18, %v1289_v39  ;;  %v1318_v48 = vadd.f32 %v1300_v46, %v1290_v32 }
 0x1b1   : > { %v1323_v53 = vmax.f32 %v1317_v44, 0.0  ;;  %v1324_v55 = vmax.f32 %v1318_v48, 0.0 }
 0x1b2   : > { %v1232_v31 = vpop.f32.mrf.mxu3  ;;  %v1284_v9 = vpop.f32.mrf.mxu2 }
 0x1b3   : > { %1330 = vst [vmem:[%s2891_s14 + $0x10] sm:$0xff] %v1323_v53  ;;  %v1233_v1 = vadd.f32 %v1232_v31, %v1206_v8 }
 0x1b4   : > { %1331 = vst.msk [vmem:[%s2891_s14 + $0x18] sm:$0xff] %vm1328_vm5, %v1324_v55 }
 0x1b5   : > { %v1291_v49 = vadd.f32 %v1233_v1, %v1117_v43 }
 0x1b7   : > { %v1319_v5 = vadd.f32 %v1308_v62, %v1291_v49 }
 0x1b9   : > { %v1325_v2 = vmax.f32 %v1319_v5, 0.0 }
 0x1ba   : > { %v1258_v12 = vpop.f32.mrf.mxu3 }
 0x1bb   : > { %1332 = vst [vmem:[%s2891_s14 + $0x20] sm:$0xf] %v1325_v2  ;;  %v1285_v54 = vadd.f32 %v1284_v9, %v1258_v12 }
 0x1bd   : > { %v1292_v60 = vadd.f32 %v1285_v54, %v1118_v61 }
 0x1bf   : > { %v1320_v63 = vadd.f32 %v1304_v58, %v1292_v60 }
 0x1c1   : > { %v1326_v14 = vmax.f32 %v1320_v63, 0.0 }
 0x1c3   : > { %1334 = vst.msk [vmem:[%s2891_s14 + $0x28] sm:$0xf] %vm1333_vm6, %v1326_v14 }
 0x1c4 PF: > { %s15_s18 = sadd.s32 1, %s1651_s18  }
 0x1c5   : > { %p12_p4 = scmp.ge.s32.totalorder %s15_s18, 4  }
 0x1c7   :  { %14 = sbr.rel (!%p12_p4) target bundleno = 1 (0x1), region = 74 }

// kernel: crop_resnet_pool_forward.14
= control target key start
LH: loop header
LB: loop body
LE: loop exit
PB: predicated region body
PF: predicated region fallthrough
CT: control target
= control target key end

     0   :  { %s1270_s18 = smov 0   ;;  %s1963_s0 = inlined_call_operand.vmem [shape: f32[2,20,160], index: 0, kind: input, shape index: {}]   ;;  %s1964_s1 = inlined_call_operand.vmem [shape: f32[3,160,144], index: 1, kind: input, shape index: {}]   ;;  %s1965_s2 = inlined_call_operand.vmem [shape: f32[1,144], index: 2, kind: input, shape index: {}]   ;;  %s1966_s3 = inlined_call_operand.vmem [shape: f32[3,144,128], index: 3, kind: input, shape index: {}]   ;;  %s1967_s4 = inlined_call_operand.vmem [shape: f32[1,128], index: 4, kind: input, shape index: {}]   ;;  %s1968_s5 = inlined_call_operand.vmem [shape: f32[2,16,128], index: 5, kind: output, shape index: {}]  }
   0x1 LB: > { %s1069_s19 = sadd.s32 4294967295, %s1237_s18   ;;  %p1073_p0 = scmp.ge.s32.totalorder %s1237_s18, 1  ;;  %s1237_s18 = sphi %s1270_s18, %s15_s18  }
   0x2   : > { %p187_p1 = scmp.lt.s32.totalorder %s1237_s18, 3 }
   0x4   : > { %p188_p2 = pnand %p1073_p0, %p187_p1 }
   0x5   : > { %p215_p3 = scmp.lt.s32.totalorder (!%p188_p2), %s1069_s19, 1  ;;  %s1239_s14 = smov (!%p188_p2), 112  }
   0x6   : > { %191 = sbr.rel (%p188_p2) target bundleno = 400 (0x190), region = 40 }
   0xb   : > { %v267_v0 = vld [vmem:[%s1964_s1 + $0xf0] sm:$0xff]  ;;  %v268_v2 = vld [vmem:[%s1964_s1 + $0xf8] sm:$0xff]  ;;  %v265_v4 = vld [vmem:[%s1964_s1 + $0xe0] sm:$0xff]  ;;  %s1970_s19 = smov (!%p215_p3, %s1069_s19), 1  ;;  %vm277_vm0 = vcmask 261120   ;;  %vm441_vm1 = vcmask 1046528  }
   0xc   : > { %v275_v1 = vld [vmem:[%s1964_s1 + $0x130] sm:$0xff]  ;;  %287 = vmatpush.msra.mxu0 %v267_v0  ;;  %v276_v3 = vld [vmem:[%s1964_s1 + $0x138] sm:$0xff]  ;;  %v273_v5 = vld [vmem:[%s1964_s1 + $0x120] sm:$0xff]  ;;  %339 = vmatpush.msra.mxu2 %v268_v2  ;;  %s1220_s25 = smul.u32 48, %s1970_s19  ;;  %vm612_vm2 = vcmask 1045504   ;;  %vm770_vm3 = vcmask 130048  }
   0xd   : > { %325 = vmatpush.msra.mxu1 %v275_v1  ;;  %377 = vmatpush.msra.mxu3 %v276_v3  ;;  %v266_v6 = vld [vmem:[%s1964_s1 + $0xe8] sm:$0xff]  ;;  %v263_v8 = vld [vmem:[%s1964_s1 + $0xd0] sm:$0xff]  ;;  %v264_v10 = vld [vmem:[%s1964_s1 + $0xd8] sm:$0xff]  ;;  %vm1003_vm4 = vcmask 916480   ;;  %s1219_s12 = sshll.u32 %s1970_s19, 4 }
   0xe   : > { %v274_v7 = vld [vmem:[%s1964_s1 + $0x128] sm:$0xff]  ;;  %288 = vmatpush.msra.mxu0 %v265_v4  ;;  %v271_v9 = vld [vmem:[%s1964_s1 + $0x110] sm:$0xff]  ;;  %v272_v11 = vld [vmem:[%s1964_s1 + $0x118] sm:$0xff]  ;;  %340 = vmatpush.msra.mxu2 %v266_v6  ;;  %s1338_s11 = scalar_lea.vmem %s1963_s0, %s1220_s25  ;;  %s224_s15 = scalar_lea.vmem %s1968_s5, %s1219_s12 }
   0xf   : > { %326 = vmatpush.msra.mxu1 %v273_v5  ;;  %378 = vmatpush.msra.mxu3 %v274_v7  ;;  %v261_v12 = vld [vmem:[%s1964_s1 + $0xc0] sm:$0xff]  ;;  %v262_v14 = vld [vmem:[%s1964_s1 + $0xc8] sm:$0xff]  ;;  %v1113_v16 = vld [vmem:[%s1964_s1 + $0x230] sm:$0xff] }
  0x10   : > { %v269_v13 = vld [vmem:[%s1964_s1 + $0x100] sm:$0xff]  ;;  %289 = vmatpush.msra.mxu0 %v263_v8  ;;  %v270_v15 = vld [vmem:[%s1964_s1 + $0x108] sm:$0xff]  ;;  %341 = vmatpush.msra.mxu2 %v264_v10  ;;  %v259_v17 = vld [vmem:[%s1964_s1 + $0xb0] sm:$0xff] }
  0x11   : > { %327 = vmatpush.msra.mxu1 %v271_v9  ;;  %379 = vmatpush.msra.mxu3 %v272_v11  ;;  %v1341_v18 = vld [vmem:[%s1338_s11 + $0x8] sm:$0xff]  ;;  %v260_v19 = vld [vmem:[%s1964_s1 + $0xb8] sm:$0xff]  ;;  %v1111_v20 = vld [vmem:[%s1964_s1 + $0x220] sm:$0xff] }
  0x12   : > { %290 = vmatpush.msra.mxu0 %v261_v12  ;;  %342 = vmatpush.msra.mxu2 %v262_v14  ;;  %v257_v21 = vld [vmem:[%s1964_s1 + $0xa0] sm:$0xff]  ;;  %v258_v22 = vld [vmem:[%s1964_s1 + $0xa8] sm:$0xff]  ;;  %v1109_v23 = vld [vmem:[%s1964_s1 + $0x210] sm:$0xff]  ;;  %v445_v58 = vrot.slane %v1341_v18, 1 }
  0x13   : > { %328 = vmatpush.msra.mxu1 %v269_v13  ;;  %380 = vmatpush.msra.mxu3 %v270_v15  ;;  %v255_v24 = vld [vmem:[%s1964_s1 + $0x90] sm:$0xff]  ;;  %v256_v25 = vld [vmem:[%s1964_s1 + $0x98] sm:$0xff]  ;;  %v1107_v27 = vld [vmem:[%s1964_s1 + $0x200] sm:$0xff] }
  0x14   : > { %291 = vmatpush.msra.mxu0 %v259_v17  ;;  %1080 = vmatmul.msk.f32.vlgmr.msra.gmra.mxu3 %vm277_vm0, %v1341_v18  ;;  %v1121_v26 = vld [vmem:[%s1964_s1 + $0x270] sm:$0xff]  ;;  %v253_v28 = vld [vmem:[%s1964_s1 + $0x80] sm:$0xff]  ;;  %v254_v29 = vld [vmem:[%s1964_s1 + $0x88] sm:$0xff] }
  0x15   : > { %461 = vmatpush.msrb.mxu1 %v1113_v16  ;;  %343 = vmatpush.msra.mxu2 %v260_v19  ;;  %v1119_v30 = vld [vmem:[%s1964_s1 + $0x260] sm:$0xff]  ;;  %v1105_v31 = vld [vmem:[%s1964_s1 + $0x1f0] sm:$0xff]  ;;  %v1390_v33 = vld [vmem:[%s1338_s11 + $0x18] sm:$0xff] }
  0x16   : > { %292 = vmatpush.msra.mxu0 %v257_v21  ;;  %1077 = vmatmul.msk.f32.vlgmr.msra.gmra.mxu1 %vm277_vm0, %v1341_v18  ;;  %v251_v32 = vld [vmem:[%s1964_s1 + $0x70] sm:$0xff]  ;;  %v252_v34 = vld [vmem:[%s1964_s1 + $0x78] sm:$0xff]  ;;  %v1103_v35 = vld [vmem:[%s1964_s1 + $0x1e0] sm:$0xff]  ;;  %v446_v59 = vrot.slane %v1390_v33, 1 }
  0x17   : > { %462 = vmatpush.msrb.mxu1 %v1111_v20  ;;  %344 = vmatpush.msra.mxu2 %v258_v22  ;;  %v249_v36 = vld [vmem:[%s1964_s1 + $0x60] sm:$0xff]  ;;  %v250_v37 = vld [vmem:[%s1964_s1 + $0x68] sm:$0xff]  ;;  %v1101_v38 = vld [vmem:[%s1964_s1 + $0x1d0] sm:$0xff] }
  0x18   : > { %293 = vmatpush.msra.mxu0 %v255_v24  ;;  %499 = vmatpush.msrb.mxu3 %v1121_v26  ;;  %v247_v39 = vld [vmem:[%s1964_s1 + $0x50] sm:$0xff]  ;;  %v248_v40 = vld [vmem:[%s1964_s1 + $0x58] sm:$0xff]  ;;  %v1099_v42 = vld [vmem:[%s1964_s1 + $0x1c0] sm:$0xff]  ;;  %v1499_v4 = vsel %vm441_vm1, %v445_v58, %v446_v59 }
  0x19   : > { %463 = vmatpush.msrb.mxu1 %v1109_v23  ;;  %345 = vmatpush.msra.mxu2 %v256_v25  ;;  %v1117_v41 = vld [vmem:[%s1964_s1 + $0x250] sm:$0xff]  ;;  %v245_v43 = vld [vmem:[%s1964_s1 + $0x40] sm:$0xff]  ;;  %v246_v44 = vld [vmem:[%s1964_s1 + $0x48] sm:$0xff] }
  0x1a   : > { %294 = vmatpush.msra.mxu0 %v253_v28  ;;  %500 = vmatpush.msrb.mxu3 %v1119_v30  ;;  %v1115_v45 = vld [vmem:[%s1964_s1 + $0x240] sm:$0xff]  ;;  %v1097_v46 = vld [vmem:[%s1964_s1 + $0x1b0] sm:$0xff]  ;;  %v1439_v48 = vld [vmem:[%s1338_s11 + $0x28] sm:$0xf] }
  0x1b   : > { %464 = vmatpush.msrb.mxu1 %v1107_v27  ;;  %346 = vmatpush.msra.mxu2 %v254_v29  ;;  %v243_v47 = vld [vmem:[%s1964_s1 + $0x30] sm:$0xff]  ;;  %v244_v49 = vld [vmem:[%s1964_s1 + $0x38] sm:$0xff]  ;;  %v1095_v50 = vld [vmem:[%s1964_s1 + $0x1a0] sm:$0xff]  ;;  %v1537_v17 = vrot.slane %v1439_v48, 1 }
  0x1c   : > { %295 = vmatpush.msra.mxu0 %v251_v32  ;;  %1081 = vmatmul.msk.f32.gmra.mxu3 %vm277_vm0, %v1390_v33  ;;  %v1159_v51 = vld [vmem:[%s1964_s1 + $0x370] sm:$0xff]  ;;  %v241_v52 = vld [vmem:[%s1964_s1 + $0x20] sm:$0xff]  ;;  %v242_v53 = vld [vmem:[%s1964_s1 + $0x28] sm:$0xff] }
  0x1d   : > { %465 = vmatpush.msrb.mxu1 %v1105_v31  ;;  %347 = vmatpush.msra.mxu2 %v252_v34  ;;  %v1093_v54 = vld [vmem:[%s1964_s1 + $0x190] sm:$0xff]  ;;  %v1157_v55 = vld [vmem:[%s1964_s1 + $0x360] sm:$0xff]  ;;  %v240_v57 = vld [vmem:[%s1964_s1 + $0x18] sm:$0xff]  ;;  %v1563_v26 = vsel %vm441_vm1, %v446_v59, %v1537_v17 }
  0x1e   : > { %296 = vmatpush.msra.mxu0 %v249_v36  ;;  %1078 = vmatmul.msk.f32.gmra.mxu1 %vm277_vm0, %v1390_v33  ;;  %v239_v56 = vld [vmem:[%s1964_s1 + $0x10] sm:$0xff]  ;;  %v1091_v60 = vld [vmem:[%s1964_s1 + $0x180] sm:$0xff]  ;;  %v238_v63 = vld [vmem:[%s1964_s1 + $0x8] sm:$0xff] }
  0x1f   : > { %466 = vmatpush.msrb.mxu1 %v1103_v35  ;;  %348 = vmatpush.msra.mxu2 %v250_v37  ;;  %v1155_v61 = vld [vmem:[%s1964_s1 + $0x350] sm:$0xff]  ;;  %v237_v62 = vld [vmem:[%s1964_s1] sm:$0xff]  ;;  %v1114_v1 = vld [vmem:[%s1964_s1 + $0x238] sm:$0xff] }
  0x20   : > { %297 = vmatpush.msra.mxu0 %v247_v39  ;;  %501 = vmatpush.msrb.mxu3 %v1117_v41  ;;  %v1089_v0 = vld [vmem:[%s1964_s1 + $0x170] sm:$0xff]  ;;  %v1153_v2 = vld [vmem:[%s1964_s1 + $0x340] sm:$0xff]  ;;  %v1122_v6 = vld [vmem:[%s1964_s1 + $0x278] sm:$0xff] }
  0x21   : > { %467 = vmatpush.msrb.mxu1 %v1101_v38  ;;  %349 = vmatpush.msra.mxu2 %v248_v40  ;;  %v1496_v3 = vld [vmem:[%s1338_s11] sm:$0xff]  ;;  %v1502_v5 = vld [vmem:[%s1338_s11 + $0x10] sm:$0xff]  ;;  %v1112_v8 = vld [vmem:[%s1964_s1 + $0x228] sm:$0xff] }
  0x22   : > { %298 = vmatpush.msra.mxu0 %v245_v43  ;;  %502 = vmatpush.msrb.mxu3 %v1115_v45  ;;  %v1087_v7 = vld [vmem:[%s1964_s1 + $0x160] sm:$0xff]  ;;  %v1151_v9 = vld [vmem:[%s1964_s1 + $0x330] sm:$0xff]  ;;  %v442_v11 = vrot.slane %v1496_v3, 1  ;;  %v443_v12 = vrot.slane %v1502_v5, 1  ;;  %v1110_v13 = vld [vmem:[%s1964_s1 + $0x218] sm:$0xff] }
  0x23   : > { %468 = vmatpush.msrb.mxu1 %v1099_v42  ;;  %350 = vmatpush.msra.mxu2 %v246_v44  ;;  %v1085_v10 = vld [vmem:[%s1964_s1 + $0x150] sm:$0xff]  ;;  %v1149_v14 = vld [vmem:[%s1964_s1 + $0x320] sm:$0xff]  ;;  %v1120_v16 = vld [vmem:[%s1964_s1 + $0x268] sm:$0xff] }
  0x24   : > { %299 = vmatpush.msra.mxu0 %v243_v47  ;;  %1082 = vmatmul.msk.f32.gmra.mxu3 %vm277_vm0, %v1439_v48  ;;  %v1083_v15 = vld [vmem:[%s1964_s1 + $0x140] sm:$0xff]  ;;  %v1108_v19 = vld [vmem:[%s1964_s1 + $0x208] sm:$0xff]  ;;  %v1147_v20 = vld [vmem:[%s1964_s1 + $0x310] sm:$0xff]  ;;  %v1547_v21 = vsel %vm441_vm1, %v442_v11, %v443_v12  ;;  %v613_v47 = vrot.slane %v1496_v3, 2 }
  0x25   : > { %469 = vmatpush.msrb.mxu1 %v1097_v46  ;;  %351 = vmatpush.msra.mxu2 %v244_v49  ;;  %v1118_v22 = vld [vmem:[%s1964_s1 + $0x258] sm:$0xff]  ;;  %v1145_v24 = vld [vmem:[%s1964_s1 + $0x300] sm:$0xff]  ;;  %v1104_v27 = vld [vmem:[%s1964_s1 + $0x1e8] sm:$0xff] }
  0x26   : > { %632 = vmatpush.msra.mxu3 %v1159_v51  ;;  %300 = vmatpush.msra.mxu0 %v241_v52  ;;  %v1106_v23 = vld [vmem:[%s1964_s1 + $0x1f8] sm:$0xff]  ;;  %v1559_v25 = vld [vmem:[%s1338_s11 + $0x20] sm:$0xf]  ;;  %v1143_v28 = vld [vmem:[%s1964_s1 + $0x2f0] sm:$0xff] }
  0x27   : > { %470 = vmatpush.msrb.mxu1 %v1095_v50  ;;  %352 = vmatpush.msra.mxu2 %v242_v53  ;;  %v1573_v29 = vrot.slane %v1559_v25, 1  ;;  %v1116_v30 = vld [vmem:[%s1964_s1 + $0x248] sm:$0xff]  ;;  %v1102_v31 = vld [vmem:[%s1964_s1 + $0x1d8] sm:$0xff]  ;;  %v1141_v32 = vld [vmem:[%s1964_s1 + $0x2e0] sm:$0xff]  ;;  %v614_v50 = vrot.slane %v1502_v5, 2 }
  0x28   : > { %633 = vmatpush.msra.mxu3 %v1157_v55  ;;  %301 = vmatpush.msra.mxu0 %v239_v56  ;;  %v1160_v34 = vld [vmem:[%s1964_s1 + $0x378] sm:$0xff]  ;;  %v1167_v35 = vld [vmem:[%s1964_s1 + $0x3b0] sm:$0xff]  ;;  %v1100_v36 = vld [vmem:[%s1964_s1 + $0x1c8] sm:$0xff] }
  0x29   : > { %471 = vmatpush.msrb.mxu1 %v1093_v54  ;;  %353 = vmatpush.msra.mxu2 %v240_v57  ;;  %v1139_v37 = vld [vmem:[%s1964_s1 + $0x2d0] sm:$0xff]  ;;  %v1602_v38 = vsel %vm441_vm1, %v443_v12, %v1573_v29  ;;  %v1158_v39 = vld [vmem:[%s1964_s1 + $0x368] sm:$0xff]  ;;  %v1098_v40 = vld [vmem:[%s1964_s1 + $0x1b8] sm:$0xff]  ;;  %v1657_v57 = vsel %vm612_vm2, %v613_v47, %v614_v50 }
  0x2a   : > { %634 = vmatpush.msra.mxu3 %v1155_v61  ;;  %302 = vmatpush.msra.mxu0 %v237_v62  ;;  %v1137_v41 = vld [vmem:[%s1964_s1 + $0x2c0] sm:$0xff]  ;;  %v1096_v42 = vld [vmem:[%s1964_s1 + $0x1a8] sm:$0xff]  ;;  %v1135_v43 = vld [vmem:[%s1964_s1 + $0x2b0] sm:$0xff]  ;;  %v617_v61 = vrot.slane %v1390_v33, 2 }
  0x2b   : > { %472 = vmatpush.msrb.mxu1 %v1091_v60  ;;  %354 = vmatpush.msra.mxu2 %v238_v63  ;;  %v1156_v44 = vld [vmem:[%s1964_s1 + $0x358] sm:$0xff]  ;;  %v1133_v46 = vld [vmem:[%s1964_s1 + $0x2a0] sm:$0xff]  ;;  %v1154_v49 = vld [vmem:[%s1964_s1 + $0x348] sm:$0xff]  ;;  %v616_v60 = vrot.slane %v1341_v18, 2 }
  0x2c   : > { %1079 = vmatmul.msk.f32.gmra.mxu1 %vm277_vm0, %v1439_v48  ;;  %513 = vmatpush.msrb.mxu0 %v1114_v1  ;;  %v1094_v45 = vld [vmem:[%s1964_s1 + $0x198] sm:$0xff]  ;;  %v1165_v51 = vld [vmem:[%s1964_s1 + $0x3a0] sm:$0xff]  ;;  %v1092_v52 = vld [vmem:[%s1964_s1 + $0x188] sm:$0xff] }
  0x2d   : > { %473 = vmatpush.msrb.mxu1 %v1089_v0  ;;  %635 = vmatpush.msra.mxu3 %v1153_v2  ;;  %v1131_v53 = vld [vmem:[%s1964_s1 + $0x290] sm:$0xff]  ;;  %v1152_v54 = vld [vmem:[%s1964_s1 + $0x338] sm:$0xff]  ;;  %v1129_v56 = vld [vmem:[%s1964_s1 + $0x280] sm:$0xff]  ;;  %v619_v0 = vrot.slane %v1559_v25, 2  ;;  %v618_v2 = vsel %vm612_vm2, %v616_v60, %v617_v61 }
  0x2e   : > { %355 = vmatmul.f32.vlgmr.msra.gmra.mxu2 %v1496_v3  ;;  %1123 = vmatmul.msk.f32.vlgmr.msrb.gmra.mxu3 %vm277_vm0, %v1499_v4  ;;  %v1090_v55 = vld [vmem:[%s1964_s1 + $0x178] sm:$0xff]  ;;  %v1088_v58 = vld [vmem:[%s1964_s1 + $0x168] sm:$0xff]  ;;  %v1163_v59 = vld [vmem:[%s1964_s1 + $0x390] sm:$0xff] }
  0x2f   : > { %551 = vmatpush.msrb.mxu2 %v1122_v6  ;;  %474 = vmatpush.msrb.mxu1 %v1087_v7  ;;  %v1150_v62 = vld [vmem:[%s1964_s1 + $0x328] sm:$0xff]  ;;  %v1086_v63 = vld [vmem:[%s1964_s1 + $0x158] sm:$0xff]  ;;  %v1161_v18 = vld [vmem:[%s1964_s1 + $0x380] sm:$0xff] }
  0x30   : > { %514 = vmatpush.msrb.mxu0 %v1112_v8  ;;  %636 = vmatpush.msra.mxu3 %v1151_v9  ;;  %v1148_v33 = vld [vmem:[%s1964_s1 + $0x318] sm:$0xff]  ;;  %v1084_v1 = vld [vmem:[%s1964_s1 + $0x148] sm:$0xff]  ;;  %v621_v8 = vrot.slane %v1439_v48, 2  ;;  %v756_v47 = vld [vmem:[%s1966_s3 + $0x20] sm:$0xff] }
  0x31   : > { %475 = vmatpush.msrb.mxu1 %v1085_v10  ;;  %303 = vmatmul.f32.vlgmr.msra.gmra.mxu0 %v1496_v3  ;;  %v1168_v3 = vld [vmem:[%s1964_s1 + $0x3b8] sm:$0xff]  ;;  %v1166_v7 = vld [vmem:[%s1964_s1 + $0x3a8] sm:$0xff] }
  0x32   : > { %515 = vmatpush.msrb.mxu0 %v1110_v13  ;;  %637 = vmatpush.msra.mxu3 %v1149_v14  ;;  %v1144_v6 = vld [vmem:[%s1964_s1 + $0x2f8] sm:$0xff]  ;;  %v1142_v9 = vld [vmem:[%s1964_s1 + $0x2e8] sm:$0xff]  ;;  %v622_v12 = vsel %vm612_vm2, %v617_v61, %v621_v8  ;;  %v1183_v61 = vld [vmem:[%s1966_s3 + $0xc0] sm:$0xff] }
  0x33   : > { %476 = vmatpush.msrb.mxu1 %v1083_v15  ;;  %552 = vmatpush.msrb.mxu2 %v1120_v16  ;;  %v1164_v10 = vld [vmem:[%s1964_s1 + $0x398] sm:$0xff]  ;;  %v1162_v48 = vld [vmem:[%s1964_s1 + $0x388] sm:$0xff] }
  0x34   : > { %516 = vmatpush.msrb.mxu0 %v1108_v19  ;;  %638 = vmatpush.msra.mxu3 %v1147_v20  ;;  %v1140_v11 = vld [vmem:[%s1964_s1 + $0x2d8] sm:$0xff]  ;;  %v1138_v13 = vld [vmem:[%s1964_s1 + $0x2c8] sm:$0xff]  ;;  %v766_v20 = vld [vmem:[%s1966_s3 + $0x70] sm:$0xff] }
  0x35   : > { %477 = vmatmul.f32.vlgmr.msrb.gmra.mxu1 %v1547_v21  ;;  %553 = vmatpush.msrb.mxu2 %v1118_v22  ;;  %v1136_v14 = vld [vmem:[%s1964_s1 + $0x2b8] sm:$0xff]  ;;  %v1134_v15 = vld [vmem:[%s1964_s1 + $0x2a8] sm:$0xff] }
  0x36   : > { %517 = vmatpush.msrb.mxu0 %v1106_v23  ;;  %639 = vmatpush.msra.mxu3 %v1145_v24  ;;  %v1132_v16 = vld [vmem:[%s1964_s1 + $0x298] sm:$0xff]  ;;  %v1130_v19 = vld [vmem:[%s1964_s1 + $0x288] sm:$0xff]  ;;  %v764_v23 = vld [vmem:[%s1966_s3 + $0x60] sm:$0xff] }
  0x37   : > { %358 = vmatmul.f32.gmra.mxu2 %v1502_v5  ;;  %1124 = vmatmul.msk.f32.gmra.mxu3 %vm277_vm0, %v1563_v26  ;;  %v765_v22 = vld [vmem:[%s1966_s3 + $0x68] sm:$0xff] }
  0x38   : > { %518 = vmatpush.msrb.mxu0 %v1104_v27  ;;  %640 = vmatpush.msra.mxu3 %v1143_v28  ;;  %v1192_v27 = vld [vmem:[%s1966_s3 + $0x108] sm:$0xff]  ;;  %v1212_v28 = vld [vmem:[%s1966_s3 + $0x198] sm:$0xff] }
  0x39   : > { %306 = vmatmul.f32.gmra.mxu0 %v1502_v5  ;;  %554 = vmatpush.msrb.mxu2 %v1116_v30  ;;  %v620_v5 = vsel %vm612_vm2, %v614_v50, %v619_v0  ;;  %v761_v30 = vld [vmem:[%s1966_s3 + $0x48] sm:$0xff] }
  0x3a   : > { %519 = vmatpush.msrb.mxu0 %v1102_v31  ;;  %641 = vmatpush.msra.mxu3 %v1141_v32  ;;  %v1191_v31 = vld [vmem:[%s1966_s3 + $0x100] sm:$0xff]  ;;  %v1211_v32 = vld [vmem:[%s1966_s3 + $0x190] sm:$0xff]  ;;  %v1206_v50 = vld [vmem:[%s1966_s3 + $0x168] sm:$0xff] }
  0x3b   : > { %684 = vmatpush.msra.mxu2 %v1160_v34  ;;  %670 = vmatpush.msra.mxu1 %v1167_v35  ;;  %v760_v34 = vld [vmem:[%s1966_s3 + $0x40] sm:$0xff]  ;;  %v1190_v35 = vld [vmem:[%s1966_s3 + $0xf8] sm:$0xff]  ;;  %v753_v60 = vld [vmem:[%s1966_s3 + $0x8] sm:$0xff] }
  0x3c   : > { %520 = vmatpush.msrb.mxu0 %v1100_v36  ;;  %642 = vmatpush.msra.mxu3 %v1139_v37  ;;  %v1210_v36 = vld [vmem:[%s1966_s3 + $0x188] sm:$0xff] }
  0x3d   : > { %480 = vmatmul.f32.gmra.mxu1 %v1602_v38  ;;  %685 = vmatpush.msra.mxu2 %v1158_v39  ;;  %v1189_v39 = vld [vmem:[%s1966_s3 + $0xf0] sm:$0xff] }
  0x3e   : > { %521 = vmatpush.msrb.mxu0 %v1098_v40  ;;  %643 = vmatpush.msra.mxu3 %v1137_v41  ;;  %v1209_v40 = vld [vmem:[%s1966_s3 + $0x180] sm:$0xff]  ;;  %v758_v41 = vld [vmem:[%s1966_s3 + $0x30] sm:$0xff] }
  0x3f   : > { %361 = vmatmul.f32.gmra.mxu2 %v1559_v25  ;;  %1125 = vmatmul.msk.f32.gmra.mxu3 %vm277_vm0, %v1537_v17 }
  0x40   : > { %522 = vmatpush.msrb.mxu0 %v1096_v42  ;;  %644 = vmatpush.msra.mxu3 %v1135_v43  ;;  %v1188_v42 = vld [vmem:[%s1966_s3 + $0xe8] sm:$0xff]  ;;  %v1208_v43 = vld [vmem:[%s1966_s3 + $0x178] sm:$0xff] }
  0x41   : > { %686 = vmatpush.msra.mxu2 %v1156_v44  ;;  %309 = vmatmul.f32.gmra.mxu0 %v1559_v25  ;;  %v763_v25 = vld [vmem:[%s1966_s3 + $0x58] sm:$0xff]  ;;  %v757_v44 = vld [vmem:[%s1966_s3 + $0x28] sm:$0xff] }
  0x42   : > { %523 = vmatpush.msrb.mxu0 %v1094_v45  ;;  %645 = vmatpush.msra.mxu3 %v1133_v46  ;;  %v1187_v45 = vld [vmem:[%s1966_s3 + $0xe0] sm:$0xff]  ;;  %v1207_v46 = vld [vmem:[%s1966_s3 + $0x170] sm:$0xff] }
  0x43   : > { %687 = vmatpush.msra.mxu2 %v1154_v49  ;;  %671 = vmatpush.msra.mxu1 %v1165_v51  ;;  %v1186_v49 = vld [vmem:[%s1966_s3 + $0xd8] sm:$0xff] }
  0x44   : > { %524 = vmatpush.msrb.mxu0 %v1092_v52  ;;  %646 = vmatpush.msra.mxu3 %v1131_v53  ;;  %v755_v53 = vld [vmem:[%s1966_s3 + $0x18] sm:$0xff] }
  0x45   : > { %483 = vmatmul.f32.gmra.mxu1 %v1573_v29  ;;  %688 = vmatpush.msra.mxu2 %v1152_v54  ;;  %v1185_v54 = vld [vmem:[%s1966_s3 + $0xd0] sm:$0xff] }
  0x46   : > { %525 = vmatpush.msrb.mxu0 %v1090_v55  ;;  %647 = vmatpush.msra.mxu3 %v1129_v56  ;;  %v1205_v55 = vld [vmem:[%s1966_s3 + $0x160] sm:$0xff]  ;;  %v754_v56 = vld [vmem:[%s1966_s3 + $0x10] sm:$0xff] }
  0x47   : > { %1126 = vmatmul.msk.f32.vlgmr.msrb.gmra.mxu2 %vm277_vm0, %v1499_v4  ;;  %648 = vmatmul.f32.vlgmr.msra.gmra.mxu3 %v1657_v57  ;;  %v1146_v4 = vld [vmem:[%s1964_s1 + $0x308] sm:$0xff] }
  0x48   : > { %526 = vmatpush.msrb.mxu0 %v1088_v58  ;;  %672 = vmatpush.msra.mxu1 %v1163_v59  ;;  %v1204_v58 = vld [vmem:[%s1966_s3 + $0x158] sm:$0xff] }
  0x49   : > { %689 = vmatpush.msra.mxu2 %v1150_v62  ;;  %999 = vrot.lane.b32.xlu1 %v620_v5, %s1239_s14  ;;  %v1203_v62 = vld [vmem:[%s1966_s3 + $0x150] sm:$0xff] }
  0x4a   : > { %527 = vmatpush.msrb.mxu0 %v1086_v63  ;;  %673 = vmatpush.msra.mxu1 %v1161_v18  ;;  %v752_v63 = vld [vmem:[%s1966_s3] sm:$0xff] }
  0x4b   : > { %690 = vmatpush.msra.mxu2 %v1148_v33  ;;  %995 = vrot.lane.b32.xlu0 %v1657_v57, %s1239_s14 }
  0x4c   : > { %528 = vmatpush.msrb.mxu0 %v1084_v1  ;;  %v1202_v1 = vld [vmem:[%s1966_s3 + $0x148] sm:$0xff] }
  0x4d   : > { %529 = vmatmul.f32.vlgmr.msrb.gmra.mxu0 %v1547_v21  ;;  %1169 = vmatmul.msk.f32.vlgmr.msra.gmra.mxu1 %vm277_vm0, %v618_v2 }
  0x4e   : > { %722 = vmatpush.msra.mxu0 %v1168_v3  ;;  %691 = vmatpush.msra.mxu2 %v1146_v4  ;;  %v769_v3 = vld [vmem:[%s1966_s3 + $0x88] sm:$0xff]  ;;  %v1181_v4 = vld [vmem:[%s1966_s3 + $0xb0] sm:$0xff] }
  0x4f   : > { %1127 = vmatmul.msk.f32.gmra.mxu2 %vm277_vm0, %v1563_v26  ;;  %651 = vmatmul.f32.gmra.mxu3 %v620_v5  ;;  %v762_v26 = vld [vmem:[%s1966_s3 + $0x50] sm:$0xff] }
  0x50   : > { %692 = vmatpush.msra.mxu2 %v1144_v6  ;;  %723 = vmatpush.msra.mxu0 %v1166_v7  ;;  %v1180_v6 = vld [vmem:[%s1966_s3 + $0xa8] sm:$0xff]  ;;  %v1200_v7 = vld [vmem:[%s1966_s3 + $0x138] sm:$0xff] }
  0x51   : > { %1001 = vrot.lane.b32.xlu1 %v622_v12, %s1239_s14  ;;  %814 = vmatpush.msrb.mxu3 %v769_v3 }
  0x52   : > { %693 = vmatpush.msra.mxu2 %v1142_v9  ;;  %724 = vmatpush.msra.mxu0 %v1164_v10  ;;  %v1179_v9 = vld [vmem:[%s1966_s3 + $0xa0] sm:$0xff]  ;;  %v1199_v10 = vld [vmem:[%s1966_s3 + $0x130] sm:$0xff] }
  0x53   : > { %997 = vrot.lane.b32.xlu0 %v618_v2, %s1239_s14 }
  0x54   : > { %694 = vmatpush.msra.mxu2 %v1140_v11  ;;  %725 = vmatpush.msra.mxu0 %v1162_v48  ;;  %v1178_v11 = vld [vmem:[%s1966_s3 + $0x98] sm:$0xff]  ;;  %v1198_v48 = vld [vmem:[%s1966_s3 + $0x128] sm:$0xff] }
  0x55   : > { %532 = vmatmul.f32.gmra.mxu0 %v1602_v38  ;;  %1170 = vmatmul.msk.f32.gmra.mxu1 %vm277_vm0, %v622_v12  ;;  %v759_v38 = vld [vmem:[%s1966_s3 + $0x38] sm:$0xff] }
  0x56   : > { %695 = vmatpush.msra.mxu2 %v1138_v13  ;;  %864 = vmatpush.msrb.mxu0 %v1192_v27 }
  0x57   : > { %1128 = vmatmul.msk.f32.gmra.mxu2 %vm277_vm0, %v1537_v17  ;;  %654 = vmatmul.f32.gmra.mxu3 %v619_v0  ;;  %v767_v17 = vld [vmem:[%s1966_s3 + $0x78] sm:$0xff] }
  0x58   : > { %696 = vmatpush.msra.mxu2 %v1136_v14  ;;  %777 = vmatpush.msrb.mxu1 %v767_v17  ;;  %v768_v17 = vld [vmem:[%s1966_s3 + $0x80] sm:$0xff] }
  0x59   : > { %865 = vmatpush.msrb.mxu0 %v1191_v31  ;;  %815 = vmatpush.msrb.mxu3 %v768_v17  ;;  %v1194_v31 = vld [vmem:[%s1966_s3 + $0x118] sm:$0xff] }
  0x5a   : > { %697 = vmatpush.msra.mxu2 %v1134_v15  ;;  %778 = vmatpush.msrb.mxu1 %v766_v20  ;;  %v1177_v15 = vld [vmem:[%s1966_s3 + $0x90] sm:$0xff]  ;;  %v231_v20 = vld [vmem:[%s1965_s2] sm:$0x3] }
  0x5b   : > { %866 = vmatpush.msrb.mxu0 %v1190_v35  ;;  %901 = vmatpush.msra.mxu3 %v1194_v31 }
  0x5c   : > { %698 = vmatpush.msra.mxu2 %v1132_v16  ;;  %779 = vmatpush.msrb.mxu1 %v765_v22  ;;  %v1197_v16 = vld [vmem:[%s1966_s3 + $0x120] sm:$0xff] }
  0x5d   : > { %535 = vmatmul.f32.gmra.mxu0 %v1573_v29  ;;  %1171 = vmatmul.msk.f32.gmra.mxu1 %vm277_vm0, %v621_v8 }
  0x5e   : > { %699 = vmatpush.msra.mxu2 %v1130_v19  ;;  %780 = vmatpush.msrb.mxu1 %v764_v23 }
  0x5f   : > { %700 = vmatmul.f32.vlgmr.msra.gmra.mxu2 %v1657_v57  ;;  %867 = vmatpush.msrb.mxu0 %v1189_v39  ;;  %v1184_v57 = vld [vmem:[%s1966_s3 + $0xc8] sm:$0xff] }
  0x60   : > { %781 = vmatpush.msrb.mxu1 %v763_v25  ;;  %947 = vmatpush.msrb.mxu2 %v1212_v28 }
  0x61   : > { %868 = vmatpush.msrb.mxu0 %v1188_v42 }
  0x62   : > { %782 = vmatpush.msrb.mxu1 %v762_v26  ;;  %948 = vmatpush.msrb.mxu2 %v1211_v32  ;;  %v233_v26 = vperm.slane %v231_v20, 0 }
  0x63   : > { %869 = vmatpush.msrb.mxu0 %v1187_v45  ;;  %v1214_v45 = vld [vmem:[%s1966_s3 + $0x1a8] sm:$0xff] }
  0x64   : > { %783 = vmatpush.msrb.mxu1 %v761_v30  ;;  %949 = vmatpush.msrb.mxu2 %v1210_v36 }
  0x65   : > { %1172 = vmatmul.msk.f32.vlgmr.msra.gmra.mxu0 %vm277_vm0, %v618_v2 }
  0x66   : > { %784 = vmatpush.msrb.mxu1 %v760_v34  ;;  %950 = vmatpush.msrb.mxu2 %v1209_v40 }
  0x67   : > { %703 = vmatmul.f32.gmra.mxu2 %v620_v5  ;;  %870 = vmatpush.msrb.mxu0 %v1186_v49  ;;  %v1201_v5 = vld [vmem:[%s1966_s3 + $0x140] sm:$0xff] }
  0x68   : > { %785 = vmatpush.msrb.mxu1 %v759_v38  ;;  %951 = vmatpush.msrb.mxu2 %v1208_v43 }
  0x69   : > { %871 = vmatpush.msrb.mxu0 %v1185_v54 }
  0x6a   : > { %786 = vmatpush.msrb.mxu1 %v758_v41  ;;  %952 = vmatpush.msrb.mxu2 %v1207_v46 }
  0x6b   : > { %872 = vmatpush.msrb.mxu0 %v1184_v57 }
  0x6c   : > { %787 = vmatpush.msrb.mxu1 %v757_v44  ;;  %953 = vmatpush.msrb.mxu2 %v1206_v50 }
  0x6d   : > { %1173 = vmatmul.msk.f32.gmra.mxu0 %vm277_vm0, %v622_v12 }
  0x6e   : > { %788 = vmatpush.msrb.mxu1 %v756_v47  ;;  %954 = vmatpush.msrb.mxu2 %v1205_v55 }
  0x6f   : > { %706 = vmatmul.f32.gmra.mxu2 %v619_v0  ;;  %873 = vmatpush.msrb.mxu0 %v1183_v61  ;;  %v1182_v0 = vld [vmem:[%s1966_s3 + $0xb8] sm:$0xff] }
  0x70   : > { %789 = vmatpush.msrb.mxu1 %v755_v53  ;;  %955 = vmatpush.msrb.mxu2 %v1204_v58 }
  0x71   : > { %874 = vmatpush.msrb.mxu0 %v1182_v0 }
  0x72   : > { %790 = vmatpush.msrb.mxu1 %v754_v56  ;;  %956 = vmatpush.msrb.mxu2 %v1203_v62 }
  0x73   : > { %875 = vmatpush.msrb.mxu0 %v1181_v4 }
  0x74   : > { %791 = vmatpush.msrb.mxu1 %v753_v60  ;;  %957 = vmatpush.msrb.mxu2 %v1202_v1 }
  0x75   : > { %1174 = vmatmul.msk.f32.gmra.mxu0 %vm277_vm0, %v621_v8 }
  0x76   : > { %792 = vmatpush.msrb.mxu1 %v752_v63  ;;  %958 = vmatpush.msrb.mxu2 %v1201_v5 }
  0x77   : > { %876 = vmatpush.msrb.mxu0 %v1180_v6  ;;  %v234_v6 = vperm.slane %v231_v20, 1 }
  0x78   : > { %959 = vmatpush.msrb.mxu2 %v1200_v7  ;;  %984 = vmatpush.msra.mxu1 %v1214_v45 }
  0x79   : > { %877 = vmatpush.msrb.mxu0 %v1179_v9 }
  0x7a   : > { %960 = vmatpush.msrb.mxu2 %v1199_v10 }
  0x7b   : > { %878 = vmatpush.msrb.mxu0 %v1178_v11 }
  0x7c   : > { %961 = vmatpush.msrb.mxu2 %v1198_v48 }
  0x7d   : > { %879 = vmatpush.msrb.mxu0 %v1177_v15 }
  0x7e   : > { %962 = vmatpush.msrb.mxu2 %v1197_v16 }
  0x93   : > { %v1751_v21 = vpop.f32.mrf.mxu1 }
  0x97   : > { %v1759_v24 = vpop.f32.mrf.mxu3 }
  0x9b   : > { %v1773_v29 = vpop.f32.mrf.mxu1 }
  0x9f   : > { %v1793_v37 = vpop.f32.mrf.mxu3 }
  0xa7   : > { %v1833_v52 = vpop.f32.mrf.mxu3 }
  0xa9   : > { %v1831_v51 = vpop.f32.mrf.mxu1 }
  0xae   : > { %v304_v59 = vpop.f32.mrf.mxu0 }
  0xaf   : > { %v331_v27 = vadd.f32 %v1751_v21, %v304_v59  ;;  %v1193_v21 = vld [vmem:[%s1966_s3 + $0x110] sm:$0xff] }
  0xb0   : > { %902 = vmatpush.msra.mxu3 %v1193_v21 }
  0xb1   : > { %v1865_v18 = vpop.f32.mrf.mxu2  ;;  %v504_v33 = vpop.f32.mrf.mxu3  ;;  %v391_v28 = vadd.f32 %v331_v27, %v233_v26 }
  0xb2   : > { %v478_v2 = vpop.f32.mrf.mxu1  ;;  %v383_v7 = vadd.f32 %v1759_v24, %v1865_v18 }
  0xb3   : > { %v505_v30 = vadd.f32 %v504_v33, %v478_v2 }
  0xb4   : > { %v392_v11 = vadd.f32 %v383_v7, %v234_v6 }
  0xb5   : > { %v565_v38 = vadd.f32 %v505_v30, %v391_v28 }
  0xb6   : > { %v307_v8 = vpop.f32.mrf.mxu0 }
  0xb7   : > { %v334_v39 = vadd.f32 %v1773_v29, %v307_v8  ;;  %v1213_v29 = vld [vmem:[%s1966_s3 + $0x1a0] sm:$0xff] }
  0xb8   : > { %985 = vmatpush.msra.mxu1 %v1213_v29 }
  0xb9   : > { %v393_v42 = vadd.f32 %v334_v39, %v233_v26 }
  0xba   : > { %v1900_v12 = vpop.f32.mrf.mxu2  ;;  %v481_v13 = vpop.f32.mrf.mxu1 }
  0xbb   : > { %v507_v14 = vpop.f32.mrf.mxu3  ;;  %v386_v20 = vadd.f32 %v1793_v37, %v1900_v12 }
  0xbc   : > { %v508_v43 = vadd.f32 %v507_v14, %v481_v13 }
  0xbe   : > { %v310_v19 = vpop.f32.mrf.mxu0  ;;  %v567_v53 = vadd.f32 %v508_v43, %v393_v42 }
  0xbf   : > { %v337_v54 = vadd.f32 %v1831_v51, %v310_v19 }
  0xc1   : > { %v395_v57 = vadd.f32 %v337_v54, %v233_v26  ;;  %v394_v26 = vadd.f32 %v386_v20, %v234_v6 }
  0xc2   : > { %v1914_v22 = vpop.f32.mrf.mxu2  ;;  %v484_v23 = vpop.f32.mrf.mxu1 }
  0xc3   : > { %v510_v25 = vpop.f32.mrf.mxu3 }
  0xc4   : > { %v511_v58 = vadd.f32 %v510_v25, %v484_v23 }
  0xc6   : > { %v569_v3 = vadd.f32 %v511_v58, %v395_v57  ;;  %v1230_v58 = vld [vmem:[%s1967_s4] ss:$0 sm:$0xff] }
  0xca   : > { %v530_v32 = vpop.f32.mrf.mxu0  ;;  %v556_v34 = vpop.f32.mrf.mxu2 }
  0xcb   : > { %v649_v35 = vpop.f32.mrf.mxu3  ;;  %v675_v36 = vpop.f32.mrf.mxu1  ;;  %v557_v9 = vadd.f32 %v556_v34, %v530_v32  ;;  %v389_v32 = vadd.f32 %v1833_v52, %v1914_v22 }
  0xcc   : > { %v676_v40 = vadd.f32 %v675_v36, %v649_v35 }
  0xcd   : > { %v566_v16 = vadd.f32 %v557_v9, %v392_v11  ;;  %v396_v37 = vadd.f32 %v389_v32, %v234_v6 }
  0xce   : > { %v736_v41 = vadd.f32 %v676_v40, %v565_v38 }
  0xd0   : > { %v742_v44 = vmax.f32 %v736_v41, 0.0 }
  0xd2   : > { %793 = vmatmul.f32.vlgmr.msrb.gmra.mxu1 %v742_v44  ;;  %v533_v46 = vpop.f32.mrf.mxu0  ;;  %v559_v47 = vpop.f32.mrf.mxu2  ;;  %v848_v60 = vrot.slane %v742_v44, 1  ;;  %v931_v61 = vrot.slane %v742_v44, 2 }
  0xd3   : > { %v652_v49 = vpop.f32.mrf.mxu3  ;;  %v678_v50 = vpop.f32.mrf.mxu1  ;;  %v560_v18 = vadd.f32 %v559_v47, %v533_v46 }
  0xd4   : > { %v679_v55 = vadd.f32 %v678_v50, %v652_v49 }
  0xd5   : > { %v568_v30 = vadd.f32 %v560_v18, %v394_v26 }
  0xd6   : > { %v738_v56 = vadd.f32 %v679_v55, %v567_v53  ;;  %v996_v55 = vpop.permute.xlu0 %995 }
  0xd8   : > { %v744_v59 = vmax.f32 %v738_v56, 0.0 }
  0xda   : > { %v849_v62 = vrot.slane %v744_v59, 1  ;;  %v932_v63 = vrot.slane %v744_v59, 2  ;;  %796 = vmatmul.f32.gmra.mxu1 %v744_v59  ;;  %v536_v33 = vpop.f32.mrf.mxu0  ;;  %v562_v0 = vpop.f32.mrf.mxu2 }
  0xdb   : > { %v655_v1 = vpop.f32.mrf.mxu3  ;;  %v681_v2 = vpop.f32.mrf.mxu1  ;;  %v563_v35 = vadd.f32 %v562_v0, %v536_v33 }
  0xdc   : > { %v682_v4 = vadd.f32 %v681_v2, %v655_v1  ;;  %v850_v5 = vsel %vm441_vm1, %v848_v60, %v849_v62  ;;  %v933_v51 = vsel %vm612_vm2, %v931_v61, %v932_v63  ;;  %v1000_v33 = vpop.permute.xlu1 %999 }
  0xdd   : > { %880 = vmatmul.f32.vlgmr.msrb.gmra.mxu0 %v850_v5  ;;  %963 = vmatmul.f32.vlgmr.msrb.gmra.mxu2 %v933_v51  ;;  %v570_v43 = vadd.f32 %v563_v35, %v396_v37 }
  0xde   : > { %v740_v8 = vadd.f32 %v682_v4, %v569_v3  ;;  %v998_v1 = vpop.permute.xlu0 %997 }
  0xdf   : > { %v1004_v4 = vsel %vm1003_vm4, %v996_v55, %v998_v1 }
  0xe0   : > { %v746_v10 = vmax.f32 %v740_v8, 0.0 }
  0xe2   : > { %v701_v48 = vpop.f32.mrf.mxu2  ;;  %v727_v13 = vpop.f32.mrf.mxu0  ;;  %v854_v14 = vrot.slane %v746_v10, 1  ;;  %v937_v15 = vrot.slane %v746_v10, 2 }
  0xe3   : > { %v728_v19 = vadd.f32 %v727_v13, %v701_v48 }
  0xe4   : > { %v855_v17 = vsel %vm441_vm1, %v849_v62, %v854_v14  ;;  %v938_v23 = vsel %vm612_vm2, %v932_v63, %v937_v15  ;;  %v1002_v15 = vpop.permute.xlu1 %1001 }
  0xe5   : > { %v737_v24 = vadd.f32 %v728_v19, %v566_v16  ;;  %883 = vmatmul.f32.gmra.mxu0 %v855_v17  ;;  %966 = vmatmul.f32.gmra.mxu2 %v938_v23  ;;  %v1005_v17 = vsel %vm1003_vm4, %v1000_v33, %v1002_v15 }
  0xe7   : > { %v743_v25 = vmax.f32 %v737_v24, 0.0 }
  0xe9   : > { %1175 = vmatmul.msk.f32.vlgmr.msrb.gmra.mxu3 %vm770_vm3, %v743_v25  ;;  %v851_v12 = vrot.slane %v743_v25, 1  ;;  %v934_v38 = vrot.slane %v743_v25, 2 }
  0xea   : > { %v704_v27 = vpop.f32.mrf.mxu2  ;;  %v730_v28 = vpop.f32.mrf.mxu0 }
  0xeb   : > { %v731_v31 = vadd.f32 %v730_v28, %v704_v27 }
  0xed   : > { %v739_v34 = vadd.f32 %v731_v31, %v568_v30 }
  0xef   : > { %v745_v36 = vmax.f32 %v739_v34, 0.0 }
  0xf1   : > { %v852_v39 = vrot.slane %v745_v36, 1  ;;  %v935_v40 = vrot.slane %v745_v36, 2  ;;  %1176 = vmatmul.msk.f32.gmra.mxu3 %vm770_vm3, %v745_v36 }
  0xf2   : > { %v707_v41 = vpop.f32.mrf.mxu2  ;;  %v733_v42 = vpop.f32.mrf.mxu0 }
  0xf3   : > { %v734_v44 = vadd.f32 %v733_v42, %v707_v41  ;;  %v936_v21 = vsel %vm612_vm2, %v934_v38, %v935_v40  ;;  %v853_v45 = vsel %vm441_vm1, %v851_v12, %v852_v39 }
  0xf4   : > { %1215 = vmatmul.msk.f32.vlgmr.msra.gmra.mxu1 %vm770_vm3, %v936_v21 }
  0xf5   : > { %v741_v52 = vadd.f32 %v734_v44, %v570_v43 }
  0xf7   : > { %v747_v22 = vmax.f32 %v741_v52, 0.0 }
  0xf9   : > { %v856_v46 = vrot.slane %v747_v22, 1  ;;  %v939_v47 = vrot.slane %v747_v22, 2  ;;  %1195 = vmatmul.msk.f32.vlgmr.msra.gmra.mxu3 %vm770_vm3, %v853_v45 }
  0xfb   : > { %v940_v49 = vsel %vm612_vm2, %v935_v40, %v939_v47  ;;  %v857_v50 = vsel %vm441_vm1, %v852_v39, %v856_v46 }
  0xfc   : > { %1216 = vmatmul.msk.f32.gmra.mxu1 %vm770_vm3, %v940_v49 }
 0x101   : > { %1196 = vmatmul.msk.f32.gmra.mxu3 %vm770_vm3, %v857_v50 }
 0x14f   : > { %v794_v29 = vpop.f32.mrf.mxu1 }
 0x157   : > { %v797_v54 = vpop.f32.mrf.mxu1 }
 0x15a   : > { %v881_v57 = vpop.f32.mrf.mxu0 }
 0x160   : > { %v964_v61 = vpop.f32.mrf.mxu2 }
 0x162   : > { %v884_v6 = vpop.f32.mrf.mxu0 }
 0x168   : > { %v967_v13 = vpop.f32.mrf.mxu2 }
 0x16c   : > { %v817_v53 = vpop.f32.mrf.mxu3 }
 0x16d   : > { %v818_v59 = vadd.f32 %v817_v53, %v794_v29 }
 0x16f   : > { %v823_v63 = vadd.f32 %v1230_v58, %v818_v59 }
 0x171   : > { %v987_v60 = vpop.f32.mrf.mxu1 }
 0x172   : > { %v988_v2 = vadd.f32 %v987_v60, %v964_v61 }
 0x174   : > { %v820_v56 = vpop.f32.mrf.mxu3 }
 0x175   : > { %v821_v5 = vadd.f32 %v820_v56, %v797_v54 }
 0x177   : > { %v824_v10 = vadd.f32 %v1230_v58, %v821_v5 }
 0x179   : > { %v990_v8 = vpop.f32.mrf.mxu1 }
 0x17a   : > { %v991_v14 = vadd.f32 %v990_v8, %v967_v13 }
 0x17c   : > { %v904_v62 = vpop.f32.mrf.mxu3 }
 0x17d   : > { %v905_v0 = vadd.f32 %v904_v62, %v881_v57 }
 0x17f   : > { %v910_v3 = vadd.f32 %v905_v0, %v823_v63 }
 0x181   : > { %v993_v51 = vadd.f32 %v988_v2, %v910_v3 }
 0x183   : > { %v1008_v7 = vadd.f32 %v1004_v4, %v993_v51 }
 0x184   : > { %v907_v9 = vpop.f32.mrf.mxu3 }
 0x185   : > { %v1010_v11 = vmax.f32 %v1008_v7, 0.0  ;;  %v908_v48 = vadd.f32 %v907_v9, %v884_v6 }
 0x187   : > { %1012 = vst [vmem:[%s224_s15] sm:$0xff] %v1010_v11  ;;  %v911_v16 = vadd.f32 %v908_v48, %v824_v10 }
 0x189   : > { %v994_v19 = vadd.f32 %v991_v14, %v911_v16 }
 0x18b   : > { %v1009_v23 = vadd.f32 %v1005_v17, %v994_v19 }
 0x18d   : > { %v1011_v20 = vmax.f32 %v1009_v23, 0.0 }
 0x18f   : > { %1013 = vst [vmem:[%s224_s15 + $0x8] sm:$0xff] %v1011_v20 }
 0x190 PF: > { %s15_s18 = sadd.s32 1, %s1237_s18  }
 0x191   : > { %p12_p4 = scmp.ge.s32.totalorder %s15_s18, 4  }
 0x193   :  { %14 = sbr.rel (!%p12_p4) target bundleno = 1 (0x1), region = 74 }

// kernel: crop_resnet_pool_forward.16
= control target key start
LH: loop header
LB: loop body
LE: loop exit
PB: predicated region body
PF: predicated region fallthrough
CT: control target
= control target key end

     0   :  { %s655_s18 = smov 0   ;;  %s899_s0 = inlined_call_operand.vmem [shape: f32[2,12,96], index: 0, kind: input, shape index: {}]   ;;  %s900_s1 = inlined_call_operand.vmem [shape: f32[3,96,80], index: 1, kind: input, shape index: {}]   ;;  %s901_s2 = inlined_call_operand.vmem [shape: f32[1,80], index: 2, kind: input, shape index: {}]   ;;  %s902_s3 = inlined_call_operand.vmem [shape: f32[3,80,64], index: 3, kind: input, shape index: {}]   ;;  %s903_s4 = inlined_call_operand.vmem [shape: f32[1,64], index: 4, kind: input, shape index: {}]   ;;  %s904_s5 = inlined_call_operand.vmem [shape: f32[2,8,64], index: 5, kind: output, shape index: {}]  }
   0x1 LB: > { %s541_s19 = sadd.s32 4294967295, %s622_s18   ;;  %p545_p0 = scmp.ge.s32.totalorder %s622_s18, 1  ;;  %s622_s18 = sphi %s655_s18, %s15_s18  }
   0x2   : > { %p187_p1 = scmp.lt.s32.totalorder %s622_s18, 3 }
   0x4   : > { %p188_p2 = pnand %p545_p0, %p187_p1 }
   0x5   : > { %p672_p3 = scmp.lt.s32.totalorder (!%p188_p2), %s541_s19, 1  ;;  %s624_s23 = smov (!%p188_p2), 112  }
   0x6   : > { %191 = sbr.rel (%p188_p2) target bundleno = 323 (0x143), region = 40 }
   0xb   : > { %v576_v0 = vld [vmem:[%s900_s1 + $0x118] sm:$0xff]  ;;  %v575_v2 = vld [vmem:[%s900_s1 + $0x110] sm:$0xff]  ;;  %v574_v5 = vld [vmem:[%s900_s1 + $0x108] sm:$0xff]  ;;  %s907_s19 = smov (!%p672_p3, %s541_s19), 1  ;;  %vm332_vm0 = vcmask 1045504   ;;  %vm286_vm1 = vcmask 1046528  }
   0xc   : > { %v240_v1 = vld [vmem:[%s900_s1 + $0x58] sm:$0xff]  ;;  %344 = vmatpush.msra.mxu2 %v576_v0  ;;  %v239_v3 = vld [vmem:[%s900_s1 + $0x50] sm:$0xff]  ;;  %v238_v6 = vld [vmem:[%s900_s1 + $0x48] sm:$0xff]  ;;  %s604_s7 = sshll.u32 %s907_s19, 4  ;;  %vm241_vm2 = vcmask 785408   ;;  %vm381_vm3 = vcmask 654336  }
   0xd   : > { %252 = vmatpush.msra.mxu0 %v240_v1  ;;  %v562_v4 = vld [vmem:[%s900_s1 + $0xb8] sm:$0xff]  ;;  %v561_v7 = vld [vmem:[%s900_s1 + $0xb0] sm:$0xff]  ;;  %v560_v8 = vld [vmem:[%s900_s1 + $0xa8] sm:$0xff]  ;;  %s218_s20 = scalar_lea.vmem %s899_s0, %s604_s7  ;;  %s548_s24 = sshll.u32 %s907_s19, 3  ;;  %vm486_vm4 = vcmask 523264  }
   0xe   : > { %298 = vmatpush.msra.mxu1 %v562_v4  ;;  %345 = vmatpush.msra.mxu2 %v575_v2  ;;  %v573_v9 = vld [vmem:[%s900_s1 + $0x100] sm:$0xff]  ;;  %v572_v12 = vld [vmem:[%s900_s1 + $0xf8] sm:$0xff]  ;;  %v571_v15 = vld [vmem:[%s900_s1 + $0xf0] sm:$0xff]  ;;  %s222_s27 = scalar_lea.vmem %s904_s5, %s548_s24 }
   0xf   : > { %253 = vmatpush.msra.mxu0 %v239_v3  ;;  %v237_v10 = vld [vmem:[%s900_s1 + $0x40] sm:$0xff]  ;;  %v236_v13 = vld [vmem:[%s900_s1 + $0x38] sm:$0xff]  ;;  %v235_v16 = vld [vmem:[%s900_s1 + $0x30] sm:$0xff] }
  0x10   : > { %299 = vmatpush.msra.mxu1 %v561_v7  ;;  %346 = vmatpush.msra.mxu2 %v574_v5  ;;  %v559_v11 = vld [vmem:[%s900_s1 + $0xa0] sm:$0xff]  ;;  %v558_v14 = vld [vmem:[%s900_s1 + $0x98] sm:$0xff]  ;;  %v557_v17 = vld [vmem:[%s900_s1 + $0x90] sm:$0xff] }
  0x11   : > { %254 = vmatpush.msra.mxu0 %v238_v6  ;;  %v570_v18 = vld [vmem:[%s900_s1 + $0xe8] sm:$0xff]  ;;  %v569_v21 = vld [vmem:[%s900_s1 + $0xe0] sm:$0xff]  ;;  %v568_v23 = vld [vmem:[%s900_s1 + $0xd8] sm:$0xff] }
  0x12   : > { %300 = vmatpush.msra.mxu1 %v560_v8  ;;  %347 = vmatpush.msra.mxu2 %v573_v9  ;;  %v234_v19 = vld [vmem:[%s900_s1 + $0x28] sm:$0xff]  ;;  %v233_v22 = vld [vmem:[%s900_s1 + $0x20] sm:$0xff]  ;;  %v232_v27 = vld [vmem:[%s900_s1 + $0x18] sm:$0xff] }
  0x13   : > { %255 = vmatpush.msra.mxu0 %v237_v10  ;;  %v556_v20 = vld [vmem:[%s900_s1 + $0x88] sm:$0xff]  ;;  %v555_v24 = vld [vmem:[%s900_s1 + $0x80] sm:$0xff]  ;;  %v567_v30 = vld [vmem:[%s900_s1 + $0xd0] sm:$0xff] }
  0x14   : > { %301 = vmatpush.msra.mxu1 %v559_v11  ;;  %348 = vmatpush.msra.mxu2 %v572_v12  ;;  %v380_v25 = vld [vmem:[%s902_s3 + $0x48] sm:$0xff]  ;;  %v379_v26 = vld [vmem:[%s902_s3 + $0x40] sm:$0xff]  ;;  %v554_v31 = vld [vmem:[%s900_s1 + $0x78] sm:$0xff] }
  0x15   : > { %256 = vmatpush.msra.mxu0 %v236_v13  ;;  %v223_v28 = vld [vmem:[%s218_s20] sm:$0xff]  ;;  %v224_v29 = vld [vmem:[%s218_s20 + $0x8] sm:$0xf]  ;;  %391 = vmatpush.msra.mxu3 %v380_v25  ;;  %v378_v32 = vld [vmem:[%s902_s3 + $0x38] sm:$0xff] }
  0x16   : > { %302 = vmatpush.msra.mxu1 %v558_v14  ;;  %349 = vmatpush.msra.mxu2 %v571_v15  ;;  %v231_v33 = vld [vmem:[%s900_s1 + $0x10] sm:$0xff]  ;;  %v333_v35 = vrot.slane %v223_v28, 2  ;;  %v334_v36 = vrot.slane %v224_v29, 2  ;;  %v566_v38 = vld [vmem:[%s900_s1 + $0xc8] sm:$0xff]  ;;  %v287_v41 = vrot.slane %v223_v28, 1  ;;  %v288_v42 = vrot.slane %v224_v29, 1 }
  0x17   : > { %257 = vmatpush.msra.mxu0 %v235_v16  ;;  %392 = vmatpush.msra.mxu3 %v379_v26  ;;  %v553_v34 = vld [vmem:[%s900_s1 + $0x70] sm:$0xff]  ;;  %v230_v39 = vld [vmem:[%s900_s1 + $0x8] sm:$0xff]  ;;  %v565_v44 = vld [vmem:[%s900_s1 + $0xc0] sm:$0xff] }
  0x18   : > { %303 = vmatpush.msra.mxu1 %v557_v17  ;;  %350 = vmatpush.msra.mxu2 %v570_v18  ;;  %v377_v37 = vld [vmem:[%s902_s3 + $0x30] sm:$0xff]  ;;  %v552_v40 = vld [vmem:[%s900_s1 + $0x68] sm:$0xff]  ;;  %v229_v45 = vld [vmem:[%s900_s1] sm:$0xff]  ;;  %v335_v46 = vsel %vm332_vm0, %v333_v35, %v334_v36  ;;  %v289_v49 = vsel %vm286_vm1, %v287_v41, %v288_v42 }
  0x19   : > { %258 = vmatpush.msra.mxu0 %v234_v19  ;;  %393 = vmatpush.msra.mxu3 %v378_v32  ;;  %v376_v43 = vld [vmem:[%s902_s3 + $0x28] sm:$0xff]  ;;  %v551_v47 = vld [vmem:[%s900_s1 + $0x60] sm:$0xff]  ;;  %v374_v50 = vld [vmem:[%s902_s3 + $0x18] sm:$0xff] }
  0x1a   : > { %304 = vmatpush.msra.mxu1 %v556_v20  ;;  %351 = vmatpush.msra.mxu2 %v569_v21  ;;  %v375_v48 = vld [vmem:[%s902_s3 + $0x20] sm:$0xff]  ;;  %v373_v51 = vld [vmem:[%s902_s3 + $0x10] sm:$0xff]  ;;  %v372_v52 = vld [vmem:[%s902_s3 + $0x8] sm:$0xff] }
  0x1b   : > { %259 = vmatpush.msra.mxu0 %v233_v22  ;;  %394 = vmatpush.msra.mxu3 %v377_v37  ;;  %v371_v53 = vld [vmem:[%s902_s3] sm:$0xff]  ;;  %v589_v54 = vld [vmem:[%s902_s3 + $0x98] sm:$0xff]  ;;  %v600_v55 = vld [vmem:[%s902_s3 + $0xe8] sm:$0xff] }
  0x1c   : > { %305 = vmatpush.msra.mxu1 %v555_v24  ;;  %352 = vmatpush.msra.mxu2 %v568_v23  ;;  %v588_v56 = vld [vmem:[%s902_s3 + $0x90] sm:$0xff]  ;;  %v599_v57 = vld [vmem:[%s902_s3 + $0xe0] sm:$0xff]  ;;  %v587_v58 = vld [vmem:[%s902_s3 + $0x88] sm:$0xff] }
  0x1d   : > { %260 = vmatpush.msra.mxu0 %v232_v27  ;;  %395 = vmatpush.msra.mxu3 %v376_v43  ;;  %v598_v59 = vld [vmem:[%s902_s3 + $0xd8] sm:$0xff]  ;;  %v586_v60 = vld [vmem:[%s902_s3 + $0x80] sm:$0xff]  ;;  %v597_v61 = vld [vmem:[%s902_s3 + $0xd0] sm:$0xff] }
  0x1e   : > { %306 = vmatpush.msra.mxu1 %v554_v31  ;;  %353 = vmatpush.msra.mxu2 %v567_v30  ;;  %v585_v62 = vld [vmem:[%s902_s3 + $0x78] sm:$0xff]  ;;  %v596_v63 = vld [vmem:[%s902_s3 + $0xc8] sm:$0xff]  ;;  %v584_v0 = vld [vmem:[%s902_s3 + $0x70] sm:$0xff] }
  0x1f   : > { %261 = vmatpush.msra.mxu0 %v231_v33  ;;  %396 = vmatpush.msra.mxu3 %v375_v48  ;;  %v595_v1 = vld [vmem:[%s902_s3 + $0xc0] sm:$0xff]  ;;  %v583_v2 = vld [vmem:[%s902_s3 + $0x68] sm:$0xff]  ;;  %v594_v3 = vld [vmem:[%s902_s3 + $0xb8] sm:$0xff] }
  0x20   : > { %307 = vmatpush.msra.mxu1 %v553_v34  ;;  %354 = vmatpush.msra.mxu2 %v566_v38  ;;  %v582_v4 = vld [vmem:[%s902_s3 + $0x60] sm:$0xff]  ;;  %v593_v5 = vld [vmem:[%s902_s3 + $0xb0] sm:$0xff]  ;;  %v581_v6 = vld [vmem:[%s902_s3 + $0x58] sm:$0xff] }
  0x21   : > { %262 = vmatpush.msra.mxu0 %v230_v39  ;;  %397 = vmatpush.msra.mxu3 %v374_v50  ;;  %v592_v7 = vld [vmem:[%s902_s3 + $0xa8] sm:$0xff]  ;;  %v580_v8 = vld [vmem:[%s902_s3 + $0x50] sm:$0xff]  ;;  %v591_v9 = vld [vmem:[%s902_s3 + $0xa0] sm:$0xff] }
  0x22   : > { %308 = vmatpush.msra.mxu1 %v552_v40  ;;  %355 = vmatpush.msra.mxu2 %v565_v44  ;;  %v614_v10 = vld [vmem:[%s901_s2] ss:$0 sm:$0xff] }
  0x23   : > { %263 = vmatpush.msra.mxu0 %v229_v45  ;;  %577 = vmatmul.msk.f32.vlgmr.msra.gmra.mxu2 %vm241_vm2, %v335_v46  ;;  %v615_v32 = vld [vmem:[%s903_s4] ss:$0 sm:$0xff] }
  0x24   : > { %549 = vmatmul.msk.f32.vlgmr.msra.gmra.mxu0 %vm241_vm2, %v223_v28  ;;  %309 = vmatpush.msra.mxu1 %v551_v47 }
  0x25   : > { %563 = vmatmul.msk.f32.vlgmr.msra.gmra.mxu1 %vm241_vm2, %v289_v49  ;;  %398 = vmatpush.msra.mxu3 %v373_v51 }
  0x26   : > { %481 = vrot.lane.b32.xlu0 %v335_v46, %s624_s23  ;;  %466 = vmatpush.msrb.mxu0 %v600_v55 }
  0x27   : > { %399 = vmatpush.msra.mxu3 %v372_v52 }
  0x28   : > { %467 = vmatpush.msrb.mxu0 %v599_v57 }
  0x29   : > { %400 = vmatpush.msra.mxu3 %v371_v53 }
  0x2a   : > { %468 = vmatpush.msrb.mxu0 %v598_v59 }
  0x2b   : > { %578 = vmatmul.msk.f32.gmra.mxu2 %vm241_vm2, %v334_v36  ;;  %429 = vmatpush.msrb.mxu3 %v589_v54 }
  0x2c   : > { %550 = vmatmul.msk.f32.gmra.mxu0 %vm241_vm2, %v224_v29 }
  0x2d   : > { %564 = vmatmul.msk.f32.gmra.mxu1 %vm241_vm2, %v288_v42  ;;  %430 = vmatpush.msrb.mxu3 %v588_v56 }
  0x2e   : > { %469 = vmatpush.msrb.mxu0 %v597_v61 }
  0x2f   : > { %431 = vmatpush.msrb.mxu3 %v587_v58 }
  0x30   : > { %470 = vmatpush.msrb.mxu0 %v596_v63 }
  0x31   : > { %432 = vmatpush.msrb.mxu3 %v586_v60 }
  0x32   : > { %471 = vmatpush.msrb.mxu0 %v595_v1 }
  0x33   : > { %433 = vmatpush.msrb.mxu3 %v585_v62 }
  0x34   : > { %472 = vmatpush.msrb.mxu0 %v594_v3 }
  0x35   : > { %434 = vmatpush.msrb.mxu3 %v584_v0 }
  0x36   : > { %473 = vmatpush.msrb.mxu0 %v593_v5 }
  0x37   : > { %435 = vmatpush.msrb.mxu3 %v583_v2 }
  0x38   : > { %474 = vmatpush.msrb.mxu0 %v592_v7 }
  0x39   : > { %436 = vmatpush.msrb.mxu3 %v582_v4 }
  0x3a   : > { %475 = vmatpush.msrb.mxu0 %v591_v9 }
  0x3b   : > { %437 = vmatpush.msrb.mxu3 %v581_v6 }
  0x3d   : > { %438 = vmatpush.msrb.mxu3 %v580_v8 }
  0x98   : > { %v482_v37 = vpop.permute.xlu0 %481 }
  0xa1   : > { %v265_v11 = vpop.f32.mrf.mxu0 }
  0xa2   : > { %v271_v12 = vadd.f32 %v614_v10, %v265_v11  ;;  %v311_v13 = vpop.f32.mrf.mxu1 }
  0xa4   : > { %v317_v14 = vadd.f32 %v311_v13, %v271_v12 }
  0xa6   : > { %v357_v15 = vpop.f32.mrf.mxu2 }
  0xa7   : > { %v363_v16 = vadd.f32 %v357_v15, %v317_v14 }
  0xa9   : > { %v268_v17 = vpop.f32.mrf.mxu0  ;;  %v365_v18 = vmax.f32 %v363_v16, 0.0 }
  0xaa   : > { %v272_v19 = vadd.f32 %v614_v10, %v268_v17  ;;  %v314_v20 = vpop.f32.mrf.mxu1 }
  0xab   : > { %579 = vmatmul.msk.f32.vlgmr.msra.gmra.mxu3 %vm381_vm3, %v365_v18  ;;  %v418_v25 = vrot.slane %v365_v18, 1  ;;  %v455_v26 = vrot.slane %v365_v18, 2 }
  0xac   : > { %v318_v21 = vadd.f32 %v314_v20, %v272_v19 }
  0xae   : > { %v360_v22 = vpop.f32.mrf.mxu2 }
  0xaf   : > { %v364_v23 = vadd.f32 %v360_v22, %v318_v21 }
  0xb1   : > { %v366_v24 = vmax.f32 %v364_v23, 0.0 }
  0xb3   : > { %v419_v27 = vrot.slane %v366_v24, 1  ;;  %v456_v28 = vrot.slane %v366_v24, 2 }
  0xb5   : > { %v420_v29 = vsel %vm286_vm1, %v418_v25, %v419_v27  ;;  %v457_v30 = vsel %vm332_vm0, %v455_v26, %v456_v28 }
  0xb6   : > { %590 = vmatmul.msk.f32.vlgmr.msrb.gmra.mxu3 %vm381_vm3, %v420_v29  ;;  %601 = vmatmul.msk.f32.vlgmr.msrb.gmra.mxu0 %vm381_vm3, %v457_v30 }
 0x12e   : > { %v402_v31 = vpop.f32.mrf.mxu3 }
 0x12f   : > { %v405_v33 = vadd.f32 %v615_v32, %v402_v31 }
 0x133   : > { %v477_v36 = vpop.f32.mrf.mxu0 }
 0x139   : > { %v440_v34 = vpop.f32.mrf.mxu3 }
 0x13a   : > { %v443_v35 = vadd.f32 %v440_v34, %v405_v33 }
 0x13c   : > { %v480_v38 = vadd.f32 %v477_v36, %v443_v35 }
 0x13e   : > { %v484_v39 = vadd.f32 %v482_v37, %v480_v38 }
 0x140   : > { %v485_v40 = vmax.f32 %v484_v39, 0.0 }
 0x142   : > { %487 = vst.msk [vmem:[%s222_s27] sm:$0xff] %vm486_vm4, %v485_v40 }
 0x143 PF: > { %s15_s18 = sadd.s32 1, %s622_s18  }
 0x144   : > { %p12_p4 = scmp.ge.s32.totalorder %s15_s18, 4  }
 0x146   :  { %14 = sbr.rel (!%p12_p4) target bundleno = 1 (0x1), region = 74 }

// kernel: crop_resnet_pool_forward.17
= control target key start
LH: loop header
LB: loop body
LE: loop exit
PB: predicated region body
PF: predicated region fallthrough
CT: control target
= control target key end

     0   :  { %vm32_vm0 = vcmask 64512   ;;  %v116_v15 = vmov 64.0   ;;  %vm93_vm2 = vcmask 1041409   ;;  %vm96_vm3 = vcmask 58368   ;;  %s210_s0 = inlined_call_operand.vmem [shape: f32[2,8,8,8], index: 0, kind: input, shape index: {}]   ;;  %s211_s1 = inlined_call_operand.vmem [shape: f32[1,8], index: 1, kind: input, shape index: {}]   ;;  %s212_s2 = inlined_call_operand.<no memory space> [shape: f32[1,1], index: 2, kind: input, shape index: {}]   ;;  %s213_s3 = inlined_call_operand.vmem [shape: f32[2,1], index: 3, kind: output, shape index: {}]  }
   0x1   :  { %v16_v0 = vld [vmem:[%s210_s0] sm:$0xff]  ;;  %v17_v1 = vld [vmem:[%s210_s0 + $0x8] sm:$0xff]  ;;  %v18_v2 = vld [vmem:[%s210_s0 + $0x10] sm:$0xff]  ;;  %114 = vrcp.f32 %v116_v15  ;;  %v8_v29 = vstv %s212_s2  ;;  %vm105_vm4 = vcmask 1024  }
   0x2   :  { %v19_v3 = vld [vmem:[%s210_s0 + $0x18] sm:$0xff]  ;;  %v33_v4 = vsel %vm32_vm0, %v16_v0, 0.0  ;;  %v34_v5 = vsel %vm32_vm0, %v17_v1, 0.0  ;;  %v36_v6 = vsel %vm32_vm0, %v18_v2, 0.0  ;;  %v20_v7 = vld [vmem:[%s210_s0 + $0x20] sm:$0xff]  ;;  %v25_v10 = vld [vmem:[%s210_s0 + $0x48] sm:$0xff] }
   0x3   :  { %v24_v8 = vld [vmem:[%s210_s0 + $0x40] sm:$0xff]  ;;  %v35_v9 = vadd.f32 %v34_v5, %v33_v4  ;;  %v26_v11 = vld [vmem:[%s210_s0 + $0x50] sm:$0xff]  ;;  %v27_v12 = vld [vmem:[%s210_s0 + $0x58] sm:$0xff]  ;;  %v38_v13 = vsel %vm32_vm0, %v19_v3, 0.0  ;;  %v55_v18 = vsel %vm32_vm0, %v25_v10, 0.0  ;;  %v40_v21 = vsel %vm32_vm0, %v20_v7, 0.0 }
   0x4   :  { %v54_v14 = vsel %vm32_vm0, %v24_v8, 0.0  ;;  %v21_v16 = vld [vmem:[%s210_s0 + $0x28] sm:$0xff]  ;;  %v57_v19 = vsel %vm32_vm0, %v26_v11, 0.0  ;;  %v28_v20 = vld [vmem:[%s210_s0 + $0x60] sm:$0xff]  ;;  %v22_v23 = vld [vmem:[%s210_s0 + $0x30] sm:$0xff]  ;;  %v59_v25 = vsel %vm32_vm0, %v27_v12, 0.0 }
   0x5   :  { %v37_v17 = vadd.f32 %v36_v6, %v35_v9  ;;  %v56_v22 = vadd.f32 %v55_v18, %v54_v14  ;;  %v29_v26 = vld [vmem:[%s210_s0 + $0x68] sm:$0xff]  ;;  %v42_v27 = vsel %vm32_vm0, %v21_v16, 0.0  ;;  %v23_v30 = vld [vmem:[%s210_s0 + $0x38] sm:$0xff]  ;;  %v61_v32 = vsel %vm32_vm0, %v28_v20, 0.0  ;;  %9 = vst [vmem:[#allocation2] sm:$0x1] %v8_v29 }
   0x6   :  { %v30_v34 = vld [vmem:[%s210_s0 + $0x70] sm:$0xff]  ;;  %v44_v35 = vsel %vm32_vm0, %v22_v23, 0.0  ;;  %v63_v38 = vsel %vm32_vm0, %v29_v26, 0.0  ;;  %v31_v39 = vld [vmem:[%s210_s0 + $0x78] sm:$0xff]  ;;  %v46_v40 = vsel %vm32_vm0, %v23_v30, 0.0 }
   0x7   :  { %v39_v24 = vadd.f32 %v38_v13, %v37_v17  ;;  %v58_v28 = vadd.f32 %v57_v19, %v56_v22  ;;  %v115_v33 = vpop.eup %114  ;;  %v65_v43 = vsel %vm32_vm0, %v30_v34, 0.0  ;;  %v67_v47 = vsel %vm32_vm0, %v31_v39, 0.0  ;;  %v112_v3 = vld [vmem:[%s211_s1] ss:$0 sm:$0xff] }
   0x8   :  { %v76_v44 = vmul.f32 64.0, %v115_v33  ;;  %vm80_vm1 = vweird.f32 %v115_v33 }
   0x9   :  { %v41_v31 = vadd.f32 %v40_v21, %v39_v24  ;;  %v60_v36 = vadd.f32 %v59_v25, %v58_v28 }
   0xa   :  { %v77_v50 = vsub.f32 1.0, %v76_v44 }
   0xb   :  { %v43_v37 = vadd.f32 %v42_v27, %v41_v31  ;;  %v62_v41 = vadd.f32 %v61_v32, %v60_v36 }
   0xc   :  { %v78_v55 = vmul.f32 %v115_v33, %v77_v50  ;;  %v113_v10 = vld [vmem:[#allocation2] ss:$0 sm:$0xff] }
   0xd   :  { %v45_v42 = vadd.f32 %v44_v35, %v43_v37  ;;  %v64_v45 = vadd.f32 %v63_v38, %v62_v41 }
   0xe   :  { %v79_v60 = vadd.f32 %v115_v33, %v78_v55 }
   0xf   :  { %v47_v46 = vadd.f32 %v46_v40, %v45_v42  ;;  %v66_v48 = vadd.f32 %v65_v43, %v64_v45 }
  0x10   :  { %v81_v0 = vsel %vm80_vm1, %v115_v33, %v79_v60 }
  0x11   :  { %v48_v49 = vrot.slane %v47_v46, 4  ;;  %v68_v51 = vadd.f32 %v67_v47, %v66_v48 }
  0x13   :  { %v49_v52 = vadd.f32 %v48_v49, %v47_v46  ;;  %v69_v53 = vrot.slane %v68_v51, 4 }
  0x15   :  { %v50_v54 = vrot.slane %v49_v52, 2  ;;  %v70_v56 = vadd.f32 %v69_v53, %v68_v51 }
  0x17   :  { %v51_v57 = vadd.f32 %v50_v54, %v49_v52  ;;  %v71_v58 = vrot.slane %v70_v56, 2 }
  0x19   :  { %v52_v59 = vrot.slane %v51_v57, 1  ;;  %v72_v61 = vadd.f32 %v71_v58, %v70_v56 }
  0x1b   :  { %v53_v62 = vadd.f32 %v52_v59, %v51_v57  ;;  %v73_v63 = vrot.slane %v72_v61, 1 }
  0x1d   :  { %v74_v1 = vadd.f32 %v73_v63, %v72_v61  ;;  %v82_v2 = vmul.f32 %v81_v0, %v53_v62 }
  0x1f   :  { %v83_v4 = vmul.f32 %v81_v0, %v74_v1  ;;  %v88_v5 = vmul.f32 %v112_v3, %v82_v2 }
  0x21   :  { %v89_v6 = vmul.f32 %v112_v3, %v83_v4 }
  0x23   :  { %v92_v7 = vrot.slane %v89_v6, 7 }
  0x25   :  { %v94_v8 = vsel %vm93_vm2, %v92_v7, %v88_v5 }
  0x26   :  { %v97_v9 = vsel %vm96_vm3, %v94_v8, 0.0 }
  0x27   :  { %98 = vadd.xlane.f32.xlu0 %v97_v9 }
  0x9a   :  { %v99_v11 = vpop.xlane.xlu0 %98 }
  0x9b   :  { %v104_v12 = vadd.f32 %v113_v10, %v99_v11 }
  0x9d   :  { %106 = vst.msk [vmem:[%s213_s3] sm:$0x3] %vm105_vm4, %v104_v12 }

</bundles_post_ra>
